<compile_context>
chip_gen: v7x
topology: tpu7x:2x2x1
jax: 0.10.0
libtpu: 0.0.40
codegen_flags: <defaults>
</compile_context>

<pallas_src>
import functools

import jax
import jax.numpy as jnp
from jax import lax
from jax.experimental import pallas as pl
from jax.experimental.pallas import tpu as pltpu


NEG_SLOPE = 0.05


def _lrelu(y):
    return jnp.where(y >= 0, y, NEG_SLOPE * y)


def _apply_act(y, act):
    if act == "none":
        return y
    if act == "lrelu":
        return _lrelu(y)
    if act == "relu":
        return jnp.maximum(y, 0.0)
    raise ValueError(act)


def _round_up(x, m):
    return (x + m - 1) // m * m


# --------------------------- fused stage kernel -----------------------------
# d = lrelu(conv1x1(x)),  r = lrelu(conv3x3(x) + x)   -- one kernel per stage.

def _stage_kernel(xp_ref, w_ref, b_ref, d_ref, r_ref, *, H, W, C, dc, planes):
    # xp_ref : (H+2, W+2, C)       bf16 zero-padded input image
    # w_ref  : (9*C, dc+planes)    bf16 combined weight (centre tap holds the 1x1)
    # b_ref  : (1, dc+planes)      f32 combined bias
    # d_ref  : (H*W, dc)           bf16 distilled output
    # r_ref  : (H+2, W+2, planes)  bf16 refined output, zero border (next-stage input)
    HW = H * W
    acc = jnp.zeros((HW, dc + planes), jnp.float32)
    center = None
    for t in range(9):
        di, dj = t // 3, t % 3
        patch = xp_ref[di:di + H, dj:dj + W, :].reshape(HW, C)
        if t == 4:
            center = patch
        acc = acc + jnp.dot(patch, w_ref[t * C:(t + 1) * C, :],
                            preferred_element_type=jnp.float32)
    acc = acc + b_ref[...]
    d = _lrelu(acc[:, :dc])
    r = _lrelu(acc[:, dc:] + center.astype(jnp.float32))
    d_ref[...] = d.astype(d_ref.dtype)
    r_ref[...] = jnp.zeros(r_ref.shape, r_ref.dtype)
    r_ref[1:1 + H, 1:1 + W, :] = r.reshape(H, W, planes).astype(r_ref.dtype)


def stage_call(xp, w_comb, b_comb, *, H, W, C, dc, planes):
    N = xp.shape[0]
    Hp, Wp = H + 2, W + 2
    HW = H * W
    kernel = functools.partial(_stage_kernel, H=H, W=W, C=C, dc=dc, planes=planes)
    flops = 2 * N * HW * 9 * C * (dc + planes)
    bytes_acc = xp.size * 2 + N * HW * dc * 2 + N * Hp * Wp * planes * 2
    d, r = pl.pallas_call(
        kernel,
        grid=(N,),
        in_specs=[
            pl.BlockSpec((None, Hp, Wp, C), lambda n: (n, 0, 0, 0)),
            pl.BlockSpec((9 * C, dc + planes), lambda n: (0, 0)),
            pl.BlockSpec((1, dc + planes), lambda n: (0, 0)),
        ],
        out_specs=(
            pl.BlockSpec((HW, dc), lambda n: (n, 0)),
            pl.BlockSpec((None, Hp, Wp, planes), lambda n: (n, 0, 0, 0)),
        ),
        out_shape=(
            jax.ShapeDtypeStruct((N * HW, dc), jnp.bfloat16),
            jax.ShapeDtypeStruct((N, Hp, Wp, planes), jnp.bfloat16),
        ),
        compiler_params=pltpu.CompilerParams(dimension_semantics=("parallel",)),
        cost_estimate=pl.CostEstimate(flops=flops, transcendentals=0,
                                      bytes_accessed=bytes_acc),
    )(xp, w_comb, b_comb)
    return d, r


# ----------------------------- fused tail kernel ----------------------------
# r4 = lrelu(conv3x3_c4(r3)); c5 = [d1,d2,d3,r4]@W5 + b5 (no concat); c1_ = c5@We1+be1

def _tail_kernel(xp_ref, d1_ref, d2_ref, d3_ref,
                 w4_ref, b4_ref, w5_ref, b5_ref, we1_ref, be1_ref,
                 c5_ref, c1_ref, *, H, W, C, dc, planes, f):
    HW = H * W
    acc = jnp.zeros((HW, dc), jnp.float32)
    for t in range(9):
        di, dj = t // 3, t % 3
        patch = xp_ref[di:di + H, dj:dj + W, :].reshape(HW, C)
        acc = acc + jnp.dot(patch, w4_ref[t * C:(t + 1) * C, :],
                            preferred_element_type=jnp.float32)
    r4 = _lrelu(acc + b4_ref[...])
    c5 = jnp.dot(d1_ref[...], w5_ref[0 * dc:1 * dc, :], preferred_element_type=jnp.float32)
    c5 = c5 + jnp.dot(d2_ref[...], w5_ref[1 * dc:2 * dc, :], preferred_element_type=jnp.float32)
    c5 = c5 + jnp.dot(d3_ref[...], w5_ref[2 * dc:3 * dc, :], preferred_element_type=jnp.float32)
    c5 = c5 + jnp.dot(r4.astype(jnp.bfloat16), w5_ref[3 * dc:4 * dc, :],
                      preferred_element_type=jnp.float32)
    c5 = c5 + b5_ref[...]
    c1_ = jnp.dot(c5.astype(jnp.bfloat16), we1_ref[...],
                  preferred_element_type=jnp.float32) + be1_ref[...]
    c5_ref[...] = c5
    c1_ref[...] = c1_


def tail_call(r3p, d1, d2, d3, w4, b4, w5, b5, we1, be1,
              *, H, W, C, dc, planes, f):
    N = r3p.shape[0]
    Hp, Wp = H + 2, W + 2
    HW = H * W
    kernel = functools.partial(_tail_kernel, H=H, W=W, C=C, dc=dc,
                               planes=planes, f=f)
    flops = 2 * N * HW * (9 * C * dc + 4 * dc * planes + planes * f)
    bytes_acc = r3p.size * 2 + 3 * N * HW * dc * 2 + N * HW * (planes + f) * 4
    c5f, c1_ = pl.pallas_call(
        kernel,
        grid=(N,),
        in_specs=[
            pl.BlockSpec((None, Hp, Wp, C), lambda n: (n, 0, 0, 0)),
            pl.BlockSpec((HW, dc), lambda n: (n, 0)),
            pl.BlockSpec((HW, dc), lambda n: (n, 0)),
            pl.BlockSpec((HW, dc), lambda n: (n, 0)),
            pl.BlockSpec((9 * C, dc), lambda n: (0, 0)),
            pl.BlockSpec((1, dc), lambda n: (0, 0)),
            pl.BlockSpec((4 * dc, planes), lambda n: (0, 0)),
            pl.BlockSpec((1, planes), lambda n: (0, 0)),
            pl.BlockSpec((planes, f), lambda n: (0, 0)),
            pl.BlockSpec((1, f), lambda n: (0, 0)),
        ],
        out_specs=(
            pl.BlockSpec((HW, planes), lambda n: (n, 0)),
            pl.BlockSpec((HW, f), lambda n: (n, 0)),
        ),
        out_shape=(
            jax.ShapeDtypeStruct((N * HW, planes), jnp.float32),
            jax.ShapeDtypeStruct((N * HW, f), jnp.float32),
        ),
        compiler_params=pltpu.CompilerParams(dimension_semantics=("parallel",)),
        cost_estimate=pl.CostEstimate(flops=flops, transcendentals=0,
                                      bytes_accessed=bytes_acc),
    )(r3p, d1, d2, d3, w4, b4, w5, b5, we1, be1)
    return c5f, c1_


# ------------------------- fused ESA-tail / gate kernel ----------------------
# cf = conv_f(c1_); c4 = conv4(c3_up + cf); out = x + c5 * sigmoid(c4)

def _final_kernel(x_ref, c5_ref, c1_ref, c3u_ref, wf_ref, bf_ref,
                  w4_ref, b4_ref, o_ref):
    cf = jnp.dot(c1_ref[...].astype(jnp.bfloat16), wf_ref[...],
                 preferred_element_type=jnp.float32) + bf_ref[...]
    s = c3u_ref[...] + cf
    c4 = jnp.dot(s.astype(jnp.bfloat16), w4_ref[...],
                 preferred_element_type=jnp.float32) + b4_ref[...]
    o_ref[...] = x_ref[...] + c5_ref[...] * jax.nn.sigmoid(c4)


def final_call(xf, c5f, c1_, c3u, wf, bf, w4e, b4e, *, H, W, planes, f):
    M = xf.shape[0]
    HW = H * W
    N = M // HW
    out = pl.pallas_call(
        _final_kernel,
        grid=(N,),
        in_specs=[
            pl.BlockSpec((HW, planes), lambda n: (n, 0)),
            pl.BlockSpec((HW, planes), lambda n: (n, 0)),
            pl.BlockSpec((HW, f), lambda n: (n, 0)),
            pl.BlockSpec((HW, f), lambda n: (n, 0)),
            pl.BlockSpec((f, f), lambda n: (0, 0)),
            pl.BlockSpec((1, f), lambda n: (0, 0)),
            pl.BlockSpec((f, planes), lambda n: (0, 0)),
            pl.BlockSpec((1, planes), lambda n: (0, 0)),
        ],
        out_specs=pl.BlockSpec((HW, planes), lambda n: (n, 0)),
        out_shape=jax.ShapeDtypeStruct((M, planes), jnp.float32),
        compiler_params=pltpu.CompilerParams(dimension_semantics=("parallel",)),
        cost_estimate=pl.CostEstimate(
            flops=2 * M * (f * f + f * planes),
            transcendentals=M * planes,
            bytes_accessed=M * (3 * planes + 2 * f) * 4),
    )(xf, c5f, c1_, c3u, wf, bf, w4e, b4e)
    return out


# ------------------- generic small matmul (tiny ESA convs) -------------------

def _mm_kernel(a_ref, w_ref, b_ref, o_ref, *, act):
    y = jnp.dot(a_ref[...], w_ref[...],
                preferred_element_type=jnp.float32) + b_ref[...]
    o_ref[...] = _apply_act(y, act)


def matmul_bias_act(a, w, b, act="none", tm=512):
    """act((M,K)@(K,N)+b); bf16 matmul inputs, f32 math; rows padded (never tm=M)."""
    M, K = a.shape
    Nc = w.shape[1]
    if M <= tm:
        Mp = _round_up(max(M, 8), 8)
        tm_eff = Mp
    else:
        Mp = _round_up(M, tm)
        tm_eff = tm
    a_p = a if Mp == M else jnp.pad(a, ((0, Mp - M), (0, 0)))
    out = pl.pallas_call(
        functools.partial(_mm_kernel, act=act),
        grid=(Mp // tm_eff,),
        in_specs=[
            pl.BlockSpec((tm_eff, K), lambda i: (i, 0)),
            pl.BlockSpec((K, Nc), lambda i: (0, 0)),
            pl.BlockSpec((1, Nc), lambda i: (0, 0)),
        ],
        out_specs=pl.BlockSpec((tm_eff, Nc), lambda i: (i, 0)),
        out_shape=jax.ShapeDtypeStruct((Mp, Nc), jnp.float32),
        compiler_params=pltpu.CompilerParams(dimension_semantics=("parallel",)),
        cost_estimate=pl.CostEstimate(
            flops=2 * Mp * K * Nc, transcendentals=0,
            bytes_accessed=(Mp * K + K * Nc) * 2 + Mp * Nc * 4),
    )(a_p.astype(jnp.bfloat16), w.astype(jnp.bfloat16),
      b.reshape(1, Nc).astype(jnp.float32))
    return out[:M]


# ------------------------------- JAX glue -----------------------------------

def _im2col(x_nhwc, k=3, stride=1, padding=1):
    """kxk patches -> (N*Ho*Wo, k*k*C), tap-major (kh, kw, C). Tiny ESA convs only."""
    N, H, W, C = x_nhwc.shape
    xp = jnp.pad(x_nhwc, ((0, 0), (padding, padding), (padding, padding), (0, 0)))
    Ho = (H + 2 * padding - k) // stride + 1
    Wo = (W + 2 * padding - k) // stride + 1
    cols = []
    for i in range(k):
        for j in range(k):
            cols.append(xp[:, i:i + stride * Ho:stride, j:j + stride * Wo:stride, :])
    cols = jnp.stack(cols, axis=3)
    return cols.reshape(N * Ho * Wo, k * k * C), (N, Ho, Wo)


def _w1x1(w):   # (Cout, Cin, 1, 1) -> (Cin, Cout)
    return jnp.transpose(w[:, :, 0, 0], (1, 0))


def _w3x3(w):   # (Cout, Cin, 3, 3) -> (9*Cin, Cout), tap-major (kh, kw, Cin)
    Cout, Cin, _, _ = w.shape
    return jnp.transpose(w, (2, 3, 1, 0)).reshape(9 * Cin, Cout)


def _combine_stage(w3, b3, w1, b1):
    """Embed the 1x1 distill weight as the centre tap -> (9*Cin, dc+planes)."""
    planes_, Cin = w3.shape[0], w3.shape[1]
    dc = w1.shape[0]
    w3t = jnp.transpose(w3, (2, 3, 1, 0)).reshape(9, Cin, planes_)
    wc = jnp.zeros((9, Cin, dc + planes_), jnp.float32)
    wc = wc.at[:, :, dc:].set(w3t)
    wc = wc.at[4, :, :dc].set(_w1x1(w1))
    wc = wc.reshape(9 * Cin, dc + planes_)
    bc = jnp.concatenate([b1, b3]).reshape(1, dc + planes_)
    return wc.astype(jnp.bfloat16), bc.astype(jnp.float32)


def _pad_nhwc(x):
    return jnp.pad(x, ((0, 0), (1, 1), (1, 1), (0, 0)))


def _conv3x3_small(x_nhwc, w, b, act="none", stride=1, padding=1):
    cols, dims = _im2col(x_nhwc, 3, stride, padding)
    out = matmul_bias_act(cols, _w3x3(w), b, act=act)
    return out, dims


# ------------------------------ parameters ----------------------------------

def init_params(key, planes):
    dc = int(planes * 0.5)
    f = planes // 4
    shapes = {
        "c1_d": (dc, planes, 1), "c1_r": (planes, planes, 3),
        "c2_d": (dc, planes, 1), "c2_r": (planes, planes, 3),
        "c3_d": (dc, planes, 1), "c3_r": (planes, planes, 3),
        "c4": (dc, planes, 3), "c5": (planes, dc * 4, 1),
        "esa_conv1": (f, planes, 1), "esa_conv_f": (f, f, 1),
        "esa_conv_max": (f, f, 3), "esa_conv2": (f, f, 3),
        "esa_conv3": (f, f, 3), "esa_conv3_": (f, f, 3),
        "esa_conv4": (planes, f, 1),
    }
    params = {}
    keys = jax.random.split(key, len(shapes))
    for (name, (co, ci, k)), kk in zip(shapes.items(), keys):
        kw, kb = jax.random.split(kk)
        params[name] = (
            0.1 * jax.random.normal(kw, (co, ci, k, k), jnp.float32),
            0.05 * jax.random.normal(kb, (co,), jnp.float32),
        )
    return params


# -------------------------------- forward -----------------------------------

def erfdb_forward(x_nchw, params, planes):
    N, C, H, W = x_nchw.shape
    dc = int(planes * 0.5)
    f = planes // 4
    HW = H * W
    p = params

    x = jnp.transpose(x_nchw, (0, 2, 3, 1)).astype(jnp.float32)    # NHWC
    xf = x.reshape(N * HW, C)                                       # f32 (final residual)
    xp = _pad_nhwc(x).astype(jnp.bfloat16)                          # stage-1 input

    # fused distillation stages 1-3 (1x1 distill + 3x3 refine + residual + lrelu each)
    w1c, b1c = _combine_stage(p["c1_r"][0], p["c1_r"][1], p["c1_d"][0], p["c1_d"][1])
    w2c, b2c = _combine_stage(p["c2_r"][0], p["c2_r"][1], p["c2_d"][0], p["c2_d"][1])
    w3c, b3c = _combine_stage(p["c3_r"][0], p["c3_r"][1], p["c3_d"][0], p["c3_d"][1])

    d1, r1p = stage_call(xp,  w1c, b1c, H=H, W=W, C=C, dc=dc, planes=planes)
    d2, r2p = stage_call(r1p, w2c, b2c, H=H, W=W, C=C, dc=dc, planes=planes)
    d3, r3p = stage_call(r2p, w3c, b3c, H=H, W=W, C=C, dc=dc, planes=planes)

    # tail: c4 (3x3, lrelu) + c5 (1x1 over virtual concat) + ESA conv1 (1x1), fused
    w4 = _w3x3(p["c4"][0]).astype(jnp.bfloat16)
    b4 = p["c4"][1].reshape(1, dc).astype(jnp.float32)
    w5 = _w1x1(p["c5"][0]).astype(jnp.bfloat16)                     # (4*dc, planes)
    b5 = p["c5"][1].reshape(1, planes).astype(jnp.float32)
    we1 = _w1x1(p["esa_conv1"][0]).astype(jnp.bfloat16)             # (planes, f)
    be1 = p["esa_conv1"][1].reshape(1, f).astype(jnp.float32)
    c5f, c1_ = tail_call(r3p, d1, d2, d3, w4, b4, w5, b5, we1, be1,
                         H=H, W=W, C=C, dc=dc, planes=planes, f=f)

    # ESA spatial branch (small): stride-2 conv, 7x7/3 max-pool, 3 tiny convs, upsample
    c1_nhwc = c1_.reshape(N, H, W, f)
    c1s, (_, H2, W2) = _conv3x3_small(c1_nhwc, *p["esa_conv2"], act="none",
                                      stride=2, padding=0)
    c1s = c1s.reshape(N, H2, W2, f)
    # TODO(synk): 7x7/3 max-pool and bilinear upsample kept as XLA glue (tiny tensors,
    #             no clean Pallas equivalent worth the complexity here).
    v_max = lax.reduce_window(c1s, -jnp.inf, lax.max,
                              (1, 7, 7, 1), (1, 3, 3, 1), "VALID")
    v_range, (_, Hp2, Wp2) = _conv3x3_small(v_max, *p["esa_conv_max"], act="relu")
    v_range = v_range.reshape(N, Hp2, Wp2, f)
    c3, _ = _conv3x3_small(v_range, *p["esa_conv3"], act="relu")
    c3 = c3.reshape(N, Hp2, Wp2, f)
    c3, _ = _conv3x3_small(c3, *p["esa_conv3_"], act="none")
    c3 = c3.reshape(N, Hp2, Wp2, f)
    c3u = jax.image.resize(c3, (N, H, W, f), method="bilinear").reshape(N * HW, f)

    # fused ESA tail: conv_f + add + conv4 + sigmoid gate + outer residual
    wf = _w1x1(p["esa_conv_f"][0]).astype(jnp.bfloat16)
    bf = p["esa_conv_f"][1].reshape(1, f).astype(jnp.float32)
    w4e = _w1x1(p["esa_conv4"][0]).astype(jnp.bfloat16)
    b4e = p["esa_conv4"][1].reshape(1, planes).astype(jnp.float32)
    yf = final_call(xf, c5f, c1_, c3u, wf, bf, w4e, b4e,
                    H=H, W=W, planes=planes, f=f)

    return jnp.transpose(yf.reshape(N, H, W, C), (0, 3, 1, 2))      # back to NCHW


# ---------------------------------- main -------------------------------------

if __name__ == "__main__":
    planes = 16
    N, H, W = 2, 16, 16

    key = jax.random.PRNGKey(0)
    kx, kp = jax.random.split(key)
    x = jax.random.normal(kx, (N, planes, H, W), jnp.float32)       # NCHW, like PyTorch
    params = init_params(kp, planes)

    fwd = jax.jit(functools.partial(erfdb_forward, planes=planes))
    y = fwd(x, params)
    jax.block_until_ready(y)

    assert y.shape == (N, planes, H, W) and y.dtype == jnp.float32
    assert bool(jnp.all(jnp.isfinite(y)))
    print("KERNEL_OK")
</pallas_src>

<mosaic_0001>
module attributes {stable_mosaic.version = 11 : i64} {
  func.func @_tail_kernel(%arg0: i32, %arg1: memref<1x18x18x16xbf16, #tpu.memory_space<vmem>>, %arg2: memref<256x8xbf16, #tpu.memory_space<vmem>>, %arg3: memref<256x8xbf16, #tpu.memory_space<vmem>>, %arg4: memref<256x8xbf16, #tpu.memory_space<vmem>>, %arg5: memref<144x8xbf16, #tpu.memory_space<vmem>>, %arg6: memref<1x8xf32, #tpu.memory_space<vmem>>, %arg7: memref<32x16xbf16, #tpu.memory_space<vmem>>, %arg8: memref<1x16xf32, #tpu.memory_space<vmem>>, %arg9: memref<16x4xbf16, #tpu.memory_space<vmem>>, %arg10: memref<1x4xf32, #tpu.memory_space<vmem>>, %arg11: memref<256x16xf32, #tpu.memory_space<vmem>>, %arg12: memref<256x4xf32, #tpu.memory_space<vmem>>) attributes {dimension_semantics = [#tpu.dimension_semantics<parallel>], iteration_bounds = array<i64: 2>, scalar_prefetch = 0 : i64, scratch_operands = 0 : i64, tpu.core_type = #tpu.core_type<tc>, window_params = [{transform_indices = @transform_0, window_bounds = array<i64: 1, 18, 18, 16>}, {transform_indices = @transform_1, window_bounds = array<i64: 256, 8>}, {transform_indices = @transform_2, window_bounds = array<i64: 256, 8>}, {transform_indices = @transform_3, window_bounds = array<i64: 256, 8>}, {pipeline_mode = #tpu.pipeline_mode<synchronous>, transform_indices = @transform_4, window_bounds = array<i64: 144, 8>}, {pipeline_mode = #tpu.pipeline_mode<synchronous>, transform_indices = @transform_5, window_bounds = array<i64: 1, 8>}, {pipeline_mode = #tpu.pipeline_mode<synchronous>, transform_indices = @transform_6, window_bounds = array<i64: 32, 16>}, {pipeline_mode = #tpu.pipeline_mode<synchronous>, transform_indices = @transform_7, window_bounds = array<i64: 1, 16>}, {pipeline_mode = #tpu.pipeline_mode<synchronous>, transform_indices = @transform_8, window_bounds = array<i64: 16, 4>}, {pipeline_mode = #tpu.pipeline_mode<synchronous>, transform_indices = @transform_9, window_bounds = array<i64: 1, 4>}, {transform_indices = @transform_10, window_bounds = array<i64: 256, 16>}, {transform_indices = @transform_11, window_bounds = array<i64: 256, 4>}]} {
    %cst = arith.constant 0.000000e+00 : f32
    %0 = vector.broadcast %cst : f32 to vector<256x8xf32>
    %c0 = arith.constant 0 : index
    %c0_0 = arith.constant 0 : index
    %c0_1 = arith.constant 0 : index
    %c0_2 = arith.constant 0 : index
    %1 = vector.load %arg1[%c0, %c0_0, %c0_1, %c0_2] : memref<1x18x18x16xbf16, #tpu.memory_space<vmem>>, vector<1x16x16x16xbf16>
    %2 = vector.shape_cast %1 : vector<1x16x16x16xbf16> to vector<16x16x16xbf16>
    %3 = vector.shape_cast %2 : vector<16x16x16xbf16> to vector<256x16xbf16>
    %c0_3 = arith.constant 0 : index
    %c0_4 = arith.constant 0 : index
    %4 = vector.load %arg5[%c0_3, %c0_4] : memref<144x8xbf16, #tpu.memory_space<vmem>>, vector<16x8xbf16>
    %cst_5 = arith.constant dense<0.000000e+00> : vector<256x8xf32>
    %5 = tpu.matmul %3, %4, %cst_5 {dimension_numbers = #tpu.dot_dimension_numbers<[1], [0], [0], [1], [0, 0, 1, 1], [], []>} : vector<256x16xbf16>, vector<16x8xbf16>, vector<256x8xf32> -> vector<256x8xf32>
    %6 = arith.addf %0, %5 : vector<256x8xf32>
    %c0_6 = arith.constant 0 : index
    %c0_7 = arith.constant 0 : index
    %c1 = arith.constant 1 : index
    %c0_8 = arith.constant 0 : index
    %7 = vector.load %arg1[%c0_6, %c0_7, %c1, %c0_8] : memref<1x18x18x16xbf16, #tpu.memory_space<vmem>>, vector<1x16x16x16xbf16>
    %8 = vector.shape_cast %7 : vector<1x16x16x16xbf16> to vector<16x16x16xbf16>
    %9 = vector.shape_cast %8 : vector<16x16x16xbf16> to vector<256x16xbf16>
    %c16 = arith.constant 16 : index
    %c0_9 = arith.constant 0 : index
    %10 = vector.load %arg5[%c16, %c0_9] : memref<144x8xbf16, #tpu.memory_space<vmem>>, vector<16x8xbf16>
    %cst_10 = arith.constant dense<0.000000e+00> : vector<256x8xf32>
    %11 = tpu.matmul %9, %10, %cst_10 {dimension_numbers = #tpu.dot_dimension_numbers<[1], [0], [0], [1], [0, 0, 1, 1], [], []>} : vector<256x16xbf16>, vector<16x8xbf16>, vector<256x8xf32> -> vector<256x8xf32>
    %12 = arith.addf %6, %11 : vector<256x8xf32>
    %c0_11 = arith.constant 0 : index
    %c0_12 = arith.constant 0 : index
    %c2 = arith.constant 2 : index
    %c0_13 = arith.constant 0 : index
    %13 = vector.load %arg1[%c0_11, %c0_12, %c2, %c0_13] : memref<1x18x18x16xbf16, #tpu.memory_space<vmem>>, vector<1x16x16x16xbf16>
    %14 = vector.shape_cast %13 : vector<1x16x16x16xbf16> to vector<16x16x16xbf16>
    %15 = vector.shape_cast %14 : vector<16x16x16xbf16> to vector<256x16xbf16>
    %c32 = arith.constant 32 : index
    %c0_14 = arith.constant 0 : index
    %16 = vector.load %arg5[%c32, %c0_14] : memref<144x8xbf16, #tpu.memory_space<vmem>>, vector<16x8xbf16>
    %cst_15 = arith.constant dense<0.000000e+00> : vector<256x8xf32>
    %17 = tpu.matmul %15, %16, %cst_15 {dimension_numbers = #tpu.dot_dimension_numbers<[1], [0], [0], [1], [0, 0, 1, 1], [], []>} : vector<256x16xbf16>, vector<16x8xbf16>, vector<256x8xf32> -> vector<256x8xf32>
    %18 = arith.addf %12, %17 : vector<256x8xf32>
    %c0_16 = arith.constant 0 : index
    %c1_17 = arith.constant 1 : index
    %c0_18 = arith.constant 0 : index
    %c0_19 = arith.constant 0 : index
    %19 = vector.load %arg1[%c0_16, %c1_17, %c0_18, %c0_19] : memref<1x18x18x16xbf16, #tpu.memory_space<vmem>>, vector<1x16x16x16xbf16>
    %20 = vector.shape_cast %19 : vector<1x16x16x16xbf16> to vector<16x16x16xbf16>
    %21 = vector.shape_cast %20 : vector<16x16x16xbf16> to vector<256x16xbf16>
    %c48 = arith.constant 48 : index
    %c0_20 = arith.constant 0 : index
    %22 = vector.load %arg5[%c48, %c0_20] : memref<144x8xbf16, #tpu.memory_space<vmem>>, vector<16x8xbf16>
    %cst_21 = arith.constant dense<0.000000e+00> : vector<256x8xf32>
    %23 = tpu.matmul %21, %22, %cst_21 {dimension_numbers = #tpu.dot_dimension_numbers<[1], [0], [0], [1], [0, 0, 1, 1], [], []>} : vector<256x16xbf16>, vector<16x8xbf16>, vector<256x8xf32> -> vector<256x8xf32>
    %24 = arith.addf %18, %23 : vector<256x8xf32>
    %c0_22 = arith.constant 0 : index
    %c1_23 = arith.constant 1 : index
    %c1_24 = arith.constant 1 : index
    %c0_25 = arith.constant 0 : index
    %25 = vector.load %arg1[%c0_22, %c1_23, %c1_24, %c0_25] : memref<1x18x18x16xbf16, #tpu.memory_space<vmem>>, vector<1x16x16x16xbf16>
    %26 = vector.shape_cast %25 : vector<1x16x16x16xbf16> to vector<16x16x16xbf16>
    %27 = vector.shape_cast %26 : vector<16x16x16xbf16> to vector<256x16xbf16>
    %c64 = arith.constant 64 : index
    %c0_26 = arith.constant 0 : index
    %28 = vector.load %arg5[%c64, %c0_26] : memref<144x8xbf16, #tpu.memory_space<vmem>>, vector<16x8xbf16>
    %cst_27 = arith.constant dense<0.000000e+00> : vector<256x8xf32>
    %29 = tpu.matmul %27, %28, %cst_27 {dimension_numbers = #tpu.dot_dimension_numbers<[1], [0], [0], [1], [0, 0, 1, 1], [], []>} : vector<256x16xbf16>, vector<16x8xbf16>, vector<256x8xf32> -> vector<256x8xf32>
    %30 = arith.addf %24, %29 : vector<256x8xf32>
    %c0_28 = arith.constant 0 : index
    %c1_29 = arith.constant 1 : index
    %c2_30 = arith.constant 2 : index
    %c0_31 = arith.constant 0 : index
    %31 = vector.load %arg1[%c0_28, %c1_29, %c2_30, %c0_31] : memref<1x18x18x16xbf16, #tpu.memory_space<vmem>>, vector<1x16x16x16xbf16>
    %32 = vector.shape_cast %31 : vector<1x16x16x16xbf16> to vector<16x16x16xbf16>
    %33 = vector.shape_cast %32 : vector<16x16x16xbf16> to vector<256x16xbf16>
    %c80 = arith.constant 80 : index
    %c0_32 = arith.constant 0 : index
    %34 = vector.load %arg5[%c80, %c0_32] : memref<144x8xbf16, #tpu.memory_space<vmem>>, vector<16x8xbf16>
    %cst_33 = arith.constant dense<0.000000e+00> : vector<256x8xf32>
    %35 = tpu.matmul %33, %34, %cst_33 {dimension_numbers = #tpu.dot_dimension_numbers<[1], [0], [0], [1], [0, 0, 1, 1], [], []>} : vector<256x16xbf16>, vector<16x8xbf16>, vector<256x8xf32> -> vector<256x8xf32>
    %36 = arith.addf %30, %35 : vector<256x8xf32>
    %c0_34 = arith.constant 0 : index
    %c2_35 = arith.constant 2 : index
    %c0_36 = arith.constant 0 : index
    %c0_37 = arith.constant 0 : index
    %37 = vector.load %arg1[%c0_34, %c2_35, %c0_36, %c0_37] : memref<1x18x18x16xbf16, #tpu.memory_space<vmem>>, vector<1x16x16x16xbf16>
    %38 = vector.shape_cast %37 : vector<1x16x16x16xbf16> to vector<16x16x16xbf16>
    %39 = vector.shape_cast %38 : vector<16x16x16xbf16> to vector<256x16xbf16>
    %c96 = arith.constant 96 : index
    %c0_38 = arith.constant 0 : index
    %40 = vector.load %arg5[%c96, %c0_38] : memref<144x8xbf16, #tpu.memory_space<vmem>>, vector<16x8xbf16>
    %cst_39 = arith.constant dense<0.000000e+00> : vector<256x8xf32>
    %41 = tpu.matmul %39, %40, %cst_39 {dimension_numbers = #tpu.dot_dimension_numbers<[1], [0], [0], [1], [0, 0, 1, 1], [], []>} : vector<256x16xbf16>, vector<16x8xbf16>, vector<256x8xf32> -> vector<256x8xf32>
    %42 = arith.addf %36, %41 : vector<256x8xf32>
    %c0_40 = arith.constant 0 : index
    %c2_41 = arith.constant 2 : index
    %c1_42 = arith.constant 1 : index
    %c0_43 = arith.constant 0 : index
    %43 = vector.load %arg1[%c0_40, %c2_41, %c1_42, %c0_43] : memref<1x18x18x16xbf16, #tpu.memory_space<vmem>>, vector<1x16x16x16xbf16>
    %44 = vector.shape_cast %43 : vector<1x16x16x16xbf16> to vector<16x16x16xbf16>
    %45 = vector.shape_cast %44 : vector<16x16x16xbf16> to vector<256x16xbf16>
    %c112 = arith.constant 112 : index
    %c0_44 = arith.constant 0 : index
    %46 = vector.load %arg5[%c112, %c0_44] : memref<144x8xbf16, #tpu.memory_space<vmem>>, vector<16x8xbf16>
    %cst_45 = arith.constant dense<0.000000e+00> : vector<256x8xf32>
    %47 = tpu.matmul %45, %46, %cst_45 {dimension_numbers = #tpu.dot_dimension_numbers<[1], [0], [0], [1], [0, 0, 1, 1], [], []>} : vector<256x16xbf16>, vector<16x8xbf16>, vector<256x8xf32> -> vector<256x8xf32>
    %48 = arith.addf %42, %47 : vector<256x8xf32>
    %c0_46 = arith.constant 0 : index
    %c2_47 = arith.constant 2 : index
    %c2_48 = arith.constant 2 : index
    %c0_49 = arith.constant 0 : index
    %49 = vector.load %arg1[%c0_46, %c2_47, %c2_48, %c0_49] : memref<1x18x18x16xbf16, #tpu.memory_space<vmem>>, vector<1x16x16x16xbf16>
    %50 = vector.shape_cast %49 : vector<1x16x16x16xbf16> to vector<16x16x16xbf16>
    %51 = vector.shape_cast %50 : vector<16x16x16xbf16> to vector<256x16xbf16>
    %c128 = arith.constant 128 : index
    %c0_50 = arith.constant 0 : index
    %52 = vector.load %arg5[%c128, %c0_50] : memref<144x8xbf16, #tpu.memory_space<vmem>>, vector<16x8xbf16>
    %cst_51 = arith.constant dense<0.000000e+00> : vector<256x8xf32>
    %53 = tpu.matmul %51, %52, %cst_51 {dimension_numbers = #tpu.dot_dimension_numbers<[1], [0], [0], [1], [0, 0, 1, 1], [], []>} : vector<256x16xbf16>, vector<16x8xbf16>, vector<256x8xf32> -> vector<256x8xf32>
    %54 = arith.addf %48, %53 : vector<256x8xf32>
    %c0_52 = arith.constant 0 : index
    %c0_53 = arith.constant 0 : index
    %55 = vector.load %arg6[%c0_52, %c0_53] : memref<1x8xf32, #tpu.memory_space<vmem>>, vector<1x8xf32>
    %56 = vector.broadcast %55 : vector<1x8xf32> to vector<256x8xf32>
    %57 = arith.addf %54, %56 : vector<256x8xf32>
    %cst_54 = arith.constant 0.000000e+00 : f32
    %58 = vector.broadcast %cst_54 : f32 to vector<256x8xf32>
    %59 = arith.cmpf oge, %57, %58 : vector<256x8xf32>
    %cst_55 = arith.constant 5.000000e-02 : f32
    %60 = vector.broadcast %cst_55 : f32 to vector<256x8xf32>
    %61 = arith.mulf %60, %57 : vector<256x8xf32>
    %62 = arith.select %59, %57, %61 : vector<256x8xi1>, vector<256x8xf32>
    %c0_56 = arith.constant 0 : index
    %c0_57 = arith.constant 0 : index
    %63 = vector.load %arg2[%c0_56, %c0_57] : memref<256x8xbf16, #tpu.memory_space<vmem>>, vector<256x8xbf16>
    %c0_58 = arith.constant 0 : index
    %c0_59 = arith.constant 0 : index
    %64 = vector.load %arg7[%c0_58, %c0_59] : memref<32x16xbf16, #tpu.memory_space<vmem>>, vector<8x16xbf16>
    %cst_60 = arith.constant dense<0.000000e+00> : vector<256x16xf32>
    %65 = tpu.matmul %63, %64, %cst_60 {dimension_numbers = #tpu.dot_dimension_numbers<[1], [0], [0], [1], [0, 0, 1, 1], [], []>} : vector<256x8xbf16>, vector<8x16xbf16>, vector<256x16xf32> -> vector<256x16xf32>
    %c0_61 = arith.constant 0 : index
    %c0_62 = arith.constant 0 : index
    %66 = vector.load %arg3[%c0_61, %c0_62] : memref<256x8xbf16, #tpu.memory_space<vmem>>, vector<256x8xbf16>
    %c8 = arith.constant 8 : index
    %c0_63 = arith.constant 0 : index
    %67 = vector.load %arg7[%c8, %c0_63] : memref<32x16xbf16, #tpu.memory_space<vmem>>, vector<8x16xbf16>
    %cst_64 = arith.constant dense<0.000000e+00> : vector<256x16xf32>
    %68 = tpu.matmul %66, %67, %cst_64 {dimension_numbers = #tpu.dot_dimension_numbers<[1], [0], [0], [1], [0, 0, 1, 1], [], []>} : vector<256x8xbf16>, vector<8x16xbf16>, vector<256x16xf32> -> vector<256x16xf32>
    %69 = arith.addf %65, %68 : vector<256x16xf32>
    %c0_65 = arith.constant 0 : index
    %c0_66 = arith.constant 0 : index
    %70 = vector.load %arg4[%c0_65, %c0_66] : memref<256x8xbf16, #tpu.memory_space<vmem>>, vector<256x8xbf16>
    %c16_67 = arith.constant 16 : index
    %c0_68 = arith.constant 0 : index
    %71 = vector.load %arg7[%c16_67, %c0_68] : memref<32x16xbf16, #tpu.memory_space<vmem>>, vector<8x16xbf16>
    %cst_69 = arith.constant dense<0.000000e+00> : vector<256x16xf32>
    %72 = tpu.matmul %70, %71, %cst_69 {dimension_numbers = #tpu.dot_dimension_numbers<[1], [0], [0], [1], [0, 0, 1, 1], [], []>} : vector<256x8xbf16>, vector<8x16xbf16>, vector<256x16xf32> -> vector<256x16xf32>
    %73 = arith.addf %69, %72 : vector<256x16xf32>
    %74 = arith.truncf %62 : vector<256x8xf32> to vector<256x8xbf16>
    %c24 = arith.constant 24 : index
    %c0_70 = arith.constant 0 : index
    %75 = vector.load %arg7[%c24, %c0_70] : memref<32x16xbf16, #tpu.memory_space<vmem>>, vector<8x16xbf16>
    %cst_71 = arith.constant dense<0.000000e+00> : vector<256x16xf32>
    %76 = tpu.matmul %74, %75, %cst_71 {dimension_numbers = #tpu.dot_dimension_numbers<[1], [0], [0], [1], [0, 0, 1, 1], [], []>} : vector<256x8xbf16>, vector<8x16xbf16>, vector<256x16xf32> -> vector<256x16xf32>
    %77 = arith.addf %73, %76 : vector<256x16xf32>
    %c0_72 = arith.constant 0 : index
    %c0_73 = arith.constant 0 : index
    %78 = vector.load %arg8[%c0_72, %c0_73] : memref<1x16xf32, #tpu.memory_space<vmem>>, vector<1x16xf32>
    %79 = vector.broadcast %78 : vector<1x16xf32> to vector<256x16xf32>
    %80 = arith.addf %77, %79 : vector<256x16xf32>
    %81 = arith.truncf %80 : vector<256x16xf32> to vector<256x16xbf16>
    %c0_74 = arith.constant 0 : index
    %c0_75 = arith.constant 0 : index
    %82 = vector.load %arg9[%c0_74, %c0_75] : memref<16x4xbf16, #tpu.memory_space<vmem>>, vector<16x4xbf16>
    %cst_76 = arith.constant dense<0.000000e+00> : vector<256x4xf32>
    %83 = tpu.matmul %81, %82, %cst_76 {dimension_numbers = #tpu.dot_dimension_numbers<[1], [0], [0], [1], [0, 0, 1, 1], [], []>} : vector<256x16xbf16>, vector<16x4xbf16>, vector<256x4xf32> -> vector<256x4xf32>
    %c0_77 = arith.constant 0 : index
    %c0_78 = arith.constant 0 : index
    %84 = vector.load %arg10[%c0_77, %c0_78] : memref<1x4xf32, #tpu.memory_space<vmem>>, vector<1x4xf32>
    %85 = vector.broadcast %84 : vector<1x4xf32> to vector<256x4xf32>
    %86 = arith.addf %83, %85 : vector<256x4xf32>
    %c0_79 = arith.constant 0 : index
    %c0_80 = arith.constant 0 : index
    %87 = vector.load %arg11[%c0_79, %c0_80] : memref<256x16xf32, #tpu.memory_space<vmem>>, vector<256x16xf32>
    tpu.vector_store %arg11[%c0_79, %c0_80], %80 {strides = array<i32>} : memref<256x16xf32, #tpu.memory_space<vmem>>, vector<256x16xf32>,
    %c0_81 = arith.constant 0 : index
    %c0_82 = arith.constant 0 : index
    %88 = vector.load %arg12[%c0_81, %c0_82] : memref<256x4xf32, #tpu.memory_space<vmem>>, vector<256x4xf32>
    tpu.vector_store %arg12[%c0_81, %c0_82], %86 {strides = array<i32>} : memref<256x4xf32, #tpu.memory_space<vmem>>, vector<256x4xf32>,
    return
  }
  func.func @transform_0(%arg0: i32) -> (i32, i32, i32, i32) {
    %c0_i32 = arith.constant 0 : i32
    %c0_i32_0 = arith.constant 0 : i32
    %c0_i32_1 = arith.constant 0 : i32
    %c0_i32_2 = arith.constant 0 : i32
    return %arg0, %c0_i32, %c0_i32_0, %c0_i32_1 : i32, i32, i32, i32
  }
  func.func @transform_1(%arg0: i32) -> (i32, i32) {
    %c0_i32 = arith.constant 0 : i32
    %c0_i32_0 = arith.constant 0 : i32
    return %arg0, %c0_i32 : i32, i32
  }
  func.func @transform_2(%arg0: i32) -> (i32, i32) {
    %c0_i32 = arith.constant 0 : i32
    %c0_i32_0 = arith.constant 0 : i32
    return %arg0, %c0_i32 : i32, i32
  }
  func.func @transform_3(%arg0: i32) -> (i32, i32) {
    %c0_i32 = arith.constant 0 : i32
    %c0_i32_0 = arith.constant 0 : i32
    return %arg0, %c0_i32 : i32, i32
  }
  func.func @transform_4(%arg0: i32) -> (i32, i32) {
    %c0_i32 = arith.constant 0 : i32
    %c0_i32_0 = arith.constant 0 : i32
    %c0_i32_1 = arith.constant 0 : i32
    return %c0_i32, %c0_i32_0 : i32, i32
  }
  func.func @transform_5(%arg0: i32) -> (i32, i32) {
    %c0_i32 = arith.constant 0 : i32
    %c0_i32_0 = arith.constant 0 : i32
    %c0_i32_1 = arith.constant 0 : i32
    return %c0_i32, %c0_i32_0 : i32, i32
  }
  func.func @transform_6(%arg0: i32) -> (i32, i32) {
    %c0_i32 = arith.constant 0 : i32
    %c0_i32_0 = arith.constant 0 : i32
    %c0_i32_1 = arith.constant 0 : i32
    return %c0_i32, %c0_i32_0 : i32, i32
  }
  func.func @transform_7(%arg0: i32) -> (i32, i32) {
    %c0_i32 = arith.constant 0 : i32
    %c0_i32_0 = arith.constant 0 : i32
    %c0_i32_1 = arith.constant 0 : i32
    return %c0_i32, %c0_i32_0 : i32, i32
  }
  func.func @transform_8(%arg0: i32) -> (i32, i32) {
    %c0_i32 = arith.constant 0 : i32
    %c0_i32_0 = arith.constant 0 : i32
    %c0_i32_1 = arith.constant 0 : i32
    return %c0_i32, %c0_i32_0 : i32, i32
  }
  func.func @transform_9(%arg0: i32) -> (i32, i32) {
    %c0_i32 = arith.constant 0 : i32
    %c0_i32_0 = arith.constant 0 : i32
    %c0_i32_1 = arith.constant 0 : i32
    return %c0_i32, %c0_i32_0 : i32, i32
  }
  func.func @transform_10(%arg0: i32) -> (i32, i32) {
    %c0_i32 = arith.constant 0 : i32
    %c0_i32_0 = arith.constant 0 : i32
    return %arg0, %c0_i32 : i32, i32
  }
  func.func @transform_11(%arg0: i32) -> (i32, i32) {
    %c0_i32 = arith.constant 0 : i32
    %c0_i32_0 = arith.constant 0 : i32
    return %arg0, %c0_i32 : i32, i32
  }
}

module attributes {stable_mosaic.version = 11 : i64} {
  func.func @_stage_kernel(%arg0: i32, %arg1: memref<1x18x18x16xbf16, #tpu.memory_space<vmem>>, %arg2: memref<144x24xbf16, #tpu.memory_space<vmem>>, %arg3: memref<1x24xf32, #tpu.memory_space<vmem>>, %arg4: memref<256x8xbf16, #tpu.memory_space<vmem>>, %arg5: memref<1x18x18x16xbf16, #tpu.memory_space<vmem>>) attributes {dimension_semantics = [#tpu.dimension_semantics<parallel>], iteration_bounds = array<i64: 2>, scalar_prefetch = 0 : i64, scratch_operands = 0 : i64, tpu.core_type = #tpu.core_type<tc>, window_params = [{transform_indices = @transform_0, window_bounds = array<i64: 1, 18, 18, 16>}, {pipeline_mode = #tpu.pipeline_mode<synchronous>, transform_indices = @transform_1, window_bounds = array<i64: 144, 24>}, {pipeline_mode = #tpu.pipeline_mode<synchronous>, transform_indices = @transform_2, window_bounds = array<i64: 1, 24>}, {transform_indices = @transform_3, window_bounds = array<i64: 256, 8>}, {transform_indices = @transform_4, window_bounds = array<i64: 1, 18, 18, 16>}]} {
    %cst = arith.constant 0.000000e+00 : f32
    %0 = vector.broadcast %cst : f32 to vector<256x24xf32>
    %c0 = arith.constant 0 : index
    %c0_0 = arith.constant 0 : index
    %c0_1 = arith.constant 0 : index
    %c0_2 = arith.constant 0 : index
    %1 = vector.load %arg1[%c0, %c0_0, %c0_1, %c0_2] : memref<1x18x18x16xbf16, #tpu.memory_space<vmem>>, vector<1x16x16x16xbf16>
    %2 = vector.shape_cast %1 : vector<1x16x16x16xbf16> to vector<16x16x16xbf16>
    %3 = vector.shape_cast %2 : vector<16x16x16xbf16> to vector<256x16xbf16>
    %c0_3 = arith.constant 0 : index
    %c0_4 = arith.constant 0 : index
    %4 = vector.load %arg2[%c0_3, %c0_4] : memref<144x24xbf16, #tpu.memory_space<vmem>>, vector<16x24xbf16>
    %cst_5 = arith.constant dense<0.000000e+00> : vector<256x24xf32>
    %5 = tpu.matmul %3, %4, %cst_5 {dimension_numbers = #tpu.dot_dimension_numbers<[1], [0], [0], [1], [0, 0, 1, 1], [], []>} : vector<256x16xbf16>, vector<16x24xbf16>, vector<256x24xf32> -> vector<256x24xf32>
    %6 = arith.addf %0, %5 : vector<256x24xf32>
    %c0_6 = arith.constant 0 : index
    %c0_7 = arith.constant 0 : index
    %c1 = arith.constant 1 : index
    %c0_8 = arith.constant 0 : index
    %7 = vector.load %arg1[%c0_6, %c0_7, %c1, %c0_8] : memref<1x18x18x16xbf16, #tpu.memory_space<vmem>>, vector<1x16x16x16xbf16>
    %8 = vector.shape_cast %7 : vector<1x16x16x16xbf16> to vector<16x16x16xbf16>
    %9 = vector.shape_cast %8 : vector<16x16x16xbf16> to vector<256x16xbf16>
    %c16 = arith.constant 16 : index
    %c0_9 = arith.constant 0 : index
    %10 = vector.load %arg2[%c16, %c0_9] : memref<144x24xbf16, #tpu.memory_space<vmem>>, vector<16x24xbf16>
    %cst_10 = arith.constant dense<0.000000e+00> : vector<256x24xf32>
    %11 = tpu.matmul %9, %10, %cst_10 {dimension_numbers = #tpu.dot_dimension_numbers<[1], [0], [0], [1], [0, 0, 1, 1], [], []>} : vector<256x16xbf16>, vector<16x24xbf16>, vector<256x24xf32> -> vector<256x24xf32>
    %12 = arith.addf %6, %11 : vector<256x24xf32>
    %c0_11 = arith.constant 0 : index
    %c0_12 = arith.constant 0 : index
    %c2 = arith.constant 2 : index
    %c0_13 = arith.constant 0 : index
    %13 = vector.load %arg1[%c0_11, %c0_12, %c2, %c0_13] : memref<1x18x18x16xbf16, #tpu.memory_space<vmem>>, vector<1x16x16x16xbf16>
    %14 = vector.shape_cast %13 : vector<1x16x16x16xbf16> to vector<16x16x16xbf16>
    %15 = vector.shape_cast %14 : vector<16x16x16xbf16> to vector<256x16xbf16>
    %c32 = arith.constant 32 : index
    %c0_14 = arith.constant 0 : index
    %16 = vector.load %arg2[%c32, %c0_14] : memref<144x24xbf16, #tpu.memory_space<vmem>>, vector<16x24xbf16>
    %cst_15 = arith.constant dense<0.000000e+00> : vector<256x24xf32>
    %17 = tpu.matmul %15, %16, %cst_15 {dimension_numbers = #tpu.dot_dimension_numbers<[1], [0], [0], [1], [0, 0, 1, 1], [], []>} : vector<256x16xbf16>, vector<16x24xbf16>, vector<256x24xf32> -> vector<256x24xf32>
    %18 = arith.addf %12, %17 : vector<256x24xf32>
    %c0_16 = arith.constant 0 : index
    %c1_17 = arith.constant 1 : index
    %c0_18 = arith.constant 0 : index
    %c0_19 = arith.constant 0 : index
    %19 = vector.load %arg1[%c0_16, %c1_17, %c0_18, %c0_19] : memref<1x18x18x16xbf16, #tpu.memory_space<vmem>>, vector<1x16x16x16xbf16>
    %20 = vector.shape_cast %19 : vector<1x16x16x16xbf16> to vector<16x16x16xbf16>
    %21 = vector.shape_cast %20 : vector<16x16x16xbf16> to vector<256x16xbf16>
    %c48 = arith.constant 48 : index
    %c0_20 = arith.constant 0 : index
    %22 = vector.load %arg2[%c48, %c0_20] : memref<144x24xbf16, #tpu.memory_space<vmem>>, vector<16x24xbf16>
    %cst_21 = arith.constant dense<0.000000e+00> : vector<256x24xf32>
    %23 = tpu.matmul %21, %22, %cst_21 {dimension_numbers = #tpu.dot_dimension_numbers<[1], [0], [0], [1], [0, 0, 1, 1], [], []>} : vector<256x16xbf16>, vector<16x24xbf16>, vector<256x24xf32> -> vector<256x24xf32>
    %24 = arith.addf %18, %23 : vector<256x24xf32>
    %c0_22 = arith.constant 0 : index
    %c1_23 = arith.constant 1 : index
    %c1_24 = arith.constant 1 : index
    %c0_25 = arith.constant 0 : index
    %25 = vector.load %arg1[%c0_22, %c1_23, %c1_24, %c0_25] : memref<1x18x18x16xbf16, #tpu.memory_space<vmem>>, vector<1x16x16x16xbf16>
    %26 = vector.shape_cast %25 : vector<1x16x16x16xbf16> to vector<16x16x16xbf16>
    %27 = vector.shape_cast %26 : vector<16x16x16xbf16> to vector<256x16xbf16>
    %c64 = arith.constant 64 : index
    %c0_26 = arith.constant 0 : index
    %28 = vector.load %arg2[%c64, %c0_26] : memref<144x24xbf16, #tpu.memory_space<vmem>>, vector<16x24xbf16>
    %cst_27 = arith.constant dense<0.000000e+00> : vector<256x24xf32>
    %29 = tpu.matmul %27, %28, %cst_27 {dimension_numbers = #tpu.dot_dimension_numbers<[1], [0], [0], [1], [0, 0, 1, 1], [], []>} : vector<256x16xbf16>, vector<16x24xbf16>, vector<256x24xf32> -> vector<256x24xf32>
    %30 = arith.addf %24, %29 : vector<256x24xf32>
    %c0_28 = arith.constant 0 : index
    %c1_29 = arith.constant 1 : index
    %c2_30 = arith.constant 2 : index
    %c0_31 = arith.constant 0 : index
    %31 = vector.load %arg1[%c0_28, %c1_29, %c2_30, %c0_31] : memref<1x18x18x16xbf16, #tpu.memory_space<vmem>>, vector<1x16x16x16xbf16>
    %32 = vector.shape_cast %31 : vector<1x16x16x16xbf16> to vector<16x16x16xbf16>
    %33 = vector.shape_cast %32 : vector<16x16x16xbf16> to vector<256x16xbf16>
    %c80 = arith.constant 80 : index
    %c0_32 = arith.constant 0 : index
    %34 = vector.load %arg2[%c80, %c0_32] : memref<144x24xbf16, #tpu.memory_space<vmem>>, vector<16x24xbf16>
    %cst_33 = arith.constant dense<0.000000e+00> : vector<256x24xf32>
    %35 = tpu.matmul %33, %34, %cst_33 {dimension_numbers = #tpu.dot_dimension_numbers<[1], [0], [0], [1], [0, 0, 1, 1], [], []>} : vector<256x16xbf16>, vector<16x24xbf16>, vector<256x24xf32> -> vector<256x24xf32>
    %36 = arith.addf %30, %35 : vector<256x24xf32>
    %c0_34 = arith.constant 0 : index
    %c2_35 = arith.constant 2 : index
    %c0_36 = arith.constant 0 : index
    %c0_37 = arith.constant 0 : index
    %37 = vector.load %arg1[%c0_34, %c2_35, %c0_36, %c0_37] : memref<1x18x18x16xbf16, #tpu.memory_space<vmem>>, vector<1x16x16x16xbf16>
    %38 = vector.shape_cast %37 : vector<1x16x16x16xbf16> to vector<16x16x16xbf16>
    %39 = vector.shape_cast %38 : vector<16x16x16xbf16> to vector<256x16xbf16>
    %c96 = arith.constant 96 : index
    %c0_38 = arith.constant 0 : index
    %40 = vector.load %arg2[%c96, %c0_38] : memref<144x24xbf16, #tpu.memory_space<vmem>>, vector<16x24xbf16>
    %cst_39 = arith.constant dense<0.000000e+00> : vector<256x24xf32>
    %41 = tpu.matmul %39, %40, %cst_39 {dimension_numbers = #tpu.dot_dimension_numbers<[1], [0], [0], [1], [0, 0, 1, 1], [], []>} : vector<256x16xbf16>, vector<16x24xbf16>, vector<256x24xf32> -> vector<256x24xf32>
    %42 = arith.addf %36, %41 : vector<256x24xf32>
    %c0_40 = arith.constant 0 : index
    %c2_41 = arith.constant 2 : index
    %c1_42 = arith.constant 1 : index
    %c0_43 = arith.constant 0 : index
    %43 = vector.load %arg1[%c0_40, %c2_41, %c1_42, %c0_43] : memref<1x18x18x16xbf16, #tpu.memory_space<vmem>>, vector<1x16x16x16xbf16>
    %44 = vector.shape_cast %43 : vector<1x16x16x16xbf16> to vector<16x16x16xbf16>
    %45 = vector.shape_cast %44 : vector<16x16x16xbf16> to vector<256x16xbf16>
    %c112 = arith.constant 112 : index
    %c0_44 = arith.constant 0 : index
    %46 = vector.load %arg2[%c112, %c0_44] : memref<144x24xbf16, #tpu.memory_space<vmem>>, vector<16x24xbf16>
    %cst_45 = arith.constant dense<0.000000e+00> : vector<256x24xf32>
    %47 = tpu.matmul %45, %46, %cst_45 {dimension_numbers = #tpu.dot_dimension_numbers<[1], [0], [0], [1], [0, 0, 1, 1], [], []>} : vector<256x16xbf16>, vector<16x24xbf16>, vector<256x24xf32> -> vector<256x24xf32>
    %48 = arith.addf %42, %47 : vector<256x24xf32>
    %c0_46 = arith.constant 0 : index
    %c2_47 = arith.constant 2 : index
    %c2_48 = arith.constant 2 : index
    %c0_49 = arith.constant 0 : index
    %49 = vector.load %arg1[%c0_46, %c2_47, %c2_48, %c0_49] : memref<1x18x18x16xbf16, #tpu.memory_space<vmem>>, vector<1x16x16x16xbf16>
    %50 = vector.shape_cast %49 : vector<1x16x16x16xbf16> to vector<16x16x16xbf16>
    %51 = vector.shape_cast %50 : vector<16x16x16xbf16> to vector<256x16xbf16>
    %c128 = arith.constant 128 : index
    %c0_50 = arith.constant 0 : index
    %52 = vector.load %arg2[%c128, %c0_50] : memref<144x24xbf16, #tpu.memory_space<vmem>>, vector<16x24xbf16>
    %cst_51 = arith.constant dense<0.000000e+00> : vector<256x24xf32>
    %53 = tpu.matmul %51, %52, %cst_51 {dimension_numbers = #tpu.dot_dimension_numbers<[1], [0], [0], [1], [0, 0, 1, 1], [], []>} : vector<256x16xbf16>, vector<16x24xbf16>, vector<256x24xf32> -> vector<256x24xf32>
    %54 = arith.addf %48, %53 : vector<256x24xf32>
    %c0_52 = arith.constant 0 : index
    %c0_53 = arith.constant 0 : index
    %55 = vector.load %arg3[%c0_52, %c0_53] : memref<1x24xf32, #tpu.memory_space<vmem>>, vector<1x24xf32>
    %56 = vector.broadcast %55 : vector<1x24xf32> to vector<256x24xf32>
    %57 = arith.addf %54, %56 : vector<256x24xf32>
    %58 = vector.extract_strided_slice %57 {offsets = [0, 0], sizes = [256, 8], strides = [1, 1]} : vector<256x24xf32> to vector<256x8xf32>
    %cst_54 = arith.constant 0.000000e+00 : f32
    %59 = vector.broadcast %cst_54 : f32 to vector<256x8xf32>
    %60 = arith.cmpf oge, %58, %59 : vector<256x8xf32>
    %cst_55 = arith.constant 5.000000e-02 : f32
    %61 = vector.broadcast %cst_55 : f32 to vector<256x8xf32>
    %62 = arith.mulf %61, %58 : vector<256x8xf32>
    %63 = arith.select %60, %58, %62 : vector<256x8xi1>, vector<256x8xf32>
    %64 = vector.extract_strided_slice %57 {offsets = [0, 8], sizes = [256, 16], strides = [1, 1]} : vector<256x24xf32> to vector<256x16xf32>
    %65 = arith.extf %27 : vector<256x16xbf16> to vector<256x16xf32>
    %66 = arith.addf %64, %65 : vector<256x16xf32>
    %cst_56 = arith.constant 0.000000e+00 : f32
    %67 = vector.broadcast %cst_56 : f32 to vector<256x16xf32>
    %68 = arith.cmpf oge, %66, %67 : vector<256x16xf32>
    %cst_57 = arith.constant 5.000000e-02 : f32
    %69 = vector.broadcast %cst_57 : f32 to vector<256x16xf32>
    %70 = arith.mulf %69, %66 : vector<256x16xf32>
    %71 = arith.select %68, %66, %70 : vector<256x16xi1>, vector<256x16xf32>
    %72 = arith.truncf %63 : vector<256x8xf32> to vector<256x8xbf16>
    %c0_58 = arith.constant 0 : index
    %c0_59 = arith.constant 0 : index
    %73 = vector.load %arg4[%c0_58, %c0_59] : memref<256x8xbf16, #tpu.memory_space<vmem>>, vector<256x8xbf16>
    tpu.vector_store %arg4[%c0_58, %c0_59], %72 {strides = array<i32>} : memref<256x8xbf16, #tpu.memory_space<vmem>>, vector<256x8xbf16>,
    %cst_60 = arith.constant 0.000000e+00 : bf16
    %74 = vector.broadcast %cst_60 : bf16 to vector<18x18x16xbf16>
    %c0_61 = arith.constant 0 : index
    %c0_62 = arith.constant 0 : index
    %c0_63 = arith.constant 0 : index
    %c0_64 = arith.constant 0 : index
    %75 = vector.load %arg5[%c0_61, %c0_62, %c0_63, %c0_64] : memref<1x18x18x16xbf16, #tpu.memory_space<vmem>>, vector<1x18x18x16xbf16>
    %76 = vector.shape_cast %75 : vector<1x18x18x16xbf16> to vector<18x18x16xbf16>
    %77 = vector.shape_cast %74 : vector<18x18x16xbf16> to vector<1x18x18x16xbf16>
    tpu.vector_store %arg5[%c0_61, %c0_62, %c0_63, %c0_64], %77 {strides = array<i32>} : memref<1x18x18x16xbf16, #tpu.memory_space<vmem>>, vector<1x18x18x16xbf16>,
    %78 = vector.shape_cast %71 : vector<256x16xf32> to vector<16x16x16xf32>
    %79 = arith.truncf %78 : vector<16x16x16xf32> to vector<16x16x16xbf16>
    %c0_65 = arith.constant 0 : index
    %c1_66 = arith.constant 1 : index
    %c1_67 = arith.constant 1 : index
    %c0_68 = arith.constant 0 : index
    %80 = vector.load %arg5[%c0_65, %c1_66, %c1_67, %c0_68] : memref<1x18x18x16xbf16, #tpu.memory_space<vmem>>, vector<1x16x16x16xbf16>
    %81 = vector.shape_cast %80 : vector<1x16x16x16xbf16> to vector<16x16x16xbf16>
    %82 = vector.shape_cast %79 : vector<16x16x16xbf16> to vector<1x16x16x16xbf16>
    tpu.vector_store %arg5[%c0_65, %c1_66, %c1_67, %c0_68], %82 {strides = array<i32>} : memref<1x18x18x16xbf16, #tpu.memory_space<vmem>>, vector<1x16x16x16xbf16>,
    return
  }
  func.func @transform_0(%arg0: i32) -> (i32, i32, i32, i32) {
    %c0_i32 = arith.constant 0 : i32
    %c0_i32_0 = arith.constant 0 : i32
    %c0_i32_1 = arith.constant 0 : i32
    %c0_i32_2 = arith.constant 0 : i32
    return %arg0, %c0_i32, %c0_i32_0, %c0_i32_1 : i32, i32, i32, i32
  }
  func.func @transform_1(%arg0: i32) -> (i32, i32) {
    %c0_i32 = arith.constant 0 : i32
    %c0_i32_0 = arith.constant 0 : i32
    %c0_i32_1 = arith.constant 0 : i32
    return %c0_i32, %c0_i32_0 : i32, i32
  }
  func.func @transform_2(%arg0: i32) -> (i32, i32) {
    %c0_i32 = arith.constant 0 : i32
    %c0_i32_0 = arith.constant 0 : i32
    %c0_i32_1 = arith.constant 0 : i32
    return %c0_i32, %c0_i32_0 : i32, i32
  }
  func.func @transform_3(%arg0: i32) -> (i32, i32) {
    %c0_i32 = arith.constant 0 : i32
    %c0_i32_0 = arith.constant 0 : i32
    return %arg0, %c0_i32 : i32, i32
  }
  func.func @transform_4(%arg0: i32) -> (i32, i32, i32, i32) {
    %c0_i32 = arith.constant 0 : i32
    %c0_i32_0 = arith.constant 0 : i32
    %c0_i32_1 = arith.constant 0 : i32
    %c0_i32_2 = arith.constant 0 : i32
    return %arg0, %c0_i32, %c0_i32_0, %c0_i32_1 : i32, i32, i32, i32
  }
}

module attributes {stable_mosaic.version = 11 : i64} {
  func.func @_mm_kernel(%arg0: i32, %arg1: memref<104x36xbf16, #tpu.memory_space<vmem>>, %arg2: memref<36x4xbf16, #tpu.memory_space<vmem>>, %arg3: memref<1x4xf32, #tpu.memory_space<vmem>>, %arg4: memref<104x4xf32, #tpu.memory_space<vmem>>) attributes {dimension_semantics = [#tpu.dimension_semantics<parallel>], iteration_bounds = array<i64: 1>, scalar_prefetch = 0 : i64, scratch_operands = 0 : i64, tpu.core_type = #tpu.core_type<tc>, window_params = [{transform_indices = @transform_0, window_bounds = array<i64: 104, 36>}, {pipeline_mode = #tpu.pipeline_mode<synchronous>, transform_indices = @transform_1, window_bounds = array<i64: 36, 4>}, {pipeline_mode = #tpu.pipeline_mode<synchronous>, transform_indices = @transform_2, window_bounds = array<i64: 1, 4>}, {transform_indices = @transform_3, window_bounds = array<i64: 104, 4>}]} {
    %c0 = arith.constant 0 : index
    %c0_0 = arith.constant 0 : index
    %0 = vector.load %arg1[%c0, %c0_0] : memref<104x36xbf16, #tpu.memory_space<vmem>>, vector<104x36xbf16>
    %c0_1 = arith.constant 0 : index
    %c0_2 = arith.constant 0 : index
    %1 = vector.load %arg2[%c0_1, %c0_2] : memref<36x4xbf16, #tpu.memory_space<vmem>>, vector<36x4xbf16>
    %cst = arith.constant dense<0.000000e+00> : vector<104x4xf32>
    %2 = tpu.matmul %0, %1, %cst {dimension_numbers = #tpu.dot_dimension_numbers<[1], [0], [0], [1], [0, 0, 1, 1], [], []>} : vector<104x36xbf16>, vector<36x4xbf16>, vector<104x4xf32> -> vector<104x4xf32>
    %c0_3 = arith.constant 0 : index
    %c0_4 = arith.constant 0 : index
    %3 = vector.load %arg3[%c0_3, %c0_4] : memref<1x4xf32, #tpu.memory_space<vmem>>, vector<1x4xf32>
    %4 = vector.broadcast %3 : vector<1x4xf32> to vector<104x4xf32>
    %5 = arith.addf %2, %4 : vector<104x4xf32>
    %c0_5 = arith.constant 0 : index
    %c0_6 = arith.constant 0 : index
    %6 = vector.load %arg4[%c0_5, %c0_6] : memref<104x4xf32, #tpu.memory_space<vmem>>, vector<104x4xf32>
    tpu.vector_store %arg4[%c0_5, %c0_6], %5 {strides = array<i32>} : memref<104x4xf32, #tpu.memory_space<vmem>>, vector<104x4xf32>,
    return
  }
  func.func @transform_0(%arg0: i32) -> (i32, i32) {
    %c0_i32 = arith.constant 0 : i32
    %c0_i32_0 = arith.constant 0 : i32
    return %arg0, %c0_i32 : i32, i32
  }
  func.func @transform_1(%arg0: i32) -> (i32, i32) {
    %c0_i32 = arith.constant 0 : i32
    %c0_i32_0 = arith.constant 0 : i32
    %c0_i32_1 = arith.constant 0 : i32
    return %c0_i32, %c0_i32_0 : i32, i32
  }
  func.func @transform_2(%arg0: i32) -> (i32, i32) {
    %c0_i32 = arith.constant 0 : i32
    %c0_i32_0 = arith.constant 0 : i32
    %c0_i32_1 = arith.constant 0 : i32
    return %c0_i32, %c0_i32_0 : i32, i32
  }
  func.func @transform_3(%arg0: i32) -> (i32, i32) {
    %c0_i32 = arith.constant 0 : i32
    %c0_i32_0 = arith.constant 0 : i32
    return %arg0, %c0_i32 : i32, i32
  }
}

module attributes {stable_mosaic.version = 11 : i64} {
  func.func @_mm_kernel(%arg0: i32, %arg1: memref<8x36xbf16, #tpu.memory_space<vmem>>, %arg2: memref<36x4xbf16, #tpu.memory_space<vmem>>, %arg3: memref<1x4xf32, #tpu.memory_space<vmem>>, %arg4: memref<8x4xf32, #tpu.memory_space<vmem>>) attributes {dimension_semantics = [#tpu.dimension_semantics<parallel>], iteration_bounds = array<i64: 1>, scalar_prefetch = 0 : i64, scratch_operands = 0 : i64, tpu.core_type = #tpu.core_type<tc>, window_params = [{transform_indices = @transform_0, window_bounds = array<i64: 8, 36>}, {pipeline_mode = #tpu.pipeline_mode<synchronous>, transform_indices = @transform_1, window_bounds = array<i64: 36, 4>}, {pipeline_mode = #tpu.pipeline_mode<synchronous>, transform_indices = @transform_2, window_bounds = array<i64: 1, 4>}, {transform_indices = @transform_3, window_bounds = array<i64: 8, 4>}]} {
    %c0 = arith.constant 0 : index
    %c0_0 = arith.constant 0 : index
    %0 = vector.load %arg1[%c0, %c0_0] : memref<8x36xbf16, #tpu.memory_space<vmem>>, vector<8x36xbf16>
    %c0_1 = arith.constant 0 : index
    %c0_2 = arith.constant 0 : index
    %1 = vector.load %arg2[%c0_1, %c0_2] : memref<36x4xbf16, #tpu.memory_space<vmem>>, vector<36x4xbf16>
    %cst = arith.constant dense<0.000000e+00> : vector<8x4xf32>
    %2 = tpu.matmul %0, %1, %cst {dimension_numbers = #tpu.dot_dimension_numbers<[1], [0], [0], [1], [0, 0, 1, 1], [], []>} : vector<8x36xbf16>, vector<36x4xbf16>, vector<8x4xf32> -> vector<8x4xf32>
    %c0_3 = arith.constant 0 : index
    %c0_4 = arith.constant 0 : index
    %3 = vector.load %arg3[%c0_3, %c0_4] : memref<1x4xf32, #tpu.memory_space<vmem>>, vector<1x4xf32>
    %4 = vector.broadcast %3 : vector<1x4xf32> to vector<8x4xf32>
    %5 = arith.addf %2, %4 : vector<8x4xf32>
    %cst_5 = arith.constant 0.000000e+00 : f32
    %6 = vector.broadcast %cst_5 : f32 to vector<8x4xf32>
    %7 = arith.maximumf %5, %6 : vector<8x4xf32>
    %c0_6 = arith.constant 0 : index
    %c0_7 = arith.constant 0 : index
    %8 = vector.load %arg4[%c0_6, %c0_7] : memref<8x4xf32, #tpu.memory_space<vmem>>, vector<8x4xf32>
    tpu.vector_store %arg4[%c0_6, %c0_7], %7 {strides = array<i32>} : memref<8x4xf32, #tpu.memory_space<vmem>>, vector<8x4xf32>,
    return
  }
  func.func @transform_0(%arg0: i32) -> (i32, i32) {
    %c0_i32 = arith.constant 0 : i32
    %c0_i32_0 = arith.constant 0 : i32
    return %arg0, %c0_i32 : i32, i32
  }
  func.func @transform_1(%arg0: i32) -> (i32, i32) {
    %c0_i32 = arith.constant 0 : i32
    %c0_i32_0 = arith.constant 0 : i32
    %c0_i32_1 = arith.constant 0 : i32
    return %c0_i32, %c0_i32_0 : i32, i32
  }
  func.func @transform_2(%arg0: i32) -> (i32, i32) {
    %c0_i32 = arith.constant 0 : i32
    %c0_i32_0 = arith.constant 0 : i32
    %c0_i32_1 = arith.constant 0 : i32
    return %c0_i32, %c0_i32_0 : i32, i32
  }
  func.func @transform_3(%arg0: i32) -> (i32, i32) {
    %c0_i32 = arith.constant 0 : i32
    %c0_i32_0 = arith.constant 0 : i32
    return %arg0, %c0_i32 : i32, i32
  }
}

module attributes {stable_mosaic.version = 11 : i64} {
  func.func @_mm_kernel(%arg0: i32, %arg1: memref<8x36xbf16, #tpu.memory_space<vmem>>, %arg2: memref<36x4xbf16, #tpu.memory_space<vmem>>, %arg3: memref<1x4xf32, #tpu.memory_space<vmem>>, %arg4: memref<8x4xf32, #tpu.memory_space<vmem>>) attributes {dimension_semantics = [#tpu.dimension_semantics<parallel>], iteration_bounds = array<i64: 1>, scalar_prefetch = 0 : i64, scratch_operands = 0 : i64, tpu.core_type = #tpu.core_type<tc>, window_params = [{transform_indices = @transform_0, window_bounds = array<i64: 8, 36>}, {pipeline_mode = #tpu.pipeline_mode<synchronous>, transform_indices = @transform_1, window_bounds = array<i64: 36, 4>}, {pipeline_mode = #tpu.pipeline_mode<synchronous>, transform_indices = @transform_2, window_bounds = array<i64: 1, 4>}, {transform_indices = @transform_3, window_bounds = array<i64: 8, 4>}]} {
    %c0 = arith.constant 0 : index
    %c0_0 = arith.constant 0 : index
    %0 = vector.load %arg1[%c0, %c0_0] : memref<8x36xbf16, #tpu.memory_space<vmem>>, vector<8x36xbf16>
    %c0_1 = arith.constant 0 : index
    %c0_2 = arith.constant 0 : index
    %1 = vector.load %arg2[%c0_1, %c0_2] : memref<36x4xbf16, #tpu.memory_space<vmem>>, vector<36x4xbf16>
    %cst = arith.constant dense<0.000000e+00> : vector<8x4xf32>
    %2 = tpu.matmul %0, %1, %cst {dimension_numbers = #tpu.dot_dimension_numbers<[1], [0], [0], [1], [0, 0, 1, 1], [], []>} : vector<8x36xbf16>, vector<36x4xbf16>, vector<8x4xf32> -> vector<8x4xf32>
    %c0_3 = arith.constant 0 : index
    %c0_4 = arith.constant 0 : index
    %3 = vector.load %arg3[%c0_3, %c0_4] : memref<1x4xf32, #tpu.memory_space<vmem>>, vector<1x4xf32>
    %4 = vector.broadcast %3 : vector<1x4xf32> to vector<8x4xf32>
    %5 = arith.addf %2, %4 : vector<8x4xf32>
    %c0_5 = arith.constant 0 : index
    %c0_6 = arith.constant 0 : index
    %6 = vector.load %arg4[%c0_5, %c0_6] : memref<8x4xf32, #tpu.memory_space<vmem>>, vector<8x4xf32>
    tpu.vector_store %arg4[%c0_5, %c0_6], %5 {strides = array<i32>} : memref<8x4xf32, #tpu.memory_space<vmem>>, vector<8x4xf32>,
    return
  }
  func.func @transform_0(%arg0: i32) -> (i32, i32) {
    %c0_i32 = arith.constant 0 : i32
    %c0_i32_0 = arith.constant 0 : i32
    return %arg0, %c0_i32 : i32, i32
  }
  func.func @transform_1(%arg0: i32) -> (i32, i32) {
    %c0_i32 = arith.constant 0 : i32
    %c0_i32_0 = arith.constant 0 : i32
    %c0_i32_1 = arith.constant 0 : i32
    return %c0_i32, %c0_i32_0 : i32, i32
  }
  func.func @transform_2(%arg0: i32) -> (i32, i32) {
    %c0_i32 = arith.constant 0 : i32
    %c0_i32_0 = arith.constant 0 : i32
    %c0_i32_1 = arith.constant 0 : i32
    return %c0_i32, %c0_i32_0 : i32, i32
  }
  func.func @transform_3(%arg0: i32) -> (i32, i32) {
    %c0_i32 = arith.constant 0 : i32
    %c0_i32_0 = arith.constant 0 : i32
    return %arg0, %c0_i32 : i32, i32
  }
}

module attributes {stable_mosaic.version = 11 : i64} {
  func.func @_final_kernel(%arg0: i32, %arg1: memref<256x16xf32, #tpu.memory_space<vmem>>, %arg2: memref<256x16xf32, #tpu.memory_space<vmem>>, %arg3: memref<256x4xf32, #tpu.memory_space<vmem>>, %arg4: memref<256x4xf32, #tpu.memory_space<vmem>>, %arg5: memref<4x4xbf16, #tpu.memory_space<vmem>>, %arg6: memref<1x4xf32, #tpu.memory_space<vmem>>, %arg7: memref<4x16xbf16, #tpu.memory_space<vmem>>, %arg8: memref<1x16xf32, #tpu.memory_space<vmem>>, %arg9: memref<256x16xf32, #tpu.memory_space<vmem>>) attributes {dimension_semantics = [#tpu.dimension_semantics<parallel>], iteration_bounds = array<i64: 2>, scalar_prefetch = 0 : i64, scratch_operands = 0 : i64, tpu.core_type = #tpu.core_type<tc>, window_params = [{transform_indices = @transform_0, window_bounds = array<i64: 256, 16>}, {transform_indices = @transform_1, window_bounds = array<i64: 256, 16>}, {transform_indices = @transform_2, window_bounds = array<i64: 256, 4>}, {transform_indices = @transform_3, window_bounds = array<i64: 256, 4>}, {pipeline_mode = #tpu.pipeline_mode<synchronous>, transform_indices = @transform_4, window_bounds = array<i64: 4, 4>}, {pipeline_mode = #tpu.pipeline_mode<synchronous>, transform_indices = @transform_5, window_bounds = array<i64: 1, 4>}, {pipeline_mode = #tpu.pipeline_mode<synchronous>, transform_indices = @transform_6, window_bounds = array<i64: 4, 16>}, {pipeline_mode = #tpu.pipeline_mode<synchronous>, transform_indices = @transform_7, window_bounds = array<i64: 1, 16>}, {transform_indices = @transform_8, window_bounds = array<i64: 256, 16>}]} {
    %c0 = arith.constant 0 : index
    %c0_0 = arith.constant 0 : index
    %0 = vector.load %arg3[%c0, %c0_0] : memref<256x4xf32, #tpu.memory_space<vmem>>, vector<256x4xf32>
    %1 = arith.truncf %0 : vector<256x4xf32> to vector<256x4xbf16>
    %c0_1 = arith.constant 0 : index
    %c0_2 = arith.constant 0 : index
    %2 = vector.load %arg5[%c0_1, %c0_2] : memref<4x4xbf16, #tpu.memory_space<vmem>>, vector<4x4xbf16>
    %cst = arith.constant dense<0.000000e+00> : vector<256x4xf32>
    %3 = tpu.matmul %1, %2, %cst {dimension_numbers = #tpu.dot_dimension_numbers<[1], [0], [0], [1], [0, 0, 1, 1], [], []>} : vector<256x4xbf16>, vector<4x4xbf16>, vector<256x4xf32> -> vector<256x4xf32>
    %c0_3 = arith.constant 0 : index
    %c0_4 = arith.constant 0 : index
    %4 = vector.load %arg6[%c0_3, %c0_4] : memref<1x4xf32, #tpu.memory_space<vmem>>, vector<1x4xf32>
    %5 = vector.broadcast %4 : vector<1x4xf32> to vector<256x4xf32>
    %6 = arith.addf %3, %5 : vector<256x4xf32>
    %c0_5 = arith.constant 0 : index
    %c0_6 = arith.constant 0 : index
    %7 = vector.load %arg4[%c0_5, %c0_6] : memref<256x4xf32, #tpu.memory_space<vmem>>, vector<256x4xf32>
    %8 = arith.addf %7, %6 : vector<256x4xf32>
    %9 = arith.truncf %8 : vector<256x4xf32> to vector<256x4xbf16>
    %c0_7 = arith.constant 0 : index
    %c0_8 = arith.constant 0 : index
    %10 = vector.load %arg7[%c0_7, %c0_8] : memref<4x16xbf16, #tpu.memory_space<vmem>>, vector<4x16xbf16>
    %cst_9 = arith.constant dense<0.000000e+00> : vector<256x16xf32>
    %11 = tpu.matmul %9, %10, %cst_9 {dimension_numbers = #tpu.dot_dimension_numbers<[1], [0], [0], [1], [0, 0, 1, 1], [], []>} : vector<256x4xbf16>, vector<4x16xbf16>, vector<256x16xf32> -> vector<256x16xf32>
    %c0_10 = arith.constant 0 : index
    %c0_11 = arith.constant 0 : index
    %12 = vector.load %arg8[%c0_10, %c0_11] : memref<1x16xf32, #tpu.memory_space<vmem>>, vector<1x16xf32>
    %13 = vector.broadcast %12 : vector<1x16xf32> to vector<256x16xf32>
    %14 = arith.addf %11, %13 : vector<256x16xf32>
    %c0_12 = arith.constant 0 : index
    %c0_13 = arith.constant 0 : index
    %15 = vector.load %arg1[%c0_12, %c0_13] : memref<256x16xf32, #tpu.memory_space<vmem>>, vector<256x16xf32>
    %c0_14 = arith.constant 0 : index
    %c0_15 = arith.constant 0 : index
    %16 = vector.load %arg2[%c0_14, %c0_15] : memref<256x16xf32, #tpu.memory_space<vmem>>, vector<256x16xf32>
    %17 = arith.negf %14 : vector<256x16xf32>
    %18 = math.exp %17 : vector<256x16xf32>
    %cst_16 = arith.constant 1.000000e+00 : f32
    %19 = vector.broadcast %cst_16 : f32 to vector<256x16xf32>
    %20 = arith.addf %19, %18 : vector<256x16xf32>
    %21 = arith.divf %19, %20 : vector<256x16xf32>
    %22 = arith.mulf %16, %21 : vector<256x16xf32>
    %23 = arith.addf %15, %22 : vector<256x16xf32>
    %c0_17 = arith.constant 0 : index
    %c0_18 = arith.constant 0 : index
    %24 = vector.load %arg9[%c0_17, %c0_18] : memref<256x16xf32, #tpu.memory_space<vmem>>, vector<256x16xf32>
    tpu.vector_store %arg9[%c0_17, %c0_18], %23 {strides = array<i32>} : memref<256x16xf32, #tpu.memory_space<vmem>>, vector<256x16xf32>,
    return
  }
  func.func @transform_0(%arg0: i32) -> (i32, i32) {
    %c0_i32 = arith.constant 0 : i32
    %c0_i32_0 = arith.constant 0 : i32
    return %arg0, %c0_i32 : i32, i32
  }
  func.func @transform_1(%arg0: i32) -> (i32, i32) {
    %c0_i32 = arith.constant 0 : i32
    %c0_i32_0 = arith.constant 0 : i32
    return %arg0, %c0_i32 : i32, i32
  }
  func.func @transform_2(%arg0: i32) -> (i32, i32) {
    %c0_i32 = arith.constant 0 : i32
    %c0_i32_0 = arith.constant 0 : i32
    return %arg0, %c0_i32 : i32, i32
  }
  func.func @transform_3(%arg0: i32) -> (i32, i32) {
    %c0_i32 = arith.constant 0 : i32
    %c0_i32_0 = arith.constant 0 : i32
    return %arg0, %c0_i32 : i32, i32
  }
  func.func @transform_4(%arg0: i32) -> (i32, i32) {
    %c0_i32 = arith.constant 0 : i32
    %c0_i32_0 = arith.constant 0 : i32
    %c0_i32_1 = arith.constant 0 : i32
    return %c0_i32, %c0_i32_0 : i32, i32
  }
  func.func @transform_5(%arg0: i32) -> (i32, i32) {
    %c0_i32 = arith.constant 0 : i32
    %c0_i32_0 = arith.constant 0 : i32
    %c0_i32_1 = arith.constant 0 : i32
    return %c0_i32, %c0_i32_0 : i32, i32
  }
  func.func @transform_6(%arg0: i32) -> (i32, i32) {
    %c0_i32 = arith.constant 0 : i32
    %c0_i32_0 = arith.constant 0 : i32
    %c0_i32_1 = arith.constant 0 : i32
    return %c0_i32, %c0_i32_0 : i32, i32
  }
  func.func @transform_7(%arg0: i32) -> (i32, i32) {
    %c0_i32 = arith.constant 0 : i32
    %c0_i32_0 = arith.constant 0 : i32
    %c0_i32_1 = arith.constant 0 : i32
    return %c0_i32, %c0_i32_0 : i32, i32
  }
  func.func @transform_8(%arg0: i32) -> (i32, i32) {
    %c0_i32 = arith.constant 0 : i32
    %c0_i32_0 = arith.constant 0 : i32
    return %arg0, %c0_i32 : i32, i32
  }
}

</mosaic_0001>

<bundles_post_ra>
// kernel: erfdb_forward.13
= control target key start
LH: loop header
LB: loop body
LE: loop exit
PB: predicated region body
PF: predicated region fallthrough
CT: control target
= control target key end

     0   :  { %v300_v0 = vmov 0.0   ;;  %vm301_vm0 = vmmov 0   ;;  %vm110_vm1 = vcmask 1041408   ;;  %vm88_vm2 = vcmask 293888   ;;  %s421_s1 = inlined_call_operand.vmem [shape: bf16[36,4], index: 1, kind: input, shape index: {}]   ;;  %s422_s0 = inlined_call_operand.vmem [shape: bf16[104,36], index: 0, kind: input, shape index: {}]   ;;  %s423_s2 = inlined_call_operand.vmem [shape: f32[1,4], index: 2, kind: input, shape index: {}]   ;;  %s424_s3 = inlined_call_operand.vmem [shape: f32[104,4], index: 3, kind: output, shape index: {}]  }
   0x1   :  { %248 = vmatprep.subr.bf16.mxu0 %v300_v0  ;;  %v290_v1 = vld [vmem:[%s421_s1] sm:$0xff]   ;;  %282 = vmatprep.subr.bf16.mxu1 %v300_v0  ;;  %v291_v2 = vld [vmem:[%s421_s1 + $0x8] sm:$0xff]   ;;  %v292_v3 = vld [vmem:[%s421_s1 + $0x10] ss:$0 sps:$4 sm:$0x33]   ;;  %vm202_vm3 = vcmask 31744  }
   0x2   :  { %254 = vmatprep.mubr.msk.bf16.mxu0 %vm301_vm0, %v300_v0  ;;  %270 = vmatprep.mubr.msk.bf16.mxu1 %vm301_vm0, %v300_v0  ;;  %v112_v4 = vsel %vm110_vm1, %v292_v3, 0  ;;  %v293_v5 = vld [vmem:[%s422_s0] sm:$0xff]   ;;  %v295_v7 = vld [vmem:[%s422_s0 + $0x8] sm:$0xff]   ;;  %v297_v9 = vld [vmem:[%s422_s0 + $0x10] sm:$0xff]  }
   0x3   :  { %249 = vmatpush3.bf16.msra.mxu0 %v290_v1  ;;  %285 = vmatpush3.bf16.msra.mxu1 %v290_v1  ;;  %v294_v6 = vld [vmem:[%s422_s0 + $0x20] sm:$0xff]   ;;  %v296_v8 = vld [vmem:[%s422_s0 + $0x28] sm:$0xff]   ;;  %v298_v10 = vld [vmem:[%s422_s0 + $0x30] ss:$0 sps:$4 sm:$0xff]  }
   0x4   :  { %250 = vmatprep.subr.bf16.mxu0 %v300_v0  ;;  %283 = vmatprep.subr.bf16.mxu1 %v300_v0  ;;  %v299_v11 = vld [vmem:[%s422_s0 + $0x18] sm:$0xff]   ;;  %v220_v12 = vld [vmem:[%s423_s2] ss:$0 sm:$0xff] }
   0x7   :  { %251 = vmatpush3.bf16.msra.mxu0 %v291_v2  ;;  %286 = vmatpush3.bf16.msra.mxu1 %v291_v2 }
   0x8   :  { %252 = vmatprep.subr.bf16.mxu0 %v300_v0  ;;  %284 = vmatprep.subr.bf16.mxu1 %v300_v0 }
   0xb   :  { %253 = vmatpush3.bf16.msra.mxu0 %v112_v4  ;;  %287 = vmatpush3.bf16.msra.mxu1 %v112_v4 }
   0xe   :  { %255 = vmatmul.mubr.msk.bf16.vlgmr.msra.gmra.mrb[0].mxu0 %vm88_vm2, %v293_v5  ;;  %271 = vmatmul.mubr.msk.bf16.vlgmr.msra.gmra.mrb[0].mxu1 %vm88_vm2, %v294_v6 }
   0xf   :  { %258 = vmatprep.mubr.msk.bf16.mxu0 %vm301_vm0, %v300_v0  ;;  %274 = vmatprep.mubr.msk.bf16.mxu1 %vm301_vm0, %v300_v0 }
  0x16   :  { %259 = vmatmul.mubr.msk.bf16.gmra.mrb[4].mxu0 %vm88_vm2, %v295_v7  ;;  %275 = vmatmul.mubr.msk.bf16.gmra.mrb[4].mxu1 %vm88_vm2, %v296_v8 }
  0x17   :  { %262 = vmatprep.mubr.msk.bf16.mxu0 %vm301_vm0, %v300_v0  ;;  %278 = vmatprep.mubr.msk.bf16.mxu1 %vm301_vm0, %v300_v0 }
  0x1e   :  { %263 = vmatmul.mubr.msk.bf16.gmra.mrb[8].mxu0 %vm88_vm2, %v297_v9  ;;  %279 = vmatmul.mubr.msk.bf16.gmra.mrb[8].mxu1 %vm88_vm2, %v298_v10 }
  0x1f   :  { %266 = vmatprep.mubr.msk.bf16.mxu0 %vm301_vm0, %v300_v0 }
  0x26   :  { %267 = vmatmul.mubr.msk.bf16.gmra.mrb[12].mxu0 %vm88_vm2, %v299_v11 }
  0xe1   :  { %v148_v13 = vpop.f32.mrb[0].mxu0  ;;  %v180_v14 = vpop.f32.mrb[0].mxu1 }
  0xe2   :  { %v149_v15 = vadd.f32 %v220_v12, %v148_v13  ;;  %v256_v16 = vpop.f32.mrb[1].mxu0  ;;  %v181_v17 = vadd.f32 %v220_v12, %v180_v14  ;;  %v272_v18 = vpop.f32.mrb[1].mxu1 }
  0xe3   :  { %v151_v19 = vpop.f32.mrb[2].mxu0  ;;  %v183_v20 = vpop.f32.mrb[2].mxu1 }
  0xe4   :  { %203 = vst.msk [vmem:[%s424_s3] sm:$0xff] %vm202_vm3, %v149_v15  ;;  %v152_v21 = vadd.f32 %v220_v12, %v151_v19  ;;  %v257_v22 = vpop.f32.mrb[3].mxu0  ;;  %211 = vst.msk [vmem:[%s424_s3 + $0x40] sm:$0xff] %vm202_vm3, %v181_v17  ;;  %v184_v23 = vadd.f32 %v220_v12, %v183_v20  ;;  %v273_v24 = vpop.f32.mrb[3].mxu1 }
  0xe6   :  { %204 = vst.msk [vmem:[%s424_s3 + $0x8] sm:$0xff] %vm202_vm3, %v152_v21  ;;  %212 = vst.msk [vmem:[%s424_s3 + $0x48] sm:$0xff] %vm202_vm3, %v184_v23 }
  0xe9   :  { %v156_v25 = vpop.f32.mrb[4].mxu0  ;;  %v188_v26 = vpop.f32.mrb[4].mxu1 }
  0xea   :  { %v157_v27 = vadd.f32 %v220_v12, %v156_v25  ;;  %v260_v28 = vpop.f32.mrb[5].mxu0  ;;  %v189_v29 = vadd.f32 %v220_v12, %v188_v26  ;;  %v276_v30 = vpop.f32.mrb[5].mxu1 }
  0xeb   :  { %v159_v31 = vpop.f32.mrb[6].mxu0  ;;  %v191_v32 = vpop.f32.mrb[6].mxu1 }
  0xec   :  { %205 = vst.msk [vmem:[%s424_s3 + $0x10] sm:$0xff] %vm202_vm3, %v157_v27  ;;  %v160_v33 = vadd.f32 %v220_v12, %v159_v31  ;;  %v261_v34 = vpop.f32.mrb[7].mxu0  ;;  %213 = vst.msk [vmem:[%s424_s3 + $0x50] sm:$0xff] %vm202_vm3, %v189_v29  ;;  %v192_v35 = vadd.f32 %v220_v12, %v191_v32  ;;  %v277_v36 = vpop.f32.mrb[7].mxu1 }
  0xee   :  { %206 = vst.msk [vmem:[%s424_s3 + $0x18] sm:$0xff] %vm202_vm3, %v160_v33  ;;  %214 = vst.msk [vmem:[%s424_s3 + $0x58] sm:$0xff] %vm202_vm3, %v192_v35 }
  0xf1   :  { %v164_v37 = vpop.f32.mrb[8].mxu0  ;;  %v196_v38 = vpop.f32.mrb[8].mxu1 }
  0xf2   :  { %v165_v39 = vadd.f32 %v220_v12, %v164_v37  ;;  %v264_v40 = vpop.f32.mrb[9].mxu0  ;;  %v197_v41 = vadd.f32 %v220_v12, %v196_v38  ;;  %v280_v42 = vpop.f32.mrb[9].mxu1 }
  0xf3   :  { %v167_v43 = vpop.f32.mrb[10].mxu0  ;;  %v199_v44 = vpop.f32.mrb[10].mxu1 }
  0xf4   :  { %207 = vst.msk [vmem:[%s424_s3 + $0x20] sm:$0xff] %vm202_vm3, %v165_v39  ;;  %v168_v45 = vadd.f32 %v220_v12, %v167_v43  ;;  %v265_v46 = vpop.f32.mrb[11].mxu0  ;;  %215 = vst.msk [vmem:[%s424_s3 + $0x60] sm:$0xff] %vm202_vm3, %v197_v41  ;;  %v281_v47 = vpop.f32.mrb[11].mxu1 }
  0xf6   :  { %208 = vst.msk [vmem:[%s424_s3 + $0x28] sm:$0xff] %vm202_vm3, %v168_v45 }
  0xf9   :  { %v172_v48 = vpop.f32.mrb[12].mxu0 }
  0xfa   :  { %v173_v49 = vadd.f32 %v220_v12, %v172_v48  ;;  %v268_v50 = vpop.f32.mrb[13].mxu0 }
  0xfb   :  { %v175_v51 = vpop.f32.mrb[14].mxu0 }
  0xfc   :  { %209 = vst.msk [vmem:[%s424_s3 + $0x30] sm:$0xff] %vm202_vm3, %v173_v49  ;;  %v176_v52 = vadd.f32 %v220_v12, %v175_v51  ;;  %v269_v53 = vpop.f32.mrb[15].mxu0 }
  0xfe   :  { %210 = vst.msk [vmem:[%s424_s3 + $0x38] sm:$0xff] %vm202_vm3, %v176_v52 }

// kernel: erfdb_forward.12
= control target key start
LH: loop header
LB: loop body
LE: loop exit
PB: predicated region body
PF: predicated region fallthrough
CT: control target
= control target key end

     0   :  { %s8908_s17 = smov 0   ;;  %s11433_s0 = inlined_call_operand.vmem [shape: bf16[2,18,18,16], index: 0, kind: input, shape index: {}]   ;;  %s11434_s1 = inlined_call_operand.vmem [shape: bf16[512,8], index: 1, kind: input, shape index: {}]   ;;  %s11435_s2 = inlined_call_operand.vmem [shape: bf16[512,8], index: 2, kind: input, shape index: {}]   ;;  %s11436_s3 = inlined_call_operand.vmem [shape: bf16[512,8], index: 3, kind: input, shape index: {}]   ;;  %s11437_s4 = inlined_call_operand.vmem [shape: bf16[144,8], index: 4, kind: input, shape index: {}]   ;;  %s11438_s5 = inlined_call_operand.vmem [shape: f32[1,8], index: 5, kind: input, shape index: {}]   ;;  %s11439_s6 = inlined_call_operand.vmem [shape: bf16[32,16], index: 6, kind: input, shape index: {}]   ;;  %s11440_s7 = inlined_call_operand.vmem [shape: f32[1,16], index: 7, kind: input, shape index: {}]   ;;  %s11441_s8 = inlined_call_operand.vmem [shape: bf16[16,4], index: 8, kind: input, shape index: {}]   ;;  %s11442_s9 = inlined_call_operand.vmem [shape: f32[1,4], index: 9, kind: input, shape index: {}]   ;;  %s11443_s10 = inlined_call_operand.vmem [shape: f32[512,16], index: 10, kind: output, shape index: {0}]   ;;  %s11444_s11 = inlined_call_operand.vmem [shape: f32[512,4], index: 11, kind: output, shape index: {1}]  }
   0x1 LB: > { %s8914_s18 = sadd.s32 4294967295, %s8846_s17   ;;  %p6934_p0 = scmp.ge.s32.totalorder %s8846_s17, 1  ;;  %s8846_s17 = sphi %s8908_s17, %s22_s17  }
   0x2   : > { %p373_p1 = scmp.lt.s32.totalorder %s8846_s17, 3 }
   0x4   : > { %p374_p2 = pnand %p6934_p0, %p373_p1 }
   0x6   : > { %377 = sbr.rel (%p374_p2) target bundleno = 1132 (0x46c), region = 60 }
   0xd   : > { %v8696_v0 = vld [vmem:[%s11437_s4 + $0x10] sm:$0xff]   ;;  %p433_p3 = scmp.lt.s32.totalorder %s8914_s18, 1  ;;  %vm1515_vm0 = vcmask 1042432   ;;  %vm1516_vm1 = vcmask 1046532   ;;  %v8697_v1 = vld [vmem:[%s11437_s4 + $0x18] sm:$0xff]   ;;  %vm962_vm3 = vcmask 130048  }
   0xe   : > { %7923 = vmatprep.subr.bf16.mxu0 %v8696_v0  ;;  %vm8926_vm2 = vmor %vm1515_vm0, %vm1516_vm1  ;;  %v8955_v28 = vld [vmem:[%s11437_s4 + $0x20] sm:$0xff]   ;;  %vm519_vm4 = vsmask.f32 3328  ;;  %vm520_vm5 = vsmask.f32 7440  ;;  %vm5385_vm7 = vcmask 1043456  }
   0xf   : > { %s434_s23 = scalar_select %p433_p3, %s8914_s18, 1  ;;  %7924 = vmatpush3.bf16.msra.mxu0 %v8696_v0  ;;  %vm9119_vm6 = vmor %vm519_vm4, %vm520_vm5  ;;  %vm5336_vm8 = vcmask 64512  }
  0x10   : > { %7957 = vmatprep.subr.bf16.mxu0 %v8697_v1  ;;  %s6936_s28 = sshll.u32 %s8914_s18, 5 }
  0x11   : > { %s8687_s24 = smul.u32 216, %s434_s23  ;;  %p439_p4 = scmp.lt.s32.totalorder %s6936_s28, 63 }
  0x13   : > { %s8933_s27 = scalar_lea.vmem %s11433_s0, %s8687_s24  ;;  %s11693_s28 = smov (!%p439_p4, %s6936_s28), 63 }
  0x14   : > { %v470_v3 = vld [vmem:[%s8933_s27 + $0x4] sm:$0xf]  ;;  %v503_v4 = vld [vmem:[%s8933_s27 + $0x8] sm:$0x1]  ;;  %v1467_v5 = vld [vmem:[%s8933_s27] sm:$0xe] }
  0x15   : > { %v7012_v6 = vrot.slane %v1467_v5, 9  ;;  %v1520_v7 = vrot.slane %v470_v3, 5  ;;  %v1523_v8 = vrot.slane %v503_v4, 5  ;;  %v472_v9 = vld [vmem:[%s8933_s27 + $0x10] sm:$0xf]  ;;  %s10418_s18 = sshll.u32 %s11693_s28, 2 }
  0x16   : > { %v504_v10 = vld [vmem:[%s8933_s27 + $0x14] sm:$0x1]  ;;  %v1468_v11 = vld [vmem:[%s8933_s27 + $0xc] sm:$0xe]  ;;  %v1527_v12 = vrot.slane %v472_v9, 5  ;;  %s10433_s12 = scalar_lea.vmem %s11435_s2, %s10418_s18  ;;  %s10698_s19 = scalar_lea.vmem %s11434_s1, %s10418_s18 }
  0x17   : > { %v1521_v13 = vsel %vm8926_vm2, %v7012_v6, %v1520_v7  ;;  %v1522_v14 = vrot.slane %v1520_v7, 4  ;;  %v7013_v15 = vrot.slane %v1468_v11, 9  ;;  %v1530_v16 = vrot.slane %v504_v10, 5  ;;  %v474_v17 = vld [vmem:[%s8933_s27 + $0x1c] sm:$0xf]  ;;  %s10842_s24 = scalar_lea.vmem %s11436_s3, %s10418_s18 }
  0x18   : > { %v1529_v18 = vrot.slane %v1527_v12, 4  ;;  %v505_v19 = vld [vmem:[%s8933_s27 + $0x20] sm:$0x1]  ;;  %v1469_v20 = vld [vmem:[%s8933_s27 + $0x18] sm:$0xe]  ;;  %v1534_v21 = vrot.slane %v474_v17, 5 }
  0x19   : > { %v1524_v22 = vsel %vm8926_vm2, %v1522_v14, %v1523_v8  ;;  %v1528_v23 = vsel %vm8926_vm2, %v7013_v15, %v1527_v12  ;;  %v7014_v24 = vrot.slane %v1469_v20, 9  ;;  %v1537_v25 = vrot.slane %v505_v19, 5  ;;  %v476_v26 = vld [vmem:[%s8933_s27 + $0x28] sm:$0xf]  ;;  %v506_v27 = vld [vmem:[%s8933_s27 + $0x2c] sm:$0x1] }
  0x1a   : > { %v7028_v29 = vcombine.low %v1521_v13, %v1524_v22  ;;  %v1531_v30 = vsel %vm8926_vm2, %v1529_v18, %v1530_v16  ;;  %v1536_v31 = vrot.slane %v1534_v21, 4  ;;  %v1470_v32 = vld [vmem:[%s8933_s27 + $0x24] sm:$0xe]  ;;  %v1541_v33 = vrot.slane %v476_v26, 5  ;;  %v478_v34 = vld [vmem:[%s8933_s27 + $0x34] sm:$0xf] }
  0x1b   : > { %v7029_v35 = vcombine.low %v1528_v23, %v1531_v30  ;;  %v1535_v36 = vsel %vm8926_vm2, %v7014_v24, %v1534_v21  ;;  %v7015_v37 = vrot.slane %v1470_v32, 9  ;;  %v1544_v38 = vrot.slane %v506_v27, 5  ;;  %v507_v39 = vld [vmem:[%s8933_s27 + $0x38] sm:$0x1]  ;;  %v1471_v40 = vld [vmem:[%s8933_s27 + $0x30] sm:$0xe] }
  0x1c   : > { %7925 = vmatprep.mubr.msk.bf16.mxu0 %vm962_vm3, %v7028_v29  ;;  %v1538_v41 = vsel %vm8926_vm2, %v1536_v31, %v1537_v25  ;;  %v1543_v42 = vrot.slane %v1541_v33, 4  ;;  %v7016_v43 = vrot.slane %v1471_v40, 9  ;;  %v1548_v44 = vrot.slane %v478_v34, 5  ;;  %v480_v45 = vld [vmem:[%s8933_s27 + $0x40] sm:$0xf]  ;;  %v8780_v2 = vld [vmem:[%s10698_s19 + $0x58] sm:$0xff]  }
  0x1d   : > { %7926 = vmatmul.mubr.msk.bf16.vlgmr.msra.gmra.mrb[0].mxu0 %vm962_vm3, %v7029_v35  ;;  %v7030_v46 = vcombine.low %v1535_v36, %v1538_v41  ;;  %v1551_v47 = vrot.slane %v507_v39, 5  ;;  %v508_v48 = vld [vmem:[%s8933_s27 + $0x44] sm:$0x1]  ;;  %v1555_v49 = vrot.slane %v480_v45, 5  ;;  %v1542_v50 = vsel %vm8926_vm2, %v7015_v37, %v1541_v33  ;;  %v1472_v53 = vld [vmem:[%s8933_s27 + $0x3c] sm:$0xe] }
  0x1e   : > { %7958 = vmatpush3.bf16.msra.mxu0 %v8697_v1  ;;  %v1545_v51 = vsel %vm8926_vm2, %v1543_v42, %v1544_v38  ;;  %v1550_v52 = vrot.slane %v1548_v44, 4  ;;  %v482_v54 = vld [vmem:[%s8933_s27 + $0x4c] sm:$0xf]  ;;  %v1549_v55 = vsel %vm8926_vm2, %v7016_v43, %v1548_v44  ;;  %v509_v56 = vld [vmem:[%s8933_s27 + $0x50] sm:$0x1]  ;;  %v7017_v62 = vrot.slane %v1472_v53, 9 }
  0x1f   : > { %7929 = vmatprep.mubr.msk.bf16.mxu0 %vm962_vm3, %v7030_v46  ;;  %v1473_v57 = vld [vmem:[%s8933_s27 + $0x48] sm:$0xe]  ;;  %v1562_v58 = vrot.slane %v482_v54, 5  ;;  %7991 = vmatprep.subr.bf16.mxu0 %v8955_v28  ;;  %v484_v60 = vld [vmem:[%s8933_s27 + $0x58] sm:$0xf]  ;;  %v7031_v61 = vcombine.low %v1542_v50, %v1545_v51  ;;  %v1557_v63 = vrot.slane %v1555_v49, 4 }
  0x20   : > { %v1552_v59 = vsel %vm8926_vm2, %v1550_v52, %v1551_v47  ;;  %v1558_v1 = vrot.slane %v508_v48, 5  ;;  %v7018_v3 = vrot.slane %v1473_v57, 9  ;;  %v1565_v4 = vrot.slane %v509_v56, 5  ;;  %v486_v5 = vld [vmem:[%s8933_s27 + $0x64] sm:$0xf] }
  0x21   : > { %v7032_v0 = vcombine.low %v1549_v55, %v1552_v59  ;;  %v1564_v6 = vrot.slane %v1562_v58, 4  ;;  %v510_v7 = vld [vmem:[%s8933_s27 + $0x5c] sm:$0x1]  ;;  %v1474_v8 = vld [vmem:[%s8933_s27 + $0x54] sm:$0xe]  ;;  %v1569_v9 = vrot.slane %v484_v60, 5  ;;  %v1556_v12 = vsel %vm8926_vm2, %v7017_v62, %v1555_v49 }
  0x22   : > { %v511_v10 = vld [vmem:[%s8933_s27 + $0x68] sm:$0x1]  ;;  %v1475_v11 = vld [vmem:[%s8933_s27 + $0x60] sm:$0xe]  ;;  %v1576_v13 = vrot.slane %v486_v5, 5  ;;  %v1559_v14 = vsel %vm8926_vm2, %v1557_v63, %v1558_v1  ;;  %v1563_v15 = vsel %vm8926_vm2, %v7018_v3, %v1562_v58  ;;  %v7019_v16 = vrot.slane %v1474_v8, 9 }
  0x23   : > { %v1572_v17 = vrot.slane %v510_v7, 5  ;;  %v488_v18 = vld [vmem:[%s8933_s27 + $0x70] sm:$0xf]  ;;  %v1566_v19 = vsel %vm8926_vm2, %v1564_v6, %v1565_v4  ;;  %v1571_v20 = vrot.slane %v1569_v9, 4  ;;  %v7020_v21 = vrot.slane %v1475_v11, 9 }
  0x24   : > { %v1579_v22 = vrot.slane %v511_v10, 5  ;;  %v490_v23 = vld [vmem:[%s8933_s27 + $0x7c] sm:$0xf]  ;;  %v512_v24 = vld [vmem:[%s8933_s27 + $0x74] sm:$0x1]  ;;  %v7033_v27 = vcombine.low %v1556_v12, %v1559_v14  ;;  %v1578_v29 = vrot.slane %v1576_v13, 4  ;;  %v7034_v33 = vcombine.low %v1563_v15, %v1566_v19 }
  0x25   : > { %7930 = vmatmul.mubr.msk.bf16.gmra.mrb[4].mxu0 %vm962_vm3, %v7031_v61  ;;  %v1476_v25 = vld [vmem:[%s8933_s27 + $0x6c] sm:$0xe]  ;;  %v492_v26 = vld [vmem:[%s8933_s27 + $0x88] sm:$0xf]  ;;  %v1583_v30 = vrot.slane %v488_v18, 5  ;;  %v1590_v35 = vrot.slane %v490_v23, 5  ;;  %v1570_v37 = vsel %vm8926_vm2, %v7019_v16, %v1569_v9  ;;  %v1573_v41 = vsel %vm8926_vm2, %v1571_v20, %v1572_v17 }
  0x26   : > { %7933 = vmatprep.mubr.msk.bf16.mxu0 %vm962_vm3, %v7032_v0  ;;  %v513_v31 = vld [vmem:[%s8933_s27 + $0x80] sm:$0x1]  ;;  %v494_v32 = vld [vmem:[%s8933_s27 + $0x94] sm:$0xf]  ;;  %v1477_v34 = vld [vmem:[%s8933_s27 + $0x78] sm:$0xe]  ;;  %v1577_v42 = vsel %vm8926_vm2, %v7020_v21, %v1576_v13  ;;  %v1580_v47 = vsel %vm8926_vm2, %v1578_v29, %v1579_v22  ;;  %v7035_v63 = vcombine.low %v1570_v37, %v1573_v41 }
  0x27   : > { %v9010_v36 = vld [vmem:[%s8933_s27 + $0xa0] sm:$0xf]  ;;  %v514_v38 = vld [vmem:[%s8933_s27 + $0x8c] sm:$0x1]  ;;  %v1478_v39 = vld [vmem:[%s8933_s27 + $0x84] sm:$0xe]  ;;  %v7036_v3 = vcombine.low %v1577_v42, %v1580_v47 }
  0x28   : > { %v1597_v40 = vrot.slane %v492_v26, 5  ;;  %v7021_v43 = vrot.slane %v1476_v25, 9  ;;  %v515_v44 = vld [vmem:[%s8933_s27 + $0x98] sm:$0x1]  ;;  %v1479_v45 = vld [vmem:[%s8933_s27 + $0x90] sm:$0xe] }
  0x29   : > { %v1604_v46 = vrot.slane %v494_v32, 5  ;;  %v1585_v48 = vrot.slane %v1583_v30, 4  ;;  %v1586_v49 = vrot.slane %v512_v24, 5  ;;  %v1480_v50 = vld [vmem:[%s8933_s27 + $0x9c] sm:$0xe]  ;;  %v1611_v51 = vrot.slane %v9010_v36, 5 }
  0x2a   : > { %v7022_v52 = vrot.slane %v1477_v34, 9  ;;  %v1592_v53 = vrot.slane %v1590_v35, 4  ;;  %v1593_v54 = vrot.slane %v513_v31, 5  ;;  %v7023_v55 = vrot.slane %v1478_v39, 9  ;;  %v498_v56 = vld [vmem:[%s8933_s27 + $0xac] sm:$0xf] }
  0x2b   : > { %v1599_v57 = vrot.slane %v1597_v40, 4  ;;  %v1600_v58 = vrot.slane %v514_v38, 5  ;;  %v7024_v59 = vrot.slane %v1479_v45, 9  ;;  %v1607_v60 = vrot.slane %v515_v44, 5  ;;  %v516_v4 = vld [vmem:[%s8933_s27 + $0xa4] sm:$0x1] }
  0x2c   : > { %v1606_v61 = vrot.slane %v1604_v46, 4  ;;  %v7025_v62 = vrot.slane %v1480_v50, 9  ;;  %v1613_v0 = vrot.slane %v1611_v51, 4  ;;  %v1618_v1 = vrot.slane %v498_v56, 5  ;;  %v500_v5 = vld [vmem:[%s8933_s27 + $0xb8] sm:$0xf] }
  0x2d   : > { %7934 = vmatmul.mubr.msk.bf16.gmra.mrb[8].mxu0 %vm962_vm3, %v7033_v27  ;;  %v517_v6 = vld [vmem:[%s8933_s27 + $0xb0] sm:$0x1]  ;;  %v1481_v7 = vld [vmem:[%s8933_s27 + $0xa8] sm:$0xe]  ;;  %v1584_v8 = vsel %vm8926_vm2, %v7021_v43, %v1583_v30  ;;  %v1587_v9 = vsel %vm8926_vm2, %v1585_v48, %v1586_v49  ;;  %v1591_v10 = vsel %vm8926_vm2, %v7022_v52, %v1590_v35  ;;  %v1594_v11 = vsel %vm8926_vm2, %v1592_v53, %v1593_v54  ;;  %v1482_v12 = vld [vmem:[%s8933_s27 + $0xb4] sm:$0xe] }
  0x2e   : > { %7937 = vmatprep.mubr.msk.bf16.mxu0 %vm962_vm3, %v7034_v33  ;;  %v1614_v13 = vrot.slane %v516_v4, 5  ;;  %v1625_v14 = vrot.slane %v500_v5, 5  ;;  %v7037_v15 = vcombine.low %v1584_v8, %v1587_v9  ;;  %v7038_v16 = vcombine.low %v1591_v10, %v1594_v11  ;;  %v518_v17 = vld [vmem:[%s8933_s27 + $0xbc] sm:$0x1]  ;;  %v7126_v31 = vld [vmem:[%s8933_s27 + $0xc] sm:$0xf] }
  0x2f   : > { %v1598_v18 = vsel %vm8926_vm2, %v7023_v55, %v1597_v40  ;;  %v1601_v19 = vsel %vm8926_vm2, %v1599_v57, %v1600_v58  ;;  %v7026_v20 = vrot.slane %v1481_v7, 9  ;;  %v1621_v21 = vrot.slane %v517_v6, 5  ;;  %v9065_v34 = vld [vmem:[%s8933_s27 + $0x10] sm:$0xf]  ;;  %v9068_v35 = vld [vmem:[%s8933_s27 + $0x14] sm:$0x1] }
  0x30   : > { %v1605_v22 = vsel %vm8926_vm2, %v7024_v59, %v1604_v46  ;;  %v1608_v23 = vsel %vm8926_vm2, %v1606_v61, %v1607_v60  ;;  %v1620_v24 = vrot.slane %v1618_v1, 4  ;;  %v7027_v25 = vrot.slane %v1482_v12, 9  ;;  %v7129_v42 = vld [vmem:[%s8933_s27 + $0x18] sm:$0xf]  ;;  %v9090_v47 = vld [vmem:[%s8933_s27 + $0x1c] sm:$0xf] }
  0x31   : > { %v1627_v26 = vrot.slane %v1625_v14, 4  ;;  %v1628_v27 = vrot.slane %v518_v17, 5  ;;  %v7039_v29 = vcombine.low %v1598_v18, %v1601_v19  ;;  %v9056_v30 = vsel %vm8926_vm2, %v7025_v62, %v1611_v51  ;;  %v7132_v52 = vld [vmem:[%s8933_s27 + $0x24] sm:$0xf]  ;;  %v9097_v54 = vld [vmem:[%s8933_s27 + $0x20] sm:$0x1] }
  0x32   : > { %v7040_v32 = vcombine.low %v1605_v22, %v1608_v23  ;;  %v9062_v33 = vsel %vm8926_vm2, %v1613_v0, %v1614_v13  ;;  %v2338_v36 = vshrl.u32 %v7126_v31, 16  ;;  %v2341_v37 = vshll.u32 %v7126_v31, 16  ;;  %v9103_v60 = vld [vmem:[%s8933_s27 + $0x28] sm:$0xf]  ;;  %v9113_v8 = vld [vmem:[%s8933_s27 + $0x2c] sm:$0x1] }
  0x33   : > { %v9072_v38 = vsel %vm8926_vm2, %v7026_v20, %v1618_v1  ;;  %v9076_v39 = vsel %vm8926_vm2, %v1620_v24, %v1621_v21  ;;  %v2347_v40 = vshll.u32 %v9065_v34, 16  ;;  %v2351_v41 = vshrl.u32 %v9065_v34, 16  ;;  %v7135_v10 = vld [vmem:[%s8933_s27 + $0x30] sm:$0xf] }
  0x34   : > { %v9083_v43 = vsel %vm8926_vm2, %v7027_v25, %v1625_v14  ;;  %v9087_v44 = vsel %vm8926_vm2, %v1627_v26, %v1628_v27  ;;  %v2340_v45 = vrot.slane %v2338_v36, 4  ;;  %v2343_v46 = vrot.slane %v2341_v37, 5  ;;  %v9144_v36 = vld [vmem:[%s8933_s27 + $0x38] sm:$0x1] }
  0x35   : > { %7938 = vmatmul.mubr.msk.bf16.gmra.mrb[12].mxu0 %vm962_vm3, %v7035_v63  ;;  %v9092_v48 = vrot.slane %v2347_v40, 5  ;;  %v2353_v49 = vrot.slane %v2351_v41, 4  ;;  %v2357_v50 = vshll.u32 %v9068_v35, 16  ;;  %v2362_v51 = vshrl.u32 %v7129_v42, 16 }
  0x36   : > { %7941 = vmatprep.mubr.msk.bf16.mxu0 %vm962_vm3, %v7036_v3  ;;  %v2344_v53 = vor.u32 %v2343_v46, %v2340_v45  ;;  %v2365_v55 = vshll.u32 %v7129_v42, 16  ;;  %v2371_v56 = vshll.u32 %v9090_v47, 16  ;;  %v2375_v57 = vshrl.u32 %v9090_v47, 16 }
  0x37   : > { %v2354_v58 = vor.u32 %v2353_v49, %v9092_v48  ;;  %v2364_v59 = vrot.slane %v2362_v51, 4  ;;  %v2386_v61 = vshrl.u32 %v7132_v52, 16  ;;  %v2359_v1 = vrot.slane %v2357_v50, 5 }
  0x38   : > { %v2367_v62 = vrot.slane %v2365_v55, 5  ;;  %v9105_v63 = vrot.slane %v2371_v56, 5  ;;  %v2377_v0 = vrot.slane %v2375_v57, 4  ;;  %v2381_v3 = vshll.u32 %v9097_v54, 16  ;;  %v7141_v55 = vld [vmem:[%s8933_s27 + $0x48] sm:$0xf] }
  0x39   : > { %v2388_v4 = vrot.slane %v2386_v61, 4  ;;  %v2389_v5 = vshll.u32 %v7132_v52, 16  ;;  %v7041_v6 = vcombine.low %v9056_v30, %v9062_v33  ;;  %v2345_v7 = vrot.slane %v2344_v53, 4  ;;  %v7138_v30 = vld [vmem:[%s8933_s27 + $0x3c] sm:$0xf] }
  0x3a   : > { %v2395_v9 = vshll.u32 %v9103_v60, 16  ;;  %v2355_v12 = vrot.slane %v2354_v58, 4  ;;  %v2368_v13 = vor.u32 %v2367_v62, %v2364_v59  ;;  %v7042_v17 = vcombine.low %v9072_v38, %v9076_v39  ;;  %v9147_v38 = vld [vmem:[%s8933_s27 + $0x40] sm:$0xf]  ;;  %v9159_v61 = vld [vmem:[%s8933_s27 + $0x4c] sm:$0xf] }
  0x3b   : > { %v2391_v14 = vrot.slane %v2389_v5, 5  ;;  %v7043_v18 = vcombine.low %v9083_v43, %v9087_v44  ;;  %v2378_v19 = vor.u32 %v2377_v0, %v9105_v63  ;;  %v2405_v23 = vshll.u32 %v9113_v8, 16 }
  0x3c   : > { %v9132_v20 = vrot.slane %v2395_v9, 5  ;;  %v2410_v24 = vshrl.u32 %v7135_v10, 16  ;;  %v2350_v25 = vsel %vm9119_vm6, %v2345_v7, %v9092_v48  ;;  %v2383_v26 = vrot.slane %v2381_v3, 5 }
  0x3d   : > { %7942 = vmatmul.mubr.msk.bf16.gmra.mrb[16].mxu0 %vm962_vm3, %v7037_v15  ;;  %v2399_v15 = vshrl.u32 %v9103_v60, 16  ;;  %v2392_v21 = vor.u32 %v2391_v14, %v2388_v4  ;;  %v2413_v27 = vshll.u32 %v7135_v10, 16  ;;  %v2360_v31 = vsel %vm9119_vm6, %v2355_v12, %v2359_v1  ;;  %v9170_v4 = vld [vmem:[%s8933_s27 + $0x44] sm:$0x1]  ;;  %v8698_v10 = vld [vmem:[%s8933_s27 + $0xc] sm:$0xff]  }
  0x3e   : > { %7945 = vmatprep.mubr.msk.bf16.mxu0 %vm962_vm3, %v7038_v16  ;;  %v9125_v16 = vld [vmem:[%s8933_s27 + $0x34] sm:$0xf]  ;;  %v2412_v37 = vrot.slane %v2410_v24, 4  ;;  %v2379_v39 = vrot.slane %v2378_v19, 4  ;;  %v2407_v46 = vrot.slane %v2405_v23, 5  ;;  %v2434_v48 = vshrl.u32 %v7138_v30, 16 }
  0x3f   : > { %v2401_v22 = vrot.slane %v2399_v15, 4  ;;  %v2415_v40 = vrot.slane %v2413_v27, 5  ;;  %v2423_v42 = vshrl.u32 %v9125_v16, 16  ;;  %v2393_v45 = vrot.slane %v2392_v21, 4  ;;  %v9190_v27 = vld [vmem:[%s8933_s27 + $0x58] sm:$0xf] }
  0x40   : > { %v2437_v49 = vshll.u32 %v7138_v30, 16  ;;  %v2429_v52 = vshll.u32 %v9144_v36, 16  ;;  %v2443_v53 = vshll.u32 %v9147_v38, 16  ;;  %v2436_v57 = vrot.slane %v2434_v48, 4 }
  0x41   : > { %v2402_v33 = vor.u32 %v2401_v22, %v9132_v20  ;;  %v2425_v51 = vrot.slane %v2423_v42, 4  ;;  %v2416_v56 = vor.u32 %v2415_v40, %v2412_v37  ;;  %v2447_v59 = vshrl.u32 %v9147_v38, 16  ;;  %v7144_v22 = vld [vmem:[%s8933_s27 + $0x54] sm:$0xf] }
  0x42   : > { %v2439_v58 = vrot.slane %v2437_v49, 5  ;;  %v9161_v62 = vcombine.low %v2350_v25, %v2360_v31  ;;  %v2384_v1 = vsel %vm9119_vm6, %v2379_v39, %v2383_v26  ;;  %v2398_v5 = vsel %vm9119_vm6, %v2393_v45, %v9132_v20  ;;  %v7147_v45 = vld [vmem:[%s8933_s27 + $0x60] sm:$0xf] }
  0x43   : > { %v2403_v50 = vrot.slane %v2402_v33, 4  ;;  %v2449_v7 = vrot.slane %v2447_v59, 4  ;;  %v2458_v9 = vshrl.u32 %v7141_v55, 16  ;;  %v2431_v12 = vrot.slane %v2429_v52, 5  ;;  %v9220_v52 = vld [vmem:[%s8933_s27 + $0x64] sm:$0xf] }
  0x44   : > { %v2461_v14 = vshll.u32 %v7141_v55, 16  ;;  %v2467_v15 = vshll.u32 %v9159_v61, 16  ;;  %v2440_v19 = vor.u32 %v2439_v58, %v2436_v57  ;;  %v2453_v21 = vshll.u32 %v9170_v4, 16 }
  0x45   : > { %7946 = vmatmul.mubr.msk.bf16.gmra.mrb[20].mxu0 %vm962_vm3, %v7039_v29  ;;  %v2419_v29 = vshll.u32 %v9125_v16, 16  ;;  %v2460_v20 = vrot.slane %v2458_v9, 4  ;;  %v2471_v26 = vshrl.u32 %v9159_v61, 16  ;;  %v2482_v39 = vshrl.u32 %v7144_v22, 16 }
  0x46   : > { %7949 = vmatprep.mubr.msk.bf16.mxu0 %vm962_vm3, %v7040_v32  ;;  %v2369_v32 = vrot.slane %v2368_v13, 4  ;;  %v9181_v13 = vld [vmem:[%s8933_s27 + $0x50] sm:$0x1]  ;;  %v2463_v24 = vrot.slane %v2461_v14, 5  ;;  %v9186_v25 = vrot.slane %v2467_v15, 5  ;;  %v2485_v43 = vshll.u32 %v7144_v22, 16 }
  0x47   : > { %v9149_v41 = vrot.slane %v2419_v29, 5  ;;  %v2473_v37 = vrot.slane %v2471_v26, 4  ;;  %v2491_v40 = vshll.u32 %v9190_v27, 16  ;;  %v2495_v42 = vshrl.u32 %v9190_v27, 16  ;;  %v7150_v14 = vld [vmem:[%s8933_s27 + $0x6c] sm:$0xf] }
  0x48   : > { %v2374_v0 = vsel %vm9119_vm6, %v2369_v32, %v9105_v63  ;;  %v2408_v63 = vsel %vm9119_vm6, %v2403_v50, %v2407_v46  ;;  %v2477_v32 = vshll.u32 %v9181_v13, 16  ;;  %v2464_v33 = vor.u32 %v2463_v24, %v2460_v20  ;;  %v9217_v50 = vld [vmem:[%s8933_s27 + $0x5c] sm:$0x1]  ;;  %v9240_v20 = vld [vmem:[%s8933_s27 + $0x70] sm:$0xf] }
  0x49   : > { %v2426_v3 = vor.u32 %v2425_v51, %v9149_v41  ;;  %v9196_v29 = vcombine.low %v2374_v0, %v2384_v1  ;;  %v9198_v30 = vcombine.low %v2398_v5, %v2408_v63  ;;  %v9213_v48 = vrot.slane %v2453_v21, 5  ;;  %v9227_v1 = vld [vmem:[%s8933_s27 + $0x68] sm:$0x1] }
  0x4a   : > { %v2474_v49 = vor.u32 %v2473_v37, %v9186_v25  ;;  %v2484_v51 = vrot.slane %v2482_v39, 4  ;;  %v9224_v57 = vrot.slane %v2491_v40, 5  ;;  %v2497_v58 = vrot.slane %v2495_v42, 4 }
  0x4b   : > { %v2427_v23 = vrot.slane %v2426_v3, 4  ;;  %11511 = vst [vmem:[#allocation2_spill] sm:$0xff] %v9196_v29  ;;  %11512 = vst [vmem:[#allocation3_spill] sm:$0xff] %v9198_v30  ;;  %v2465_v59 = vrot.slane %v2464_v33, 4  ;;  %v2479_v0 = vrot.slane %v2477_v32, 5  ;;  %v2506_v3 = vshrl.u32 %v7147_v45, 16 }
  0x4c   : > { %v2509_v5 = vshll.u32 %v7147_v45, 16  ;;  %v2475_v9 = vrot.slane %v2474_v49, 4  ;;  %v2501_v63 = vshll.u32 %v9217_v50, 16  ;;  %v2498_v15 = vor.u32 %v2497_v58, %v9224_v57  ;;  %v8702_v49 = vld [vmem:[%s8933_s27 + $0x30] sm:$0xff]  }
  0x4d   : > { %7950 = vmatmul.mubr.msk.bf16.gmra.mrb[24].mxu0 %vm962_vm3, %v7041_v6  ;;  %v9175_v6 = vrot.slane %v2443_v53, 5  ;;  %v2432_v46 = vsel %vm9119_vm6, %v2427_v23, %v2431_v12  ;;  %v8701_v53 = vld [vmem:[%s8933_s27 + $0x24] sm:$0xff]   ;;  %v2515_v12 = vshll.u32 %v9220_v52, 16  ;;  %v2519_v21 = vshrl.u32 %v9220_v52, 16 }
  0x4e   : > { %7953 = vmatprep.mubr.msk.bf16.mxu0 %vm962_vm3, %v7042_v17  ;;  %v2417_v17 = vrot.slane %v2416_v56, 4  ;;  %v2487_v56 = vrot.slane %v2485_v43, 5  ;;  %v2525_v33 = vshll.u32 %v9227_v1, 16  ;;  %v2530_v37 = vshrl.u32 %v7150_v14, 16 }
  0x4f   : > { %v2450_v31 = vor.u32 %v2449_v7, %v9175_v6  ;;  %v9232_v7 = vld [vmem:[%s11437_s4 + $0x28] sm:$0xff]   ;;  %v9252_v26 = vrot.slane %v2515_v12, 5  ;;  %v2521_v32 = vrot.slane %v2519_v21, 4  ;;  %v2503_v39 = vrot.slane %v2501_v63, 5  ;;  %v7156_v63 = vld [vmem:[%s8933_s27 + $0x84] sm:$0xf] }
  0x50   : > { %v2422_v44 = vsel %vm9119_vm6, %v2417_v17, %v9149_v41  ;;  %v8700_v41 = vld [vmem:[%s8933_s27 + $0x18] sm:$0xff]   ;;  %11513 = vst [vmem:[#allocation4_spill] sm:$0xff] %v9232_v7  ;;  %v2508_v17 = vrot.slane %v2506_v3, 4  ;;  %v2533_v43 = vshll.u32 %v7150_v14, 16  ;;  %v2499_v42 = vrot.slane %v2498_v15, 4 }
  0x51   : > { %v2451_v55 = vrot.slane %v2450_v31, 4  ;;  %v9243_v22 = vcombine.low %v2422_v44, %v2432_v46  ;;  %v7153_v44 = vld [vmem:[%s8933_s27 + $0x78] sm:$0xf]  ;;  %v2522_v45 = vor.u32 %v2521_v32, %v9252_v26  ;;  %v9267_v46 = vld [vmem:[%s8933_s27 + $0x74] sm:$0x1] }
  0x52   : > { %11515 = vst [vmem:[#allocation6_spill] sm:$0xff] %v9267_v46  ;;  %v9294_v32 = vld [vmem:[%s8933_s27 + $0x88] sm:$0xf] }
  0x53   : > { %11514 = vst [vmem:[#allocation5_spill] sm:$0xff] %v9243_v22  ;;  %v2456_v24 = vsel %vm9119_vm6, %v2451_v55, %v9213_v48  ;;  %v9270_v48 = vld [vmem:[%s8933_s27 + $0x7c] sm:$0xf]  ;;  %v2523_v58 = vrot.slane %v2522_v45, 4  ;;  %11520 = vst [vmem:[#allocation11_spill] sm:$0xff] %v9294_v32 }
  0x54   : > { %11516 = vst [vmem:[#allocation7_spill] sm:$0xff] %v9270_v48  ;;  %v8703_v55 = vld [vmem:[%s8933_s27 + $0x3c] sm:$0xff]  }
  0x55   : > { %7954 = vmatmul.mubr.msk.bf16.gmra.mrb[28].mxu0 %vm962_vm3, %v7043_v18  ;;  %v9206_v18 = vrot.slane %v2440_v19, 4  ;;  %v2511_v19 = vrot.slane %v2509_v5, 5  ;;  %v2549_v5 = vshll.u32 %v9267_v46, 16 }
  0x56   : > { %7959 = vmatprep.mubr.msk.bf16.mxu0 %vm962_vm3, %v8698_v10  ;;  %v2488_v10 = vor.u32 %v2487_v56, %v2484_v51  ;;  %v2535_v51 = vrot.slane %v2533_v43, 5 }
  0x57   : > { %v2446_v23 = vsel %vm9119_vm6, %v9206_v18, %v9175_v6  ;;  %v2512_v31 = vor.u32 %v2511_v19, %v2508_v17  ;;  %v2470_v6 = vsel %vm9119_vm6, %v2465_v59, %v9186_v25  ;;  %v2480_v18 = vsel %vm9119_vm6, %v2475_v9, %v2479_v0  ;;  %v9285_v17 = vld [vmem:[%s8933_s27 + $0x80] sm:$0x1] }
  0x58   : > { %v2489_v40 = vrot.slane %v2488_v10, 4  ;;  %v2532_v25 = vrot.slane %v2530_v37, 4  ;;  %v2527_v59 = vrot.slane %v2525_v33, 5  ;;  %v2554_v0 = vshrl.u32 %v7153_v44, 16  ;;  %11519 = vst [vmem:[#allocation10_spill] sm:$0xff] %v9285_v17 }
  0x59   : > { %v2513_v56 = vrot.slane %v2512_v31, 4  ;;  %v2557_v9 = vshll.u32 %v7153_v44, 16  ;;  %v2563_v10 = vshll.u32 %v9270_v48, 16  ;;  %v9280_v12 = vcombine.low %v2446_v23, %v2456_v24  ;;  %v9297_v33 = vld [vmem:[%s8933_s27 + $0x8c] sm:$0x1] }
  0x5a   : > { %v9282_v14 = vcombine.low %v2470_v6, %v2480_v18  ;;  %v2536_v15 = vor.u32 %v2535_v51, %v2532_v25  ;;  %v2567_v19 = vshrl.u32 %v9270_v48, 16  ;;  %v2494_v21 = vsel %vm9119_vm6, %v2489_v40, %v9224_v57  ;;  %11521 = vst [vmem:[#allocation12_spill] sm:$0xff] %v9297_v33  ;;  %v7159_v57 = vld [vmem:[%s8933_s27 + $0x90] sm:$0xf]  ;;  %v8704_v44 = vld [vmem:[%s8933_s27 + $0x48] sm:$0xff]  }
  0x5b   : > { %11517 = vst [vmem:[#allocation8_spill] sm:$0xff] %v9280_v12  ;;  %v2556_v23 = vrot.slane %v2554_v0, 4  ;;  %v2559_v24 = vrot.slane %v2557_v9, 5  ;;  %v2504_v37 = vsel %vm9119_vm6, %v2499_v42, %v2503_v39  ;;  %v9302_v6 = vrot.slane %v2563_v10, 5  ;;  %v9314_v25 = vld [vmem:[%s8933_s27 + $0x94] sm:$0xf] }
  0x5c   : > { %11518 = vst [vmem:[#allocation9_spill] sm:$0xff] %v9282_v14  ;;  %v2569_v43 = vrot.slane %v2567_v19, 4  ;;  %v2518_v18 = vsel %vm9119_vm6, %v2513_v56, %v9252_v26  ;;  %v2528_v40 = vsel %vm9119_vm6, %v2523_v58, %v2527_v59  ;;  %v9311_v45 = vrot.slane %v2549_v5, 5  ;;  %11522 = vst [vmem:[#allocation13_spill] sm:$0xff] %v9314_v25  ;;  %v7162_v10 = vld [vmem:[%s8933_s27 + $0x9c] sm:$0xf] }
  0x5d   : > { %7960 = vmatmul.mubr.msk.bf16.vlgmr.msra.gmra.mrb[0].mxu0 %vm962_vm3, %v8700_v41  ;;  %v9316_v39 = vrot.slane %v2536_v15, 4  ;;  %v2573_v42 = vshll.u32 %v9285_v17, 16  ;;  %v2560_v26 = vor.u32 %v2559_v24, %v2556_v23  ;;  %v2591_v58 = vshrl.u32 %v9294_v32, 16 }
  0x5e   : > { %7992 = vmatpush3.bf16.msra.mxu0 %v8955_v28  ;;  %7963 = vmatprep.mubr.msk.bf16.mxu0 %vm962_vm3, %v8701_v53  ;;  %v2539_v28 = vshll.u32 %v9240_v20, 16  ;;  %v2543_v53 = vshrl.u32 %v9240_v20, 16  ;;  %v9324_v59 = vcombine.low %v2494_v21, %v2504_v37  ;;  %v2597_v9 = vshll.u32 %v9297_v33, 16 }
  0x5f   : > { %8025 = vmatprep.subr.bf16.mxu0 %v9232_v7  ;;  %v2593_v19 = vrot.slane %v2591_v58, 4  ;;  %v2602_v23 = vshrl.u32 %v7159_v57, 16  ;;  %v9340_v24 = vrot.slane %v2573_v42, 5  ;;  %v2605_v37 = vshll.u32 %v7159_v57, 16  ;;  %v9432_v7 = vld [vmem:[%s8933_s27 + $0xc4] sm:$0xf] }
  0x60   : > { %v9273_v41 = vrot.slane %v2539_v28, 5  ;;  %v2545_v3 = vrot.slane %v2543_v53, 4  ;;  %v2578_v28 = vshrl.u32 %v7156_v63, 16  ;;  %v2587_v53 = vshll.u32 %v9294_v32, 16  ;;  %11523 = vst [vmem:[#allocation14_spill] sm:$0xff] %v9324_v59 }
  0x61   : > { %v9366_v21 = vrot.slane %v2597_v9, 5 }
  0x62   : > { %v2546_v31 = vor.u32 %v2545_v3, %v9273_v41  ;;  %v2580_v51 = vrot.slane %v2578_v28, 4  ;;  %v2570_v3 = vor.u32 %v2569_v43, %v9302_v6  ;;  %v9327_v5 = vrot.slane %v2587_v53, 5  ;;  %v7165_v28 = vld [vmem:[%s8933_s27 + $0xa8] sm:$0xf] }
  0x63   : > { %v2611_v43 = vshll.u32 %v9314_v25, 16  ;;  %v2615_v53 = vshrl.u32 %v9314_v25, 16 }
  0x64   : > { %v9321_v0 = vrot.slane %v2546_v31, 4  ;;  %v9334_v31 = vld [vmem:[%s8933_s27 + $0x98] sm:$0x1]  ;;  %v9355_v57 = vrot.slane %v2570_v3, 4 }
  0x65   : > { %7964 = vmatmul.mubr.msk.bf16.gmra.mrb[4].mxu0 %vm962_vm3, %v8702_v49  ;;  %v2581_v49 = vshll.u32 %v7156_v63, 16  ;;  %v9331_v63 = vcombine.low %v2518_v18, %v2528_v40  ;;  %11525 = vst [vmem:[#allocation16_spill] sm:$0xff] %v9334_v31  ;;  %v9348_v18 = vrot.slane %v2560_v26, 4  ;;  %v2594_v40 = vor.u32 %v2593_v19, %v9327_v5  ;;  %v8706_v26 = vld [vmem:[%s8933_s27 + $0x60] sm:$0xff]  }
  0x66   : > { %7967 = vmatprep.mubr.msk.bf16.mxu0 %vm962_vm3, %v8703_v55  ;;  %v8705_v55 = vld [vmem:[%s8933_s27 + $0x54] sm:$0xff]   ;;  %v9357_v42 = vrot.slane %v2611_v43, 5  ;;  %v2626_v19 = vshrl.u32 %v7162_v10, 16  ;;  %v2617_v3 = vrot.slane %v2615_v53, 4  ;;  %v2621_v59 = vshll.u32 %v9334_v31, 16 }
  0x67   : > { %v2583_v56 = vrot.slane %v2581_v49, 5  ;;  %11524 = vst [vmem:[#allocation15_spill] sm:$0xff] %v9331_v63  ;;  %v2604_v49 = vrot.slane %v2602_v23, 4  ;;  %v2629_v23 = vshll.u32 %v7162_v10, 16  ;;  %v8707_v63 = vld [vmem:[%s8933_s27 + $0x6c] sm:$0xff]   ;;  %v9375_v14 = vrot.slane %v2594_v40, 4 }
  0x68   : > { %v9373_v43 = vld [vmem:[%s8933_s27 + $0xac] sm:$0xf]  ;;  %v2628_v12 = vrot.slane %v2626_v19, 4  ;;  %v2650_v19 = vshrl.u32 %v7165_v28, 16 }
  0x69   : > { %v2584_v15 = vor.u32 %v2583_v56, %v2580_v51  ;;  %v9352_v51 = vld [vmem:[%s8933_s27 + $0xa0] sm:$0xf]  ;;  %v9361_v56 = vld [vmem:[%s8933_s27 + $0xa4] sm:$0x1]  ;;  %11528 = vst [vmem:[#allocation19_spill] sm:$0xff] %v9373_v43 }
  0x6a   : > { %11526 = vst [vmem:[#allocation17_spill] sm:$0xff] %v9352_v51  ;;  %11527 = vst [vmem:[#allocation18_spill] sm:$0xff] %v9361_v56  ;;  %v2639_v9 = vshrl.u32 %v9352_v51, 16  ;;  %v2645_v40 = vshll.u32 %v9361_v56, 16  ;;  %v7168_v56 = vld [vmem:[%s8933_s27 + $0xb4] sm:$0xf] }
  0x6b   : > { %v9364_v58 = vrot.slane %v2584_v15, 4  ;;  %v2631_v15 = vrot.slane %v2629_v23, 5  ;;  %v2652_v23 = vrot.slane %v2650_v19, 4  ;;  %v2674_v32 = vshrl.u32 %v7168_v56, 16 }
  0x6c   : > { %v2641_v25 = vrot.slane %v2639_v9, 4  ;;  %v9403_v9 = vrot.slane %v2621_v59, 5  ;;  %v2663_v59 = vshrl.u32 %v9373_v43, 16  ;;  %v2677_v30 = vshll.u32 %v7168_v56, 16 }
  0x6d   : > { %7968 = vmatmul.mubr.msk.bf16.gmra.mrb[8].mxu0 %vm962_vm3, %v8704_v44  ;;  %v2607_v44 = vrot.slane %v2605_v37, 5  ;;  %v2635_v37 = vshll.u32 %v9352_v51, 16  ;;  %v2632_v31 = vor.u32 %v2631_v15, %v2628_v12  ;;  %v2659_v12 = vshll.u32 %v9373_v43, 16  ;;  %v7169_v51 = vld [vmem:[%s8933_s27 + $0xb8] sm:$0xf] }
  0x6e   : > { %7971 = vmatprep.mubr.msk.bf16.mxu0 %vm962_vm3, %v8705_v55  ;;  %v8708_v43 = vld [vmem:[%s8933_s27 + $0x78] sm:$0xff]   ;;  %v2665_v33 = vrot.slane %v2663_v59, 4  ;;  %v2676_v59 = vrot.slane %v2674_v32, 4 }
  0x6f   : > { %v2608_v55 = vor.u32 %v2607_v44, %v2604_v49  ;;  %v2618_v44 = vor.u32 %v2617_v3, %v9357_v42  ;;  %v9385_v53 = vrot.slane %v2635_v37, 5  ;;  %v9397_v3 = vld [vmem:[%s8933_s27 + $0xb0] sm:$0x1]  ;;  %v2653_v37 = vshll.u32 %v7165_v28, 16 }
  0x70   : > { %11529 = vst [vmem:[#allocation20_spill] sm:$0xff] %v9397_v3  ;;  %v9411_v28 = vrot.slane %v2632_v31, 4  ;;  %v9425_v31 = vrot.slane %v2645_v40, 5  ;;  %v2669_v19 = vshll.u32 %v9397_v3, 16  ;;  %v2687_v40 = vshrl.u32 %v7169_v51, 16 }
  0x71   : > { %v9382_v49 = vrot.slane %v2608_v55, 4  ;;  %v9401_v15 = vrot.slane %v2618_v44, 4  ;;  %v2642_v10 = vor.u32 %v2641_v25, %v9385_v53  ;;  %v8717_v55 = vld [vmem:[%s11437_s4 + $0x8] sm:$0xff]   ;;  %v9413_v44 = vrot.slane %v2659_v12, 5  ;;  %v7171_v12 = vld [vmem:[%s8933_s27 + $0xc0] sm:$0xf] }
  0x72   : > { %v2600_v25 = vsel %vm9119_vm6, %v9375_v14, %v9366_v21  ;;  %7855 = vmatprep.subr.bf16.mxu1 %v8717_v55  ;;  %v8709_v14 = vld [vmem:[%s8933_s27 + $0x84] sm:$0xff]   ;;  %v2689_v29 = vrot.slane %v2687_v40, 4 }
  0x73   : > { %7856 = vmatpush3.bf16.msra.mxu1 %v8717_v55  ;;  %v2624_v21 = vsel %vm9119_vm6, %v9401_v15, %v9403_v9  ;;  %v2666_v56 = vor.u32 %v2665_v33, %v9413_v44  ;;  %v2679_v55 = vrot.slane %v2677_v30, 5  ;;  %v2698_v15 = vshrl.u32 %v7171_v12, 16 }
  0x75   : > { %7972 = vmatmul.mubr.msk.bf16.gmra.mrb[12].mxu0 %vm962_vm3, %v8706_v26  ;;  %v2655_v26 = vrot.slane %v2653_v37, 5  ;;  %v7170_v37 = vld [vmem:[%s8933_s27 + $0xbc] sm:$0x1]  ;;  %v2667_v48 = vrot.slane %v2666_v56, 4  ;;  %v2680_v9 = vor.u32 %v2679_v55, %v2676_v59  ;;  %v2700_v32 = vrot.slane %v2698_v15, 4 }
  0x76   : > { %7975 = vmatprep.mubr.msk.bf16.mxu0 %vm962_vm3, %v8707_v63  ;;  %v2614_v63 = vsel %vm9119_vm6, %v9382_v49, %v9357_v42  ;;  %v2643_v42 = vrot.slane %v2642_v10, 4  ;;  %v2683_v49 = vshll.u32 %v7169_v51, 16  ;;  %v2693_v17 = vshll.u32 %v7170_v37, 16  ;;  %v9465_v56 = vld [vmem:[%s8933_s27 + $0x18] sm:$0xe] }
  0x77   : > { %v2656_v22 = vor.u32 %v2655_v26, %v2652_v23  ;;  %v2638_v23 = vsel %vm9119_vm6, %v9411_v28, %v9385_v53  ;;  %v2671_v10 = vrot.slane %v2669_v19, 5  ;;  %v2701_v51 = vshll.u32 %v7171_v12, 16  ;;  %v9446_v28 = vld [vmem:[%s8933_s27 + $0xc8] sm:$0x1]  ;;  %v7209_v59 = vld [vmem:[%s8933_s27 + $0x24] sm:$0xe] }
  0x78   : > { %v2685_v3 = vrot.slane %v2683_v49, 5  ;;  %v2695_v53 = vrot.slane %v2693_v17, 5  ;;  %v2648_v30 = vsel %vm9119_vm6, %v2643_v42, %v9425_v31  ;;  %v2711_v19 = vshrl.u32 %v9432_v7, 16 }
  0x79   : > { %v2657_v26 = vrot.slane %v2656_v22, 4  ;;  %v2707_v22 = vshll.u32 %v9432_v7, 16  ;;  %v2703_v33 = vrot.slane %v2701_v51, 5  ;;  %v2681_v37 = vrot.slane %v2680_v9, 4 }
  0x7a   : > { %v2690_v46 = vor.u32 %v2689_v29, %v2685_v3  ;;  %v8710_v29 = vld [vmem:[%s8933_s27 + $0x90] sm:$0xff]   ;;  %v2713_v31 = vrot.slane %v2711_v19, 4  ;;  %v2717_v42 = vshll.u32 %v9446_v28, 16  ;;  %v11531_v15 = vsel %vm9119_vm6, %v9316_v39, %v9273_v41 }
  0x7b   : > { %v2662_v17 = vsel %vm9119_vm6, %v2657_v26, %v9413_v44  ;;  %v9459_v49 = vrot.slane %v2707_v22, 5  ;;  %v2704_v40 = vor.u32 %v2703_v33, %v2700_v32  ;;  %v2686_v55 = vsel %vm9119_vm6, %v2681_v37, %v2685_v3 }
  0x7c   : > { %v2691_v12 = vrot.slane %v2690_v46, 4  ;;  %v3084_v26 = vrot.slane %v9065_v34, 5  ;;  %v11532_v3 = vsel %vm9119_vm6, %v9355_v57, %v9340_v24  ;;  %v11533_v34 = vsel %vm9119_vm6, %v9348_v18, %v9302_v6  ;;  %v7210_v6 = vld [vmem:[%s8933_s27 + $0x30] sm:$0xe]  ;;  %v7211_v18 = vld [vmem:[%s8933_s27 + $0x3c] sm:$0xe] }
  0x7d   : > { %7976 = vmatmul.mubr.msk.bf16.gmra.mrb[16].mxu0 %vm962_vm3, %v8708_v43  ;;  %v7207_v43 = vld [vmem:[%s8933_s27 + $0xc] sm:$0xe]  ;;  %v9496_v9 = vcombine.low %v11533_v34, %v11532_v3  ;;  %v9505_v39 = vrot.slane %v2704_v40, 4  ;;  %v2714_v57 = vor.u32 %v2713_v31, %v9459_v49  ;;  %v3101_v19 = vrot.slane %v9113_v8, 5  ;;  %v9567_v3 = vld [vmem:[%s8933_s27] sm:$0xf] }
  0x7e   : > { %7979 = vmatprep.mubr.msk.bf16.mxu0 %vm962_vm3, %v8709_v14  ;;  %v2672_v14 = vsel %vm9119_vm6, %v2667_v48, %v2671_v10  ;;  %v2696_v46 = vsel %vm9119_vm6, %v2691_v12, %v2695_v53  ;;  %v7223_v44 = vrot.slane %v7207_v43, 9  ;;  %v8711_v48 = vld [vmem:[%s8933_s27 + $0x9c] sm:$0xff]   ;;  %v11530_v10 = vsel %vm9119_vm6, %v9321_v0, %v9311_v45 }
  0x7f   : > { %v9484_v51 = vcombine.low %v11531_v15, %v11530_v10  ;;  %v11534_v45 = vsel %vm9119_vm6, %v9364_v58, %v9327_v5  ;;  %v9507_v0 = vcombine.low %v2614_v63, %v2624_v21  ;;  %v9509_v53 = vcombine.low %v2638_v23, %v2648_v30  ;;  %v8805_v10 = vld [vmem:[%s8933_s27 + $0x14] sm:$0x1]  ;;  %v7218_v23 = vld [vmem:[%s8933_s27 + $0x90] sm:$0xe] }
  0x80   : > { %v9503_v41 = vcombine.low %v11534_v45, %v2600_v25  ;;  %v9511_v24 = vcombine.low %v2662_v17, %v2672_v14  ;;  %v9516_v22 = vcombine.low %v2686_v55, %v2696_v46  ;;  %v3086_v32 = vrot.slane %v3084_v26, 4  ;;  %v7212_v25 = vld [vmem:[%s8933_s27 + $0x48] sm:$0xe]  ;;  %v8713_v55 = vld [vmem:[%s8933_s27 + $0xb4] sm:$0xff]  }
  0x81   : > { %v3087_v5 = vrot.slane %v9068_v35, 5  ;;  %v7225_v58 = vrot.slane %v7209_v59, 9  ;;  %v9521_v63 = vrot.slane %v2717_v42, 5  ;;  %v9525_v21 = vsel %vm8926_vm2, %v7223_v44, %v3084_v26  ;;  %v8712_v14 = vld [vmem:[%s8933_s27 + $0xa8] sm:$0xff]   ;;  %v7214_v59 = vld [vmem:[%s8933_s27 + $0x60] sm:$0xe] }
  0x82   : > { %v3098_v30 = vrot.slane %v9103_v60, 5  ;;  %v7226_v43 = vrot.slane %v7210_v6, 9  ;;  %v9537_v17 = vrot.slane %v2714_v57, 4  ;;  %v3105_v31 = vrot.slane %v9125_v16, 5 }
  0x83   : > { %v9547_v40 = vsel %vm8926_vm2, %v3086_v32, %v3087_v5  ;;  %v3108_v8 = vrot.slane %v9144_v36, 5  ;;  %v7227_v42 = vrot.slane %v7211_v18, 9  ;;  %v3112_v44 = vrot.slane %v9147_v38, 5 }
  0x84   : > { %v9542_v60 = vsel %vm8926_vm2, %v7225_v58, %v3098_v30  ;;  %v3100_v12 = vrot.slane %v3098_v30, 4  ;;  %v3115_v26 = vrot.slane %v9170_v4, 5  ;;  %v9563_v16 = vsel %vm8926_vm2, %v7226_v43, %v3105_v31 }
  0x85   : > { %7980 = vmatmul.mubr.msk.bf16.gmra.mrb[20].mxu0 %vm962_vm3, %v8710_v29  ;;  %v7213_v29 = vld [vmem:[%s8933_s27 + $0x54] sm:$0xe]  ;;  %v3107_v36 = vrot.slane %v3105_v31, 4  ;;  %v3119_v15 = vrot.slane %v9159_v61, 5  ;;  %v9571_v34 = vsel %vm8926_vm2, %v7227_v42, %v3112_v44  ;;  %v3114_v38 = vrot.slane %v3112_v44, 4 }
  0x86   : > { %7983 = vmatprep.mubr.msk.bf16.mxu0 %vm962_vm3, %v8711_v48  ;;  %v9555_v46 = vsel %vm8926_vm2, %v3100_v12, %v3101_v19  ;;  %v7228_v48 = vrot.slane %v7212_v25, 9  ;;  %v3122_v4 = vrot.slane %v9181_v13, 5  ;;  %v7229_v45 = vrot.slane %v7213_v29, 9 }
  0x87   : > { %v9576_v57 = vsel %vm8926_vm2, %v3107_v36, %v3108_v8  ;;  %v3121_v18 = vrot.slane %v3119_v15, 4  ;;  %v3126_v61 = vrot.slane %v9190_v27, 5  ;;  %v9588_v13 = vsel %vm8926_vm2, %v3114_v38, %v3115_v26  ;;  %v9613_v8 = vld [vmem:[%s8933_s27 + $0x4] sm:$0xf] }
  0x88   : > { %v9580_v6 = vsel %vm8926_vm2, %v7228_v48, %v3119_v15  ;;  %v3129_v5 = vrot.slane %v9217_v50, 5  ;;  %v7230_v58 = vrot.slane %v7214_v59, 9  ;;  %v3133_v43 = vrot.slane %v9220_v52, 5  ;;  %v8714_v52 = vld [vmem:[%s8933_s27 + $0xc0] sm:$0xff]   ;;  %v7216_v50 = vld [vmem:[%s8933_s27 + $0x78] sm:$0xe] }
  0x89   : > { %v9596_v25 = vsel %vm8926_vm2, %v3121_v18, %v3122_v4  ;;  %v9600_v30 = vsel %vm8926_vm2, %v7229_v45, %v3126_v61  ;;  %v3128_v19 = vrot.slane %v3126_v61, 4  ;;  %v3136_v29 = vrot.slane %v9227_v1, 5  ;;  %v8803_v4 = vld [vmem:[%s8933_s27 + $0x8] sm:$0x1] }
  0x8a   : > { %v523_v12 = vshrl.u32 %v9567_v3, 16  ;;  %v526_v31 = vshll.u32 %v9567_v3, 16  ;;  %v532_v42 = vshll.u32 %v9613_v8, 16  ;;  %v536_v59 = vshrl.u32 %v9613_v8, 16 }
  0x8b   : > { %v9625_v44 = vsel %vm8926_vm2, %v7230_v58, %v3133_v43  ;;  %v3135_v26 = vrot.slane %v3133_v43, 4  ;;  %v542_v45 = vshll.u32 %v8803_v4, 16  ;;  %v7215_v43 = vld [vmem:[%s8933_s27 + $0x6c] sm:$0xe]  ;;  %v566_v35 = vshll.u32 %v8805_v10, 16 }
  0x8c   : > { %11535 = vst [vmem:[#allocation21_spill] sm:$0xff] %v9625_v44  ;;  %v525_v48 = vrot.slane %v523_v12, 4  ;;  %v528_v36 = vrot.slane %v526_v31, 5  ;;  %v534_v15 = vrot.slane %v532_v42, 5  ;;  %v538_v38 = vrot.slane %v536_v59, 4  ;;  %v11552_v44 = vld [vmem:[#allocation5_spill] sm:$0xff] }
  0x8d   : > { %7984 = vmatmul.mubr.msk.bf16.gmra.mrb[24].mxu0 %vm962_vm3, %v8712_v14  ;;  %v9609_v14 = vsel %vm8926_vm2, %v3128_v19, %v3129_v5  ;;  %v9630_v18 = vsel %vm8926_vm2, %v3135_v26, %v3136_v29  ;;  %v9635_v19 = vld [vmem:[%s8933_s27 + $0x10] sm:$0xf]  ;;  %v544_v59 = vrot.slane %v542_v45, 5  ;;  %v7231_v12 = vrot.slane %v7215_v43, 9 }
  0x8e   : > { %7987 = vmatprep.mubr.msk.bf16.mxu0 %vm962_vm3, %v8713_v55  ;;  %v9618_v55 = vld [vmem:[%s8933_s27 + $0xc] sm:$0xf]  ;;  %11536 = vst [vmem:[#allocation22_spill] sm:$0xff] %v9630_v18  ;;  %v556_v58 = vshll.u32 %v9635_v19, 16  ;;  %v529_v31 = vor.u32 %v528_v36, %v525_v48  ;;  %v539_v42 = vor.u32 %v538_v38, %v534_v15  ;;  %v560_v1 = vshrl.u32 %v9635_v19, 16 }
  0x8f   : > { %v547_v61 = vshrl.u32 %v9618_v55, 16  ;;  %v550_v5 = vshll.u32 %v9618_v55, 16  ;;  %v3140_v38 = vrot.slane %v9240_v20, 5  ;;  %v9720_v18 = vld [vmem:[%s8933_s27 + $0x30] sm:$0xf] }
  0x90   : > { %v558_v4 = vrot.slane %v556_v58, 5  ;;  %v530_v27 = vrot.slane %v529_v31, 4  ;;  %v540_v32 = vrot.slane %v539_v42, 4  ;;  %v562_v36 = vrot.slane %v560_v1, 4 }
  0x91   : > { %v549_v29 = vrot.slane %v547_v61, 4  ;;  %v552_v26 = vrot.slane %v550_v5, 5  ;;  %v9650_v61 = vld [vmem:[%s8933_s27 + $0x18] sm:$0xf]  ;;  %v7232_v31 = vrot.slane %v7216_v50, 9  ;;  %v9658_v1 = vsel %vm8926_vm2, %v7231_v12, %v3140_v38 }
  0x92   : > { %v535_v5 = vsel %vm9119_vm6, %v530_v27, %v534_v15  ;;  %v545_v58 = vsel %vm9119_vm6, %v540_v32, %v544_v59  ;;  %v563_v43 = vor.u32 %v562_v36, %v558_v4  ;;  %v3142_v20 = vrot.slane %v3140_v38, 4  ;;  %v9673_v12 = vld [vmem:[%s8933_s27 + $0x1c] sm:$0xf] }
  0x93   : > { %v553_v48 = vor.u32 %v552_v26, %v549_v29  ;;  %v6946_v42 = vcombine.low %v535_v5, %v545_v58  ;;  %v11539_v29 = vld [vmem:[#allocation7_spill] sm:$0xff]  ;;  %v571_v27 = vshrl.u32 %v9650_v61, 16  ;;  %v574_v15 = vshll.u32 %v9650_v61, 16  ;;  %v9685_v58 = vld [vmem:[%s8933_s27 + $0x24] sm:$0xf] }
  0x94   : > { %v3147_v26 = vrot.slane %v11539_v29, 5  ;;  %v564_v50 = vrot.slane %v563_v43, 4  ;;  %v580_v59 = vshll.u32 %v9673_v12, 16  ;;  %11543 = vst [vmem:[#allocation23_spill] sm:$0xff] %v9685_v58 }
  0x95   : > { %7988 = vmatmul.mubr.msk.bf16.gmra.mrb[28].mxu0 %vm962_vm3, %v8714_v52  ;;  %v11537_v52 = vld [vmem:[#allocation6_spill] sm:$0xff]  ;;  %v554_v10 = vrot.slane %v553_v48, 4  ;;  %7857 = vmatprep.mubr.msk.bf16.mxu1 %vm962_vm3, %v6946_v42  ;;  %v573_v5 = vrot.slane %v571_v27, 4 }
  0x96   : > { %7993 = vmatprep.mubr.msk.bf16.mxu0 %vm962_vm3, %v9161_v62  ;;  %v3143_v45 = vrot.slane %v11537_v52, 5  ;;  %v568_v62 = vrot.slane %v566_v35, 5  ;;  %11538 = vst [vmem:[#allocation6_spill] sm:$0xff] %v9658_v1  ;;  %v11540_v52 = vld [vmem:[#allocation10_spill] sm:$0xff]  ;;  %v9666_v35 = vld [vmem:[%s11437_s4 + $0x30] sm:$0xff]   ;;  %v9682_v36 = vsel %vm8926_vm2, %v7232_v31, %v3147_v26  ;;  %v3149_v38 = vrot.slane %v3147_v26, 4 }
  0x97   : > { %v3150_v37 = vrot.slane %v11540_v52, 5  ;;  %v559_v32 = vsel %vm9119_vm6, %v554_v10, %v558_v4  ;;  %11542 = vst [vmem:[#allocation10_spill] sm:$0xff] %v9682_v36  ;;  %v11544_v4 = vld [vmem:[#allocation2_spill] sm:$0xff]  ;;  %v582_v43 = vrot.slane %v580_v59, 5  ;;  %v11546_v31 = vld [vmem:[#allocation3_spill] sm:$0xff]  ;;  %v584_v52 = vshrl.u32 %v9673_v12, 16 }
  0x98   : > { %v9678_v48 = vsel %vm8926_vm2, %v3142_v20, %v3143_v45  ;;  %v569_v42 = vsel %vm9119_vm6, %v564_v50, %v568_v62  ;;  %v576_v45 = vrot.slane %v574_v15, 5  ;;  %v11545_v20 = vld [vmem:[#allocation4_spill] sm:$0xff]  ;;  %v8807_v62 = vld [vmem:[%s8933_s27 + $0x20] sm:$0x1]  ;;  %v595_v59 = vshrl.u32 %v9685_v58, 16  ;;  %v11549_v1 = vld [vmem:[#allocation11_spill] sm:$0xff] }
  0x99   : > { %11541 = vst [vmem:[#allocation7_spill] sm:$0xff] %v9678_v48  ;;  %v6947_v29 = vcombine.low %v559_v32, %v569_v42  ;;  %v9698_v26 = vsel %vm8926_vm2, %v3149_v38, %v3150_v37  ;;  %v590_v27 = vshll.u32 %v8807_v62, 16  ;;  %v598_v32 = vshll.u32 %v9685_v58, 16  ;;  %v9710_v42 = vld [vmem:[%s8933_s27 + $0x28] sm:$0xf]  ;;  %11550 = vst [vmem:[#allocation3_spill] sm:$0xff] %v9720_v18 }
  0x9a   : > { %11547 = vst [vmem:[#allocation2_spill] sm:$0xff] %v9698_v26  ;;  %v577_v15 = vor.u32 %v576_v45, %v573_v5  ;;  %v586_v37 = vrot.slane %v584_v52, 4  ;;  %11548 = vst [vmem:[#allocation4_spill] sm:$0xff] %v9710_v42  ;;  %v597_v50 = vrot.slane %v595_v59, 4  ;;  %v8809_v5 = vld [vmem:[%s8933_s27 + $0x2c] sm:$0x1] }
  0x9b   : > { %7858 = vmatmul.mubr.msk.bf16.vlgmr.msra.gmra.mrb[0].mxu1 %vm962_vm3, %v6947_v29  ;;  %v592_v38 = vrot.slane %v590_v27, 5  ;;  %v600_v10 = vrot.slane %v598_v32, 5  ;;  %v614_v45 = vshll.u32 %v8809_v5, 16  ;;  %v3154_v58 = vrot.slane %v11549_v1, 5  ;;  %v11551_v59 = vld [vmem:[#allocation12_spill] sm:$0xff] }
  0x9c   : > { %v578_v62 = vrot.slane %v577_v15, 4  ;;  %v587_v33 = vor.u32 %v586_v37, %v582_v43  ;;  %v3157_v32 = vrot.slane %v11551_v59, 5  ;;  %v7234_v5 = vrot.slane %v7218_v23, 9  ;;  %v11555_v1 = vld [vmem:[#allocation8_spill] sm:$0xff] }
  0x9d   : > { %7994 = vmatmul.mubr.msk.bf16.vlgmr.msra.gmra.mrb[0].mxu0 %vm962_vm3, %v11544_v4  ;;  %v7217_v4 = vld [vmem:[%s8933_s27 + $0x84] sm:$0xe]  ;;  %v601_v52 = vor.u32 %v600_v10, %v597_v50  ;;  %v616_v27 = vrot.slane %v614_v45, 5  ;;  %v3156_v10 = vrot.slane %v3154_v58, 4  ;;  %v11556_v23 = vld [vmem:[#allocation16_spill] sm:$0xff] }
  0x9e   : > { %8026 = vmatpush3.bf16.msra.mxu0 %v11545_v20  ;;  %7997 = vmatprep.mubr.msk.bf16.mxu0 %vm962_vm3, %v11546_v31  ;;  %v604_v20 = vshll.u32 %v9710_v42, 16  ;;  %v608_v31 = vshrl.u32 %v9710_v42, 16  ;;  %v7233_v48 = vrot.slane %v7217_v4, 9  ;;  %v583_v29 = vsel %vm9119_vm6, %v578_v62, %v582_v43  ;;  %v11554_v43 = vld [vmem:[#allocation13_spill] sm:$0xff]  ;;  %v9756_v59 = vld [vmem:[%s8933_s27 + $0x34] sm:$0xf] }
  0x9f   : > { %8059 = vmatprep.subr.bf16.mxu0 %v9666_v35  ;;  %v588_v42 = vrot.slane %v587_v33, 4  ;;  %v602_v37 = vrot.slane %v601_v52, 4  ;;  %v3161_v50 = vrot.slane %v11554_v43, 5  ;;  %11560 = vst [vmem:[#allocation8_spill] sm:$0xff] %v9756_v59 }
  0xa0   : > { %v606_v26 = vrot.slane %v604_v20, 5  ;;  %v610_v36 = vrot.slane %v608_v31, 4  ;;  %v9727_v4 = vsel %vm8926_vm2, %v7233_v48, %v3154_v58  ;;  %v3164_v20 = vrot.slane %v11556_v23, 5 }
  0xa1   : > { %11553 = vst [vmem:[#allocation11_spill] sm:$0xff] %v9727_v4  ;;  %v593_v33 = vsel %vm9119_vm6, %v588_v42, %v592_v38  ;;  %v9740_v58 = vsel %vm8926_vm2, %v3156_v10, %v3157_v32  ;;  %v9744_v62 = vsel %vm8926_vm2, %v7234_v5, %v3161_v50  ;;  %v9747_v38 = vld [vmem:[%s8933_s27 + $0x3c] sm:$0xf]  ;;  %v628_v32 = vshll.u32 %v9756_v59, 16 }
  0xa2   : > { %v611_v15 = vor.u32 %v610_v36, %v606_v26  ;;  %v6948_v31 = vcombine.low %v583_v29, %v593_v33  ;;  %v607_v48 = vsel %vm9119_vm6, %v602_v37, %v606_v26  ;;  %11557 = vst [vmem:[#allocation12_spill] sm:$0xff] %v9740_v58  ;;  %11558 = vst [vmem:[#allocation5_spill] sm:$0xff] %v9744_v62  ;;  %v3163_v29 = vrot.slane %v3161_v50, 4  ;;  %v8811_v37 = vld [vmem:[%s8933_s27 + $0x38] sm:$0x1] }
  0xa3   : > { %11559 = vst [vmem:[#allocation13_spill] sm:$0xff] %v9747_v38  ;;  %v632_v5 = vshrl.u32 %v9756_v59, 16  ;;  %v638_v10 = vshll.u32 %v8811_v37, 16  ;;  %v643_v43 = vshrl.u32 %v9747_v38, 16  ;;  %v646_v50 = vshll.u32 %v9747_v38, 16  ;;  %v11563_v37 = vld [vmem:[#allocation9_spill] sm:$0xff] }
  0xa4   : > { %v612_v36 = vrot.slane %v611_v15, 4  ;;  %7861 = vmatprep.mubr.msk.bf16.mxu1 %vm962_vm3, %v6948_v31  ;;  %v622_v15 = vshll.u32 %v9720_v18, 16  ;;  %v7220_v62 = vld [vmem:[%s8933_s27 + $0xa8] sm:$0xe] }
  0xa5   : > { %7998 = vmatmul.mubr.msk.bf16.gmra.mrb[4].mxu0 %vm962_vm3, %v11552_v44  ;;  %v619_v44 = vshrl.u32 %v9720_v18, 16  ;;  %v634_v23 = vrot.slane %v632_v5, 4  ;;  %v640_v31 = vrot.slane %v638_v10, 5  ;;  %v9789_v59 = vld [vmem:[%s8933_s27 + $0x48] sm:$0xf] }
  0xa6   : > { %8001 = vmatprep.mubr.msk.bf16.mxu0 %vm962_vm3, %v11555_v1  ;;  %v617_v42 = vsel %vm9119_vm6, %v612_v36, %v616_v27  ;;  %v9762_v27 = vsel %vm8926_vm2, %v3163_v29, %v3164_v20  ;;  %v624_v33 = vrot.slane %v622_v15, 5  ;;  %v630_v36 = vrot.slane %v628_v32, 5  ;;  %v8813_v1 = vld [vmem:[%s8933_s27 + $0x44] sm:$0x1] }
  0xa7   : > { %v621_v52 = vrot.slane %v619_v44, 4  ;;  %v6949_v26 = vcombine.low %v607_v48, %v617_v42  ;;  %11561 = vst [vmem:[#allocation16_spill] sm:$0xff] %v9762_v27  ;;  %v7219_v44 = vld [vmem:[%s8933_s27 + $0x9c] sm:$0xe]  ;;  %v645_v20 = vrot.slane %v643_v43, 4  ;;  %v648_v48 = vrot.slane %v646_v50, 5 }
  0xa8   : > { %v9772_v42 = vld [vmem:[%s8933_s27 + $0x40] sm:$0xf]  ;;  %v662_v15 = vshll.u32 %v8813_v1, 16  ;;  %v7235_v43 = vrot.slane %v7219_v44, 9  ;;  %v11565_v50 = vld [vmem:[#allocation17_spill] sm:$0xff] }
  0xa9   : > { %7862 = vmatmul.mubr.msk.bf16.gmra.mrb[4].mxu1 %vm962_vm3, %v6949_v26  ;;  %11562 = vst [vmem:[#allocation24_spill] sm:$0xff] %v9772_v42  ;;  %v652_v29 = vshll.u32 %v9772_v42, 16  ;;  %v625_v45 = vor.u32 %v624_v33, %v621_v52  ;;  %v635_v26 = vor.u32 %v634_v23, %v630_v36  ;;  %v656_v58 = vshrl.u32 %v9772_v42, 16  ;;  %v11564_v32 = vld [vmem:[#allocation14_spill] sm:$0xff] }
  0xaa   : > { %v649_v5 = vor.u32 %v648_v48, %v645_v20  ;;  %v3168_v27 = vrot.slane %v11565_v50, 5  ;;  %v11566_v1 = vld [vmem:[#allocation18_spill] sm:$0xff]  ;;  %v11570_v50 = vld [vmem:[#allocation15_spill] sm:$0xff] }
  0xab   : > { %v654_v10 = vrot.slane %v652_v29, 5  ;;  %v626_v4 = vrot.slane %v625_v45, 4  ;;  %v636_v38 = vrot.slane %v635_v26, 4  ;;  %v658_v18 = vrot.slane %v656_v58, 4  ;;  %v11567_v26 = vld [vmem:[#allocation19_spill] sm:$0xff] }
  0xac   : > { %v650_v52 = vrot.slane %v649_v5, 4  ;;  %v9785_v33 = vsel %vm8926_vm2, %v7235_v43, %v3168_v27  ;;  %v3170_v23 = vrot.slane %v3168_v27, 4  ;;  %v3171_v42 = vrot.slane %v11566_v1, 5  ;;  %v9813_v5 = vld [vmem:[%s8933_s27 + $0x4c] sm:$0xf] }
  0xad   : > { %8002 = vmatmul.mubr.msk.bf16.gmra.mrb[8].mxu0 %vm962_vm3, %v11563_v37  ;;  %v664_v37 = vrot.slane %v662_v15, 5  ;;  %v631_v44 = vsel %vm9119_vm6, %v626_v4, %v630_v36  ;;  %v641_v45 = vsel %vm9119_vm6, %v636_v38, %v640_v31  ;;  %v659_v20 = vor.u32 %v658_v18, %v654_v10  ;;  %v11568_v36 = vld [vmem:[#allocation20_spill] sm:$0xff] }
  0xae   : > { %8005 = vmatprep.mubr.msk.bf16.mxu0 %vm962_vm3, %v11564_v32  ;;  %v7236_v58 = vrot.slane %v7220_v62, 9  ;;  %v6950_v48 = vcombine.low %v631_v44, %v641_v45  ;;  %v655_v29 = vsel %vm9119_vm6, %v650_v52, %v654_v10  ;;  %v9799_v27 = vsel %vm8926_vm2, %v3170_v23, %v3171_v42  ;;  %v9817_v43 = vld [vmem:[%s8933_s27 + $0x54] sm:$0xf]  ;;  %v8815_v44 = vld [vmem:[%s8933_s27 + $0x50] sm:$0x1] }
  0xaf   : > { %v3175_v15 = vrot.slane %v11567_v26, 5  ;;  %v660_v32 = vrot.slane %v659_v20, 4  ;;  %v3178_v38 = vrot.slane %v11568_v36, 5  ;;  %v667_v18 = vshrl.u32 %v9789_v59, 16  ;;  %v8727_v20 = vld [vmem:[%s11437_s4] sm:$0xff]  }
  0xb0   : > { %7865 = vmatprep.mubr.msk.bf16.mxu1 %vm962_vm3, %v6950_v48  ;;  %v670_v42 = vshll.u32 %v9789_v59, 16  ;;  %v676_v10 = vshll.u32 %v9813_v5, 16  ;;  %v680_v1 = vshrl.u32 %v9813_v5, 16  ;;  %v686_v45 = vshll.u32 %v8815_v44, 16  ;;  %7889 = vmatprep.subr.bf16.mxu1 %v8727_v20  ;;  %v7222_v36 = vld [vmem:[%s8933_s27 + $0xc0] sm:$0xe] }
  0xb1   : > { %v9809_v62 = vsel %vm8926_vm2, %v7236_v58, %v3175_v15  ;;  %v3177_v31 = vrot.slane %v3175_v15, 4  ;;  %v665_v52 = vsel %vm9119_vm6, %v660_v32, %v664_v37  ;;  %v669_v23 = vrot.slane %v667_v18, 4  ;;  %7890 = vmatpush3.bf16.msra.mxu1 %v8727_v20 }
  0xb2   : > { %11569 = vst [vmem:[#allocation9_spill] sm:$0xff] %v9809_v62  ;;  %v6951_v58 = vcombine.low %v655_v29, %v665_v52  ;;  %v672_v26 = vrot.slane %v670_v42, 5  ;;  %v678_v37 = vrot.slane %v676_v10, 5  ;;  %v11572_v15 = vrot.slane %v9090_v47, 5 }
  0xb3   : > { %v9832_v48 = vsel %vm8926_vm2, %v3177_v31, %v3178_v38  ;;  %v682_v18 = vrot.slane %v680_v1, 4  ;;  %v694_v29 = vshll.u32 %v9817_v43, 16  ;;  %v9842_v38 = vld [vmem:[%s8933_s27 + $0x58] sm:$0xf]  ;;  %v688_v52 = vrot.slane %v686_v45, 5 }
  0xb4   : > { %11571 = vst [vmem:[#allocation14_spill] sm:$0xff] %v9832_v48  ;;  %v3093_v32 = vrot.slane %v11572_v15, 4  ;;  %7866 = vmatmul.mubr.msk.bf16.gmra.mrb[8].mxu1 %vm962_vm3, %v6951_v58  ;;  %v700_v31 = vshll.u32 %v9842_v38, 16  ;;  %v704_v42 = vshrl.u32 %v9842_v38, 16  ;;  %v8817_v15 = vld [vmem:[%s8933_s27 + $0x5c] sm:$0x1] }
  0xb5   : > { %8006 = vmatmul.mubr.msk.bf16.gmra.mrb[12].mxu0 %vm962_vm3, %v11570_v50  ;;  %v691_v50 = vshrl.u32 %v9817_v43, 16  ;;  %v683_v10 = vor.u32 %v682_v18, %v678_v37  ;;  %v710_v1 = vshll.u32 %v8817_v15, 16  ;;  %v696_v48 = vrot.slane %v694_v29, 5 }
  0xb6   : > { %8009 = vmatprep.mubr.msk.bf16.mxu0 %vm962_vm3, %v9484_v51  ;;  %v673_v51 = vor.u32 %v672_v26, %v669_v23  ;;  %v702_v58 = vrot.slane %v700_v31, 5  ;;  %v706_v23 = vrot.slane %v704_v42, 4  ;;  %v2720_v26 = vsel %vm9119_vm6, %v9537_v17, %v9521_v63  ;;  %v9863_v42 = vld [vmem:[%s8933_s27 + $0x60] sm:$0xf] }
  0xb7   : > { %v693_v44 = vrot.slane %v691_v50, 4  ;;  %v11573_v62 = vrot.slane %v9090_v47, 5  ;;  %v11574_v18 = vrot.slane %v9465_v56, 9  ;;  %v684_v50 = vrot.slane %v683_v10, 4  ;;  %v8823_v10 = vld [vmem:[%s8933_s27 + $0x80] sm:$0x1] }
  0xb8   : > { %v674_v4 = vrot.slane %v673_v51, 4  ;;  %v712_v15 = vrot.slane %v710_v1, 5  ;;  %v707_v29 = vor.u32 %v706_v23, %v702_v58  ;;  %v7238_v31 = vrot.slane %v7222_v36, 9 }
  0xb9   : > { %v9858_v45 = vsel %vm8926_vm2, %v11574_v18, %v11573_v62  ;;  %v697_v51 = vor.u32 %v696_v48, %v693_v44  ;;  %v11575_v56 = vrot.slane %v9097_v54, 5  ;;  %v689_v17 = vsel %vm9119_vm6, %v684_v50, %v688_v52  ;;  %v9902_v52 = vld [vmem:[%s8933_s27 + $0x6c] sm:$0xf] }
  0xba   : > { %v679_v20 = vsel %vm9119_vm6, %v674_v4, %v678_v37  ;;  %v3189_v4 = vrot.slane %v9432_v7, 5  ;;  %v708_v48 = vrot.slane %v707_v29, 4  ;;  %v3192_v37 = vrot.slane %v9446_v28, 5 }
  0xbb   : > { %v9873_v63 = vsel %vm8926_vm2, %v3093_v32, %v11575_v56  ;;  %v6952_v62 = vcombine.low %v679_v20, %v689_v17  ;;  %v11576_v54 = vsel %vm9119_vm6, %v9505_v39, %v9459_v49  ;;  %v718_v39 = vshll.u32 %v9863_v42, 16  ;;  %v8819_v20 = vld [vmem:[%s8933_s27 + $0x68] sm:$0x1]  ;;  %v9920_v17 = vld [vmem:[%s8933_s27 + $0x70] sm:$0xf] }
  0xbc   : > { %v9886_v32 = vcombine.low %v11576_v54, %v2720_v26  ;;  %v9890_v36 = vsel %vm8926_vm2, %v7238_v31, %v3189_v4  ;;  %v3191_v7 = vrot.slane %v3189_v4, 4  ;;  %v713_v49 = vsel %vm9119_vm6, %v708_v48, %v712_v15  ;;  %v9909_v26 = vld [vmem:[%s8933_s27 + $0x64] sm:$0xf] }
  0xbd   : > { %8010 = vmatmul.mubr.msk.bf16.gmra.mrb[16].mxu0 %vm962_vm3, %v9496_v9  ;;  %v698_v9 = vrot.slane %v697_v51, 4  ;;  %11577 = vst [vmem:[#allocation17_spill] sm:$0xff] %v9890_v36  ;;  %7869 = vmatprep.mubr.msk.bf16.mxu1 %vm962_vm3, %v6952_v62  ;;  %v724_v18 = vshll.u32 %v9909_v26, 16  ;;  %v720_v50 = vrot.slane %v718_v39, 5  ;;  %v728_v15 = vshrl.u32 %v9909_v26, 16 }
  0xbe   : > { %8013 = vmatprep.mubr.msk.bf16.mxu0 %vm962_vm3, %v9503_v41  ;;  %v715_v41 = vshrl.u32 %v9863_v42, 16  ;;  %v9906_v1 = vsel %vm8926_vm2, %v3191_v7, %v3192_v37  ;;  %v734_v51 = vshll.u32 %v8819_v20, 16  ;;  %v739_v31 = vshrl.u32 %v9902_v52, 16  ;;  %v9924_v62 = vld [vmem:[%s8933_s27 + $0x78] sm:$0xf] }
  0xbf   : > { %v703_v28 = vsel %vm9119_vm6, %v698_v9, %v702_v58  ;;  %11578 = vst [vmem:[#allocation18_spill] sm:$0xff] %v9906_v1  ;;  %v726_v29 = vrot.slane %v724_v18, 5  ;;  %v742_v56 = vshll.u32 %v9902_v52, 16  ;;  %v748_v4 = vshll.u32 %v9920_v17, 16 }
  0xc0   : > { %v6953_v44 = vcombine.low %v703_v28, %v713_v49  ;;  %v717_v23 = vrot.slane %v715_v41, 4  ;;  %v730_v48 = vrot.slane %v728_v15, 4  ;;  %v736_v37 = vrot.slane %v734_v51, 5  ;;  %v8821_v49 = vld [vmem:[%s8933_s27 + $0x74] sm:$0x1] }
  0xc1   : > { %v752_v54 = vshrl.u32 %v9920_v17, 16  ;;  %v741_v7 = vrot.slane %v739_v31, 4  ;;  %v744_v41 = vrot.slane %v742_v56, 5  ;;  %v750_v28 = vrot.slane %v748_v4, 5  ;;  %v9939_v56 = vld [vmem:[%s8933_s27 + $0x84] sm:$0xf] }
  0xc2   : > { %7870 = vmatmul.mubr.msk.bf16.gmra.mrb[12].mxu1 %vm962_vm3, %v6953_v44  ;;  %v721_v9 = vor.u32 %v720_v50, %v717_v23  ;;  %v758_v39 = vshll.u32 %v8821_v49, 16  ;;  %v731_v18 = vor.u32 %v730_v48, %v726_v29  ;;  %v763_v50 = vshrl.u32 %v9924_v62, 16 }
  0xc3   : > { %v754_v23 = vrot.slane %v752_v54, 4  ;;  %v745_v15 = vor.u32 %v744_v41, %v741_v7  ;;  %v766_v51 = vshll.u32 %v9924_v62, 16  ;;  %v782_v47 = vshll.u32 %v8823_v10, 16 }
  0xc4   : > { %v722_v44 = vrot.slane %v721_v9, 4  ;;  %v760_v20 = vrot.slane %v758_v39, 5  ;;  %v765_v48 = vrot.slane %v763_v50, 4  ;;  %v787_v1 = vshrl.u32 %v9939_v56, 16 }
  0xc5   : > { %8014 = vmatmul.mubr.msk.bf16.gmra.mrb[20].mxu0 %vm962_vm3, %v9507_v0  ;;  %v9935_v0 = vld [vmem:[%s8933_s27 + $0x7c] sm:$0xf]  ;;  %v755_v9 = vor.u32 %v754_v23, %v750_v28  ;;  %v746_v54 = vrot.slane %v745_v15, 4  ;;  %v768_v49 = vrot.slane %v766_v51, 5  ;;  %v9951_v23 = vld [vmem:[%s8933_s27 + $0x90] sm:$0xf] }
  0xc6   : > { %8017 = vmatprep.mubr.msk.bf16.mxu0 %vm962_vm3, %v9509_v53  ;;  %v772_v31 = vshll.u32 %v9935_v0, 16  ;;  %v727_v4 = vsel %vm9119_vm6, %v722_v44, %v726_v29  ;;  %v732_v53 = vrot.slane %v731_v18, 4  ;;  %v776_v41 = vshrl.u32 %v9935_v0, 16 }
  0xc7   : > { %v756_v58 = vrot.slane %v755_v9, 4  ;;  %v751_v29 = vsel %vm9119_vm6, %v746_v54, %v750_v28  ;;  %v769_v44 = vor.u32 %v768_v49, %v765_v48  ;;  %v784_v15 = vrot.slane %v782_v47, 5 }
  0xc8   : > { %v774_v7 = vrot.slane %v772_v31, 5  ;;  %v737_v39 = vsel %vm9119_vm6, %v732_v53, %v736_v37  ;;  %v778_v18 = vrot.slane %v776_v41, 4  ;;  %v789_v37 = vrot.slane %v787_v1, 4 }
  0xc9   : > { %v6954_v36 = vcombine.low %v727_v4, %v737_v39  ;;  %v761_v50 = vsel %vm9119_vm6, %v756_v58, %v760_v20  ;;  %v790_v51 = vshll.u32 %v9939_v56, 16  ;;  %v770_v31 = vrot.slane %v769_v44, 4  ;;  %v9960_v4 = vld [vmem:[%s8933_s27 + $0x88] sm:$0xf]  ;;  %v8825_v58 = vld [vmem:[%s8933_s27 + $0x8c] sm:$0x1] }
  0xca   : > { %v6955_v10 = vcombine.low %v751_v29, %v761_v50  ;;  %v779_v28 = vor.u32 %v778_v18, %v774_v7  ;;  %v796_v53 = vshll.u32 %v9960_v4, 16  ;;  %v800_v1 = vshrl.u32 %v9960_v4, 16  ;;  %v9973_v29 = vld [vmem:[%s8933_s27 + $0x9c] sm:$0xf]  ;;  %v9978_v50 = vld [vmem:[%s8933_s27 + $0x94] sm:$0xf] }
  0xcb   : > { %7873 = vmatprep.mubr.msk.bf16.mxu1 %vm962_vm3, %v6954_v36  ;;  %v792_v47 = vrot.slane %v790_v51, 5  ;;  %v806_v20 = vshll.u32 %v8825_v58, 16  ;;  %v775_v36 = vsel %vm9119_vm6, %v770_v31, %v774_v7  ;;  %v814_v54 = vshll.u32 %v9951_v23, 16 }
  0xcc   : > { %7874 = vmatmul.mubr.msk.bf16.gmra.mrb[16].mxu1 %vm962_vm3, %v6955_v10  ;;  %v780_v9 = vrot.slane %v779_v28, 4  ;;  %v798_v48 = vrot.slane %v796_v53, 5  ;;  %v820_v51 = vshll.u32 %v9978_v50, 16  ;;  %v824_v7 = vshrl.u32 %v9978_v50, 16 }
  0xcd   : > { %8018 = vmatmul.mubr.msk.bf16.gmra.mrb[24].mxu0 %vm962_vm3, %v9511_v24  ;;  %v811_v24 = vshrl.u32 %v9951_v23, 16  ;;  %v793_v49 = vor.u32 %v792_v47, %v789_v37  ;;  %v808_v41 = vrot.slane %v806_v20, 5  ;;  %v816_v18 = vrot.slane %v814_v54, 5  ;;  %v8827_v37 = vld [vmem:[%s8933_s27 + $0x98] sm:$0x1] }
  0xce   : > { %8021 = vmatprep.mubr.msk.bf16.mxu0 %vm962_vm3, %v9516_v22  ;;  %v802_v22 = vrot.slane %v800_v1, 4  ;;  %v785_v44 = vsel %vm9119_vm6, %v780_v9, %v784_v15  ;;  %v830_v53 = vshll.u32 %v8827_v37, 16  ;;  %v822_v1 = vrot.slane %v820_v51, 5 }
  0xcf   : > { %v813_v39 = vrot.slane %v811_v24, 4  ;;  %v6956_v10 = vcombine.low %v775_v36, %v785_v44  ;;  %v794_v31 = vrot.slane %v793_v49, 4  ;;  %v826_v58 = vrot.slane %v824_v7, 4 }
  0xd0   : > { %v803_v28 = vor.u32 %v802_v22, %v798_v48  ;;  %v835_v20 = vshrl.u32 %v9973_v29, 16  ;;  %v832_v9 = vrot.slane %v830_v53, 5  ;;  %v838_v36 = vshll.u32 %v9973_v29, 16 }
  0xd1   : > { %v817_v47 = vor.u32 %v816_v18, %v813_v39  ;;  %7877 = vmatprep.mubr.msk.bf16.mxu1 %vm962_vm3, %v6956_v10  ;;  %v799_v15 = vsel %vm9119_vm6, %v794_v31, %v798_v48  ;;  %v827_v49 = vor.u32 %v826_v58, %v822_v1  ;;  %v9991_v39 = vld [vmem:[%s8933_s27 + $0xa0] sm:$0xf]  ;;  %v9995_v18 = vld [vmem:[%s8933_s27 + $0xa8] sm:$0xf]  ;;  %v11579_v51 = vcombine.low %v9525_v21, %v9547_v40  ;;  %v8829_v10 = vld [vmem:[%s8933_s27 + $0xa4] sm:$0x1] }
  0xd2   : > { %v804_v24 = vrot.slane %v803_v28, 4  ;;  %v837_v22 = vrot.slane %v835_v20, 4  ;;  %v844_v44 = vshll.u32 %v9991_v39, 16  ;;  %v840_v7 = vrot.slane %v838_v36, 5  ;;  %v10013_v36 = vld [vmem:[%s8933_s27 + $0xac] sm:$0xf] }
  0xd3   : > { %v818_v54 = vrot.slane %v817_v47, 4  ;;  %v854_v31 = vshll.u32 %v8829_v10, 16  ;;  %v828_v53 = vrot.slane %v827_v49, 4  ;;  %v859_v20 = vshrl.u32 %v9995_v18, 16  ;;  %v8831_v10 = vld [vmem:[%s8933_s27 + $0xb0] sm:$0x1] }
  0xd4   : > { %v809_v48 = vsel %vm9119_vm6, %v804_v24, %v808_v41  ;;  %v846_v47 = vrot.slane %v844_v44, 5  ;;  %v841_v58 = vor.u32 %v840_v7, %v837_v22  ;;  %v862_v24 = vshll.u32 %v9995_v18, 16 }
  0xd5   : > { %8022 = vmatmul.mubr.msk.bf16.gmra.mrb[28].mxu0 %vm962_vm3, %v9886_v32  ;;  %v848_v32 = vshrl.u32 %v9991_v39, 16  ;;  %v6957_v28 = vcombine.low %v799_v15, %v809_v48  ;;  %v823_v37 = vsel %vm9119_vm6, %v818_v54, %v822_v1  ;;  %v856_v40 = vrot.slane %v854_v31, 5  ;;  %v10018_v54 = vld [vmem:[%s8933_s27 + $0xb4] sm:$0xf]  ;;  %v10023_v48 = vld [vmem:[%s11437_s4 + $0x38] sm:$0xff]  }
  0xd6   : > { %8027 = vmatprep.mubr.msk.bf16.mxu0 %vm962_vm3, %v11579_v51  ;;  %v833_v41 = vsel %vm9119_vm6, %v828_v53, %v832_v9  ;;  %v868_v15 = vshll.u32 %v10013_v36, 16  ;;  %v872_v1 = vshrl.u32 %v10013_v36, 16  ;;  %v842_v22 = vrot.slane %v841_v58, 4 }
  0xd7   : > { %v850_v21 = vrot.slane %v848_v32, 4  ;;  %7878 = vmatmul.mubr.msk.bf16.gmra.mrb[20].mxu1 %vm962_vm3, %v6957_v28  ;;  %v6958_v49 = vcombine.low %v823_v37, %v833_v41  ;;  %v861_v51 = vrot.slane %v859_v20, 4  ;;  %v864_v9 = vrot.slane %v862_v24, 5 }
  0xd8   : > { %v870_v7 = vrot.slane %v868_v15, 5  ;;  %v874_v32 = vrot.slane %v872_v1, 4  ;;  %v878_v31 = vshll.u32 %v8831_v10, 16  ;;  %v847_v28 = vsel %vm9119_vm6, %v842_v22, %v846_v47  ;;  %v10036_v15 = vld [vmem:[%s8933_s27 + $0xb8] sm:$0xf] }
  0xd9   : > { %v851_v44 = vor.u32 %v850_v21, %v846_v47  ;;  %7881 = vmatprep.mubr.msk.bf16.mxu1 %vm962_vm3, %v6958_v49  ;;  %v883_v53 = vshrl.u32 %v10018_v54, 16  ;;  %v886_v58 = vshll.u32 %v10018_v54, 16  ;;  %v11580_v21 = vcombine.low %v9858_v45, %v9873_v63 }
  0xda   : > { %v865_v20 = vor.u32 %v864_v9, %v861_v51  ;;  %v875_v41 = vor.u32 %v874_v32, %v870_v7  ;;  %v880_v24 = vrot.slane %v878_v31, 5  ;;  %v892_v1 = vshll.u32 %v10036_v15, 16  ;;  %v8833_v31 = vld [vmem:[%s8933_s27 + $0xbc] sm:$0x1] }
  0xdb   : > { %v852_v37 = vrot.slane %v851_v44, 4  ;;  %v11581_v47 = vcombine.low %v9542_v60, %v9555_v46  ;;  %v885_v63 = vrot.slane %v883_v53, 4  ;;  %v888_v49 = vrot.slane %v886_v58, 5 }
  0xdc   : > { %v896_v22 = vshrl.u32 %v10036_v15, 16  ;;  %v866_v51 = vrot.slane %v865_v20, 4  ;;  %v876_v9 = vrot.slane %v875_v41, 4  ;;  %v894_v32 = vrot.slane %v892_v1, 5 }
  0xdd   : > { %8028 = vmatmul.mubr.msk.bf16.vlgmr.msra.gmra.mrb[0].mxu0 %vm962_vm3, %v11580_v21  ;;  %v857_v45 = vsel %vm9119_vm6, %v852_v37, %v856_v40  ;;  %v889_v10 = vor.u32 %v888_v49, %v885_v63  ;;  %v902_v21 = vshll.u32 %v8833_v31, 16  ;;  %v11582_v41 = vcombine.low %v9563_v16, %v9576_v57  ;;  %v11594_v63 = vld [vmem:[#allocation8_spill] sm:$0xff]  ;;  %v11596_v49 = vld [vmem:[#allocation10_spill] sm:$0xff] }
  0xde   : > { %8060 = vmatpush3.bf16.msra.mxu0 %v9666_v35  ;;  %8031 = vmatprep.mubr.msk.bf16.mxu0 %vm962_vm3, %v11581_v47  ;;  %v6959_v44 = vcombine.low %v847_v28, %v857_v45  ;;  %v898_v35 = vrot.slane %v896_v22, 4  ;;  %v871_v60 = vsel %vm9119_vm6, %v866_v51, %v870_v7  ;;  %v881_v46 = vsel %vm9119_vm6, %v876_v9, %v880_v24  ;;  %v11591_v45 = vld [vmem:[#allocation6_spill] sm:$0xff]  ;;  %v11599_v51 = vld [vmem:[#allocation24_spill] sm:$0xff]  ;;  %v11600_v9 = vld [vmem:[#allocation13_spill] sm:$0xff] }
  0xdf   : > { %8093 = vmatprep.subr.bf16.mxu0 %v10023_v48  ;;  %v6960_v40 = vcombine.low %v871_v60, %v881_v46  ;;  %v890_v37 = vrot.slane %v889_v10, 4  ;;  %v904_v58 = vrot.slane %v902_v21, 5  ;;  %v11583_v7 = vcombine.low %v9571_v34, %v9588_v13  ;;  %v11587_v13 = vld [vmem:[#allocation22_spill] sm:$0xff]  ;;  %v11601_v10 = vld [vmem:[#allocation11_spill] sm:$0xff]  ;;  %v8834_v60 = vld [vmem:[%s8933_s27 + $0xb8] sm:$0xf] }
  0xe0   : > { %7882 = vmatmul.mubr.msk.bf16.gmra.mrb[24].mxu1 %vm962_vm3, %v6959_v44  ;;  %v899_v53 = vor.u32 %v898_v35, %v894_v32  ;;  %v6979_v1 = vcombine.low %v9567_v3, %v9613_v8  ;;  %v11584_v16 = vcombine.low %v9580_v6, %v9596_v25  ;;  %v6980_v34 = vcombine.low %v9618_v55, %v9635_v19  ;;  %v11586_v6 = vld [vmem:[#allocation21_spill] sm:$0xff]  ;;  %v11589_v8 = vld [vmem:[#allocation4_spill] sm:$0xff]  ;;  %v11590_v55 = vld [vmem:[#allocation23_spill] sm:$0xff] }
  0xe1   : > { %7885 = vmatprep.mubr.msk.bf16.mxu1 %vm962_vm3, %v6960_v40  ;;  %v895_v28 = vsel %vm9119_vm6, %v890_v37, %v894_v32  ;;  %v11585_v57 = vcombine.low %v9600_v30, %v9609_v14  ;;  %v6981_v3 = vcombine.low %v9650_v61, %v9673_v12  ;;  %v11588_v25 = vcombine.low %v11586_v6, %v11587_v13  ;;  %v11592_v30 = vld [vmem:[#allocation7_spill] sm:$0xff]  ;;  %v11597_v22 = vld [vmem:[#allocation2_spill] sm:$0xff]  ;;  %v11602_v35 = vld [vmem:[#allocation12_spill] sm:$0xff] }
  0xe2   : > { %v900_v20 = vrot.slane %v899_v53, 4  ;;  %v6982_v19 = vcombine.low %v11590_v55, %v11589_v8  ;;  %v11593_v14 = vcombine.low %v11591_v45, %v11592_v30  ;;  %v11595_v61 = vld [vmem:[#allocation3_spill] sm:$0xff]  ;;  %v11598_v44 = vcombine.low %v11596_v49, %v11597_v22  ;;  %v7221_v40 = vld [vmem:[%s8933_s27 + $0xb4] sm:$0xe] }
  0xe3   : > { %v6983_v12 = vcombine.low %v11595_v61, %v11594_v63  ;;  %v6984_v32 = vcombine.low %v11600_v9, %v11599_v51  ;;  %v11603_v31 = vcombine.low %v11601_v10, %v11602_v35  ;;  %v6985_v21 = vcombine.low %v9789_v59, %v9813_v5  ;;  %v7341_v45 = vld [vmem:[%s8933_s27 + $0x28] sm:$0xf]  ;;  %v7343_v63 = vld [vmem:[%s8933_s27 + $0x30] sm:$0xf]  ;;  %v10167_v51 = vld [vmem:[%s8933_s27 + $0x34] sm:$0xf] }
  0xe4   : > { %v905_v24 = vsel %vm9119_vm6, %v900_v20, %v904_v58  ;;  %v3182_v46 = vrot.slane %v8834_v60, 5  ;;  %v7237_v37 = vrot.slane %v7221_v40, 9  ;;  %v8835_v58 = vld [vmem:[%s8933_s27 + $0xbc] sm:$0x1]  ;;  %v6986_v59 = vcombine.low %v9817_v43, %v9842_v38  ;;  %v8720_v9 = vld [vmem:[%s8933_s27 + $0x24] sm:$0xff]  }
  0xe5   : > { %8032 = vmatmul.mubr.msk.bf16.gmra.mrb[4].mxu0 %vm962_vm3, %v11582_v41  ;;  %v6961_v47 = vcombine.low %v895_v28, %v905_v24  ;;  %v3185_v28 = vrot.slane %v8835_v58, 5  ;;  %v11604_v20 = vld [vmem:[#allocation5_spill] sm:$0xff]  ;;  %v11605_v41 = vld [vmem:[#allocation16_spill] sm:$0xff]  ;;  %v11607_v5 = vcombine.low %v9785_v33, %v9799_v27  ;;  %v6987_v24 = vcombine.low %v9863_v42, %v9909_v26  ;;  %v11609_v27 = vld [vmem:[#allocation14_spill] sm:$0xff] }
  0xe6   : > { %8035 = vmatprep.mubr.msk.bf16.mxu0 %vm962_vm3, %v11583_v7  ;;  %v3184_v53 = vrot.slane %v3182_v46, 4  ;;  %v11606_v7 = vcombine.low %v11604_v20, %v11605_v41  ;;  %v11608_v33 = vld [vmem:[#allocation9_spill] sm:$0xff]  ;;  %v6988_v38 = vcombine.low %v9902_v52, %v9920_v17  ;;  %v5255_v42 = vld [vmem:[%s11439_s6 + $0x4] sm:$0xf]  ;;  %v6989_v26 = vcombine.low %v9924_v62, %v9935_v0 }
  0xe7   : > { %v11610_v43 = vcombine.low %v11608_v33, %v11609_v27  ;;  %8683 = vmatprep.subr.msk.bf16.mxu1 %vm5385_vm7, %v5255_v42  ;;  %v8718_v52 = vld [vmem:[%s8933_s27 + $0x18] sm:$0xff]   ;;  %v7340_v62 = vld [vmem:[%s8933_s27 + $0x24] sm:$0xf]  ;;  %v6990_v30 = vcombine.low %v9939_v56, %v9960_v4  ;;  %v6991_v61 = vcombine.low %v9951_v23, %v9978_v50  ;;  %v3935_v10 = vshll.u32 %v7341_v45, 16  ;;  %v8721_v56 = vld [vmem:[%s8933_s27 + $0x30] sm:$0xff]  }
  0xe8   : > { %7886 = vmatmul.mubr.msk.bf16.gmra.mrb[28].mxu1 %vm962_vm3, %v6961_v47  ;;  %v3186_v47 = vsel %vm8926_vm2, %v3184_v53, %v3185_v28  ;;  %v7338_v17 = vld [vmem:[%s8933_s27 + $0x1c] sm:$0xf]  ;;  %v3926_v22 = vshrl.u32 %v7340_v62, 16  ;;  %v3939_v35 = vshrl.u32 %v7341_v45, 16  ;;  %v3953_v60 = vshll.u32 %v7343_v63, 16  ;;  %v10187_v58 = vld [vmem:[%s11437_s4 + $0x40] sm:$0xff]  }
  0xe9   : > { %7891 = vmatprep.mubr.msk.bf16.mxu1 %vm962_vm3, %v6979_v1  ;;  %v3183_v1 = vsel %vm8926_vm2, %v7237_v37, %v3182_v46  ;;  %v11611_v0 = vld [vmem:[#allocation17_spill] sm:$0xff]  ;;  %v3911_v55 = vshll.u32 %v7338_v17, 16  ;;  %v3959_v46 = vshll.u32 %v10167_v51, 16  ;;  %v3963_v40 = vshrl.u32 %v10167_v51, 16  ;;  %v10181_v37 = vld [vmem:[%s8933_s27 + $0x40] sm:$0xf] }
  0xea   : > { %v7346_v23 = vld [vmem:[%s8933_s27 + $0x3c] sm:$0xf]  ;;  %v3928_v28 = vrot.slane %v3926_v22, 4  ;;  %v3983_v33 = vshll.u32 %v10181_v37, 16  ;;  %v3987_v27 = vshrl.u32 %v10181_v37, 16 }
  0xeb   : > { %v10172_v4 = vrot.slane %v3911_v55, 5  ;;  %v8723_v55 = vld [vmem:[%s8933_s27 + $0x48] sm:$0xff]  }
  0xed   : > { %8036 = vmatmul.mubr.msk.bf16.gmra.mrb[8].mxu0 %vm962_vm3, %v11584_v16  ;;  %v7253_v16 = vcombine.low %v3183_v1, %v3186_v47  ;;  %v3977_v1 = vshll.u32 %v7346_v23, 16  ;;  %v10193_v47 = vld [vmem:[%s8933_s27 + $0x4c] sm:$0xf] }
  0xee   : > { %8039 = vmatprep.mubr.msk.bf16.mxu0 %vm962_vm3, %v11585_v57  ;;  %v5387_v57 = vsel %vm5385_vm7, %v5255_v42, 0  ;;  %v10202_v42 = vrot.slane %v3959_v46, 5  ;;  %v7355_v46 = vld [vmem:[%s8933_s27 + $0x60] sm:$0xf] }
  0xf0   : > { %7892 = vmatmul.mubr.msk.bf16.vlgmr.msra.gmra.mrb[0].mxu1 %vm962_vm3, %v6980_v34  ;;  %v7337_v34 = vld [vmem:[%s8933_s27 + $0x18] sm:$0xf] }
  0xf1   : > { %7895 = vmatprep.mubr.msk.bf16.mxu1 %vm962_vm3, %v6981_v3  ;;  %8162 = vmatpush3.bf16.msra.mxu1 %v5387_v57  ;;  %v7339_v3 = vld [vmem:[%s8933_s27 + $0x20] sm:$0x1]  ;;  %v3902_v6 = vshrl.u32 %v7337_v34, 16  ;;  %v3905_v13 = vshll.u32 %v7337_v34, 16  ;;  %v6993_v34 = vcombine.low %v9995_v18, %v10013_v36  ;;  %v10208_v57 = vld [vmem:[%s8933_s27 + $0x38] sm:$0x1] }
  0xf3   : > { %v3907_v49 = vrot.slane %v3905_v13, 5 }
  0xf5   : > { %8040 = vmatmul.mubr.msk.bf16.gmra.mrb[12].mxu0 %vm962_vm3, %v11588_v25  ;;  %v11612_v25 = vld [vmem:[#allocation18_spill] sm:$0xff] }
  0xf6   : > { %8043 = vmatprep.mubr.msk.bf16.mxu0 %vm962_vm3, %v11593_v14  ;;  %v11613_v8 = vcombine.low %v11611_v0, %v11612_v25  ;;  %v3921_v14 = vshll.u32 %v7339_v3, 16  ;;  %v10219_v0 = vld [vmem:[%s8933_s27 + $0x44] sm:$0x1]  ;;  %v10221_v25 = vrot.slane %v3983_v33, 5 }
  0xf8   : > { %7896 = vmatmul.mubr.msk.bf16.gmra.mrb[4].mxu1 %vm962_vm3, %v6982_v19  ;;  %v3915_v19 = vshrl.u32 %v7338_v17, 16  ;;  %v10176_v50 = vrot.slane %v3921_v14, 5  ;;  %v3969_v14 = vshll.u32 %v10208_v57, 16 }
  0xf9   : > { %7899 = vmatprep.mubr.msk.bf16.mxu1 %vm962_vm3, %v6983_v12  ;;  %v3904_v12 = vrot.slane %v3902_v6, 4 }
  0xfb   : > { %v3908_v53 = vor.u32 %v3907_v49, %v3904_v12 }
  0xfd   : > { %8044 = vmatmul.mubr.msk.bf16.gmra.mrb[16].mxu0 %vm962_vm3, %v11598_v44  ;;  %v3929_v44 = vshll.u32 %v7340_v62, 16  ;;  %v3979_v62 = vrot.slane %v3977_v1, 5  ;;  %v10214_v18 = vrot.slane %v3908_v53, 4  ;;  %v7358_v1 = vld [vmem:[%s8933_s27 + $0x6c] sm:$0xf] }
  0xfe   : > { %8047 = vmatprep.mubr.msk.bf16.mxu0 %vm962_vm3, %v11603_v31  ;;  %v3917_v31 = vrot.slane %v3915_v19, 4 }
  0xff   : > { %v3931_v20 = vrot.slane %v3929_v44, 5 }
 0x100   : > { %7900 = vmatmul.mubr.msk.bf16.gmra.mrb[8].mxu1 %vm962_vm3, %v6984_v32  ;;  %v7342_v32 = vld [vmem:[%s8933_s27 + $0x2c] sm:$0x1]  ;;  %v3918_v3 = vor.u32 %v3917_v31, %v10172_v4 }
 0x101   : > { %7903 = vmatprep.mubr.msk.bf16.mxu1 %vm962_vm3, %v6985_v21  ;;  %v3950_v21 = vshrl.u32 %v7343_v63, 16  ;;  %v3945_v41 = vshll.u32 %v7342_v32, 16  ;;  %v3932_v6 = vor.u32 %v3931_v20, %v3928_v28  ;;  %v10229_v63 = vld [vmem:[%s8933_s27 + $0x50] sm:$0x1]  ;;  %v10254_v28 = vrot.slane %v3969_v14, 5 }
 0x103   : > { %v10216_v36 = vrot.slane %v3945_v41, 5  ;;  %v10237_v32 = vrot.slane %v3932_v6, 4  ;;  %v8724_v41 = vld [vmem:[%s8933_s27 + $0x54] sm:$0xff]  }
 0x105   : > { %8048 = vmatmul.mubr.msk.bf16.gmra.mrb[20].mxu0 %vm962_vm3, %v11606_v7  ;;  %v7349_v7 = vld [vmem:[%s8933_s27 + $0x48] sm:$0xf] }
 0x106   : > { %8051 = vmatprep.mubr.msk.bf16.mxu0 %vm962_vm3, %v11607_v5  ;;  %v3941_v5 = vrot.slane %v3939_v35, 4  ;;  %v4001_v17 = vshll.u32 %v7349_v7, 16  ;;  %v3993_v35 = vshll.u32 %v10219_v0, 16 }
 0x108   : > { %7904 = vmatmul.mubr.msk.bf16.gmra.mrb[12].mxu1 %vm962_vm3, %v6986_v59  ;;  %v10190_v59 = vrot.slane %v3935_v10, 5  ;;  %v4003_v49 = vrot.slane %v4001_v17, 5  ;;  %v10266_v33 = vrot.slane %v3993_v35, 5 }
 0x109   : > { %7907 = vmatprep.mubr.msk.bf16.mxu1 %vm962_vm3, %v6987_v24  ;;  %v3974_v24 = vshrl.u32 %v7346_v23, 16 }
 0x10a   : > { %v3942_v19 = vor.u32 %v3941_v5, %v10190_v59 }
 0x10b   : > { %v3976_v13 = vrot.slane %v3974_v24, 4 }
 0x10d   : > { %8052 = vmatmul.mubr.msk.bf16.gmra.mrb[24].mxu0 %vm962_vm3, %v11610_v43  ;;  %v6992_v43 = vcombine.low %v9973_v29, %v9991_v39  ;;  %v4007_v29 = vshll.u32 %v10193_v47, 16  ;;  %v4011_v39 = vshrl.u32 %v10193_v47, 16  ;;  %v3980_v10 = vor.u32 %v3979_v62, %v3976_v13  ;;  %v10287_v13 = vld [vmem:[%s8933_s27 + $0x70] sm:$0xf] }
 0x10e   : > { %8055 = vmatprep.mubr.msk.bf16.mxu0 %vm962_vm3, %v7253_v16  ;;  %v3952_v16 = vrot.slane %v3950_v21, 4  ;;  %v4017_v21 = vshll.u32 %v10229_v63, 16  ;;  %v4070_v62 = vshrl.u32 %v7358_v1, 16  ;;  %v4079_v35 = vshll.u32 %v10287_v13, 16 }
 0x10f   : > { %v10233_v22 = vrot.slane %v4007_v29, 5  ;;  %v4013_v44 = vrot.slane %v4011_v39, 4  ;;  %v7420_v39 = vld [vmem:[%s8933_s27 + $0x30] sm:$0xe] }
 0x110   : > { %7908 = vmatmul.mubr.msk.bf16.gmra.mrb[16].mxu1 %vm962_vm3, %v6988_v38  ;;  %v3955_v38 = vrot.slane %v3953_v60, 5  ;;  %v6994_v60 = vcombine.low %v10018_v54, %v10036_v15  ;;  %v10262_v15 = vld [vmem:[%s8933_s27 + $0x64] sm:$0xf]  ;;  %v10276_v17 = vrot.slane %v4017_v21, 5  ;;  %v4665_v21 = vrot.slane %v10208_v57, 5 }
 0x111   : > { %7911 = vmatprep.mubr.msk.bf16.mxu1 %vm962_vm3, %v6989_v26  ;;  %v3965_v26 = vrot.slane %v3963_v40, 4  ;;  %v10250_v40 = vrot.slane %v3942_v19, 4  ;;  %v4014_v24 = vor.u32 %v4013_v44, %v10233_v22  ;;  %v4059_v6 = vshrl.u32 %v10262_v15, 16  ;;  %v7421_v44 = vld [vmem:[%s8933_s27 + $0x3c] sm:$0xe] }
 0x112   : > { %v3956_v45 = vor.u32 %v3955_v38, %v3952_v16  ;;  %v8725_v16 = vld [vmem:[%s8933_s27 + $0x60] sm:$0xff]   ;;  %v4046_v38 = vshrl.u32 %v7355_v46, 16  ;;  %v4669_v57 = vrot.slane %v10181_v37, 5  ;;  %v8730_v37 = vld [vmem:[%s8933_s27 + $0x78] sm:$0xff]  }
 0x114   : > { %v10252_v53 = vrot.slane %v3956_v45, 4 }
 0x115   : > { %8056 = vmatmul.mubr.msk.bf16.gmra.mrb[28].mxu0 %vm962_vm3, %v11613_v8  ;;  %v3989_v8 = vrot.slane %v3987_v27, 4  ;;  %v10269_v27 = vld [vmem:[%s8933_s27 + $0x5c] sm:$0x1] }
 0x116   : > { %8061 = vmatprep.mubr.msk.bf16.mxu0 %vm962_vm3, %v8718_v52  ;;  %v3998_v52 = vshrl.u32 %v7349_v7, 16 }
 0x117   : > { %v3990_v31 = vor.u32 %v3989_v8, %v10221_v25 }
 0x118   : > { %7912 = vmatmul.mubr.msk.bf16.gmra.mrb[20].mxu1 %vm962_vm3, %v6990_v30  ;;  %v3966_v30 = vor.u32 %v3965_v26, %v10202_v42  ;;  %v4000_v12 = vrot.slane %v3998_v52, 4  ;;  %v4049_v26 = vshll.u32 %v7355_v46, 16  ;;  %v10314_v46 = vrot.slane %v4059_v6, 4 }
 0x119   : > { %7915 = vmatprep.mubr.msk.bf16.mxu1 %vm962_vm3, %v6991_v61  ;;  %v7352_v61 = vld [vmem:[%s8933_s27 + $0x54] sm:$0xf]  ;;  %v10274_v52 = vrot.slane %v3990_v31, 4  ;;  %v4662_v31 = vrot.slane %v10167_v51, 5 }
 0x11a   : > { %v4022_v23 = vshrl.u32 %v7352_v61, 16  ;;  %v4025_v20 = vshll.u32 %v7352_v61, 16  ;;  %v10257_v7 = vrot.slane %v3966_v30, 4  ;;  %v4004_v5 = vor.u32 %v4003_v49, %v4000_v12  ;;  %v10297_v30 = vld [vmem:[%s8933_s27 + $0x68] sm:$0x1] }
 0x11b   : > { %v10301_v61 = vrot.slane %v4046_v38, 4  ;;  %v10303_v12 = vrot.slane %v4049_v26, 5  ;;  %v7436_v49 = vrot.slane %v7420_v39, 9  ;;  %v4664_v51 = vrot.slane %v4662_v31, 4  ;;  %v8726_v38 = vld [vmem:[%s8933_s27 + $0x6c] sm:$0xff]  }
 0x11c   : > { %v10278_v29 = vrot.slane %v4022_v23, 4  ;;  %v10289_v8 = vrot.slane %v4004_v5, 4  ;;  %v7422_v23 = vld [vmem:[%s8933_s27 + $0x48] sm:$0xe]  ;;  %v10330_v39 = vrot.slane %v4079_v35, 5 }
 0x11d   : > { %8062 = vmatmul.mubr.msk.bf16.vlgmr.msra.gmra.mrb[0].mxu0 %vm962_vm3, %v8720_v9  ;;  %v10235_v9 = vrot.slane %v3918_v3, 4  ;;  %v4055_v3 = vshll.u32 %v10262_v15, 16  ;;  %v10321_v5 = vsel %vm8926_vm2, %v7436_v49, %v4662_v31  ;;  %v4676_v49 = vrot.slane %v10193_v47, 5 }
 0x11e   : > { %8094 = vmatpush3.bf16.msra.mxu0 %v10023_v48  ;;  %8065 = vmatprep.mubr.msk.bf16.mxu0 %vm962_vm3, %v8721_v56  ;;  %v8722_v48 = vld [vmem:[%s8933_s27 + $0x3c] sm:$0xff]   ;;  %v10241_v56 = vld [vmem:[%s8933_s27 + $0x58] sm:$0xf]  ;;  %11614 = vst [vmem:[#allocation19_spill] sm:$0xff] %v10321_v5  ;;  %v4686_v31 = vrot.slane %v10269_v27, 5 }
 0x11f   : > { %8127 = vmatprep.subr.bf16.mxu0 %v10187_v58  ;;  %v4031_v54 = vshll.u32 %v10241_v56, 16  ;;  %v4683_v35 = vrot.slane %v10241_v56, 5  ;;  %v4678_v47 = vrot.slane %v4676_v49, 4 }
 0x120   : > { %7916 = vmatmul.mubr.msk.bf16.gmra.mrb[24].mxu1 %vm962_vm3, %v6992_v43  ;;  %v4035_v43 = vshrl.u32 %v10241_v56, 16  ;;  %v4697_v56 = vrot.slane %v10287_v13, 5 }
 0x121   : > { %7919 = vmatprep.mubr.msk.bf16.mxu1 %vm962_vm3, %v6993_v34  ;;  %v10272_v34 = vrot.slane %v3980_v10, 4  ;;  %v10293_v19 = vrot.slane %v4031_v54, 5  ;;  %v4073_v10 = vshll.u32 %v7358_v1, 16  ;;  %v4672_v54 = vrot.slane %v10219_v0, 5  ;;  %v8731_v0 = vld [vmem:[%s8933_s27 + $0x84] sm:$0xff]  }
 0x122   : > { %v10299_v14 = vrot.slane %v4035_v43, 4  ;;  %v7438_v1 = vrot.slane %v7422_v23, 9  ;;  %v7424_v43 = vld [vmem:[%s8933_s27 + $0x60] sm:$0xe]  ;;  %v7425_v23 = vld [vmem:[%s8933_s27 + $0x6c] sm:$0xe] }
 0x123   : > { %v10328_v26 = vrot.slane %v4073_v10, 5 }
 0x125   : > { %8066 = vmatmul.mubr.msk.bf16.gmra.mrb[4].mxu0 %vm962_vm3, %v8722_v48  ;;  %v10282_v48 = vrot.slane %v4025_v20, 5  ;;  %v10408_v20 = vld [vmem:[%s8933_s27 + $0x8c] sm:$0x1] }
 0x126   : > { %8069 = vmatprep.mubr.msk.bf16.mxu0 %vm962_vm3, %v8723_v55  ;;  %v10291_v55 = vrot.slane %v4014_v24, 4  ;;  %v7437_v24 = vrot.slane %v7421_v44, 9  ;;  %v4679_v44 = vrot.slane %v10229_v63, 5  ;;  %v4690_v63 = vrot.slane %v10262_v15, 5  ;;  %v10369_v15 = vld [vmem:[%s8933_s27 + $0x74] sm:$0x1] }
 0x128   : > { %7920 = vmatmul.mubr.msk.bf16.gmra.mrb[28].mxu1 %vm962_vm3, %v6994_v60  ;;  %v10312_v60 = vrot.slane %v4055_v3, 5  ;;  %v10334_v3 = vsel %vm8926_vm2, %v4664_v51, %v4665_v21  ;;  %v10338_v6 = vsel %vm8926_vm2, %v7437_v24, %v4669_v57  ;;  %v7440_v21 = vrot.slane %v7424_v43, 9  ;;  %v10372_v43 = vld [vmem:[%s8933_s27 + $0x7c] sm:$0xf] }
 0x129   : > { %11615 = vst [vmem:[#allocation20_spill] sm:$0xff] %v10334_v3  ;;  %11616 = vst [vmem:[#allocation15_spill] sm:$0xff] %v10338_v6  ;;  %v10354_v24 = vsel %vm8926_vm2, %v7438_v1, %v4676_v49  ;;  %v7426_v1 = vld [vmem:[%s8933_s27 + $0x78] sm:$0xe]  ;;  %v4692_v49 = vrot.slane %v4690_v63, 4 }
 0x12a   : > { %11618 = vst [vmem:[#allocation22_spill] sm:$0xff] %v10354_v24  ;;  %v10463_v3 = vld [vmem:[%s8933_s27 + $0xa4] sm:$0x1] }
 0x12b   : > { %11630 = vst [vmem:[#allocation12_spill] sm:$0xff] %v10463_v3 }
 0x12d   : > { %8070 = vmatmul.mubr.msk.bf16.gmra.mrb[8].mxu0 %vm962_vm3, %v8724_v41  ;;  %v10317_v41 = vrot.slane %v4070_v62, 4  ;;  %v4671_v62 = vrot.slane %v4669_v57, 4 }
 0x12e   : > { %8073 = vmatprep.mubr.msk.bf16.mxu0 %vm962_vm3, %v8725_v16  ;;  %v7423_v16 = vld [vmem:[%s8933_s27 + $0x54] sm:$0xe] }
 0x12f   : > { %v7439_v10 = vrot.slane %v7423_v16, 9  ;;  %v10350_v51 = vsel %vm8926_vm2, %v4671_v62, %v4672_v54  ;;  %v4685_v54 = vrot.slane %v4683_v35, 4  ;;  %v4693_v16 = vrot.slane %v10297_v30, 5 }
 0x130   : > { %11617 = vst [vmem:[#allocation21_spill] sm:$0xff] %v10350_v51  ;;  %v10380_v62 = vsel %vm8926_vm2, %v7440_v21, %v4690_v63  ;;  %v10394_v21 = vld [vmem:[%s8933_s27 + $0x80] sm:$0x1]  ;;  %v4699_v63 = vrot.slane %v4697_v56, 4 }
 0x131   : > { %v10363_v57 = vsel %vm8926_vm2, %v7439_v10, %v4683_v35  ;;  %11621 = vst [vmem:[#allocation6_spill] sm:$0xff] %v10380_v62  ;;  %v7441_v10 = vrot.slane %v7425_v23, 9  ;;  %v10397_v23 = vld [vmem:[%s8933_s27 + $0x88] sm:$0xf]  ;;  %v4704_v35 = vrot.slane %v10372_v43, 5 }
 0x132   : > { %11619 = vst [vmem:[#allocation4_spill] sm:$0xff] %v10363_v57  ;;  %v10448_v57 = vld [vmem:[%s8933_s27 + $0xa0] sm:$0xf] }
 0x133   : > { %v4706_v45 = vrot.slane %v4704_v35, 4 }
 0x135   : > { %8074 = vmatmul.mubr.msk.bf16.gmra.mrb[12].mxu0 %vm962_vm3, %v8726_v38  ;;  %v10376_v38 = vsel %vm8926_vm2, %v4678_v47, %v4679_v44  ;;  %v4700_v44 = vrot.slane %v10369_v15, 5  ;;  %v7427_v47 = vld [vmem:[%s8933_s27 + $0x84] sm:$0xe] }
 0x136   : > { %8077 = vmatprep.mubr.msk.bf16.mxu0 %vm962_vm3, %v8730_v37  ;;  %11620 = vst [vmem:[#allocation23_spill] sm:$0xff] %v10376_v38  ;;  %v10386_v37 = vsel %vm8926_vm2, %v4685_v54, %v4686_v31  ;;  %v10403_v31 = vsel %vm8926_vm2, %v4692_v49, %v4693_v16  ;;  %v7442_v54 = vrot.slane %v7426_v1, 9  ;;  %v10414_v38 = vsel %vm8926_vm2, %v7441_v10, %v4697_v56  ;;  %v8734_v1 = vld [vmem:[%s8933_s27 + $0x90] sm:$0xff]   ;;  %v10436_v56 = vld [vmem:[%s8933_s27 + $0x98] sm:$0x1] }
 0x137   : > { %11622 = vst [vmem:[#allocation7_spill] sm:$0xff] %v10386_v37  ;;  %11623 = vst [vmem:[#allocation8_spill] sm:$0xff] %v10403_v31  ;;  %v4707_v16 = vrot.slane %v10394_v21, 5  ;;  %v10422_v49 = vld [vmem:[%s8933_s27 + $0x94] sm:$0xf]  ;;  %v7443_v31 = vrot.slane %v7427_v47, 9  ;;  %v10440_v62 = vsel %vm8926_vm2, %v4699_v63, %v4700_v44 }
 0x138   : > { %11624 = vst [vmem:[#allocation3_spill] sm:$0xff] %v10414_v38  ;;  %v10426_v37 = vsel %vm8926_vm2, %v7442_v54, %v4704_v35  ;;  %v4711_v10 = vrot.slane %v10397_v23, 5  ;;  %11626 = vst [vmem:[#allocation2_spill] sm:$0xff] %v10436_v56  ;;  %v4714_v35 = vrot.slane %v10408_v20, 5  ;;  %v8753_v54 = vld [vmem:[%s10433_s12] sm:$0xff]   ;;  %v8754_v63 = vld [vmem:[%s10433_s12 + $0x8] sm:$0xff]  }
 0x139   : > { %11625 = vst [vmem:[#allocation10_spill] sm:$0xff] %v10426_v37  ;;  %11627 = vst [vmem:[#allocation24_spill] sm:$0xff] %v10440_v62  ;;  %v10445_v47 = vld [vmem:[%s8933_s27 + $0x78] sm:$0xf]  ;;  %v10454_v51 = vsel %vm8926_vm2, %v4706_v45, %v4707_v16  ;;  %v5222_v45 = vld [vmem:[%s11439_s6] sm:$0xf]  ;;  %8163 = vmatprep.mubr.msk.bf16.mxu1 %vm5336_vm8, %v8753_v54 }
 0x13a   : > { %11628 = vst [vmem:[#allocation13_spill] sm:$0xff] %v10454_v51  ;;  %v10458_v6 = vsel %vm8926_vm2, %v7443_v31, %v4711_v10  ;;  %v4713_v44 = vrot.slane %v4711_v10, 4  ;;  %v7428_v16 = vld [vmem:[%s8933_s27 + $0x90] sm:$0xe]  ;;  %v4718_v31 = vrot.slane %v10422_v49, 5  ;;  %v4721_v24 = vrot.slane %v10436_v56, 5  ;;  %8684 = vmatprep.subr.msk.bf16.mxu1 %vm5385_vm7, %v5222_v45  ;;  %8164 = vmatmul.mubr.msk.bf16.vlgmr.msra.gmra.mrb[32].mxu1 %vm5336_vm8, %v8754_v63 }
 0x13b   : > { %11629 = vst [vmem:[#allocation11_spill] sm:$0xff] %v10458_v6  ;;  %v7444_v5 = vrot.slane %v7428_v16, 9  ;;  %v7429_v51 = vld [vmem:[%s8933_s27 + $0x9c] sm:$0xe]  ;;  %v4725_v54 = vrot.slane %v10448_v57, 5  ;;  %v4083_v16 = vshrl.u32 %v10287_v13, 16 }
 0x13c   : > { %v10475_v10 = vsel %vm8926_vm2, %v4713_v44, %v4714_v35  ;;  %v8735_v37 = vld [vmem:[%s8933_s27 + $0x9c] sm:$0xff]   ;;  %v7445_v35 = vrot.slane %v7429_v51, 9  ;;  %v8738_v44 = vld [vmem:[%s8933_s27 + $0xa8] sm:$0xff]   ;;  %v4094_v63 = vshrl.u32 %v10445_v47, 16  ;;  %v10513_v6 = vld [vmem:[%s8933_s27 + $0xb8] sm:$0xf] }
 0x13d   : > { %8078 = vmatmul.mubr.msk.bf16.gmra.mrb[16].mxu0 %vm962_vm3, %v8731_v0  ;;  %11631 = vst [vmem:[#allocation5_spill] sm:$0xff] %v10475_v10  ;;  %v5679_v0 = vsel %vm5385_vm7, %v5222_v45, 0  ;;  %v10491_v38 = vsel %vm8926_vm2, %v7444_v5, %v4718_v31  ;;  %v4728_v45 = vrot.slane %v10463_v3, 5  ;;  %v4727_v13 = vrot.slane %v4725_v54, 4  ;;  %v10507_v10 = vld [vmem:[%s8933_s27 + $0xb0] sm:$0x1] }
 0x13e   : > { %8081 = vmatprep.mubr.msk.bf16.mxu0 %vm962_vm3, %v8734_v1  ;;  %v4720_v1 = vrot.slane %v4718_v31, 4  ;;  %8196 = vmatpush3.bf16.msra.mxu1 %v5679_v0  ;;  %11632 = vst [vmem:[#allocation16_spill] sm:$0xff] %v10491_v38  ;;  %v10501_v62 = vsel %vm8926_vm2, %v7445_v35, %v4725_v54  ;;  %v10504_v0 = vld [vmem:[%s8933_s27 + $0xac] sm:$0xf]  ;;  %v4097_v31 = vshll.u32 %v10445_v47, 16  ;;  %11635 = vst [vmem:[#allocation17_spill] sm:$0xff] %v10513_v6 }
 0x13f   : > { %11634 = vst [vmem:[#allocation14_spill] sm:$0xff] %v10501_v62  ;;  %v8755_v35 = vld [vmem:[%s10433_s12 + $0x10] sm:$0xff]   ;;  %v10523_v54 = vrot.slane %v4083_v16, 4  ;;  %v8756_v56 = vld [vmem:[%s10433_s12 + $0x18] sm:$0xff]   ;;  %v7430_v47 = vld [vmem:[%s8933_s27 + $0xa8] sm:$0xe] }
 0x140   : > { %v10497_v51 = vsel %vm8926_vm2, %v4720_v1, %v4721_v24  ;;  %v10516_v24 = vld [vmem:[%s8933_s27 + $0xbc] sm:$0x1]  ;;  %v10520_v1 = vsel %vm8926_vm2, %v4727_v13, %v4728_v45  ;;  %8167 = vmatprep.mubr.msk.bf16.mxu1 %vm5336_vm8, %v8755_v35  ;;  %v4732_v5 = vrot.slane %v10504_v0, 5  ;;  %v4103_v45 = vshll.u32 %v10372_v43, 16  ;;  %v7431_v13 = vld [vmem:[%s8933_s27 + $0xb4] sm:$0xe] }
 0x141   : > { %11633 = vst [vmem:[#allocation9_spill] sm:$0xff] %v10497_v51  ;;  %11636 = vst [vmem:[#allocation18_spill] sm:$0xff] %v10516_v24  ;;  %v4735_v51 = vrot.slane %v10507_v10, 5  ;;  %v7446_v16 = vrot.slane %v7430_v47, 9  ;;  %v4739_v3 = vrot.slane %v10513_v6, 5  ;;  %v3914_v35 = vsel %vm9119_vm6, %v10214_v18, %v10172_v4  ;;  %v8742_v38 = vld [vmem:[%s8933_s27 + $0xc0] sm:$0xff]  }
 0x142   : > { %11637 = vst [vmem:[#allocation25_spill] sm:$0xff] %v10520_v1  ;;  %v8739_v1 = vld [vmem:[%s8933_s27 + $0xb4] sm:$0xff]   ;;  %8168 = vmatmul.mubr.msk.bf16.gmra.mrb[36].mxu1 %vm5336_vm8, %v8756_v56  ;;  %v4734_v47 = vrot.slane %v4732_v5, 4  ;;  %v7447_v62 = vrot.slane %v7431_v13, 9  ;;  %v10549_v6 = vrot.slane %v4094_v63, 4 }
 0x143   : > { %v4741_v4 = vrot.slane %v4739_v3, 4  ;;  %v10566_v56 = vld [vmem:[%s8933_s27 + $0xc4] sm:$0xf]  ;;  %v10569_v63 = vld [vmem:[%s8933_s27 + $0xc8] sm:$0x1] }
 0x144   : > { %v10557_v18 = vsel %vm8926_vm2, %v4734_v47, %v4735_v51  ;;  %v10585_v51 = vrot.slane %v4097_v31, 5  ;;  %v10588_v13 = vld [vmem:[%s8933_s27 + $0xd0] sm:$0xf]  ;;  %v4052_v47 = vor.u32 %v10303_v12, %v10301_v61  ;;  %v4746_v31 = vrot.slane %v10566_v56, 5 }
 0x145   : > { %8082 = vmatmul.mubr.msk.bf16.gmra.mrb[20].mxu0 %vm962_vm3, %v8735_v37  ;;  %v4742_v37 = vrot.slane %v10516_v24, 5  ;;  %v10553_v24 = vsel %vm8926_vm2, %v7446_v16, %v4732_v5  ;;  %11639 = vst [vmem:[#allocation27_spill] sm:$0xff] %v10557_v18  ;;  %v4107_v5 = vshrl.u32 %v10372_v43, 16  ;;  %v7433_v43 = vld [vmem:[%s8933_s27 + $0xcc] sm:$0xe]  ;;  %v4076_v61 = vor.u32 %v10328_v26, %v10317_v41 }
 0x146   : > { %8085 = vmatprep.mubr.msk.bf16.mxu0 %vm962_vm3, %v8738_v44  ;;  %v3924_v44 = vsel %vm9119_vm6, %v10235_v9, %v10176_v50  ;;  %11638 = vst [vmem:[#allocation26_spill] sm:$0xff] %v10553_v24  ;;  %v10561_v50 = vsel %vm8926_vm2, %v7447_v62, %v4739_v3  ;;  %v8758_v3 = vld [vmem:[%s10433_s12 + $0x28] sm:$0xff]   ;;  %v7432_v62 = vld [vmem:[%s8933_s27 + $0xc0] sm:$0xe]  ;;  %v4089_v12 = vshll.u32 %v10369_v15, 16  ;;  %v10628_v18 = vrot.slane %v4103_v45, 5 }
 0x147   : > { %11640 = vst [vmem:[#allocation28_spill] sm:$0xff] %v10561_v50  ;;  %v10563_v9 = vcombine.low %v3914_v35, %v3924_v44  ;;  %v10575_v16 = vsel %vm8926_vm2, %v4741_v4, %v4742_v37  ;;  %v10591_v35 = vld [vmem:[%s8933_s27 + $0xd4] sm:$0x1]  ;;  %v8757_v44 = vld [vmem:[%s10433_s12 + $0x20] sm:$0xff]   ;;  %v4028_v4 = vor.u32 %v10282_v48, %v10278_v29  ;;  %v4038_v37 = vor.u32 %v10299_v14, %v10293_v19 }
 0x148   : > { %11641 = vst [vmem:[#allocation29_spill] sm:$0xff] %v10575_v16  ;;  %11642 = vst [vmem:[#allocation30_spill] sm:$0xff] %v10591_v35  ;;  %8171 = vmatprep.mubr.msk.bf16.mxu1 %vm5336_vm8, %v8757_v44  ;;  %v4749_v16 = vrot.slane %v10569_v63, 5  ;;  %v4062_v29 = vor.u32 %v10314_v46, %v10312_v60  ;;  %v7448_v48 = vrot.slane %v7432_v62, 9  ;;  %v4753_v14 = vrot.slane %v10588_v13, 5 }
 0x149   : > { %v7364_v44 = vld [vmem:[%s8933_s27 + $0x84] sm:$0xf]  ;;  %v4748_v50 = vrot.slane %v4746_v31, 4  ;;  %v4109_v24 = vrot.slane %v4107_v5, 4  ;;  %v4086_v41 = vor.u32 %v10523_v54, %v10330_v39  ;;  %v4100_v26 = vor.u32 %v10585_v51, %v10549_v6 }
 0x14a   : > { %8172 = vmatmul.mubr.msk.bf16.gmra.mrb[40].mxu1 %vm5336_vm8, %v8758_v3  ;;  %v10632_v46 = vsel %vm8926_vm2, %v7448_v48, %v4746_v31  ;;  %v4755_v62 = vrot.slane %v4753_v14, 4  ;;  %v4113_v5 = vshll.u32 %v10394_v21, 16  ;;  %v4118_v3 = vshrl.u32 %v7364_v44, 16  ;;  %v8759_v48 = vld [vmem:[%s10433_s12 + $0x30] sm:$0xff]  }
 0x14b   : > { %v10641_v15 = vsel %vm8926_vm2, %v4748_v50, %v4749_v16  ;;  %v4121_v6 = vshll.u32 %v7364_v44, 16  ;;  %v4127_v51 = vshll.u32 %v10397_v23, 16  ;;  %v4131_v50 = vshrl.u32 %v10397_v23, 16  ;;  %v7367_v44 = vld [vmem:[%s8933_s27 + $0x90] sm:$0xf]  ;;  %8175 = vmatprep.mubr.msk.bf16.mxu1 %vm5336_vm8, %v8759_v48 }
 0x14c   : > { %v10661_v21 = vrot.slane %v4038_v37, 4  ;;  %v10671_v23 = vrot.slane %v4052_v47, 4  ;;  %v10673_v16 = vrot.slane %v4062_v29, 4  ;;  %v10679_v31 = vrot.slane %v4089_v12, 5  ;;  %v7370_v29 = vld [vmem:[%s8933_s27 + $0x9c] sm:$0xf] }
 0x14d   : > { %8086 = vmatmul.mubr.msk.bf16.gmra.mrb[24].mxu0 %vm962_vm3, %v8739_v1  ;;  %v4756_v1 = vrot.slane %v10591_v35, 5  ;;  %v8743_v35 = vld [vmem:[%s8933_s27 + $0xcc] sm:$0xff]   ;;  %v10691_v47 = vrot.slane %v4113_v5, 5  ;;  %v10702_v12 = vrot.slane %v4121_v6, 5  ;;  %v10716_v5 = vld [vmem:[%s11439_s6 + $0x8] sm:$0xf]  ;;  %v11646_v6 = vsel %vm9119_vm6, %v10237_v32, %v10190_v59 }
 0x14e   : > { %8089 = vmatprep.mubr.msk.bf16.mxu0 %vm962_vm3, %v8742_v38  ;;  %v7449_v38 = vrot.slane %v7433_v43, 9  ;;  %v10659_v43 = vrot.slane %v4028_v4, 4  ;;  %v11644_v4 = vshll.u32 %v10297_v30, 16  ;;  %v10700_v30 = vrot.slane %v4118_v3, 4  ;;  %8685 = vmatprep.subr.msk.bf16.mxu1 %vm5385_vm7, %v10716_v5 }
 0x14f   : > { %v10652_v54 = vsel %vm8926_vm2, %v4755_v62, %v4756_v1  ;;  %v4110_v1 = vor.u32 %v4109_v24, %v10628_v18  ;;  %v8760_v62 = vld [vmem:[%s10433_s12 + $0x38] sm:$0xff]   ;;  %v10685_v24 = vrot.slane %v4076_v61, 4  ;;  %v10706_v61 = vrot.slane %v4131_v50, 4 }
 0x150   : > { %v10645_v45 = vsel %vm8926_vm2, %v7449_v38, %v4753_v14  ;;  %v11643_v14 = vshll.u32 %v10269_v27, 16  ;;  %v10677_v37 = vrot.slane %v11644_v4, 5  ;;  %v8761_v27 = vld [vmem:[%s10433_s12 + $0x40] sm:$0xff]   ;;  %v11645_v3 = vsel %vm9119_vm6, %v10250_v40, %v10216_v36  ;;  %v7373_v4 = vld [vmem:[%s8933_s27 + $0xa8] sm:$0xf] }
 0x151   : > { %v4142_v50 = vshrl.u32 %v7367_v44, 16  ;;  %v11647_v48 = vsel %vm9119_vm6, %v10257_v7, %v10254_v28  ;;  %v11648_v36 = vsel %vm9119_vm6, %v10252_v53, %v10202_v42  ;;  %v4155_v59 = vshrl.u32 %v10422_v49, 16 }
 0x152   : > { %v10665_v38 = vrot.slane %v11643_v14, 5  ;;  %v10687_v14 = vrot.slane %v4086_v41, 4  ;;  %8176 = vmatmul.mubr.msk.bf16.gmra.mrb[44].mxu1 %vm5336_vm8, %v8760_v62  ;;  %v10709_v41 = vrot.slane %v4110_v1, 4  ;;  %v7387_v40 = vcombine.low %v11648_v36, %v11647_v48 }
 0x153   : > { %8179 = vmatprep.mubr.msk.bf16.mxu1 %vm5336_vm8, %v8761_v27  ;;  %v4151_v1 = vshll.u32 %v10422_v49, 16  ;;  %v4166_v32 = vshrl.u32 %v7370_v29, 16  ;;  %v4169_v62 = vshll.u32 %v7370_v29, 16  ;;  %v8763_v27 = vld [vmem:[%s10433_s12 + $0x50] sm:$0xff]   ;;  %v3986_v28 = vsel %vm9119_vm6, %v10272_v34, %v10221_v25 }
 0x154   : > { %v3996_v42 = vsel %vm9119_vm6, %v10274_v52, %v10266_v33  ;;  %v10754_v53 = vrot.slane %v4142_v50, 4  ;;  %v4010_v49 = vsel %vm9119_vm6, %v10289_v8, %v10233_v22  ;;  %v4020_v25 = vsel %vm9119_vm6, %v10291_v55, %v10276_v17 }
 0x155   : > { %8090 = vmatmul.mubr.msk.bf16.gmra.mrb[28].mxu0 %vm962_vm3, %v8743_v35  ;;  %v10689_v35 = vrot.slane %v4100_v26, 4  ;;  %v4137_v26 = vshll.u32 %v10408_v20, 16  ;;  %v4145_v20 = vshll.u32 %v7367_v44, 16  ;;  %v8762_v44 = vld [vmem:[%s10433_s12 + $0x48] sm:$0xff]   ;;  %v10766_v34 = vrot.slane %v4151_v1, 5 }
 0x156   : > { %8095 = vmatprep.mubr.msk.bf16.mxu0 %vm962_vm3, %v10563_v9  ;;  %v10704_v9 = vrot.slane %v4127_v51, 5  ;;  %v7386_v51 = vcombine.low %v11646_v6, %v11645_v3  ;;  %v4175_v33 = vshll.u32 %v10448_v57, 16  ;;  %v4157_v52 = vrot.slane %v4155_v59, 4 }
 0x157   : > { %v4147_v7 = vrot.slane %v4145_v20, 5  ;;  %v4168_v29 = vrot.slane %v4166_v32, 4  ;;  %v4179_v3 = vshrl.u32 %v10448_v57, 16  ;;  %v7388_v22 = vcombine.low %v3986_v28, %v3996_v42  ;;  %v11651_v42 = vld [vmem:[#allocation17_spill] sm:$0xff] }
 0x158   : > { %v7389_v8 = vcombine.low %v4010_v49, %v4020_v25  ;;  %v4190_v6 = vshrl.u32 %v7373_v4, 16  ;;  %v4034_v17 = vsel %vm9119_vm6, %v10659_v43, %v10293_v19  ;;  %v4044_v55 = vsel %vm9119_vm6, %v10661_v21, %v10665_v38  ;;  %v8764_v43 = vld [vmem:[%s10433_s12 + $0x58] sm:$0xff]   ;;  %v8765_v21 = vld [vmem:[%s10433_s12 + $0x60] sm:$0xff]  }
 0x159   : > { %v10780_v50 = vrot.slane %v4175_v33, 5  ;;  %v4199_v57 = vshll.u32 %v10504_v0, 16  ;;  %v4058_v20 = vsel %vm9119_vm6, %v10671_v23, %v10312_v60  ;;  %v4068_v48 = vsel %vm9119_vm6, %v10673_v16, %v10677_v37 }
 0x15a   : > { %8180 = vmatmul.mubr.msk.bf16.gmra.mrb[48].mxu1 %vm5336_vm8, %v8762_v44  ;;  %v4203_v19 = vshrl.u32 %v10504_v0, 16  ;;  %v4181_v36 = vrot.slane %v4179_v3, 4  ;;  %v7390_v38 = vcombine.low %v4034_v17, %v4044_v55  ;;  %v7391_v59 = vcombine.low %v4058_v20, %v4068_v48 }
 0x15b   : > { %8183 = vmatprep.mubr.msk.bf16.mxu1 %vm5336_vm8, %v8763_v27  ;;  %v4082_v60 = vsel %vm9119_vm6, %v10685_v24, %v10330_v39  ;;  %v4092_v0 = vsel %vm9119_vm6, %v10687_v14, %v10679_v31  ;;  %v4106_v16 = vsel %vm9119_vm6, %v10689_v35, %v10628_v18  ;;  %v4124_v23 = vor.u32 %v10702_v12, %v10700_v30  ;;  %v7376_v39 = vld [vmem:[%s8933_s27 + $0xb4] sm:$0xf] }
 0x15c   : > { %v4134_v37 = vor.u32 %v10706_v61, %v10704_v9  ;;  %v10812_v32 = vrot.slane %v4199_v57, 5  ;;  %v4205_v44 = vrot.slane %v4203_v19, 4  ;;  %v4139_v24 = vrot.slane %v4137_v26, 5  ;;  %v11650_v12 = vld [vmem:[#allocation12_spill] sm:$0xff] }
 0x15d   : > { %8096 = vmatmul.mubr.msk.bf16.vlgmr.msra.gmra.mrb[0].mxu0 %vm962_vm3, %v7386_v51  ;;  %v4193_v51 = vshll.u32 %v7373_v4, 16  ;;  %v4148_v31 = vor.u32 %v4147_v7, %v10754_v53  ;;  %v4158_v14 = vor.u32 %v4157_v52, %v10766_v34  ;;  %v4182_v30 = vor.u32 %v4181_v36, %v10780_v50  ;;  %v7379_v52 = vld [vmem:[%s8933_s27 + $0xc0] sm:$0xf] }
 0x15e   : > { %8128 = vmatpush3.bf16.msra.mxu0 %v10187_v58  ;;  %8099 = vmatprep.mubr.msk.bf16.mxu0 %vm962_vm3, %v7387_v40  ;;  %v4171_v58 = vrot.slane %v4169_v62, 5  ;;  %v4192_v40 = vrot.slane %v4190_v6, 4  ;;  %v11649_v62 = vld [vmem:[#allocation2_spill] sm:$0xff]  ;;  %v4185_v61 = vshll.u32 %v11650_v12, 16  ;;  %v4209_v27 = vshll.u32 %v10507_v10, 16 }
 0x15f   : > { %v4195_v1 = vrot.slane %v4193_v51, 5  ;;  %v4161_v18 = vshll.u32 %v11649_v62, 16  ;;  %v4214_v26 = vshrl.u32 %v7376_v39, 16  ;;  %v4217_v28 = vshll.u32 %v7376_v39, 16 }
 0x160   : > { %v4172_v35 = vor.u32 %v4171_v58, %v4168_v29  ;;  %v4223_v53 = vshll.u32 %v11651_v42, 16  ;;  %v4116_v7 = vsel %vm9119_vm6, %v10709_v41, %v10691_v47  ;;  %v4125_v49 = vrot.slane %v4124_v23, 4  ;;  %v8766_v29 = vld [vmem:[%s10433_s12 + $0x68] sm:$0xff]  }
 0x161   : > { %v4196_v4 = vor.u32 %v4195_v1, %v4192_v40  ;;  %v4206_v25 = vor.u32 %v4205_v44, %v10812_v32  ;;  %v4227_v33 = vshrl.u32 %v11651_v42, 16  ;;  %v4135_v58 = vrot.slane %v4134_v37, 4  ;;  %v8768_v1 = vld [vmem:[%s10433_s12 + $0x78] sm:$0xff]   ;;  %v8769_v37 = vld [vmem:[%s10698_s19] sm:$0xff]  }
 0x162   : > { %8184 = vmatmul.mubr.msk.bf16.gmra.mrb[52].mxu1 %vm5336_vm8, %v8764_v43  ;;  %v4149_v3 = vrot.slane %v4148_v31, 4  ;;  %v4163_v10 = vrot.slane %v4161_v18, 5  ;;  %v4173_v6 = vrot.slane %v4172_v35, 4  ;;  %v4183_v51 = vrot.slane %v4182_v30, 4  ;;  %v8770_v18 = vld [vmem:[%s10698_s19 + $0x8] sm:$0xff]   ;;  %v11652_v30 = vld [vmem:[#allocation18_spill] sm:$0xff] }
 0x163   : > { %8187 = vmatprep.mubr.msk.bf16.mxu1 %vm5336_vm8, %v8765_v21  ;;  %v4187_v17 = vrot.slane %v4185_v61, 5  ;;  %v4197_v55 = vrot.slane %v4196_v4, 4  ;;  %v4211_v47 = vrot.slane %v4209_v27, 5  ;;  %v4216_v41 = vrot.slane %v4214_v26, 4  ;;  %v8771_v61 = vld [vmem:[%s10698_s19 + $0x10] sm:$0xff]  }
 0x164   : > { %v4219_v57 = vrot.slane %v4217_v28, 5  ;;  %v10835_v20 = vrot.slane %v4223_v53, 5  ;;  %v4207_v48 = vrot.slane %v4206_v25, 4  ;;  %v4229_v19 = vrot.slane %v4227_v33, 4 }
 0x165   : > { %8100 = vmatmul.mubr.msk.bf16.gmra.mrb[4].mxu0 %vm962_vm3, %v7388_v22  ;;  %v4159_v22 = vrot.slane %v4158_v14, 4  ;;  %v4238_v43 = vshrl.u32 %v7379_v52, 16  ;;  %v4241_v36 = vshll.u32 %v7379_v52, 16  ;;  %v4247_v21 = vshll.u32 %v10566_v56, 16  ;;  %v7382_v14 = vld [vmem:[%s8933_s27 + $0xcc] sm:$0xf] }
 0x166   : > { %8103 = vmatprep.mubr.msk.bf16.mxu0 %vm962_vm3, %v7389_v8  ;;  %v8767_v8 = vld [vmem:[%s10433_s12 + $0x70] sm:$0xff]   ;;  %v7392_v40 = vcombine.low %v4082_v60, %v4092_v0  ;;  %v4130_v44 = vsel %vm9119_vm6, %v4125_v49, %v10704_v9  ;;  %v4154_v60 = vsel %vm9119_vm6, %v4149_v3, %v10766_v34  ;;  %v4188_v34 = vsel %vm9119_vm6, %v4183_v51, %v4187_v17  ;;  %v8772_v17 = vld [vmem:[%s10698_s19 + $0x18] sm:$0xff]   ;;  %s6943_s12 = sshll.u32 %s11693_s28, 3 }
 0x167   : > { %v4240_v23 = vrot.slane %v4238_v43, 4  ;;  %v4164_v0 = vsel %vm9119_vm6, %v4159_v22, %v4163_v10  ;;  %v4249_v39 = vrot.slane %v4247_v21, 5  ;;  %v4202_v35 = vsel %vm9119_vm6, %v4197_v55, %v10812_v32  ;;  %v8773_v55 = vld [vmem:[%s10698_s19 + $0x20] sm:$0xff]  }
 0x168   : > { %v7395_v9 = vcombine.low %v4154_v60, %v4164_v0  ;;  %v4233_v12 = vshll.u32 %v11652_v30, 16  ;;  %v4212_v4 = vsel %vm9119_vm6, %v4207_v48, %v4211_v47  ;;  %v4220_v27 = vor.u32 %v4219_v57, %v4216_v41  ;;  %v8837_v0 = vld [vmem:[%s8933_s27 + $0x20] sm:$0x1] }
 0x169   : > { %v4230_v26 = vor.u32 %v4229_v19, %v10835_v20  ;;  %v4262_v28 = vshrl.u32 %v7382_v14, 16  ;;  %v4265_v42 = vshll.u32 %v7382_v14, 16  ;;  %v4271_v32 = vshll.u32 %v10588_v13, 16  ;;  %v11653_v19 = vld [vmem:[#allocation30_spill] sm:$0xff] }
 0x16a   : > { %8188 = vmatmul.mubr.msk.bf16.gmra.mrb[56].mxu1 %vm5336_vm8, %v8766_v29  ;;  %v4275_v53 = vshrl.u32 %v10588_v13, 16  ;;  %v4257_v33 = vshll.u32 %v10569_v63, 16  ;;  %v7397_v52 = vcombine.low %v4202_v35, %v4212_v4  ;;  %v4221_v29 = vrot.slane %v4220_v27, 4  ;;  %v7419_v35 = vld [vmem:[%s8933_s27 + $0x24] sm:$0xe] }
 0x16b   : > { %8191 = vmatprep.mubr.msk.bf16.mxu1 %vm5336_vm8, %v8767_v8  ;;  %v4231_v13 = vrot.slane %v4230_v26, 4  ;;  %v4264_v3 = vrot.slane %v4262_v28, 4  ;;  %v4267_v22 = vrot.slane %v4265_v42, 5  ;;  %v4273_v10 = vrot.slane %v4271_v32, 5  ;;  %v8839_v4 = vld [vmem:[%s8933_s27 + $0x2c] sm:$0x1] }
 0x16c   : > { %v4277_v63 = vrot.slane %v4275_v53, 4  ;;  %v4259_v51 = vrot.slane %v4257_v33, 5  ;;  %v4226_v47 = vsel %vm9119_vm6, %v4221_v29, %v10835_v20  ;;  %v4281_v43 = vshll.u32 %v11653_v19, 16  ;;  %v8776_v26 = vld [vmem:[%s10698_s19 + $0x38] sm:$0xff]   ;;  %v8778_v53 = vld [vmem:[%s10698_s19 + $0x48] sm:$0xff]   ;;  %v11655_v33 = vld [vmem:[#allocation20_spill] sm:$0xff] }
 0x16d   : > { %8104 = vmatmul.mubr.msk.bf16.gmra.mrb[8].mxu0 %vm962_vm3, %v7390_v38  ;;  %v4251_v38 = vshrl.u32 %v10566_v56, 16  ;;  %v4140_v56 = vsel %vm9119_vm6, %v4135_v58, %v4139_v24  ;;  %v4178_v24 = vsel %vm9119_vm6, %v4173_v6, %v10780_v50  ;;  %v6004_v50 = vsel %vm5385_vm7, %v10716_v5, 0  ;;  %v11657_v29 = vld [vmem:[#allocation15_spill] sm:$0xff] }
 0x16e   : > { %8107 = vmatprep.mubr.msk.bf16.mxu0 %vm962_vm3, %v7391_v59  ;;  %v7393_v59 = vcombine.low %v4106_v16, %v4116_v7  ;;  %v4243_v16 = vrot.slane %v4241_v36, 5  ;;  %v7394_v31 = vcombine.low %v4130_v44, %v4140_v56  ;;  %v10887_v7 = vld [vmem:[%s11439_s6 + $0xc] sm:$0xf]  ;;  %v7396_v5 = vcombine.low %v4178_v24, %v4188_v34 }
 0x16f   : > { %v4253_v62 = vrot.slane %v4251_v38, 4  ;;  %v4235_v58 = vrot.slane %v4233_v12, 5  ;;  %v4268_v57 = vor.u32 %v4267_v22, %v4264_v3  ;;  %v4278_v48 = vor.u32 %v4277_v63, %v4273_v10  ;;  %v8836_v38 = vld [vmem:[%s8933_s27 + $0x1c] sm:$0xf]  ;;  %v11660_v3 = vld [vmem:[#allocation22_spill] sm:$0xff]  ;;  %v11661_v22 = vld [vmem:[#allocation23_spill] sm:$0xff] }
 0x170   : > { %v4244_v49 = vor.u32 %v4243_v16, %v4240_v23  ;;  %v4648_v20 = vrot.slane %v8836_v38, 5  ;;  %v4283_v44 = vrot.slane %v4281_v43, 5  ;;  %v4651_v16 = vrot.slane %v8837_v0, 5  ;;  %v8782_v63 = vld [vmem:[%s10698_s19 + $0x68] sm:$0xff]   ;;  %v11670_v43 = vld [vmem:[#allocation24_spill] sm:$0xff]  ;;  %v11673_v38 = vld [vmem:[#allocation13_spill] sm:$0xff] }
 0x171   : > { %v4254_v25 = vor.u32 %v4253_v62, %v4249_v39  ;;  %v4236_v41 = vsel %vm9119_vm6, %v4231_v13, %v4235_v58  ;;  %v4269_v23 = vrot.slane %v4268_v57, 4  ;;  %v8838_v62 = vld [vmem:[%s8933_s27 + $0x28] sm:$0xf]  ;;  %v7435_v11 = vrot.slane %v7419_v35, 9  ;;  %v11658_v13 = vld [vmem:[#allocation21_spill] sm:$0xff] }
 0x172   : > { %8192 = vmatmul.mubr.msk.bf16.gmra.mrb[60].mxu1 %vm5336_vm8, %v8768_v1  ;;  %v4245_v8 = vrot.slane %v4244_v49, 4  ;;  %v7398_v1 = vcombine.low %v4226_v47, %v4236_v41  ;;  %v4650_v60 = vrot.slane %v4648_v20, 4  ;;  %v4658_v27 = vrot.slane %v8839_v4, 5  ;;  %v8779_v49 = vld [vmem:[%s10698_s19 + $0x50] sm:$0xff]   ;;  %v8784_v57 = vld [vmem:[%s10698_s19 + $0x78] sm:$0xff]   ;;  %v11669_v19 = vld [vmem:[#allocation3_spill] sm:$0xff] }
 0x173   : > { %8197 = vmatprep.mubr.msk.bf16.mxu1 %vm5336_vm8, %v8769_v37  ;;  %v4255_v6 = vrot.slane %v4254_v25, 4  ;;  %v4279_v37 = vrot.slane %v4278_v48, 4  ;;  %v4274_v14 = vsel %vm9119_vm6, %v4269_v23, %v4273_v10  ;;  %v11654_v25 = vld [vmem:[#allocation19_spill] sm:$0xff]  ;;  %v11659_v58 = vcombine.low %v11657_v29, %v11658_v13  ;;  %v11667_v47 = vld [vmem:[#allocation8_spill] sm:$0xff]  ;;  %v8785_v48 = vld [vmem:[%s10842_s24] sm:$0xff]  }
 0x174   : > { %v4250_v36 = vsel %vm9119_vm6, %v4245_v8, %v4249_v39  ;;  %v8774_v39 = vld [vmem:[%s10698_s19 + $0x28] sm:$0xff]   ;;  %v4652_v34 = vsel %vm8926_vm2, %v4650_v60, %v4651_v16  ;;  %v11662_v10 = vcombine.low %v11660_v3, %v11661_v22  ;;  %v8783_v8 = vld [vmem:[%s10698_s19 + $0x70] sm:$0xff]   ;;  %v11676_v23 = vld [vmem:[#allocation5_spill] sm:$0xff] }
 0x175   : > { %8108 = vmatmul.mubr.msk.bf16.gmra.mrb[12].mxu0 %vm962_vm3, %v7392_v40  ;;  %v4260_v21 = vsel %vm9119_vm6, %v4255_v6, %v4259_v51  ;;  %v7418_v40 = vld [vmem:[%s8933_s27 + $0x18] sm:$0xe]  ;;  %v11663_v6 = vld [vmem:[#allocation4_spill] sm:$0xff]  ;;  %v11664_v51 = vld [vmem:[#allocation7_spill] sm:$0xff] }
 0x176   : > { %8111 = vmatprep.mubr.msk.bf16.mxu0 %vm962_vm3, %v7393_v59  ;;  %v7399_v59 = vcombine.low %v4250_v36, %v4260_v21  ;;  %v7434_v56 = vrot.slane %v7418_v40, 9  ;;  %v11671_v36 = vcombine.low %v11669_v19, %v11670_v43  ;;  %v11672_v21 = vld [vmem:[#allocation10_spill] sm:$0xff]  ;;  %v8786_v40 = vld [vmem:[%s10842_s24 + $0x8] sm:$0xff]   ;;  %v11679_v60 = vld [vmem:[#allocation9_spill] sm:$0xff] }
 0x177   : > { %v8788_v16 = vld [vmem:[%s10842_s24 + $0x18] sm:$0xff]   ;;  %v11687_v4 = vld [vmem:[#allocation28_spill] sm:$0xff]  ;;  %v8797_v22 = vld [vmem:[%s10842_s24 + $0x60] sm:$0xff]  }
 0x178   : > { %v4649_v24 = vsel %vm8926_vm2, %v7434_v56, %v4648_v20  ;;  %v11674_v20 = vcombine.low %v11672_v21, %v11673_v38  ;;  %v11678_v56 = vld [vmem:[#allocation16_spill] sm:$0xff] }
 0x179   : > { %v7450_v12 = vcombine.low %v4649_v24, %v4652_v34  ;;  %v11680_v0 = vcombine.low %v11678_v56, %v11679_v60  ;;  %v11685_v24 = vld [vmem:[#allocation27_spill] sm:$0xff]  ;;  %v8795_v29 = vld [vmem:[%s10842_s24 + $0x50] sm:$0xff]  }
 0x17a   : > { %8198 = vmatmul.mubr.msk.bf16.vlgmr.msra.gmra.mrb[32].mxu1 %vm5336_vm8, %v8770_v18  ;;  %v4655_v18 = vrot.slane %v8838_v62, 5 }
 0x17b   : > { %8230 = vmatpush3.bf16.msra.mxu1 %v6004_v50  ;;  %8201 = vmatprep.mubr.msk.bf16.mxu1 %vm5336_vm8, %v8771_v61  ;;  %v8777_v50 = vld [vmem:[%s10698_s19 + $0x40] sm:$0xff]  }
 0x17c   : > { %8686 = vmatprep.subr.msk.bf16.mxu1 %vm5385_vm7, %v10887_v7  ;;  %v4657_v61 = vrot.slane %v4655_v18, 4  ;;  %v4656_v28 = vsel %vm8926_vm2, %v7435_v11, %v4655_v18  ;;  %v11684_v18 = vld [vmem:[#allocation26_spill] sm:$0xff] }
 0x17d   : > { %8112 = vmatmul.mubr.msk.bf16.gmra.mrb[16].mxu0 %vm962_vm3, %v7394_v31  ;;  %v8775_v31 = vld [vmem:[%s10698_s19 + $0x30] sm:$0xff]   ;;  %v11686_v34 = vcombine.low %v11684_v18, %v11685_v24 }
 0x17e   : > { %8115 = vmatprep.mubr.msk.bf16.mxu0 %vm962_vm3, %v7395_v9  ;;  %v4284_v9 = vsel %vm9119_vm6, %v4279_v37, %v4283_v44  ;;  %v4659_v42 = vsel %vm8926_vm2, %v4657_v61, %v4658_v27  ;;  %v6265_v44 = vsel %vm5385_vm7, %v10887_v7, 0  ;;  %v8791_v61 = vld [vmem:[%s10842_s24 + $0x30] sm:$0xff]   ;;  %v11688_v27 = vld [vmem:[#allocation29_spill] sm:$0xff] }
 0x17f   : > { %v7400_v30 = vcombine.low %v4274_v14, %v4284_v9  ;;  %v7451_v32 = vcombine.low %v4656_v28, %v4659_v42  ;;  %v11681_v14 = vld [vmem:[#allocation14_spill] sm:$0xff]  ;;  %v11682_v9 = vld [vmem:[#allocation25_spill] sm:$0xff]  ;;  %v11690_v28 = vcombine.low %v10632_v46, %v10641_v15 }
 0x180   : > { %v11683_v62 = vcombine.low %v11681_v14, %v11682_v9 }
 0x182   : > { %8202 = vmatmul.mubr.msk.bf16.gmra.mrb[36].mxu1 %vm5336_vm8, %v8772_v17  ;;  %v11665_v17 = vcombine.low %v11663_v6, %v11664_v51  ;;  %v8798_v6 = vld [vmem:[%s10842_s24 + $0x68] sm:$0xff]  }
 0x183   : > { %8205 = vmatprep.mubr.msk.bf16.mxu1 %vm5336_vm8, %v8773_v55  ;;  %v11666_v55 = vld [vmem:[#allocation6_spill] sm:$0xff] }
 0x184   : > { %v11668_v41 = vcombine.low %v11666_v55, %v11667_v47 }
 0x185   : > { %8116 = vmatmul.mubr.msk.bf16.gmra.mrb[20].mxu0 %vm962_vm3, %v7396_v5  ;;  %v11656_v5 = vcombine.low %v11654_v25, %v11655_v33  ;;  %v8793_v25 = vld [vmem:[%s10842_s24 + $0x40] sm:$0xff]   ;;  %v11691_v33 = vcombine.low %v10645_v45, %v10652_v54 }
 0x186   : > { %8119 = vmatprep.mubr.msk.bf16.mxu0 %vm962_vm3, %v7397_v52  ;;  %v8781_v52 = vld [vmem:[%s10698_s19 + $0x60] sm:$0xff]   ;;  %s11208_s19 = scalar_lea.vmem %s11443_s10, %s6943_s12 }
 0x18a   : > { %8206 = vmatmul.mubr.msk.bf16.gmra.mrb[40].mxu1 %vm5336_vm8, %v8774_v39 }
 0x18b   : > { %8209 = vmatprep.mubr.msk.bf16.mxu1 %vm5336_vm8, %v8775_v31  ;;  %v8789_v31 = vld [vmem:[%s10842_s24 + $0x20] sm:$0xff]  }
 0x18d   : > { %8120 = vmatmul.mubr.msk.bf16.gmra.mrb[24].mxu0 %vm962_vm3, %v7398_v1  ;;  %v8787_v1 = vld [vmem:[%s10842_s24 + $0x10] sm:$0xff]  }
 0x18e   : > { %8123 = vmatprep.mubr.msk.bf16.mxu0 %vm962_vm3, %v7399_v59  ;;  %v11675_v59 = vld [vmem:[#allocation11_spill] sm:$0xff] }
 0x18f   : > { %v11677_v37 = vcombine.low %v11675_v59, %v11676_v23  ;;  %v11115_v23 = vld [vmem:[%s11438_s5] ss:$0 sm:$0xff] }
 0x192   : > { %8210 = vmatmul.mubr.msk.bf16.gmra.mrb[44].mxu1 %vm5336_vm8, %v8776_v26  ;;  %v11689_v26 = vcombine.low %v11687_v4, %v11688_v27 }
 0x193   : > { %8213 = vmatprep.mubr.msk.bf16.mxu1 %vm5336_vm8, %v8777_v50 }
 0x195   : > { %8124 = vmatmul.mubr.msk.bf16.gmra.mrb[28].mxu0 %vm962_vm3, %v7400_v30 }
 0x196   : > { %8129 = vmatprep.mubr.msk.bf16.mxu0 %vm962_vm3, %v7450_v12  ;;  %v8790_v12 = vld [vmem:[%s10842_s24 + $0x28] sm:$0xff]  }
 0x19a   : > { %8214 = vmatmul.mubr.msk.bf16.gmra.mrb[48].mxu1 %vm5336_vm8, %v8778_v53  ;;  %v8792_v53 = vld [vmem:[%s10842_s24 + $0x38] sm:$0xff]  }
 0x19b   : > { %8217 = vmatprep.mubr.msk.bf16.mxu1 %vm5336_vm8, %v8779_v49 }
 0x19d   : > { %8130 = vmatmul.mubr.msk.bf16.vlgmr.msra.gmra.mrb[0].mxu0 %vm962_vm3, %v7451_v32 }
 0x19e   : > { %8133 = vmatprep.mubr.msk.bf16.mxu0 %vm962_vm3, %v11656_v5 }
 0x1a2   : > { %8218 = vmatmul.mubr.msk.bf16.gmra.mrb[52].mxu1 %vm5336_vm8, %v8780_v2  ;;  %v8794_v2 = vld [vmem:[%s10842_s24 + $0x48] sm:$0xff]  }
 0x1a3   : > { %8221 = vmatprep.mubr.msk.bf16.mxu1 %vm5336_vm8, %v8781_v52 }
 0x1a5   : > { %8134 = vmatmul.mubr.msk.bf16.gmra.mrb[4].mxu0 %vm962_vm3, %v11659_v58  ;;  %v8796_v58 = vld [vmem:[%s10842_s24 + $0x58] sm:$0xff]  }
 0x1a6   : > { %8137 = vmatprep.mubr.msk.bf16.mxu0 %vm962_vm3, %v11662_v10 }
 0x1aa   : > { %8222 = vmatmul.mubr.msk.bf16.gmra.mrb[56].mxu1 %vm5336_vm8, %v8782_v63 }
 0x1ab   : > { %8225 = vmatprep.mubr.msk.bf16.mxu1 %vm5336_vm8, %v8783_v8 }
 0x1ad   : > { %8138 = vmatmul.mubr.msk.bf16.gmra.mrb[8].mxu0 %vm962_vm3, %v11665_v17 }
 0x1ae   : > { %8141 = vmatprep.mubr.msk.bf16.mxu0 %vm962_vm3, %v11668_v41  ;;  %v8799_v41 = vld [vmem:[%s10842_s24 + $0x70] sm:$0xff]  }
 0x1b2   : > { %8226 = vmatmul.mubr.msk.bf16.gmra.mrb[60].mxu1 %vm5336_vm8, %v8784_v57 }
 0x1b3   : > { %8231 = vmatprep.mubr.msk.bf16.mxu1 %vm5336_vm8, %v8785_v48  ;;  %v8800_v48 = vld [vmem:[%s10842_s24 + $0x78] sm:$0xff]   ;;  %s11332_s24 = scalar_lea.vmem %s11444_s11, %s6943_s12 }
 0x1b5   : > { %8142 = vmatmul.mubr.msk.bf16.gmra.mrb[12].mxu0 %vm962_vm3, %v11671_v36 }
 0x1b6   : > { %8145 = vmatprep.mubr.msk.bf16.mxu0 %vm962_vm3, %v11674_v20 }
 0x1ba   : > { %8232 = vmatmul.mubr.msk.bf16.vlgmr.msra.gmra.mrb[32].mxu1 %vm5336_vm8, %v8786_v40 }
 0x1bb   : > { %8264 = vmatpush3.bf16.msra.mxu1 %v6265_v44  ;;  %8235 = vmatprep.mubr.msk.bf16.mxu1 %vm5336_vm8, %v8787_v1  ;;  %v8801_v1 = vld [vmem:[%s11441_s8] sm:$0xff]  }
 0x1bc   : > { %8297 = vmatprep.subr.bf16.mxu1 %v8801_v1 }
 0x1bd   : > { %8146 = vmatmul.mubr.msk.bf16.gmra.mrb[16].mxu0 %vm962_vm3, %v11677_v37 }
 0x1be   : > { %8149 = vmatprep.mubr.msk.bf16.mxu0 %vm962_vm3, %v11680_v0 }
 0x1c2   : > { %8236 = vmatmul.mubr.msk.bf16.gmra.mrb[36].mxu1 %vm5336_vm8, %v8788_v16 }
 0x1c3   : > { %v11000_v39 = vpop.f32.mrb[0].mxu1  ;;  %8239 = vmatprep.mubr.msk.bf16.mxu1 %vm5336_vm8, %v8789_v31 }
 0x1c4   : > { %v11007_v7 = vpop.f32.mrb[1].mxu1 }
 0x1c5   : > { %8150 = vmatmul.mubr.msk.bf16.gmra.mrb[20].mxu0 %vm962_vm3, %v11683_v62  ;;  %v11013_v35 = vpop.f32.mrb[2].mxu1 }
 0x1c6   : > { %8153 = vmatprep.mubr.msk.bf16.mxu0 %vm962_vm3, %v11686_v34  ;;  %v11015_v30 = vpop.f32.mrb[3].mxu1 }
 0x1ca   : > { %8240 = vmatmul.mubr.msk.bf16.gmra.mrb[40].mxu1 %vm5336_vm8, %v8790_v12 }
 0x1cb   : > { %v11020_v11 = vpop.f32.mrb[4].mxu1  ;;  %8243 = vmatprep.mubr.msk.bf16.mxu1 %vm5336_vm8, %v8791_v61 }
 0x1cc   : > { %v11027_v50 = vpop.f32.mrb[5].mxu1 }
 0x1cd   : > { %8154 = vmatmul.mubr.msk.bf16.gmra.mrb[24].mxu0 %vm962_vm3, %v11689_v26  ;;  %v11033_v42 = vpop.f32.mrb[6].mxu1 }
 0x1ce   : > { %8157 = vmatprep.mubr.msk.bf16.mxu0 %vm962_vm3, %v11690_v28  ;;  %v11035_v32 = vpop.f32.mrb[7].mxu1 }
 0x1d2   : > { %8244 = vmatmul.mubr.msk.bf16.gmra.mrb[44].mxu1 %vm5336_vm8, %v8792_v53 }
 0x1d3   : > { %v11040_v49 = vpop.f32.mrb[8].mxu1  ;;  %8247 = vmatprep.mubr.msk.bf16.mxu1 %vm5336_vm8, %v8793_v25 }
 0x1d4   : > { %v11047_v46 = vpop.f32.mrb[9].mxu1 }
 0x1d5   : > { %8158 = vmatmul.mubr.msk.bf16.gmra.mrb[28].mxu0 %vm962_vm3, %v11691_v33  ;;  %v11049_v15 = vpop.f32.mrb[10].mxu1 }
 0x1d6   : > { %v11051_v5 = vpop.f32.mrb[11].mxu1 }
 0x1da   : > { %8248 = vmatmul.mubr.msk.bf16.gmra.mrb[48].mxu1 %vm5336_vm8, %v8794_v2 }
 0x1db   : > { %v11056_v52 = vpop.f32.mrb[12].mxu1  ;;  %8251 = vmatprep.mubr.msk.bf16.mxu1 %vm5336_vm8, %v8795_v29 }
 0x1dc   : > { %v11059_v13 = vpop.f32.mrb[13].mxu1 }
 0x1dd   : > { %v11061_v45 = vpop.f32.mrb[14].mxu1 }
 0x1de   : > { %v11063_v54 = vpop.f32.mrb[15].mxu1 }
 0x1e2   : > { %8252 = vmatmul.mubr.msk.bf16.gmra.mrb[52].mxu1 %vm5336_vm8, %v8796_v58 }
 0x1e3   : > { %v11068_v3 = vpop.f32.mrb[16].mxu1  ;;  %8255 = vmatprep.mubr.msk.bf16.mxu1 %vm5336_vm8, %v8797_v22 }
 0x1e4   : > { %v11071_v10 = vpop.f32.mrb[17].mxu1 }
 0x1e5   : > { %v11073_v63 = vpop.f32.mrb[18].mxu1 }
 0x1e6   : > { %v11075_v8 = vpop.f32.mrb[19].mxu1 }
 0x1ea   : > { %8256 = vmatmul.mubr.msk.bf16.gmra.mrb[56].mxu1 %vm5336_vm8, %v8798_v6 }
 0x1eb   : > { %v11080_v51 = vpop.f32.mrb[20].mxu1  ;;  %8259 = vmatprep.mubr.msk.bf16.mxu1 %vm5336_vm8, %v8799_v41 }
 0x1ec   : > { %v11082_v17 = vpop.f32.mrb[21].mxu1 }
 0x1ed   : > { %v11084_v55 = vpop.f32.mrb[22].mxu1 }
 0x1ee   : > { %v11086_v47 = vpop.f32.mrb[23].mxu1 }
 0x1f2   : > { %8260 = vmatmul.mubr.msk.bf16.gmra.mrb[60].mxu1 %vm5336_vm8, %v8800_v48 }
 0x1f3   : > { %v11090_v57 = vpop.f32.mrb[24].mxu1 }
 0x1f4   : > { %v11093_v19 = vpop.f32.mrb[25].mxu1 }
 0x1f5   : > { %v11096_v43 = vpop.f32.mrb[26].mxu1 }
 0x1f6   : > { %v11098_v36 = vpop.f32.mrb[27].mxu1 }
 0x1fb   : > { %v11101_v21 = vpop.f32.mrb[28].mxu1 }
 0x1fc   : > { %v11103_v38 = vpop.f32.mrb[29].mxu1 }
 0x1fd   : > { %v11105_v20 = vpop.f32.mrb[30].mxu1 }
 0x1fe   : > { %v11107_v40 = vpop.f32.mrb[31].mxu1 }
 0x270   : > { %v8131_v59 = vpop.f32.mrb[0].mxu0 }
 0x271   : > { %v8331_v37 = vadd.f32 %v8131_v59, %v11000_v39  ;;  %v4896_v44 = vpop.f32.mrb[1].mxu0 }
 0x272   : > { %v8332_v56 = vadd.f32 %v4896_v44, %v11007_v7  ;;  %v8132_v60 = vpop.f32.mrb[2].mxu0 }
 0x273   : > { %v5064_v0 = vadd.f32 %v8331_v37, %v11115_v23  ;;  %v8333_v16 = vadd.f32 %v8132_v60, %v11013_v35  ;;  %v4899_v31 = vpop.f32.mrb[3].mxu0 }
 0x274   : > { %v5062_v14 = vadd.f32 %v8332_v56, %v11115_v23  ;;  %v8334_v9 = vadd.f32 %v4899_v31, %v11015_v30 }
 0x275   : > { %v5128_v62 = vmul.f32 0.05, %v5064_v0  ;;  %v5065_v18 = vadd.f32 %v8333_v16, %v11115_v23  ;;  %vm5096_vm9 = vcmp.ge.f32.partialorder %v5064_v0, 0.0 }
 0x276   : > { %v5126_v24 = vmul.f32 0.05, %v5062_v14  ;;  %v5063_v39 = vadd.f32 %v8334_v9, %v11115_v23  ;;  %vm5094_vm10 = vcmp.ge.f32.partialorder %v5062_v14, 0.0 }
 0x277   : > { %vm5097_vm11 = vcmp.ge.f32.partialorder %v5065_v18, 0.0  ;;  %v5129_v7 = vmul.f32 0.05, %v5065_v18  ;;  %v5160_v61 = vsel %vm5096_vm9, %v5064_v0, %v5128_v62 }
 0x278   : > { %vm5095_vm12 = vcmp.ge.f32.partialorder %v5063_v39, 0.0  ;;  %v5127_v34 = vmul.f32 0.05, %v5063_v39  ;;  %v8135_v12 = vpop.f32.mrb[4].mxu0  ;;  %v5158_v26 = vsel %vm5094_vm10, %v5062_v14, %v5126_v24 }
 0x279   : > { %v5161_v35 = vsel %vm5097_vm11, %v5065_v18, %v5129_v7  ;;  %v8335_v4 = vadd.f32 %v8135_v12, %v11020_v11  ;;  %v4912_v27 = vpop.f32.mrb[5].mxu0 }
 0x27a   : > { %v6200_v30 = vpack.c.bf16 %v5161_v35, %v5160_v61  ;;  %v5159_v28 = vsel %vm5095_vm12, %v5063_v39, %v5127_v34  ;;  %v8336_v53 = vadd.f32 %v4912_v27, %v11027_v50  ;;  %v8136_v25 = vpop.f32.mrb[6].mxu0 }
 0x27b   : > { %v5068_v33 = vadd.f32 %v8335_v4, %v11115_v23  ;;  %v8337_v2 = vadd.f32 %v8136_v25, %v11033_v42  ;;  %v4915_v29 = vpop.f32.mrb[7].mxu0  ;;  %v6199_v58 = vpack.c.bf16 %v5159_v28, %v5158_v26 }
 0x27c   : > { %v5066_v22 = vadd.f32 %v8336_v53, %v11115_v23  ;;  %v8338_v6 = vadd.f32 %v4915_v29, %v11035_v32 }
 0x27d   : > { %v5132_v41 = vmul.f32 0.05, %v5068_v33  ;;  %v5069_v11 = vadd.f32 %v8337_v2, %v11115_v23  ;;  %8265 = vmatprep.mubr.msk.bf16.mxu1 %vm5336_vm8, %v6199_v58  ;;  %vm5100_vm13 = vcmp.ge.f32.partialorder %v5068_v33, 0.0 }
 0x27e   : > { %v5130_v48 = vmul.f32 0.05, %v5066_v22  ;;  %v5067_v50 = vadd.f32 %v8338_v6, %v11115_v23  ;;  %8266 = vmatmul.mubr.msk.bf16.vlgmr.msra.gmra.mrb[32].mxu1 %vm5336_vm8, %v6200_v30  ;;  %vm5098_vm14 = vcmp.ge.f32.partialorder %v5066_v22, 0.0 }
 0x27f   : > { %vm5101_vm15 = vcmp.ge.f32.partialorder %v5069_v11, 0.0  ;;  %v5133_v42 = vmul.f32 0.05, %v5069_v11  ;;  %8298 = vmatpush3.bf16.msra.mxu1 %v8801_v1  ;;  %v5164_v44 = vsel %vm5100_vm13, %v5068_v33, %v5132_v41 }
 0x280   : > { %vm5099_vm0 = vcmp.ge.f32.partialorder %v5067_v50, 0.0  ;;  %v5131_v59 = vmul.f32 0.05, %v5067_v50  ;;  %v8139_v37 = vpop.f32.mrb[8].mxu0  ;;  %v5162_v0 = vsel %vm5098_vm14, %v5066_v22, %v5130_v48 }
 0x281   : > { %v5165_v32 = vsel %vm5101_vm15, %v5069_v11, %v5133_v42  ;;  %v8339_v56 = vadd.f32 %v8139_v37, %v11040_v49  ;;  %v4928_v60 = vpop.f32.mrb[9].mxu0 }
 0x282   : > { %v5163_v16 = vsel %vm5099_vm0, %v5067_v50, %v5131_v59  ;;  %v8340_v31 = vadd.f32 %v4928_v60, %v11047_v46  ;;  %v8140_v14 = vpop.f32.mrb[10].mxu0  ;;  %v6202_v9 = vpack.c.bf16 %v5165_v32, %v5164_v44 }
 0x283   : > { %v5072_v62 = vadd.f32 %v8339_v56, %v11115_v23  ;;  %v8341_v18 = vadd.f32 %v8140_v14, %v11049_v15  ;;  %v4931_v24 = vpop.f32.mrb[11].mxu0  ;;  %v6201_v1 = vpack.c.bf16 %v5163_v16, %v5162_v0 }
 0x284   : > { %v5070_v39 = vadd.f32 %v8340_v31, %v11115_v23  ;;  %v8342_v7 = vadd.f32 %v4931_v24, %v11051_v5 }
 0x285   : > { %v5136_v34 = vmul.f32 0.05, %v5072_v62  ;;  %v5073_v49 = vadd.f32 %v8341_v18, %v11115_v23  ;;  %8269 = vmatprep.mubr.msk.bf16.mxu1 %vm5336_vm8, %v6201_v1  ;;  %vm5104_vm1 = vcmp.ge.f32.partialorder %v5072_v62, 0.0 }
 0x286   : > { %v5134_v12 = vmul.f32 0.05, %v5070_v39  ;;  %v5071_v46 = vadd.f32 %v8342_v7, %v11115_v23  ;;  %8270 = vmatmul.mubr.msk.bf16.gmra.mrb[36].mxu1 %vm5336_vm8, %v6202_v9  ;;  %vm5102_vm2 = vcmp.ge.f32.partialorder %v5070_v39, 0.0 }
 0x287   : > { %vm5105_vm4 = vcmp.ge.f32.partialorder %v5073_v49, 0.0  ;;  %v5137_v15 = vmul.f32 0.05, %v5073_v49  ;;  %v5168_v4 = vsel %vm5104_vm1, %v5072_v62, %v5136_v34 }
 0x288   : > { %vm5103_vm5 = vcmp.ge.f32.partialorder %v5071_v46, 0.0  ;;  %v5135_v61 = vmul.f32 0.05, %v5071_v46  ;;  %v8143_v35 = vpop.f32.mrb[12].mxu0  ;;  %v5166_v30 = vsel %vm5102_vm2, %v5070_v39, %v5134_v12 }
 0x289   : > { %v5169_v27 = vsel %vm5105_vm4, %v5073_v49, %v5137_v15  ;;  %v8343_v5 = vadd.f32 %v8143_v35, %v11056_v52  ;;  %v4944_v26 = vpop.f32.mrb[13].mxu0 }
 0x28a   : > { %v5167_v28 = vsel %vm5103_vm5, %v5071_v46, %v5135_v61  ;;  %v8344_v53 = vadd.f32 %v4944_v26, %v11059_v13  ;;  %v8144_v25 = vpop.f32.mrb[14].mxu0  ;;  %v6204_v33 = vpack.c.bf16 %v5169_v27, %v5168_v4 }
 0x28b   : > { %v5076_v2 = vadd.f32 %v8343_v5, %v11115_v23  ;;  %v8345_v29 = vadd.f32 %v8144_v25, %v11061_v45  ;;  %v4947_v58 = vpop.f32.mrb[15].mxu0  ;;  %v6203_v22 = vpack.c.bf16 %v5167_v28, %v5166_v30 }
 0x28c   : > { %v5074_v6 = vadd.f32 %v8344_v53, %v11115_v23  ;;  %v8346_v41 = vadd.f32 %v4947_v58, %v11063_v54 }
 0x28d   : > { %v5140_v11 = vmul.f32 0.05, %v5076_v2  ;;  %v5077_v52 = vadd.f32 %v8345_v29, %v11115_v23  ;;  %8273 = vmatprep.mubr.msk.bf16.mxu1 %vm5336_vm8, %v6203_v22  ;;  %vm5108_vm6 = vcmp.ge.f32.partialorder %v5076_v2, 0.0 }
 0x28e   : > { %v5138_v48 = vmul.f32 0.05, %v5074_v6  ;;  %v5075_v13 = vadd.f32 %v8346_v41, %v11115_v23  ;;  %8274 = vmatmul.mubr.msk.bf16.gmra.mrb[40].mxu1 %vm5336_vm8, %v6204_v33  ;;  %vm5106_vm7 = vcmp.ge.f32.partialorder %v5074_v6, 0.0 }
 0x28f   : > { %vm5109_vm9 = vcmp.ge.f32.partialorder %v5077_v52, 0.0  ;;  %v5141_v45 = vmul.f32 0.05, %v5077_v52  ;;  %v5172_v59 = vsel %vm5108_vm6, %v5076_v2, %v5140_v11 }
 0x290   : > { %vm5107_vm10 = vcmp.ge.f32.partialorder %v5075_v13, 0.0  ;;  %v5139_v50 = vmul.f32 0.05, %v5075_v13  ;;  %v8147_v42 = vpop.f32.mrb[16].mxu0  ;;  %v5170_v32 = vsel %vm5106_vm7, %v5074_v6, %v5138_v48 }
 0x291   : > { %v5173_v37 = vsel %vm5109_vm9, %v5077_v52, %v5141_v45  ;;  %v8347_v54 = vadd.f32 %v8147_v42, %v11068_v3  ;;  %v4960_v44 = vpop.f32.mrb[17].mxu0 }
 0x292   : > { %v5171_v56 = vsel %vm5107_vm10, %v5075_v13, %v5139_v50  ;;  %v8348_v60 = vadd.f32 %v4960_v44, %v11071_v10  ;;  %v8148_v0 = vpop.f32.mrb[18].mxu0  ;;  %v6206_v16 = vpack.c.bf16 %v5173_v37, %v5172_v59 }
 0x293   : > { %v5080_v31 = vadd.f32 %v8347_v54, %v11115_v23  ;;  %v8349_v14 = vadd.f32 %v8148_v0, %v11073_v63  ;;  %v4963_v9 = vpop.f32.mrb[19].mxu0  ;;  %v6205_v62 = vpack.c.bf16 %v5171_v56, %v5170_v32 }
 0x294   : > { %v5078_v18 = vadd.f32 %v8348_v60, %v11115_v23  ;;  %v8350_v24 = vadd.f32 %v4963_v9, %v11075_v8 }
 0x295   : > { %v5144_v1 = vmul.f32 0.05, %v5080_v31  ;;  %v5081_v3 = vadd.f32 %v8349_v14, %v11115_v23  ;;  %8277 = vmatprep.mubr.msk.bf16.mxu1 %vm5336_vm8, %v6205_v62  ;;  %vm5112_vm11 = vcmp.ge.f32.partialorder %v5080_v31, 0.0 }
 0x296   : > { %v5142_v39 = vmul.f32 0.05, %v5078_v18  ;;  %v5079_v10 = vadd.f32 %v8350_v24, %v11115_v23  ;;  %8278 = vmatmul.mubr.msk.bf16.gmra.mrb[44].mxu1 %vm5336_vm8, %v6206_v16  ;;  %vm5110_vm12 = vcmp.ge.f32.partialorder %v5078_v18, 0.0 }
 0x297   : > { %vm5113_vm13 = vcmp.ge.f32.partialorder %v5081_v3, 0.0  ;;  %v5145_v63 = vmul.f32 0.05, %v5081_v3  ;;  %v5176_v49 = vsel %vm5112_vm11, %v5080_v31, %v5144_v1 }
 0x298   : > { %vm5111_vm14 = vcmp.ge.f32.partialorder %v5079_v10, 0.0  ;;  %v5143_v7 = vmul.f32 0.05, %v5079_v10  ;;  %v8151_v34 = vpop.f32.mrb[20].mxu0  ;;  %v5174_v15 = vsel %vm5110_vm12, %v5078_v18, %v5142_v39 }
 0x299   : > { %v5177_v12 = vsel %vm5113_vm13, %v5081_v3, %v5145_v63  ;;  %v8351_v8 = vadd.f32 %v8151_v34, %v11080_v51  ;;  %v4976_v46 = vpop.f32.mrb[21].mxu0 }
 0x29a   : > { %v5175_v61 = vsel %vm5111_vm14, %v5079_v10, %v5143_v7  ;;  %v8352_v35 = vadd.f32 %v4976_v46, %v11082_v17  ;;  %v8152_v4 = vpop.f32.mrb[22].mxu0  ;;  %v6208_v27 = vpack.c.bf16 %v5177_v12, %v5176_v49 }
 0x29b   : > { %v5084_v5 = vadd.f32 %v8351_v8, %v11115_v23  ;;  %v8353_v26 = vadd.f32 %v8152_v4, %v11084_v55  ;;  %v4979_v30 = vpop.f32.mrb[23].mxu0  ;;  %v6207_v28 = vpack.c.bf16 %v5175_v61, %v5174_v15 }
 0x29c   : > { %v5082_v53 = vadd.f32 %v8352_v35, %v11115_v23  ;;  %v8354_v25 = vadd.f32 %v4979_v30, %v11086_v47 }
 0x29d   : > { %v5148_v33 = vmul.f32 0.05, %v5084_v5  ;;  %v5085_v51 = vadd.f32 %v8353_v26, %v11115_v23  ;;  %8281 = vmatprep.mubr.msk.bf16.mxu1 %vm5336_vm8, %v6207_v28  ;;  %vm5116_vm15 = vcmp.ge.f32.partialorder %v5084_v5, 0.0 }
 0x29e   : > { %v5146_v2 = vmul.f32 0.05, %v5082_v53  ;;  %v5083_v17 = vadd.f32 %v8354_v25, %v11115_v23  ;;  %8282 = vmatmul.mubr.msk.bf16.gmra.mrb[48].mxu1 %vm5336_vm8, %v6208_v27  ;;  %vm5114_vm0 = vcmp.ge.f32.partialorder %v5082_v53, 0.0 }
 0x29f   : > { %vm5117_vm1 = vcmp.ge.f32.partialorder %v5085_v51, 0.0  ;;  %v5149_v55 = vmul.f32 0.05, %v5085_v51  ;;  %v5180_v22 = vsel %vm5116_vm15, %v5084_v5, %v5148_v33 }
 0x2a0   : > { %vm5115_vm2 = vcmp.ge.f32.partialorder %v5083_v17, 0.0  ;;  %v5147_v29 = vmul.f32 0.05, %v5083_v17  ;;  %v8155_v58 = vpop.f32.mrb[24].mxu0  ;;  %v5178_v11 = vsel %vm5114_vm0, %v5082_v53, %v5146_v2 }
 0x2a1   : > { %v5181_v6 = vsel %vm5117_vm1, %v5085_v51, %v5149_v55  ;;  %v8355_v47 = vadd.f32 %v8155_v58, %v11090_v57  ;;  %v4992_v41 = vpop.f32.mrb[25].mxu0 }
 0x2a2   : > { %v5179_v52 = vsel %vm5115_vm2, %v5083_v17, %v5147_v29  ;;  %v8356_v48 = vadd.f32 %v4992_v41, %v11093_v19  ;;  %v8156_v13 = vpop.f32.mrb[26].mxu0  ;;  %v6210_v45 = vpack.c.bf16 %v5181_v6, %v5180_v22 }
 0x2a3   : > { %v5088_v50 = vadd.f32 %v8355_v47, %v11115_v23  ;;  %v8357_v42 = vadd.f32 %v8156_v13, %v11096_v43  ;;  %v4995_v59 = vpop.f32.mrb[27].mxu0  ;;  %v6209_v37 = vpack.c.bf16 %v5179_v52, %v5178_v11 }
 0x2a4   : > { %v5086_v54 = vadd.f32 %v8356_v48, %v11115_v23  ;;  %v8358_v44 = vadd.f32 %v4995_v59, %v11098_v36 }
 0x2a5   : > { %v5152_v32 = vmul.f32 0.05, %v5088_v50  ;;  %v5089_v57 = vadd.f32 %v8357_v42, %v11115_v23  ;;  %8285 = vmatprep.mubr.msk.bf16.mxu1 %vm5336_vm8, %v6209_v37  ;;  %vm5120_vm4 = vcmp.ge.f32.partialorder %v5088_v50, 0.0 }
 0x2a6   : > { %v5150_v56 = vmul.f32 0.05, %v5086_v54  ;;  %v5087_v19 = vadd.f32 %v8358_v44, %v11115_v23  ;;  %8286 = vmatmul.mubr.msk.bf16.gmra.mrb[52].mxu1 %vm5336_vm8, %v6210_v45  ;;  %vm5118_vm5 = vcmp.ge.f32.partialorder %v5086_v54, 0.0 }
 0x2a7   : > { %vm5121_vm6 = vcmp.ge.f32.partialorder %v5089_v57, 0.0  ;;  %v5153_v43 = vmul.f32 0.05, %v5089_v57  ;;  %v5184_v16 = vsel %vm5120_vm4, %v5088_v50, %v5152_v32 }
 0x2a8   : > { %vm5119_vm7 = vcmp.ge.f32.partialorder %v5087_v19, 0.0  ;;  %v5151_v60 = vmul.f32 0.05, %v5087_v19  ;;  %v8159_v0 = vpop.f32.mrb[28].mxu0  ;;  %v5182_v9 = vsel %vm5118_vm5, %v5086_v54, %v5150_v56 }
 0x2a9   : > { %v5185_v31 = vsel %vm5121_vm6, %v5089_v57, %v5153_v43  ;;  %v8359_v36 = vadd.f32 %v8159_v0, %v11101_v21  ;;  %v5008_v14 = vpop.f32.mrb[29].mxu0 }
 0x2aa   : > { %v5183_v62 = vsel %vm5119_vm7, %v5087_v19, %v5151_v60  ;;  %v8360_v18 = vadd.f32 %v5008_v14, %v11103_v38  ;;  %v8160_v24 = vpop.f32.mrb[30].mxu0  ;;  %v6212_v1 = vpack.c.bf16 %v5185_v31, %v5184_v16 }
 0x2ab   : > { %v5092_v3 = vadd.f32 %v8359_v36, %v11115_v23  ;;  %v8361_v39 = vadd.f32 %v8160_v24, %v11105_v20  ;;  %v5011_v10 = vpop.f32.mrb[31].mxu0  ;;  %v6211_v63 = vpack.c.bf16 %v5183_v62, %v5182_v9 }
 0x2ac   : > { %v5090_v7 = vadd.f32 %v8360_v18, %v11115_v23  ;;  %v8362_v34 = vadd.f32 %v5011_v10, %v11107_v40 }
 0x2ad   : > { %v5156_v49 = vmul.f32 0.05, %v5092_v3  ;;  %v5093_v21 = vadd.f32 %v8361_v39, %v11115_v23  ;;  %8289 = vmatprep.mubr.msk.bf16.mxu1 %vm5336_vm8, %v6211_v63  ;;  %vm5124_vm9 = vcmp.ge.f32.partialorder %v5092_v3, 0.0 }
 0x2ae   : > { %v5154_v12 = vmul.f32 0.05, %v5090_v7  ;;  %v5091_v38 = vadd.f32 %v8362_v34, %v11115_v23  ;;  %8290 = vmatmul.mubr.msk.bf16.gmra.mrb[56].mxu1 %vm5336_vm8, %v6212_v1  ;;  %vm5122_vm10 = vcmp.ge.f32.partialorder %v5090_v7, 0.0  ;;  %v11201_v23 = vld [vmem:[%s11440_s7] ss:$0 sm:$0xff] }
 0x2af   : > { %vm5125_vm11 = vcmp.ge.f32.partialorder %v5093_v21, 0.0  ;;  %v5157_v20 = vmul.f32 0.05, %v5093_v21  ;;  %v5188_v46 = vsel %vm5124_vm9, %v5092_v3, %v5156_v49 }
 0x2b0   : > { %vm5123_vm12 = vcmp.ge.f32.partialorder %v5091_v38, 0.0  ;;  %v5155_v8 = vmul.f32 0.05, %v5091_v38  ;;  %v5186_v15 = vsel %vm5122_vm10, %v5090_v7, %v5154_v12 }
 0x2b1   : > { %v5189_v40 = vsel %vm5125_vm11, %v5093_v21, %v5157_v20 }
 0x2b2   : > { %v5187_v61 = vsel %vm5123_vm12, %v5091_v38, %v5155_v8  ;;  %v6214_v35 = vpack.c.bf16 %v5189_v40, %v5188_v46 }
 0x2b3   : > { %v6213_v4 = vpack.c.bf16 %v5187_v61, %v5186_v15 }
 0x2b5   : > { %8293 = vmatprep.mubr.msk.bf16.mxu1 %vm5336_vm8, %v6213_v4 }
 0x2b6   : > { %8294 = vmatmul.mubr.msk.bf16.gmra.mrb[60].mxu1 %vm5336_vm8, %v6214_v35  ;;  %vm6771_vm8 = vcmask 31744  }
 0x351   : > { %v8267_v27 = vpop.f32.mrb[32].mxu1 }
 0x352   : > { %v6469_v5 = vadd.f32 %v8267_v27, %v11201_v23  ;;  %v6301_v26 = vpop.f32.mrb[33].mxu1 }
 0x353   : > { %v6467_v30 = vadd.f32 %v11201_v23, %v6301_v26  ;;  %v8268_v28 = vpop.f32.mrb[34].mxu1 }
 0x354   : > { %6741 = vst.msk [vmem:[%s11208_s19 + $0x10] sm:$0xff] %vm962_vm3, %v6469_v5  ;;  %v6470_v53 = vadd.f32 %v8268_v28, %v11201_v23  ;;  %v6304_v25 = vpop.f32.mrb[35].mxu1 }
 0x355   : > { %6739 = vst.msk [vmem:[%s11208_s19] sm:$0xff] %vm962_vm3, %v6467_v30  ;;  %v6468_v33 = vadd.f32 %v11201_v23, %v6304_v25 }
 0x356   : > { %v6500_v51 = vpack.c.bf16 %v6470_v53, %v6469_v5  ;;  %6742 = vst.msk [vmem:[%s11208_s19 + $0x18] sm:$0xff] %vm962_vm3, %v6470_v53 }
 0x357   : > { %v6499_v2 = vpack.c.bf16 %v6468_v33, %v6467_v30  ;;  %6740 = vst.msk [vmem:[%s11208_s19 + $0x8] sm:$0xff] %vm962_vm3, %v6468_v33 }
 0x359   : > { %v8271_v17 = vpop.f32.mrb[36].mxu1  ;;  %8299 = vmatprep.mubr.msk.bf16.mxu1 %vm962_vm3, %v6499_v2 }
 0x35a   : > { %v6473_v55 = vadd.f32 %v8271_v17, %v11201_v23  ;;  %v6317_v29 = vpop.f32.mrb[37].mxu1  ;;  %8300 = vmatmul.mubr.msk.bf16.vlgmr.msra.gmra.mrb[64].mxu1 %vm962_vm3, %v6500_v51 }
 0x35b   : > { %v6471_v58 = vadd.f32 %v11201_v23, %v6317_v29  ;;  %v8272_v22 = vpop.f32.mrb[38].mxu1 }
 0x35c   : > { %6745 = vst.msk [vmem:[%s11208_s19 + $0x30] sm:$0xff] %vm962_vm3, %v6473_v55  ;;  %v6474_v6 = vadd.f32 %v8272_v22, %v11201_v23  ;;  %v6320_v47 = vpop.f32.mrb[39].mxu1 }
 0x35d   : > { %6743 = vst.msk [vmem:[%s11208_s19 + $0x20] sm:$0xff] %vm962_vm3, %v6471_v58  ;;  %v6472_v41 = vadd.f32 %v11201_v23, %v6320_v47 }
 0x35e   : > { %v6502_v11 = vpack.c.bf16 %v6474_v6, %v6473_v55  ;;  %6746 = vst.msk [vmem:[%s11208_s19 + $0x38] sm:$0xff] %vm962_vm3, %v6474_v6 }
 0x35f   : > { %v6501_v52 = vpack.c.bf16 %v6472_v41, %v6471_v58  ;;  %6744 = vst.msk [vmem:[%s11208_s19 + $0x28] sm:$0xff] %vm962_vm3, %v6472_v41  ;;  %v11325_v41 = vld [vmem:[%s11442_s9] ss:$0 sm:$0xff] }
 0x361   : > { %v8275_v48 = vpop.f32.mrb[40].mxu1  ;;  %8303 = vmatprep.mubr.msk.bf16.mxu1 %vm962_vm3, %v6501_v52 }
 0x362   : > { %v6477_v13 = vadd.f32 %v8275_v48, %v11201_v23  ;;  %v6333_v45 = vpop.f32.mrb[41].mxu1  ;;  %8304 = vmatmul.mubr.msk.bf16.gmra.mrb[68].mxu1 %vm962_vm3, %v6502_v11 }
 0x363   : > { %v6475_v50 = vadd.f32 %v11201_v23, %v6333_v45  ;;  %v8276_v42 = vpop.f32.mrb[42].mxu1 }
 0x364   : > { %6749 = vst.msk [vmem:[%s11208_s19 + $0x50] sm:$0xff] %vm962_vm3, %v6477_v13  ;;  %v6478_v59 = vadd.f32 %v8276_v42, %v11201_v23  ;;  %v6336_v37 = vpop.f32.mrb[43].mxu1 }
 0x365   : > { %6747 = vst.msk [vmem:[%s11208_s19 + $0x40] sm:$0xff] %vm962_vm3, %v6475_v50  ;;  %v6476_v54 = vadd.f32 %v11201_v23, %v6336_v37 }
 0x366   : > { %v6504_v44 = vpack.c.bf16 %v6478_v59, %v6477_v13  ;;  %6750 = vst.msk [vmem:[%s11208_s19 + $0x58] sm:$0xff] %vm962_vm3, %v6478_v59 }
 0x367   : > { %v6503_v32 = vpack.c.bf16 %v6476_v54, %v6475_v50  ;;  %6748 = vst.msk [vmem:[%s11208_s19 + $0x48] sm:$0xff] %vm962_vm3, %v6476_v54 }
 0x369   : > { %v8279_v57 = vpop.f32.mrb[44].mxu1  ;;  %8307 = vmatprep.mubr.msk.bf16.mxu1 %vm962_vm3, %v6503_v32 }
 0x36a   : > { %v6481_v56 = vadd.f32 %v8279_v57, %v11201_v23  ;;  %v6349_v19 = vpop.f32.mrb[45].mxu1  ;;  %8308 = vmatmul.mubr.msk.bf16.gmra.mrb[72].mxu1 %vm962_vm3, %v6504_v44 }
 0x36b   : > { %v6479_v43 = vadd.f32 %v11201_v23, %v6349_v19  ;;  %v8280_v60 = vpop.f32.mrb[46].mxu1 }
 0x36c   : > { %6753 = vst.msk [vmem:[%s11208_s19 + $0x70] sm:$0xff] %vm962_vm3, %v6481_v56  ;;  %v6482_v0 = vadd.f32 %v8280_v60, %v11201_v23  ;;  %v6352_v16 = vpop.f32.mrb[47].mxu1 }
 0x36d   : > { %6751 = vst.msk [vmem:[%s11208_s19 + $0x60] sm:$0xff] %vm962_vm3, %v6479_v43  ;;  %v6480_v31 = vadd.f32 %v11201_v23, %v6352_v16 }
 0x36e   : > { %v6506_v36 = vpack.c.bf16 %v6482_v0, %v6481_v56  ;;  %6754 = vst.msk [vmem:[%s11208_s19 + $0x78] sm:$0xff] %vm962_vm3, %v6482_v0 }
 0x36f   : > { %v6505_v14 = vpack.c.bf16 %v6480_v31, %v6479_v43  ;;  %6752 = vst.msk [vmem:[%s11208_s19 + $0x68] sm:$0xff] %vm962_vm3, %v6480_v31 }
 0x371   : > { %v8283_v9 = vpop.f32.mrb[48].mxu1  ;;  %8311 = vmatprep.mubr.msk.bf16.mxu1 %vm962_vm3, %v6505_v14 }
 0x372   : > { %v6485_v62 = vadd.f32 %v8283_v9, %v11201_v23  ;;  %v6365_v18 = vpop.f32.mrb[49].mxu1  ;;  %8312 = vmatmul.mubr.msk.bf16.gmra.mrb[76].mxu1 %vm962_vm3, %v6506_v36 }
 0x373   : > { %v6483_v24 = vadd.f32 %v11201_v23, %v6365_v18  ;;  %v8284_v1 = vpop.f32.mrb[50].mxu1 }
 0x374   : > { %6757 = vst.msk [vmem:[%s11208_s19 + $0x90] sm:$0xff] %vm962_vm3, %v6485_v62  ;;  %v6486_v3 = vadd.f32 %v8284_v1, %v11201_v23  ;;  %v6368_v39 = vpop.f32.mrb[51].mxu1 }
 0x375   : > { %6755 = vst.msk [vmem:[%s11208_s19 + $0x80] sm:$0xff] %vm962_vm3, %v6483_v24  ;;  %v6484_v10 = vadd.f32 %v11201_v23, %v6368_v39 }
 0x376   : > { %v6508_v63 = vpack.c.bf16 %v6486_v3, %v6485_v62  ;;  %6758 = vst.msk [vmem:[%s11208_s19 + $0x98] sm:$0xff] %vm962_vm3, %v6486_v3 }
 0x377   : > { %v6507_v7 = vpack.c.bf16 %v6484_v10, %v6483_v24  ;;  %6756 = vst.msk [vmem:[%s11208_s19 + $0x88] sm:$0xff] %vm962_vm3, %v6484_v10 }
 0x379   : > { %v8287_v34 = vpop.f32.mrb[52].mxu1  ;;  %8315 = vmatprep.mubr.msk.bf16.mxu1 %vm962_vm3, %v6507_v7 }
 0x37a   : > { %v6489_v49 = vadd.f32 %v8287_v34, %v11201_v23  ;;  %v6381_v21 = vpop.f32.mrb[53].mxu1  ;;  %8316 = vmatmul.mubr.msk.bf16.gmra.mrb[80].mxu1 %vm962_vm3, %v6508_v63 }
 0x37b   : > { %v6487_v12 = vadd.f32 %v11201_v23, %v6381_v21  ;;  %v8288_v38 = vpop.f32.mrb[54].mxu1 }
 0x37c   : > { %6761 = vst.msk [vmem:[%s11208_s19 + $0xb0] sm:$0xff] %vm962_vm3, %v6489_v49  ;;  %v6490_v20 = vadd.f32 %v8288_v38, %v11201_v23  ;;  %v6384_v8 = vpop.f32.mrb[55].mxu1 }
 0x37d   : > { %6759 = vst.msk [vmem:[%s11208_s19 + $0xa0] sm:$0xff] %vm962_vm3, %v6487_v12  ;;  %v6488_v46 = vadd.f32 %v11201_v23, %v6384_v8 }
 0x37e   : > { %v6510_v40 = vpack.c.bf16 %v6490_v20, %v6489_v49  ;;  %6762 = vst.msk [vmem:[%s11208_s19 + $0xb8] sm:$0xff] %vm962_vm3, %v6490_v20 }
 0x37f   : > { %v6509_v15 = vpack.c.bf16 %v6488_v46, %v6487_v12  ;;  %6760 = vst.msk [vmem:[%s11208_s19 + $0xa8] sm:$0xff] %vm962_vm3, %v6488_v46 }
 0x381   : > { %v8291_v61 = vpop.f32.mrb[56].mxu1  ;;  %8319 = vmatprep.mubr.msk.bf16.mxu1 %vm962_vm3, %v6509_v15 }
 0x382   : > { %v6493_v35 = vadd.f32 %v8291_v61, %v11201_v23  ;;  %v6397_v4 = vpop.f32.mrb[57].mxu1  ;;  %8320 = vmatmul.mubr.msk.bf16.gmra.mrb[84].mxu1 %vm962_vm3, %v6510_v40 }
 0x383   : > { %v6491_v27 = vadd.f32 %v11201_v23, %v6397_v4  ;;  %v8292_v5 = vpop.f32.mrb[58].mxu1 }
 0x384   : > { %6765 = vst.msk [vmem:[%s11208_s19 + $0xd0] sm:$0xff] %vm962_vm3, %v6493_v35  ;;  %v6494_v26 = vadd.f32 %v8292_v5, %v11201_v23  ;;  %v6400_v30 = vpop.f32.mrb[59].mxu1 }
 0x385   : > { %6763 = vst.msk [vmem:[%s11208_s19 + $0xc0] sm:$0xff] %vm962_vm3, %v6491_v27  ;;  %v6492_v28 = vadd.f32 %v11201_v23, %v6400_v30 }
 0x386   : > { %v6512_v53 = vpack.c.bf16 %v6494_v26, %v6493_v35  ;;  %6766 = vst.msk [vmem:[%s11208_s19 + $0xd8] sm:$0xff] %vm962_vm3, %v6494_v26 }
 0x387   : > { %v6511_v25 = vpack.c.bf16 %v6492_v28, %v6491_v27  ;;  %6764 = vst.msk [vmem:[%s11208_s19 + $0xc8] sm:$0xff] %vm962_vm3, %v6492_v28 }
 0x389   : > { %v8295_v33 = vpop.f32.mrb[60].mxu1  ;;  %8323 = vmatprep.mubr.msk.bf16.mxu1 %vm962_vm3, %v6511_v25 }
 0x38a   : > { %v6497_v51 = vadd.f32 %v8295_v33, %v11201_v23  ;;  %v6413_v2 = vpop.f32.mrb[61].mxu1  ;;  %8324 = vmatmul.mubr.msk.bf16.gmra.mrb[88].mxu1 %vm962_vm3, %v6512_v53 }
 0x38b   : > { %v6495_v17 = vadd.f32 %v11201_v23, %v6413_v2  ;;  %v8296_v55 = vpop.f32.mrb[62].mxu1 }
 0x38c   : > { %6769 = vst.msk [vmem:[%s11208_s19 + $0xf0] sm:$0xff] %vm962_vm3, %v6497_v51  ;;  %v6498_v29 = vadd.f32 %v8296_v55, %v11201_v23  ;;  %v6416_v58 = vpop.f32.mrb[63].mxu1 }
 0x38d   : > { %6767 = vst.msk [vmem:[%s11208_s19 + $0xe0] sm:$0xff] %vm962_vm3, %v6495_v17  ;;  %v6496_v22 = vadd.f32 %v11201_v23, %v6416_v58 }
 0x38e   : > { %v6514_v6 = vpack.c.bf16 %v6498_v29, %v6497_v51  ;;  %6770 = vst.msk [vmem:[%s11208_s19 + $0xf8] sm:$0xff] %vm962_vm3, %v6498_v29 }
 0x38f   : > { %v6513_v47 = vpack.c.bf16 %v6496_v22, %v6495_v17  ;;  %6768 = vst.msk [vmem:[%s11208_s19 + $0xe8] sm:$0xff] %vm962_vm3, %v6496_v22 }
 0x391   : > { %8327 = vmatprep.mubr.msk.bf16.mxu1 %vm962_vm3, %v6513_v47 }
 0x392   : > { %8328 = vmatmul.mubr.msk.bf16.gmra.mrb[92].mxu1 %vm962_vm3, %v6514_v6 }
 0x42d   : > { %v8301_v23 = vpop.f32.mrb[64].mxu1 }
 0x42e   : > { %v6621_v11 = vadd.f32 %v8301_v23, %v11325_v41  ;;  %v6612_v52 = vpop.f32.mrb[65].mxu1 }
 0x42f   : > { %v6613_v48 = vadd.f32 %v11325_v41, %v6612_v52  ;;  %v8302_v13 = vpop.f32.mrb[66].mxu1 }
 0x430   : > { %6774 = vst.msk [vmem:[%s11332_s24 + $0x10] sm:$0xff] %vm6771_vm8, %v6621_v11  ;;  %v6624_v45 = vadd.f32 %v8302_v13, %v11325_v41  ;;  %v6615_v50 = vpop.f32.mrb[67].mxu1 }
 0x431   : > { %6772 = vst.msk [vmem:[%s11332_s24] sm:$0xff] %vm6771_vm8, %v6613_v48  ;;  %v6616_v42 = vadd.f32 %v11325_v41, %v6615_v50 }
 0x432   : > { %6775 = vst.msk [vmem:[%s11332_s24 + $0x18] sm:$0xff] %vm6771_vm8, %v6624_v45 }
 0x433   : > { %6773 = vst.msk [vmem:[%s11332_s24 + $0x8] sm:$0xff] %vm6771_vm8, %v6616_v42 }
 0x435   : > { %v8305_v59 = vpop.f32.mrb[68].mxu1 }
 0x436   : > { %v6637_v37 = vadd.f32 %v8305_v59, %v11325_v41  ;;  %v6628_v54 = vpop.f32.mrb[69].mxu1 }
 0x437   : > { %v6629_v44 = vadd.f32 %v11325_v41, %v6628_v54  ;;  %v8306_v32 = vpop.f32.mrb[70].mxu1 }
 0x438   : > { %6778 = vst.msk [vmem:[%s11332_s24 + $0x30] sm:$0xff] %vm6771_vm8, %v6637_v37  ;;  %v6640_v57 = vadd.f32 %v8306_v32, %v11325_v41  ;;  %v6631_v56 = vpop.f32.mrb[71].mxu1 }
 0x439   : > { %6776 = vst.msk [vmem:[%s11332_s24 + $0x20] sm:$0xff] %vm6771_vm8, %v6629_v44  ;;  %v6632_v19 = vadd.f32 %v11325_v41, %v6631_v56 }
 0x43a   : > { %6779 = vst.msk [vmem:[%s11332_s24 + $0x38] sm:$0xff] %vm6771_vm8, %v6640_v57 }
 0x43b   : > { %6777 = vst.msk [vmem:[%s11332_s24 + $0x28] sm:$0xff] %vm6771_vm8, %v6632_v19 }
 0x43d   : > { %v8309_v43 = vpop.f32.mrb[72].mxu1 }
 0x43e   : > { %v6653_v60 = vadd.f32 %v8309_v43, %v11325_v41  ;;  %v6644_v0 = vpop.f32.mrb[73].mxu1 }
 0x43f   : > { %v6645_v16 = vadd.f32 %v11325_v41, %v6644_v0  ;;  %v8310_v31 = vpop.f32.mrb[74].mxu1 }
 0x440   : > { %6782 = vst.msk [vmem:[%s11332_s24 + $0x50] sm:$0xff] %vm6771_vm8, %v6653_v60  ;;  %v6656_v36 = vadd.f32 %v8310_v31, %v11325_v41  ;;  %v6647_v14 = vpop.f32.mrb[75].mxu1 }
 0x441   : > { %6780 = vst.msk [vmem:[%s11332_s24 + $0x40] sm:$0xff] %vm6771_vm8, %v6645_v16  ;;  %v6648_v9 = vadd.f32 %v11325_v41, %v6647_v14 }
 0x442   : > { %6783 = vst.msk [vmem:[%s11332_s24 + $0x58] sm:$0xff] %vm6771_vm8, %v6656_v36 }
 0x443   : > { %6781 = vst.msk [vmem:[%s11332_s24 + $0x48] sm:$0xff] %vm6771_vm8, %v6648_v9 }
 0x445   : > { %v8313_v62 = vpop.f32.mrb[76].mxu1 }
 0x446   : > { %v6669_v18 = vadd.f32 %v8313_v62, %v11325_v41  ;;  %v6660_v24 = vpop.f32.mrb[77].mxu1 }
 0x447   : > { %v6661_v1 = vadd.f32 %v11325_v41, %v6660_v24  ;;  %v8314_v3 = vpop.f32.mrb[78].mxu1 }
 0x448   : > { %6786 = vst.msk [vmem:[%s11332_s24 + $0x70] sm:$0xff] %vm6771_vm8, %v6669_v18  ;;  %v6672_v39 = vadd.f32 %v8314_v3, %v11325_v41  ;;  %v6663_v10 = vpop.f32.mrb[79].mxu1 }
 0x449   : > { %6784 = vst.msk [vmem:[%s11332_s24 + $0x60] sm:$0xff] %vm6771_vm8, %v6661_v1  ;;  %v6664_v63 = vadd.f32 %v11325_v41, %v6663_v10 }
 0x44a   : > { %6787 = vst.msk [vmem:[%s11332_s24 + $0x78] sm:$0xff] %vm6771_vm8, %v6672_v39 }
 0x44b   : > { %6785 = vst.msk [vmem:[%s11332_s24 + $0x68] sm:$0xff] %vm6771_vm8, %v6664_v63 }
 0x44d   : > { %v8317_v7 = vpop.f32.mrb[80].mxu1 }
 0x44e   : > { %v6685_v34 = vadd.f32 %v8317_v7, %v11325_v41  ;;  %v6676_v49 = vpop.f32.mrb[81].mxu1 }
 0x44f   : > { %v6677_v21 = vadd.f32 %v11325_v41, %v6676_v49  ;;  %v8318_v12 = vpop.f32.mrb[82].mxu1 }
 0x450   : > { %6790 = vst.msk [vmem:[%s11332_s24 + $0x90] sm:$0xff] %vm6771_vm8, %v6685_v34  ;;  %v6688_v38 = vadd.f32 %v8318_v12, %v11325_v41  ;;  %v6679_v20 = vpop.f32.mrb[83].mxu1 }
 0x451   : > { %6788 = vst.msk [vmem:[%s11332_s24 + $0x80] sm:$0xff] %vm6771_vm8, %v6677_v21  ;;  %v6680_v8 = vadd.f32 %v11325_v41, %v6679_v20 }
 0x452   : > { %6791 = vst.msk [vmem:[%s11332_s24 + $0x98] sm:$0xff] %vm6771_vm8, %v6688_v38 }
 0x453   : > { %6789 = vst.msk [vmem:[%s11332_s24 + $0x88] sm:$0xff] %vm6771_vm8, %v6680_v8 }
 0x455   : > { %v8321_v46 = vpop.f32.mrb[84].mxu1 }
 0x456   : > { %v6701_v40 = vadd.f32 %v8321_v46, %v11325_v41  ;;  %v6692_v15 = vpop.f32.mrb[85].mxu1 }
 0x457   : > { %v6693_v61 = vadd.f32 %v11325_v41, %v6692_v15  ;;  %v8322_v35 = vpop.f32.mrb[86].mxu1 }
 0x458   : > { %6794 = vst.msk [vmem:[%s11332_s24 + $0xb0] sm:$0xff] %vm6771_vm8, %v6701_v40  ;;  %v6704_v4 = vadd.f32 %v8322_v35, %v11325_v41  ;;  %v6695_v27 = vpop.f32.mrb[87].mxu1 }
 0x459   : > { %6792 = vst.msk [vmem:[%s11332_s24 + $0xa0] sm:$0xff] %vm6771_vm8, %v6693_v61  ;;  %v6696_v5 = vadd.f32 %v11325_v41, %v6695_v27 }
 0x45a   : > { %6795 = vst.msk [vmem:[%s11332_s24 + $0xb8] sm:$0xff] %vm6771_vm8, %v6704_v4 }
 0x45b   : > { %6793 = vst.msk [vmem:[%s11332_s24 + $0xa8] sm:$0xff] %vm6771_vm8, %v6696_v5 }
 0x45d   : > { %v8325_v26 = vpop.f32.mrb[88].mxu1 }
 0x45e   : > { %v6717_v30 = vadd.f32 %v8325_v26, %v11325_v41  ;;  %v6708_v28 = vpop.f32.mrb[89].mxu1 }
 0x45f   : > { %v6709_v53 = vadd.f32 %v11325_v41, %v6708_v28  ;;  %v8326_v25 = vpop.f32.mrb[90].mxu1 }
 0x460   : > { %6798 = vst.msk [vmem:[%s11332_s24 + $0xd0] sm:$0xff] %vm6771_vm8, %v6717_v30  ;;  %v6720_v33 = vadd.f32 %v8326_v25, %v11325_v41  ;;  %v6711_v51 = vpop.f32.mrb[91].mxu1 }
 0x461   : > { %6796 = vst.msk [vmem:[%s11332_s24 + $0xc0] sm:$0xff] %vm6771_vm8, %v6709_v53  ;;  %v6712_v2 = vadd.f32 %v11325_v41, %v6711_v51 }
 0x462   : > { %6799 = vst.msk [vmem:[%s11332_s24 + $0xd8] sm:$0xff] %vm6771_vm8, %v6720_v33 }
 0x463   : > { %6797 = vst.msk [vmem:[%s11332_s24 + $0xc8] sm:$0xff] %vm6771_vm8, %v6712_v2 }
 0x465   : > { %v8329_v17 = vpop.f32.mrb[92].mxu1 }
 0x466   : > { %v6733_v55 = vadd.f32 %v8329_v17, %v11325_v41  ;;  %v6724_v29 = vpop.f32.mrb[93].mxu1 }
 0x467   : > { %v6725_v58 = vadd.f32 %v11325_v41, %v6724_v29  ;;  %v8330_v22 = vpop.f32.mrb[94].mxu1 }
 0x468   : > { %6802 = vst.msk [vmem:[%s11332_s24 + $0xf0] sm:$0xff] %vm6771_vm8, %v6733_v55  ;;  %v6736_v6 = vadd.f32 %v8330_v22, %v11325_v41  ;;  %v6727_v47 = vpop.f32.mrb[95].mxu1 }
 0x469   : > { %6800 = vst.msk [vmem:[%s11332_s24 + $0xe0] sm:$0xff] %vm6771_vm8, %v6725_v58  ;;  %v6728_v23 = vadd.f32 %v11325_v41, %v6727_v47 }
 0x46a   : > { %6803 = vst.msk [vmem:[%s11332_s24 + $0xf8] sm:$0xff] %vm6771_vm8, %v6736_v6 }
 0x46b   : > { %6801 = vst.msk [vmem:[%s11332_s24 + $0xe8] sm:$0xff] %vm6771_vm8, %v6728_v23 }
 0x46c PF: > { %s22_s17 = sadd.s32 1, %s8846_s17  }
 0x46d   : > { %p19_p5 = scmp.ge.s32.totalorder %s22_s17, 4  }
 0x46f   :  { %21 = sbr.rel (!%p19_p5) target bundleno = 1 (0x1), region = 113 }

// kernel: erfdb_forward.9
= control target key start
LH: loop header
LB: loop body
LE: loop exit
PB: predicated region body
PF: predicated region fallthrough
CT: control target
= control target key end

     0   :  { %s7938_s15 = smov 0   ;;  %s11048_s0 = inlined_call_operand.vmem [shape: bf16[2,18,18,16], index: 0, kind: input, shape index: {}]   ;;  %s11049_s1 = inlined_call_operand.vmem [shape: bf16[144,24], index: 1, kind: input, shape index: {}]   ;;  %s11050_s2 = inlined_call_operand.vmem [shape: f32[1,24], index: 2, kind: input, shape index: {}]   ;;  %s11051_s3 = inlined_call_operand.vmem [shape: bf16[512,8], index: 3, kind: output, shape index: {0}]   ;;  %s11052_s4 = inlined_call_operand.vmem [shape: bf16[2,18,18,16], index: 4, kind: output, shape index: {1}]  }
   0x1 LB: > { %s7944_s16 = sadd.s32 4294967295, %s7908_s15   ;;  %p6197_p0 = scmp.ge.s32.totalorder %s7908_s15, 1  ;;  %s7908_s15 = sphi %s7938_s15, %s15_s15  }
   0x2   : > { %p165_p1 = scmp.lt.s32.totalorder %s7908_s15, 3 }
   0x4   : > { %p166_p2 = pnand %p6197_p0, %p165_p1 }
   0x6   : > { %169 = sbr.rel (%p166_p2) target bundleno = 791 (0x317), region = 32 }
   0xd   : > { %v7759_v0 = vld [vmem:[%s11049_s1 + $0x20] sm:$0xff]   ;;  %p196_p3 = scmp.lt.s32.totalorder %s7944_s16, 1  ;;  %v7760_v1 = vld [vmem:[%s11049_s1 + $0x8] sm:$0xff]   ;;  %vm263_vm0 = vsmask.f32 3328  ;;  %vm706_vm3 = vcmask 130048  }
   0xe   : > { %7239 = vmatprep.subr.bf16.mxu0 %v7759_v0  ;;  %v7961_v2 = vld [vmem:[%s11049_s1 + $0x28] sm:$0xff]   ;;  %7103 = vmatprep.subr.bf16.mxu1 %v7760_v1  ;;  %v7968_v3 = vld [vmem:[%s11049_s1] sm:$0xff]   ;;  %vm264_vm1 = vsmask.f32 7440  ;;  %vm1259_vm4 = vcmask 1042432   ;;  %vm1260_vm5 = vcmask 1046532  }
   0xf   : > { %s7956_s21 = scalar_select %p196_p3, %s7944_s16, 1  ;;  %7240 = vmatpush3.bf16.msra.mxu0 %v7759_v0  ;;  %7104 = vmatpush3.bf16.msra.mxu1 %v7760_v1  ;;  %vm7994_vm2 = vmor %vm263_vm0, %vm264_vm1  ;;  %vm5382_vm7 = vcmask 60416  }
  0x10   : > { %7273 = vmatprep.subr.bf16.mxu0 %v7961_v2  ;;  %7137 = vmatprep.subr.bf16.mxu1 %v7968_v3  ;;  %vm8260_vm6 = vmor %vm1259_vm4, %vm1260_vm5  ;;  %s7910_s20 = smov 8   ;;  %s6199_s22 = sshll.u32 %s7944_s16, 5 }
  0x11   : > { %s7667_s24 = smul.u32 216, %s7956_s21  ;;  %p202_p4 = scmp.lt.s32.totalorder %s6199_s22, 63 }
  0x13   : > { %s7975_s29 = scalar_lea.vmem %s11048_s0, %s7667_s24  ;;  %s11267_s22 = smov (!%p202_p4, %s6199_s22), 63 }
  0x14   : > { %v213_v4 = vld [vmem:[%s7975_s29] sm:$0xf]  ;;  %v214_v5 = vld [vmem:[%s7975_s29 + $0x4] sm:$0xf]  ;;  %v247_v6 = vld [vmem:[%s7975_s29 + $0x8] sm:$0x1]  ;;  %s10663_s6 = scalar_lea.vmem %s11052_s4, %s7667_s24 }
  0x15   : > { %v267_v7 = vshrl.u32 %v213_v4, 16  ;;  %v270_v8 = vshll.u32 %v213_v4, 16  ;;  %v276_v9 = vshll.u32 %v214_v5, 16  ;;  %v280_v10 = vshrl.u32 %v214_v5, 16  ;;  %v6382_v11 = vld [vmem:[%s7975_s29 + $0xc] sm:$0xf] }
  0x16   : > { %v286_v12 = vshll.u32 %v247_v6, 16  ;;  %v7983_v13 = vld [vmem:[%s7975_s29 + $0x10] sm:$0xf]  ;;  %v7986_v14 = vld [vmem:[%s7975_s29 + $0x14] sm:$0x1]  ;;  %v2082_v20 = vshrl.u32 %v6382_v11, 16 }
  0x17   : > { %v269_v15 = vrot.slane %v267_v7, 4  ;;  %v272_v16 = vrot.slane %v270_v8, 5  ;;  %v278_v17 = vrot.slane %v276_v9, 5  ;;  %v282_v18 = vrot.slane %v280_v10, 4  ;;  %v215_v27 = vld [vmem:[%s7975_s29 + $0xc] sm:$0xf] }
  0x18   : > { %v288_v19 = vrot.slane %v286_v12, 5  ;;  %v2085_v21 = vshll.u32 %v6382_v11, 16  ;;  %v2091_v22 = vshll.u32 %v7983_v13, 16  ;;  %v2095_v25 = vshrl.u32 %v7983_v13, 16  ;;  %v216_v32 = vld [vmem:[%s7975_s29 + $0x10] sm:$0xf] }
  0x19   : > { %v273_v23 = vor.u32 %v272_v16, %v269_v15  ;;  %v283_v24 = vor.u32 %v282_v18, %v278_v17  ;;  %v2101_v26 = vshll.u32 %v7986_v14, 16  ;;  %v2084_v29 = vrot.slane %v2082_v20, 4  ;;  %v248_v38 = vld [vmem:[%s7975_s29 + $0x14] sm:$0x1]  ;;  %v6385_v49 = vld [vmem:[%s7975_s29 + $0x18] sm:$0xf] }
  0x1a   : > { %v2087_v30 = vrot.slane %v2085_v21, 5  ;;  %v2093_v31 = vrot.slane %v2091_v22, 5  ;;  %v2097_v35 = vrot.slane %v2095_v25, 4  ;;  %v291_v39 = vshrl.u32 %v215_v27, 16  ;;  %v8006_v54 = vld [vmem:[%s7975_s29 + $0x1c] sm:$0xf] }
  0x1b   : > { %v274_v33 = vrot.slane %v273_v23, 4  ;;  %v284_v34 = vrot.slane %v283_v24, 4  ;;  %v2103_v37 = vrot.slane %v2101_v26, 5  ;;  %v294_v40 = vshll.u32 %v215_v27, 16  ;;  %v8016_v59 = vld [vmem:[%s7975_s29 + $0x20] sm:$0x1] }
  0x1c   : > { %v2088_v36 = vor.u32 %v2087_v30, %v2084_v29  ;;  %v2098_v43 = vor.u32 %v2097_v35, %v2093_v31  ;;  %v300_v44 = vshll.u32 %v216_v32, 16  ;;  %v293_v47 = vrot.slane %v291_v39, 4  ;;  %v217_v10 = vld [vmem:[%s7975_s29 + $0x18] sm:$0xf]  ;;  %v249_v24 = vld [vmem:[%s7975_s29 + $0x20] sm:$0x1] }
  0x1d   : > { %v279_v41 = vsel %vm7994_vm2, %v274_v33, %v278_v17  ;;  %v289_v42 = vsel %vm7994_vm2, %v284_v34, %v288_v19  ;;  %v296_v48 = vrot.slane %v294_v40, 5  ;;  %v304_v52 = vshrl.u32 %v216_v32, 16  ;;  %v218_v17 = vld [vmem:[%s7975_s29 + $0x1c] sm:$0xf]  ;;  %v6388_v32 = vld [vmem:[%s7975_s29 + $0x24] sm:$0xf] }
  0x1e   : > { %v6202_v45 = vcombine.low %v279_v41, %v289_v42  ;;  %v2089_v46 = vrot.slane %v2088_v36, 4  ;;  %v2099_v50 = vrot.slane %v2098_v43, 4  ;;  %v302_v51 = vrot.slane %v300_v44, 5  ;;  %s6200_s25 = sshll.u32 %s11267_s22, 2 }
  0x1f   : > { %v310_v53 = vshll.u32 %v248_v38, 16  ;;  %v2860_v56 = vrot.slane %v7983_v13, 5  ;;  %v2863_v57 = vrot.slane %v7986_v14, 5  ;;  %v297_v58 = vor.u32 %v296_v48, %v293_v47  ;;  %v7768_v38 = vld [vmem:[%s11049_s1 + $0x10] sm:$0xff]   ;;  %v8297_v14 = vld [vmem:[%s7975_s29 + $0x7c] sm:$0xf]  ;;  %s9960_s28 = scalar_lea.vmem %s11051_s3, %s6200_s25 }
  0x20   : > { %7105 = vmatprep.mubr.msk.bf16.mxu1 %vm706_vm3, %v6202_v45  ;;  %v8011_v55 = vsel %vm7994_vm2, %v2089_v46, %v2093_v31  ;;  %v8020_v60 = vsel %vm7994_vm2, %v2099_v50, %v2103_v37  ;;  %v306_v61 = vrot.slane %v304_v52, 4  ;;  %v2106_v63 = vshrl.u32 %v6385_v49, 16  ;;  %v8043_v37 = vld [vmem:[%s7975_s29 + $0x28] sm:$0xf]  ;;  %v8054_v45 = vld [vmem:[%s7975_s29 + $0x2c] sm:$0x1] }
  0x21   : > { %11107 = vst [vmem:[#allocation2_spill] sm:$0xff] %v8011_v55  ;;  %11108 = vst [vmem:[#allocation3_spill] sm:$0xff] %v8020_v60  ;;  %v312_v62 = vrot.slane %v310_v53, 5  ;;  %v6430_v0 = vcombine.low %v8011_v55, %v8020_v60  ;;  %v298_v1 = vrot.slane %v297_v58, 4  ;;  %v2109_v4 = vshll.u32 %v6385_v49, 16 }
  0x22   : > { %v2115_v5 = vshll.u32 %v8006_v54, 16  ;;  %v307_v6 = vor.u32 %v306_v61, %v302_v51  ;;  %v2108_v7 = vrot.slane %v2106_v63, 4  ;;  %v2119_v8 = vshrl.u32 %v8006_v54, 16  ;;  %v219_v52 = vld [vmem:[%s7975_s29 + $0x24] sm:$0xf] }
  0x23   : > { %v2125_v9 = vshll.u32 %v8016_v59, 16  ;;  %7241 = vmatprep.mubr.msk.bf16.mxu0 %vm706_vm3, %v6430_v0  ;;  %v303_v11 = vsel %vm7994_vm2, %v298_v1, %v302_v51  ;;  %v2111_v12 = vrot.slane %v2109_v4, 5  ;;  %v11053_v16 = vrot.slane %v8006_v54, 5  ;;  %v220_v63 = vld [vmem:[%s7975_s29 + $0x28] sm:$0xf]  ;;  %v8069_v0 = vld [vmem:[%s11049_s1 + $0x30] sm:$0xff]  }
  0x24   : > { %v2117_v15 = vrot.slane %v2115_v5, 5  ;;  %v308_v18 = vrot.slane %v307_v6, 4  ;;  %v2121_v19 = vrot.slane %v2119_v8, 4  ;;  %v315_v25 = vshrl.u32 %v217_v10, 16  ;;  %v250_v8 = vld [vmem:[%s7975_s29 + $0x2c] sm:$0x1] }
  0x25   : > { %v2127_v20 = vrot.slane %v2125_v9, 5  ;;  %v2112_v22 = vor.u32 %v2111_v12, %v2108_v7  ;;  %v8036_v23 = vrot.slane %v11053_v16, 4  ;;  %v318_v26 = vshll.u32 %v217_v10, 16 }
  0x26   : > { %v313_v27 = vsel %vm7994_vm2, %v308_v18, %v312_v62  ;;  %v2122_v29 = vor.u32 %v2121_v19, %v2117_v15  ;;  %v324_v30 = vshll.u32 %v218_v17, 16  ;;  %v328_v31 = vshrl.u32 %v218_v17, 16  ;;  %v6391_v18 = vld [vmem:[%s7975_s29 + $0x30] sm:$0xf] }
  0x27   : > { %v6203_v33 = vcombine.low %v303_v11, %v313_v27  ;;  %v2113_v34 = vrot.slane %v2112_v22, 4  ;;  %v317_v35 = vrot.slane %v315_v25, 4  ;;  %v320_v36 = vrot.slane %v318_v26, 5  ;;  %v8082_v25 = vld [vmem:[%s7975_s29 + $0x34] sm:$0xf] }
  0x28   : > { %v2123_v39 = vrot.slane %v2122_v29, 4  ;;  %v326_v40 = vrot.slane %v324_v30, 5  ;;  %v330_v41 = vrot.slane %v328_v31, 4  ;;  %v334_v42 = vshll.u32 %v249_v24, 16 }
  0x29   : > { %7106 = vmatmul.mubr.msk.bf16.vlgmr.msra.gmra.mrb[0].mxu1 %vm706_vm3, %v6203_v33  ;;  %v8051_v43 = vsel %vm7994_vm2, %v2113_v34, %v2117_v15  ;;  %v321_v44 = vor.u32 %v320_v36, %v317_v35  ;;  %v2130_v46 = vshrl.u32 %v6388_v32, 16  ;;  %v2133_v47 = vshll.u32 %v6388_v32, 16  ;;  %v8091_v32 = vld [vmem:[%s7975_s29 + $0x38] sm:$0x1] }
  0x2a   : > { %11109 = vst [vmem:[#allocation4_spill] sm:$0xff] %v8051_v43  ;;  %v8058_v48 = vsel %vm7994_vm2, %v2123_v39, %v2127_v20  ;;  %v331_v49 = vor.u32 %v330_v41, %v326_v40  ;;  %v336_v50 = vrot.slane %v334_v42, 5  ;;  %v2139_v51 = vshll.u32 %v8043_v37, 16  ;;  %7138 = vmatpush3.bf16.msra.mxu1 %v7968_v3 }
  0x2b   : > { %11110 = vst [vmem:[#allocation5_spill] sm:$0xff] %v8058_v48  ;;  %v6431_v53 = vcombine.low %v8051_v43, %v8058_v48  ;;  %v322_v58 = vrot.slane %v321_v44, 4  ;;  %v2132_v61 = vrot.slane %v2130_v46, 4  ;;  %v2135_v62 = vrot.slane %v2133_v47, 5  ;;  %7171 = vmatprep.subr.bf16.mxu1 %v7768_v38  ;;  %v221_v46 = vld [vmem:[%s7975_s29 + $0x30] sm:$0xf] }
  0x2c   : > { %v332_v1 = vrot.slane %v331_v49, 4  ;;  %v2141_v4 = vrot.slane %v2139_v51, 5  ;;  %v2143_v5 = vshrl.u32 %v8043_v37, 16  ;;  %v2149_v3 = vshll.u32 %v8054_v45, 16  ;;  %v7840_v43 = vld [vmem:[%s7975_s29 + $0x70] sm:$0xf] }
  0x2d   : > { %7242 = vmatmul.mubr.msk.bf16.vlgmr.msra.gmra.mrb[0].mxu0 %vm706_vm3, %v6431_v53  ;;  %v327_v6 = vsel %vm7994_vm2, %v322_v58, %v326_v40  ;;  %v2136_v7 = vor.u32 %v2135_v62, %v2132_v61  ;;  %v339_v9 = vshrl.u32 %v219_v52, 16  ;;  %v342_v10 = vshll.u32 %v219_v52, 16  ;;  %v222_v52 = vld [vmem:[%s7975_s29 + $0x34] sm:$0xf] }
  0x2e   : > { %7274 = vmatpush3.bf16.msra.mxu0 %v7961_v2  ;;  %v337_v11 = vsel %vm7994_vm2, %v332_v1, %v336_v50  ;;  %v2145_v12 = vrot.slane %v2143_v5, 4  ;;  %v2151_v15 = vrot.slane %v2149_v3, 5  ;;  %v348_v17 = vshll.u32 %v220_v63, 16 }
  0x2f   : > { %v6204_v19 = vcombine.low %v327_v6, %v337_v11  ;;  %v2137_v20 = vrot.slane %v2136_v7, 4  ;;  %v341_v22 = vrot.slane %v339_v9, 4  ;;  %v344_v24 = vrot.slane %v342_v10, 5  ;;  %7307 = vmatprep.subr.bf16.mxu0 %v8069_v0  ;;  %v6394_v10 = vld [vmem:[%s7975_s29 + $0x3c] sm:$0xf] }
  0x30   : > { %v2146_v26 = vor.u32 %v2145_v12, %v2141_v4  ;;  %v350_v27 = vrot.slane %v348_v17, 5  ;;  %v352_v29 = vshrl.u32 %v220_v63, 16  ;;  %v358_v2 = vshll.u32 %v250_v8, 16  ;;  %v251_v63 = vld [vmem:[%s7975_s29 + $0x38] sm:$0x1] }
  0x31   : > { %7109 = vmatprep.mubr.msk.bf16.mxu1 %vm706_vm3, %v6204_v19  ;;  %v8088_v30 = vsel %vm7994_vm2, %v2137_v20, %v2141_v4  ;;  %v345_v31 = vor.u32 %v344_v24, %v341_v22  ;;  %v2154_v33 = vshrl.u32 %v6391_v18, 16  ;;  %v2157_v34 = vshll.u32 %v6391_v18, 16  ;;  %v8112_v18 = vld [vmem:[%s7975_s29 + $0x40] sm:$0xf] }
  0x32   : > { %11111 = vst [vmem:[#allocation6_spill] sm:$0xff] %v8088_v30  ;;  %v2147_v35 = vrot.slane %v2146_v26, 4  ;;  %v354_v36 = vrot.slane %v352_v29, 4  ;;  %v360_v38 = vrot.slane %v358_v2, 5  ;;  %v2163_v39 = vshll.u32 %v8082_v25, 16 }
  0x33   : > { %v346_v40 = vrot.slane %v345_v31, 4  ;;  %v2156_v41 = vrot.slane %v2154_v33, 4  ;;  %v2159_v42 = vrot.slane %v2157_v34, 5  ;;  %v2167_v44 = vshrl.u32 %v8082_v25, 16  ;;  %v8119_v2 = vld [vmem:[%s7975_s29 + $0x44] sm:$0x1] }
  0x34   : > { %v8098_v47 = vsel %vm7994_vm2, %v2147_v35, %v2151_v15  ;;  %v355_v49 = vor.u32 %v354_v36, %v350_v27  ;;  %v2165_v50 = vrot.slane %v2163_v39, 5  ;;  %v2173_v51 = vshll.u32 %v8091_v32, 16 }
  0x35   : > { %11112 = vst [vmem:[#allocation7_spill] sm:$0xff] %v8098_v47  ;;  %v6432_v53 = vcombine.low %v8088_v30, %v8098_v47  ;;  %v351_v58 = vsel %vm7994_vm2, %v346_v40, %v350_v27  ;;  %v2160_v61 = vor.u32 %v2159_v42, %v2156_v41  ;;  %v2169_v62 = vrot.slane %v2167_v44, 4  ;;  %v224_v44 = vld [vmem:[%s7975_s29 + $0x40] sm:$0xf] }
  0x36   : > { %v356_v1 = vrot.slane %v355_v49, 4  ;;  %v2175_v4 = vrot.slane %v2173_v51, 5  ;;  %v363_v5 = vshrl.u32 %v221_v46, 16  ;;  %v366_v3 = vshll.u32 %v221_v46, 16 }
  0x37   : > { %7245 = vmatprep.mubr.msk.bf16.mxu0 %vm706_vm3, %v6432_v53  ;;  %v2161_v6 = vrot.slane %v2160_v61, 4  ;;  %v2170_v7 = vor.u32 %v2169_v62, %v2165_v50  ;;  %v372_v8 = vshll.u32 %v222_v52, 16  ;;  %v376_v9 = vshrl.u32 %v222_v52, 16 }
  0x38   : > { %v361_v11 = vsel %vm7994_vm2, %v356_v1, %v360_v38  ;;  %v365_v12 = vrot.slane %v363_v5, 4  ;;  %v368_v15 = vrot.slane %v366_v3, 5  ;;  %v382_v17 = vshll.u32 %v251_v63, 16  ;;  %v223_v38 = vld [vmem:[%s7975_s29 + $0x3c] sm:$0xf] }
  0x39   : > { %v6205_v19 = vcombine.low %v351_v58, %v361_v11  ;;  %v8116_v20 = vsel %vm7994_vm2, %v2161_v6, %v2165_v50  ;;  %v2171_v22 = vrot.slane %v2170_v7, 4  ;;  %v374_v24 = vrot.slane %v372_v8, 5  ;;  %v6397_v3 = vld [vmem:[%s7975_s29 + $0x48] sm:$0xf] }
  0x3a   : > { %11113 = vst [vmem:[#allocation8_spill] sm:$0xff] %v8116_v20  ;;  %v369_v26 = vor.u32 %v368_v15, %v365_v12  ;;  %v378_v27 = vrot.slane %v376_v9, 4  ;;  %v384_v29 = vrot.slane %v382_v17, 5  ;;  %v2178_v31 = vshrl.u32 %v6394_v10, 16 }
  0x3b   : > { %7110 = vmatmul.mubr.msk.bf16.gmra.mrb[4].mxu1 %vm706_vm3, %v6205_v19  ;;  %v8124_v33 = vsel %vm7994_vm2, %v2171_v22, %v2175_v4  ;;  %v2181_v34 = vshll.u32 %v6394_v10, 16  ;;  %v2187_v35 = vshll.u32 %v8112_v18, 16  ;;  %v2191_v36 = vshrl.u32 %v8112_v18, 16  ;;  %v252_v4 = vld [vmem:[%s7975_s29 + $0x44] sm:$0x1] }
  0x3c   : > { %11114 = vst [vmem:[#allocation9_spill] sm:$0xff] %v8124_v33  ;;  %v6433_v39 = vcombine.low %v8116_v20, %v8124_v33  ;;  %v370_v40 = vrot.slane %v369_v26, 4  ;;  %v379_v41 = vor.u32 %v378_v27, %v374_v24  ;;  %v2180_v42 = vrot.slane %v2178_v31, 4  ;;  %v8141_v10 = vld [vmem:[%s7975_s29 + $0x4c] sm:$0xf] }
  0x3d   : > { %v2183_v46 = vrot.slane %v2181_v34, 5  ;;  %v2189_v49 = vrot.slane %v2187_v35, 5  ;;  %v2193_v50 = vrot.slane %v2191_v36, 4  ;;  %v2197_v51 = vshll.u32 %v8119_v2, 16  ;;  %v8153_v31 = vld [vmem:[%s7975_s29 + $0x50] sm:$0x1] }
  0x3e   : > { %7246 = vmatmul.mubr.msk.bf16.gmra.mrb[4].mxu0 %vm706_vm3, %v6433_v39  ;;  %v375_v52 = vsel %vm7994_vm2, %v370_v40, %v374_v24  ;;  %v380_v53 = vrot.slane %v379_v41, 4  ;;  %v387_v58 = vshrl.u32 %v223_v38, 16  ;;  %v390_v61 = vshll.u32 %v223_v38, 16  ;;  %v8157_v36 = vld [vmem:[%s7975_s29 + $0x48] sm:$0xf] }
  0x3f   : > { %v2184_v62 = vor.u32 %v2183_v46, %v2180_v42  ;;  %v2194_v63 = vor.u32 %v2193_v50, %v2189_v49  ;;  %v2199_v1 = vrot.slane %v2197_v51, 5  ;;  %v396_v5 = vshll.u32 %v224_v44, 16  ;;  %v8162_v42 = vld [vmem:[%s7975_s29 + $0x4c] sm:$0xf] }
  0x40   : > { %v385_v6 = vsel %vm7994_vm2, %v380_v53, %v384_v29  ;;  %v389_v7 = vrot.slane %v387_v58, 4  ;;  %v392_v8 = vrot.slane %v390_v61, 5  ;;  %v400_v9 = vshrl.u32 %v224_v44, 16  ;;  %v253_v58 = vld [vmem:[%s7975_s29 + $0x50] sm:$0x1] }
  0x41   : > { %v6206_v11 = vcombine.low %v375_v52, %v385_v6  ;;  %v2185_v12 = vrot.slane %v2184_v62, 4  ;;  %v2195_v15 = vrot.slane %v2194_v63, 4  ;;  %v398_v17 = vrot.slane %v396_v5, 5  ;;  %v6400_v5 = vld [vmem:[%s7975_s29 + $0x54] sm:$0xf] }
  0x42   : > { %v393_v19 = vor.u32 %v392_v8, %v389_v7  ;;  %v402_v22 = vrot.slane %v400_v9, 4  ;;  %v406_v24 = vshll.u32 %v252_v4, 16  ;;  %v2202_v26 = vshrl.u32 %v6397_v3, 16 }
  0x43   : > { %7113 = vmatprep.mubr.msk.bf16.mxu1 %vm706_vm3, %v6206_v11  ;;  %v8146_v27 = vsel %vm7994_vm2, %v2185_v12, %v2189_v49  ;;  %v8150_v29 = vsel %vm7994_vm2, %v2195_v15, %v2199_v1  ;;  %v2205_v34 = vshll.u32 %v6397_v3, 16  ;;  %v2211_v35 = vshll.u32 %v8141_v10, 16 }
  0x44   : > { %11115 = vst [vmem:[#allocation10_spill] sm:$0xff] %v8146_v27  ;;  %11116 = vst [vmem:[#allocation11_spill] sm:$0xff] %v8150_v29  ;;  %v6434_v38 = vcombine.low %v8146_v27, %v8150_v29  ;;  %v394_v39 = vrot.slane %v393_v19, 4  ;;  %v403_v40 = vor.u32 %v402_v22, %v398_v17  ;;  %v408_v41 = vrot.slane %v406_v24, 5 }
  0x45   : > { %v2204_v44 = vrot.slane %v2202_v26, 4  ;;  %v2207_v46 = vrot.slane %v2205_v34, 5  ;;  %v2213_v49 = vrot.slane %v2211_v35, 5  ;;  %v2215_v50 = vshrl.u32 %v8141_v10, 16 }
  0x46   : > { %7249 = vmatprep.mubr.msk.bf16.mxu0 %vm706_vm3, %v6434_v38  ;;  %v399_v51 = vsel %vm7994_vm2, %v394_v39, %v398_v17  ;;  %v404_v52 = vrot.slane %v403_v40, 4  ;;  %v2221_v53 = vshll.u32 %v8153_v31, 16  ;;  %v411_v61 = vshrl.u32 %v8157_v36, 16  ;;  %v8178_v17 = vld [vmem:[%s7975_s29 + $0x58] sm:$0xf] }
  0x47   : > { %v2208_v62 = vor.u32 %v2207_v46, %v2204_v44  ;;  %v2217_v63 = vrot.slane %v2215_v50, 4  ;;  %v414_v1 = vshll.u32 %v8157_v36, 16  ;;  %v420_v4 = vshll.u32 %v8162_v42, 16  ;;  %v8186_v39 = vld [vmem:[%s7975_s29 + $0x5c] sm:$0x1] }
  0x48   : > { %v409_v3 = vsel %vm7994_vm2, %v404_v52, %v408_v41  ;;  %v2223_v6 = vrot.slane %v2221_v53, 5  ;;  %v413_v7 = vrot.slane %v411_v61, 4  ;;  %v424_v8 = vshrl.u32 %v8162_v42, 16  ;;  %v8198_v61 = vld [vmem:[%s7975_s29 + $0x58] sm:$0xf] }
  0x49   : > { %v6207_v9 = vcombine.low %v399_v51, %v409_v3  ;;  %v2209_v11 = vrot.slane %v2208_v62, 4  ;;  %v2218_v12 = vor.u32 %v2217_v63, %v2213_v49  ;;  %v416_v15 = vrot.slane %v414_v1, 5  ;;  %v8190_v51 = vld [vmem:[%s7975_s29 + $0x54] sm:$0xf] }
  0x4a   : > { %v422_v19 = vrot.slane %v420_v4, 5  ;;  %v426_v22 = vrot.slane %v424_v8, 4  ;;  %v430_v24 = vshll.u32 %v253_v58, 16  ;;  %v2226_v26 = vshrl.u32 %v6400_v5, 16 }
  0x4b   : > { %7114 = vmatmul.mubr.msk.bf16.gmra.mrb[8].mxu1 %vm706_vm3, %v6207_v9  ;;  %v8183_v34 = vsel %vm7994_vm2, %v2209_v11, %v2213_v49  ;;  %v2219_v35 = vrot.slane %v2218_v12, 4  ;;  %v417_v38 = vor.u32 %v416_v15, %v413_v7  ;;  %v2229_v40 = vshll.u32 %v6400_v5, 16  ;;  %v254_v7 = vld [vmem:[%s7975_s29 + $0x5c] sm:$0x1] }
  0x4c   : > { %11117 = vst [vmem:[#allocation12_spill] sm:$0xff] %v8183_v34  ;;  %v427_v41 = vor.u32 %v426_v22, %v422_v19  ;;  %v432_v44 = vrot.slane %v430_v24, 5  ;;  %v2228_v46 = vrot.slane %v2226_v26, 4  ;;  %v2235_v50 = vshll.u32 %v8178_v17, 16  ;;  %v6403_v22 = vld [vmem:[%s7975_s29 + $0x60] sm:$0xf] }
  0x4d   : > { %v8194_v52 = vsel %vm7994_vm2, %v2219_v35, %v2223_v6  ;;  %v418_v53 = vrot.slane %v417_v38, 4  ;;  %v2231_v49 = vrot.slane %v2229_v40, 5  ;;  %v2239_v58 = vshrl.u32 %v8178_v17, 16  ;;  %v8214_v38 = vld [vmem:[%s7975_s29 + $0x64] sm:$0xf] }
  0x4e   : > { %11118 = vst [vmem:[#allocation13_spill] sm:$0xff] %v8194_v52  ;;  %v6435_v62 = vcombine.low %v8183_v34, %v8194_v52  ;;  %v428_v63 = vrot.slane %v427_v41, 4  ;;  %v2237_v1 = vrot.slane %v2235_v50, 5  ;;  %v2245_v4 = vshll.u32 %v8186_v39, 16  ;;  %v260_v52 = vld [vmem:[%s7975_s29 + $0xa4] sm:$0x1] }
  0x4f   : > { %v423_v5 = vsel %vm7994_vm2, %v418_v53, %v422_v19  ;;  %v2232_v3 = vor.u32 %v2231_v49, %v2228_v46  ;;  %v2241_v6 = vrot.slane %v2239_v58, 4  ;;  %v435_v8 = vshrl.u32 %v8190_v51, 16  ;;  %v8223_v49 = vld [vmem:[%s7975_s29 + $0x68] sm:$0x1]  ;;  %v6468_v34 = vld [vmem:[%s7975_s29 + $0x48] sm:$0xe] }
  0x50   : > { %7250 = vmatmul.mubr.msk.bf16.gmra.mrb[8].mxu0 %vm706_vm3, %v6435_v62  ;;  %v433_v9 = vsel %vm7994_vm2, %v428_v63, %v432_v44  ;;  %v2247_v11 = vrot.slane %v2245_v4, 5  ;;  %v438_v12 = vshll.u32 %v8190_v51, 16  ;;  %v444_v15 = vshll.u32 %v8198_v61, 16 }
  0x51   : > { %v6208_v19 = vcombine.low %v423_v5, %v433_v9  ;;  %v2233_v24 = vrot.slane %v2232_v3, 4  ;;  %v2242_v26 = vor.u32 %v2241_v6, %v2237_v1  ;;  %v437_v35 = vrot.slane %v435_v8, 4  ;;  %v8227_v6 = vld [vmem:[%s7975_s29 + $0x60] sm:$0xf] }
  0x52   : > { %v440_v40 = vrot.slane %v438_v12, 5  ;;  %v446_v41 = vrot.slane %v444_v15, 5  ;;  %v448_v44 = vshrl.u32 %v8198_v61, 16  ;;  %v454_v46 = vshll.u32 %v254_v7, 16  ;;  %v8235_v12 = vld [vmem:[%s7975_s29 + $0x64] sm:$0xf] }
  0x53   : > { %7117 = vmatprep.mubr.msk.bf16.mxu1 %vm706_vm3, %v6208_v19  ;;  %v8220_v50 = vsel %vm7994_vm2, %v2233_v24, %v2237_v1  ;;  %v2243_v53 = vrot.slane %v2242_v26, 4  ;;  %v2250_v58 = vshrl.u32 %v6403_v22, 16  ;;  %v2253_v62 = vshll.u32 %v6403_v22, 16 }
  0x54   : > { %11119 = vst [vmem:[#allocation14_spill] sm:$0xff] %v8220_v50  ;;  %v441_v63 = vor.u32 %v440_v40, %v437_v35  ;;  %v450_v4 = vrot.slane %v448_v44, 4  ;;  %v456_v5 = vrot.slane %v454_v46, 5  ;;  %v2259_v3 = vshll.u32 %v8214_v38, 16 }
  0x55   : > { %v8231_v7 = vsel %vm7994_vm2, %v2243_v53, %v2247_v11  ;;  %v2252_v8 = vrot.slane %v2250_v58, 4  ;;  %v2255_v1 = vrot.slane %v2253_v62, 5  ;;  %v2263_v9 = vshrl.u32 %v8214_v38, 16  ;;  %v255_v53 = vld [vmem:[%s7975_s29 + $0x68] sm:$0x1] }
  0x56   : > { %11120 = vst [vmem:[#allocation15_spill] sm:$0xff] %v8231_v7  ;;  %v6436_v15 = vcombine.low %v8220_v50, %v8231_v7  ;;  %v442_v22 = vrot.slane %v441_v63, 4  ;;  %v451_v19 = vor.u32 %v450_v4, %v446_v41  ;;  %v2261_v24 = vrot.slane %v2259_v3, 5 }
  0x57   : > { %v2256_v26 = vor.u32 %v2255_v1, %v2252_v8  ;;  %v2265_v35 = vrot.slane %v2263_v9, 4  ;;  %v2269_v40 = vshll.u32 %v8223_v49, 16  ;;  %v459_v11 = vshrl.u32 %v8227_v6, 16  ;;  %v6463_v1 = vld [vmem:[%s7975_s29 + $0xc] sm:$0xe] }
  0x58   : > { %7253 = vmatprep.mubr.msk.bf16.mxu0 %vm706_vm3, %v6436_v15  ;;  %v447_v44 = vsel %vm7994_vm2, %v442_v22, %v446_v41  ;;  %v452_v46 = vrot.slane %v451_v19, 4  ;;  %v462_v58 = vshll.u32 %v8227_v6, 16  ;;  %v468_v62 = vshll.u32 %v8235_v12, 16  ;;  %v8252_v41 = vld [vmem:[%s7975_s29 + $0x6c] sm:$0xf] }
  0x59   : > { %v2257_v63 = vrot.slane %v2256_v26, 4  ;;  %v2266_v4 = vor.u32 %v2265_v35, %v2261_v24  ;;  %v2271_v3 = vrot.slane %v2269_v40, 5  ;;  %v461_v8 = vrot.slane %v459_v11, 4  ;;  %v7812_v40 = vld [vmem:[%s7975_s29 + $0x9c] sm:$0xff]  }
  0x5a   : > { %v457_v9 = vsel %vm7994_vm2, %v452_v46, %v456_v5  ;;  %v464_v16 = vrot.slane %v462_v58, 5  ;;  %v470_v15 = vrot.slane %v468_v62, 5  ;;  %v472_v21 = vshrl.u32 %v8235_v12, 16  ;;  %v8267_v58 = vld [vmem:[%s7975_s29 + $0x70] sm:$0xf] }
  0x5b   : > { %v6209_v22 = vcombine.low %v447_v44, %v457_v9  ;;  %v8256_v19 = vsel %vm7994_vm2, %v2257_v63, %v2261_v24  ;;  %v2267_v26 = vrot.slane %v2266_v4, 4  ;;  %v478_v35 = vshll.u32 %v255_v53, 16 }
  0x5c   : > { %11121 = vst [vmem:[#allocation16_spill] sm:$0xff] %v8256_v19  ;;  %v465_v5 = vor.u32 %v464_v16, %v461_v8  ;;  %v474_v11 = vrot.slane %v472_v21, 4  ;;  %v6479_v46 = vrot.slane %v6463_v1, 9  ;;  %v2862_v44 = vrot.slane %v2860_v56, 4  ;;  %v256_v1 = vld [vmem:[%s7975_s29 + $0x74] sm:$0x1] }
  0x5d   : > { %7118 = vmatmul.mubr.msk.bf16.gmra.mrb[12].mxu1 %vm706_vm3, %v6209_v22  ;;  %v8272_v24 = vsel %vm7994_vm2, %v2267_v26, %v2271_v3  ;;  %v480_v53 = vrot.slane %v478_v35, 5  ;;  %v483_v62 = vshrl.u32 %v8252_v41, 16  ;;  %v486_v63 = vshll.u32 %v8252_v41, 16  ;;  %v6464_v3 = vld [vmem:[%s7975_s29 + $0x18] sm:$0xe] }
  0x5e   : > { %11124 = vst [vmem:[#allocation17_spill] sm:$0xff] %v8272_v24  ;;  %v6437_v16 = vcombine.low %v8256_v19, %v8272_v24  ;;  %v466_v21 = vrot.slane %v465_v5, 4  ;;  %v475_v4 = vor.u32 %v474_v11, %v470_v15  ;;  %v2861_v8 = vsel %vm8260_vm6, %v6479_v46, %v2860_v56  ;;  %v8290_v5 = vld [vmem:[%s7975_s29 + $0x78] sm:$0xf]  ;;  %v257_v24 = vld [vmem:[%s7975_s29 + $0x80] sm:$0x1] }
  0x5f   : > { %v2864_v9 = vsel %vm8260_vm6, %v2862_v44, %v2863_v57  ;;  %v485_v22 = vrot.slane %v483_v62, 4  ;;  %v488_v26 = vrot.slane %v486_v63, 5  ;;  %v492_v35 = vshll.u32 %v8267_v58, 16  ;;  %v6465_v19 = vld [vmem:[%s7975_s29 + $0x24] sm:$0xe] }
  0x60   : > { %7254 = vmatmul.mubr.msk.bf16.gmra.mrb[12].mxu0 %vm706_vm3, %v6437_v16  ;;  %v471_v13 = vsel %vm7994_vm2, %v466_v21, %v470_v15  ;;  %v476_v56 = vrot.slane %v475_v4, 4  ;;  %v6495_v11 = vcombine.low %v2861_v8, %v2864_v9  ;;  %v496_v46 = vshrl.u32 %v8267_v58, 16 }
  0x61   : > { %v489_v57 = vor.u32 %v488_v26, %v485_v22  ;;  %v494_v44 = vrot.slane %v492_v35, 5  ;;  %v502_v62 = vshll.u32 %v256_v1, 16  ;;  %v6480_v63 = vrot.slane %v6464_v3, 9 }
  0x62   : > { %v481_v7 = vsel %vm7994_vm2, %v476_v56, %v480_v53  ;;  %7275 = vmatprep.mubr.msk.bf16.mxu0 %vm706_vm3, %v6495_v11  ;;  %v498_v16 = vrot.slane %v496_v46, 4  ;;  %v11125_v15 = vrot.slane %v8016_v59, 5  ;;  %v507_v4 = vshrl.u32 %v8290_v5, 16  ;;  %v8316_v56 = vld [vmem:[%s7975_s29 + $0x84] sm:$0xf]  ;;  %v8329_v46 = vld [vmem:[%s11049_s1 + $0x38] sm:$0xff]  }
  0x63   : > { %v6210_v8 = vcombine.low %v471_v13, %v481_v7  ;;  %v490_v1 = vrot.slane %v489_v57, 4  ;;  %v504_v9 = vrot.slane %v502_v62, 5  ;;  %v11126_v3 = vrot.slane %v8006_v54, 5  ;;  %v8324_v11 = vld [vmem:[%s7975_s29 + $0x88] sm:$0xf] }
  0x64   : > { %v2871_v21 = vsel %vm8260_vm6, %v8036_v23, %v11125_v15  ;;  %v499_v22 = vor.u32 %v498_v16, %v494_v44  ;;  %v509_v35 = vrot.slane %v507_v4, 4  ;;  %v510_v59 = vshll.u32 %v8290_v5, 16 }
  0x65   : > { %v2868_v53 = vsel %vm8260_vm6, %v6480_v63, %v11126_v3  ;;  %7121 = vmatprep.mubr.msk.bf16.mxu1 %vm706_vm3, %v6210_v8  ;;  %v495_v23 = vsel %vm7994_vm2, %v490_v1, %v494_v44  ;;  %v516_v7 = vshll.u32 %v8297_v14, 16  ;;  %v520_v54 = vshrl.u32 %v8297_v14, 16  ;;  %v258_v8 = vld [vmem:[%s7975_s29 + $0x8c] sm:$0x1] }
  0x66   : > { %v6496_v26 = vcombine.low %v2868_v53, %v2871_v21  ;;  %v526_v13 = vshll.u32 %v257_v24, 16  ;;  %v500_v57 = vrot.slane %v499_v22, 4  ;;  %v512_v62 = vrot.slane %v510_v59, 5 }
  0x67   : > { %v6481_v63 = vrot.slane %v6465_v19, 9  ;;  %v2874_v16 = vrot.slane %v8043_v37, 5  ;;  %v518_v15 = vrot.slane %v516_v7, 5  ;;  %v522_v44 = vrot.slane %v520_v54, 4  ;;  %v6466_v19 = vld [vmem:[%s7975_s29 + $0x30] sm:$0xe] }
  0x68   : > { %v528_v21 = vrot.slane %v526_v13, 5  ;;  %v2877_v4 = vrot.slane %v8054_v45, 5  ;;  %v505_v24 = vsel %vm7994_vm2, %v500_v57, %v504_v9  ;;  %7276 = vmatmul.mubr.msk.bf16.vlgmr.msra.gmra.mrb[0].mxu0 %vm706_vm3, %v6496_v26  ;;  %v513_v1 = vor.u32 %v512_v62, %v509_v35  ;;  %v8348_v54 = vld [vmem:[%s7975_s29 + $0x90] sm:$0xf]  ;;  %v8353_v62 = vld [vmem:[%s7975_s29 + $0x94] sm:$0xf] }
  0x69   : > { %v2875_v3 = vsel %vm8260_vm6, %v6481_v63, %v2874_v16  ;;  %v2876_v53 = vrot.slane %v2874_v16, 4  ;;  %v6211_v22 = vcombine.low %v495_v23, %v505_v24  ;;  %7308 = vmatpush3.bf16.msra.mxu0 %v8069_v0  ;;  %v523_v37 = vor.u32 %v522_v44, %v518_v15 }
  0x6a   : > { %v531_v45 = vshrl.u32 %v8316_v56, 16  ;;  %v534_v59 = vshll.u32 %v8316_v56, 16  ;;  %v514_v7 = vrot.slane %v513_v1, 4  ;;  %v540_v26 = vshll.u32 %v8324_v11, 16  ;;  %7341 = vmatprep.subr.bf16.mxu0 %v8329_v46 }
  0x6b   : > { %v2878_v9 = vsel %vm8260_vm6, %v2876_v53, %v2877_v4  ;;  %v544_v35 = vshrl.u32 %v8324_v11, 16  ;;  %7122 = vmatmul.mubr.msk.bf16.gmra.mrb[16].mxu1 %vm706_vm3, %v6211_v22  ;;  %v524_v0 = vrot.slane %v523_v37, 4  ;;  %v550_v4 = vshll.u32 %v258_v8, 16  ;;  %v259_v22 = vld [vmem:[%s7975_s29 + $0x98] sm:$0x1] }
  0x6c   : > { %v6497_v23 = vcombine.low %v2875_v3, %v2878_v9  ;;  %v533_v13 = vrot.slane %v531_v45, 4  ;;  %v536_v57 = vrot.slane %v534_v59, 5  ;;  %v519_v63 = vsel %vm7994_vm2, %v514_v7, %v518_v15  ;;  %v6467_v15 = vld [vmem:[%s7975_s29 + $0x3c] sm:$0xe] }
  0x6d   : > { %v542_v16 = vrot.slane %v540_v26, 5  ;;  %v546_v44 = vrot.slane %v544_v35, 4  ;;  %v529_v24 = vsel %vm7994_vm2, %v524_v0, %v528_v21  ;;  %v6482_v53 = vrot.slane %v6466_v19, 9  ;;  %v8368_v35 = vld [vmem:[%s7975_s29 + $0x9c] sm:$0xf] }
  0x6e   : > { %7279 = vmatprep.mubr.msk.bf16.mxu0 %vm706_vm3, %v6497_v23  ;;  %v537_v1 = vor.u32 %v536_v57, %v533_v13  ;;  %v2881_v3 = vrot.slane %v8082_v25, 5  ;;  %v6212_v37 = vcombine.low %v519_v63, %v529_v24  ;;  %v552_v59 = vrot.slane %v550_v4, 5 }
  0x6f   : > { %v547_v45 = vor.u32 %v546_v44, %v542_v16  ;;  %v2884_v9 = vrot.slane %v8091_v32, 5  ;;  %v555_v21 = vshrl.u32 %v8348_v54, 16  ;;  %v558_v19 = vshll.u32 %v8348_v54, 16  ;;  %v8379_v44 = vld [vmem:[%s7975_s29 + $0xa0] sm:$0xf] }
  0x70   : > { %v538_v7 = vrot.slane %v537_v1, 4  ;;  %v2882_v8 = vsel %vm8260_vm6, %v6482_v53, %v2881_v3  ;;  %v2883_v26 = vrot.slane %v2881_v3, 4  ;;  %7125 = vmatprep.mubr.msk.bf16.mxu1 %vm706_vm3, %v6212_v37  ;;  %v564_v0 = vshll.u32 %v8353_v62, 16 }
  0x71   : > { %v548_v25 = vrot.slane %v547_v45, 4  ;;  %v568_v32 = vshrl.u32 %v8353_v62, 16  ;;  %v557_v57 = vrot.slane %v555_v21, 4  ;;  %v574_v63 = vshll.u32 %v259_v22, 16 }
  0x72   : > { %v543_v23 = vsel %vm7994_vm2, %v538_v7, %v542_v16  ;;  %v2885_v13 = vsel %vm8260_vm6, %v2883_v26, %v2884_v9  ;;  %v560_v1 = vrot.slane %v558_v19, 5  ;;  %v566_v53 = vrot.slane %v564_v0, 5 }
  0x73   : > { %v553_v4 = vsel %vm7994_vm2, %v548_v25, %v552_v59  ;;  %v6498_v24 = vcombine.low %v2882_v8, %v2885_v13  ;;  %v570_v37 = vrot.slane %v568_v32, 4  ;;  %v576_v45 = vrot.slane %v574_v63, 5 }
  0x74   : > { %v6213_v3 = vcombine.low %v543_v23, %v553_v4  ;;  %v6483_v50 = vrot.slane %v6467_v15, 9  ;;  %v561_v16 = vor.u32 %v560_v1, %v557_v57  ;;  %v2888_v9 = vrot.slane %v8112_v18, 5 }
  0x75   : > { %7280 = vmatmul.mubr.msk.bf16.gmra.mrb[4].mxu0 %vm706_vm3, %v6498_v24  ;;  %v2891_v22 = vrot.slane %v8119_v2, 5  ;;  %v579_v7 = vshrl.u32 %v8368_v35, 16  ;;  %v571_v59 = vor.u32 %v570_v37, %v566_v53  ;;  %v582_v8 = vshll.u32 %v8368_v35, 16  ;;  %v8400_v24 = vld [vmem:[%s7975_s29 + $0xa8] sm:$0xf] }
  0x76   : > { %7126 = vmatmul.mubr.msk.bf16.gmra.mrb[20].mxu1 %vm706_vm3, %v6213_v3  ;;  %v588_v26 = vshll.u32 %v8379_v44, 16  ;;  %v592_v15 = vshrl.u32 %v8379_v44, 16  ;;  %v562_v21 = vrot.slane %v561_v16, 4  ;;  %v2889_v25 = vsel %vm8260_vm6, %v6483_v50, %v2888_v9  ;;  %v8405_v16 = vld [vmem:[%s7975_s29 + $0xac] sm:$0xf] }
  0x77   : > { %v2890_v18 = vrot.slane %v2888_v9, 4  ;;  %v581_v19 = vrot.slane %v579_v7, 4  ;;  %v572_v2 = vrot.slane %v571_v59, 4  ;;  %v584_v0 = vrot.slane %v582_v8, 5 }
  0x78   : > { %v590_v32 = vrot.slane %v588_v26, 5  ;;  %v594_v23 = vrot.slane %v592_v15, 4  ;;  %v567_v13 = vsel %vm7994_vm2, %v562_v21, %v566_v53  ;;  %v598_v63 = vshll.u32 %v260_v52, 16  ;;  %v6469_v52 = vld [vmem:[%s7975_s29 + $0x54] sm:$0xe] }
  0x79   : > { %v2892_v57 = vsel %vm8260_vm6, %v2890_v18, %v2891_v22  ;;  %v6484_v4 = vrot.slane %v6468_v34, 9  ;;  %v577_v50 = vsel %vm7994_vm2, %v572_v2, %v576_v45  ;;  %v585_v3 = vor.u32 %v584_v0, %v581_v19  ;;  %v261_v22 = vld [vmem:[%s7975_s29 + $0xb0] sm:$0x1]  ;;  %v8415_v15 = vld [vmem:[%s7975_s29 + $0xb4] sm:$0xf] }
  0x7a   : > { %v6499_v1 = vcombine.low %v2889_v25, %v2892_v57  ;;  %v595_v37 = vor.u32 %v594_v23, %v590_v32  ;;  %v6214_v9 = vcombine.low %v567_v13, %v577_v50  ;;  %v600_v7 = vrot.slane %v598_v63, 5  ;;  %v8427_v23 = vld [vmem:[%s7975_s29 + $0xb8] sm:$0xf] }
  0x7b   : > { %v2895_v53 = vrot.slane %v8141_v10, 5  ;;  %v2898_v59 = vrot.slane %v8153_v31, 5  ;;  %v586_v34 = vrot.slane %v585_v3, 4  ;;  %v603_v45 = vshrl.u32 %v8400_v24, 16 }
  0x7c   : > { %7283 = vmatprep.mubr.msk.bf16.mxu0 %vm706_vm3, %v6499_v1  ;;  %v596_v8 = vrot.slane %v595_v37, 4  ;;  %v606_v26 = vshll.u32 %v8400_v24, 16  ;;  %7129 = vmatprep.mubr.msk.bf16.mxu1 %vm706_vm3, %v6214_v9  ;;  %v612_v31 = vshll.u32 %v8405_v16, 16  ;;  %v616_v25 = vshrl.u32 %v8405_v16, 16 }
  0x7d   : > { %v2896_v10 = vsel %vm8260_vm6, %v6484_v4, %v2895_v53  ;;  %v2897_v21 = vrot.slane %v2895_v53, 4  ;;  %v591_v18 = vsel %vm7994_vm2, %v586_v34, %v590_v32  ;;  %v605_v2 = vrot.slane %v603_v45, 4  ;;  %v262_v32 = vld [vmem:[%s7975_s29 + $0xbc] sm:$0x1] }
  0x7e   : > { %v601_v19 = vsel %vm7994_vm2, %v596_v8, %v600_v7  ;;  %v608_v0 = vrot.slane %v606_v26, 5  ;;  %v614_v63 = vrot.slane %v612_v31, 5  ;;  %v618_v4 = vrot.slane %v616_v25, 4  ;;  %v6470_v8 = vld [vmem:[%s7975_s29 + $0x60] sm:$0xe] }
  0x7f   : > { %v6215_v13 = vcombine.low %v591_v18, %v601_v19  ;;  %v2899_v57 = vsel %vm8260_vm6, %v2897_v21, %v2898_v59  ;;  %v622_v3 = vshll.u32 %v261_v22, 16  ;;  %v6485_v37 = vrot.slane %v6469_v52, 9  ;;  %v6471_v52 = vld [vmem:[%s7975_s29 + $0x6c] sm:$0xe] }
  0x80   : > { %v6500_v50 = vcombine.low %v2896_v10, %v2899_v57  ;;  %v609_v1 = vor.u32 %v608_v0, %v605_v2  ;;  %v619_v9 = vor.u32 %v618_v4, %v614_v63  ;;  %v2902_v7 = vrot.slane %v8178_v17, 5  ;;  %v6407_v4 = vld [vmem:[%s7975_s29 + $0x70] sm:$0xf] }
  0x81   : > { %7130 = vmatmul.mubr.msk.bf16.gmra.mrb[24].mxu1 %vm706_vm3, %v6215_v13  ;;  %v2905_v53 = vrot.slane %v8186_v39, 5  ;;  %v627_v34 = vshrl.u32 %v8415_v15, 16  ;;  %v624_v45 = vrot.slane %v622_v3, 5  ;;  %v630_v26 = vshll.u32 %v8415_v15, 16 }
  0x82   : > { %7284 = vmatmul.mubr.msk.bf16.gmra.mrb[8].mxu0 %vm706_vm3, %v6500_v50  ;;  %v610_v59 = vrot.slane %v609_v1, 4  ;;  %v636_v22 = vshll.u32 %v8427_v23, 16  ;;  %v620_v10 = vrot.slane %v619_v9, 4  ;;  %v2903_v17 = vsel %vm8260_vm6, %v6485_v37, %v2902_v7  ;;  %v6408_v50 = vld [vmem:[%s7975_s29 + $0x74] sm:$0x1] }
  0x83   : > { %v2904_v21 = vrot.slane %v2902_v7, 4  ;;  %v629_v39 = vrot.slane %v627_v34, 4  ;;  %v632_v25 = vrot.slane %v630_v26, 5  ;;  %v640_v19 = vshrl.u32 %v8427_v23, 16 }
  0x84   : > { %v615_v31 = vsel %vm7994_vm2, %v610_v59, %v614_v63  ;;  %v638_v18 = vrot.slane %v636_v22, 5  ;;  %v625_v2 = vsel %vm7994_vm2, %v620_v10, %v624_v45  ;;  %v646_v13 = vshll.u32 %v262_v32, 16  ;;  %v6472_v22 = vld [vmem:[%s7975_s29 + $0x78] sm:$0xe] }
  0x85   : > { %v2906_v0 = vsel %vm8260_vm6, %v2904_v21, %v2905_v53  ;;  %v6486_v57 = vrot.slane %v6470_v8, 9  ;;  %v6216_v1 = vcombine.low %v615_v31, %v625_v2  ;;  %v633_v37 = vor.u32 %v632_v25, %v629_v39  ;;  %v7816_v39 = vld [vmem:[%s7975_s29] sm:$0xf]  ;;  %v8467_v31 = vld [vmem:[%s7975_s29 + $0x4] sm:$0xf] }
  0x86   : > { %v6501_v3 = vcombine.low %v2903_v17, %v2906_v0  ;;  %v642_v9 = vrot.slane %v640_v19, 4  ;;  %v648_v63 = vrot.slane %v646_v13, 5  ;;  %v2909_v7 = vrot.slane %v8214_v38, 5  ;;  %v8471_v19 = vld [vmem:[%s7975_s29 + $0x7c] sm:$0xf] }
  0x87   : > { %v2912_v34 = vrot.slane %v8223_v49, 5  ;;  %v6487_v59 = vrot.slane %v6471_v52, 9  ;;  %7133 = vmatprep.mubr.msk.bf16.mxu1 %vm706_vm3, %v6216_v1  ;;  %v634_v32 = vrot.slane %v633_v37, 4  ;;  %v2916_v8 = vrot.slane %v6407_v4, 5  ;;  %v8474_v2 = vld [vmem:[%s7975_s29 + $0x80] sm:$0x1] }
  0x88   : > { %7287 = vmatprep.mubr.msk.bf16.mxu0 %vm706_vm3, %v6501_v3  ;;  %v643_v53 = vor.u32 %v642_v9, %v638_v18  ;;  %v2919_v45 = vrot.slane %v6408_v50, 5  ;;  %v2910_v26 = vsel %vm8260_vm6, %v6486_v57, %v2909_v7  ;;  %v2911_v38 = vrot.slane %v2909_v7, 4  ;;  %v6413_v50 = vld [vmem:[%s7975_s29 + $0x88] sm:$0xf]  ;;  %v6414_v1 = vld [vmem:[%s7975_s29 + $0x8c] sm:$0x1] }
  0x89   : > { %v639_v49 = vsel %vm7994_vm2, %v634_v32, %v638_v18  ;;  %v2917_v10 = vsel %vm8260_vm6, %v6487_v59, %v2916_v8  ;;  %v2918_v17 = vrot.slane %v2916_v8, 4  ;;  %v6235_v25 = vcombine.low %v7816_v39, %v8467_v31  ;;  %v6473_v18 = vld [vmem:[%s7975_s29 + $0x84] sm:$0xe]  ;;  %v6416_v9 = vld [vmem:[%s7975_s29 + $0x94] sm:$0xf] }
  0x8a   : > { %v644_v52 = vrot.slane %v643_v53, 4  ;;  %v2913_v21 = vsel %vm8260_vm6, %v2911_v38, %v2912_v34  ;;  %v6488_v4 = vrot.slane %v6472_v22, 9  ;;  %v2923_v7 = vrot.slane %v8471_v19, 5  ;;  %v6417_v53 = vld [vmem:[%s7975_s29 + $0x98] sm:$0x1] }
  0x8b   : > { %v6502_v13 = vcombine.low %v2910_v26, %v2913_v21  ;;  %v2920_v57 = vsel %vm8260_vm6, %v2918_v17, %v2919_v45  ;;  %v6489_v34 = vrot.slane %v6473_v18, 9  ;;  %v2930_v59 = vrot.slane %v6413_v50, 5  ;;  %v6474_v8 = vld [vmem:[%s7975_s29 + $0x90] sm:$0xe]  ;;  %v6419_v22 = vld [vmem:[%s7975_s29 + $0xa0] sm:$0xf] }
  0x8c   : > { %v649_v0 = vsel %vm7994_vm2, %v644_v52, %v648_v63  ;;  %v6503_v37 = vcombine.low %v2917_v10, %v2920_v57  ;;  %v2926_v63 = vrot.slane %v8474_v2, 5  ;;  %v2933_v32 = vrot.slane %v6414_v1, 5  ;;  %v6420_v10 = vld [vmem:[%s7975_s29 + $0xa4] sm:$0x1]  ;;  %v6475_v17 = vld [vmem:[%s7975_s29 + $0x9c] sm:$0xe] }
  0x8d   : > { %v6217_v3 = vcombine.low %v639_v49, %v649_v0  ;;  %7288 = vmatmul.mubr.msk.bf16.gmra.mrb[12].mxu0 %vm706_vm3, %v6502_v13  ;;  %v2924_v45 = vsel %vm8260_vm6, %v6488_v4, %v2923_v7  ;;  %v2925_v26 = vrot.slane %v2923_v7, 4  ;;  %v2937_v38 = vrot.slane %v6416_v9, 5  ;;  %v7818_v21 = vld [vmem:[%s7975_s29 + $0xc] sm:$0xf]  ;;  %v8501_v39 = vld [vmem:[%s7975_s29 + $0x10] sm:$0xf] }
  0x8e   : > { %7291 = vmatprep.mubr.msk.bf16.mxu0 %vm706_vm3, %v6503_v37  ;;  %v2931_v49 = vsel %vm8260_vm6, %v6489_v34, %v2930_v59  ;;  %v2932_v52 = vrot.slane %v2930_v59, 4  ;;  %v6490_v0 = vrot.slane %v6474_v8, 9  ;;  %v2940_v13 = vrot.slane %v6417_v53, 5  ;;  %v8510_v37 = vld [vmem:[%s7975_s29 + $0x1c] sm:$0xf] }
  0x8f   : > { %7134 = vmatmul.mubr.msk.bf16.gmra.mrb[28].mxu1 %vm706_vm3, %v6217_v3  ;;  %v2927_v18 = vsel %vm8260_vm6, %v2925_v26, %v2926_v63  ;;  %v2939_v50 = vrot.slane %v2937_v38, 4  ;;  %v2944_v1 = vrot.slane %v6419_v22, 5  ;;  %v7820_v3 = vld [vmem:[%s7975_s29 + $0x18] sm:$0xf]  ;;  %v6491_v34 = vrot.slane %v6475_v17, 9  ;;  %v7822_v22 = vld [vmem:[%s11049_s1 + $0x10] sm:$0xff]  }
  0x90   : > { %7139 = vmatprep.mubr.msk.bf16.mxu1 %vm706_vm3, %v6235_v25  ;;  %v6236_v25 = vcombine.low %v7818_v21, %v8501_v39  ;;  %v6504_v57 = vcombine.low %v2924_v45, %v2927_v18  ;;  %v2934_v4 = vsel %vm8260_vm6, %v2932_v52, %v2933_v32  ;;  %v6237_v9 = vcombine.low %v7820_v3, %v8510_v37  ;;  %v6422_v21 = vld [vmem:[%s7975_s29 + $0xac] sm:$0xf]  ;;  %v6425_v8 = vld [vmem:[%s7975_s29 + $0xb8] sm:$0xf]  ;;  %v6477_v18 = vld [vmem:[%s7975_s29 + $0xb4] sm:$0xe] }
  0x91   : > { %v6505_v7 = vcombine.low %v2931_v49, %v2934_v4  ;;  %v2947_v59 = vrot.slane %v6420_v10, 5  ;;  %v2946_v63 = vrot.slane %v2944_v1, 4  ;;  %v8518_v32 = vld [vmem:[%s11049_s1 + $0x18] sm:$0xff]   ;;  %v2938_v53 = vsel %vm8260_vm6, %v6490_v0, %v2937_v38  ;;  %v6423_v38 = vld [vmem:[%s7975_s29 + $0xb0] sm:$0x1] }
  0x92   : > { %v2941_v45 = vsel %vm8260_vm6, %v2939_v50, %v2940_v13  ;;  %v2951_v26 = vrot.slane %v6422_v21, 5  ;;  %v2945_v49 = vsel %vm8260_vm6, %v6491_v34, %v2944_v1  ;;  %v6476_v10 = vld [vmem:[%s7975_s29 + $0xa8] sm:$0xe]  ;;  %v2958_v17 = vrot.slane %v6425_v8, 5  ;;  %v7823_v0 = vld [vmem:[%s7975_s29 + $0x24] sm:$0xf] }
  0x93   : > { %v2948_v52 = vsel %vm8260_vm6, %v2946_v63, %v2947_v59  ;;  %v8542_v13 = vld [vmem:[%s7975_s29 + $0x28] sm:$0xf]  ;;  %v6506_v4 = vcombine.low %v2938_v53, %v2941_v45  ;;  %v6428_v50 = vld [vmem:[%s7975_s29 + $0xc4] sm:$0xf]  ;;  %v6492_v3 = vrot.slane %v6476_v10, 9  ;;  %v6493_v63 = vrot.slane %v6477_v18, 9 }
  0x94   : > { %v6507_v1 = vcombine.low %v2945_v49, %v2948_v52  ;;  %v7825_v34 = vld [vmem:[%s7975_s29 + $0x30] sm:$0xf]  ;;  %v8548_v59 = vld [vmem:[%s7975_s29 + $0x34] sm:$0xf]  ;;  %v2960_v8 = vrot.slane %v2958_v17, 4  ;;  %v2965_v49 = vrot.slane %v6428_v50, 5 }
  0x95   : > { %7292 = vmatmul.mubr.msk.bf16.gmra.mrb[16].mxu0 %vm706_vm3, %v6504_v57  ;;  %v6238_v57 = vcombine.low %v7823_v0, %v8542_v13  ;;  %v6239_v21 = vcombine.low %v7825_v34, %v8548_v59  ;;  %v2952_v53 = vsel %vm8260_vm6, %v6492_v3, %v2951_v26  ;;  %v2959_v52 = vsel %vm8260_vm6, %v6493_v63, %v2958_v17  ;;  %v6429_v10 = vld [vmem:[%s7975_s29 + $0xc8] sm:$0x1] }
  0x96   : > { %7295 = vmatprep.mubr.msk.bf16.mxu0 %vm706_vm3, %v6505_v7  ;;  %v2954_v7 = vrot.slane %v6423_v38, 5  ;;  %v2307_v18 = vshll.u32 %v8471_v19, 16  ;;  %v2311_v0 = vshrl.u32 %v8471_v19, 16  ;;  %v2967_v17 = vrot.slane %v2965_v49, 4 }
  0x97   : > { %7140 = vmatmul.mubr.msk.bf16.vlgmr.msra.gmra.mrb[0].mxu1 %vm706_vm3, %v6236_v25  ;;  %v6426_v25 = vld [vmem:[%s7975_s29 + $0xbc] sm:$0x1]  ;;  %v2317_v19 = vshll.u32 %v8474_v2, 16  ;;  %v1271_v63 = vrot.slane %v8501_v39, 5  ;;  %v7829_v2 = vld [vmem:[%s7975_s29 + $0x8] sm:$0x1] }
  0x98   : > { %7143 = vmatprep.mubr.msk.bf16.mxu1 %vm706_vm3, %v6237_v9  ;;  %7172 = vmatpush3.bf16.msra.mxu1 %v7822_v22  ;;  %v2953_v9 = vrot.slane %v2951_v26, 4  ;;  %v2961_v22 = vrot.slane %v6426_v25, 5  ;;  %v6478_v25 = vld [vmem:[%s7975_s29 + $0xc0] sm:$0xe]  ;;  %v7827_v26 = vld [vmem:[%s7975_s29 + $0x3c] sm:$0xf] }
  0x99   : > { %7205 = vmatprep.subr.bf16.mxu1 %v8518_v32  ;;  %v6494_v3 = vrot.slane %v6478_v25, 9  ;;  %v8574_v34 = vrot.slane %v2307_v18, 5  ;;  %v7830_v39 = vld [vmem:[%s7975_s29 + $0x14] sm:$0x1]  ;;  %v1213_v18 = vld [vmem:[%s7975_s29 + $0x18] sm:$0xe] }
  0x9a   : > { %v2955_v45 = vsel %vm8260_vm6, %v2953_v9, %v2954_v7  ;;  %v2962_v38 = vsel %vm8260_vm6, %v2960_v8, %v2961_v22  ;;  %v2968_v9 = vrot.slane %v6429_v10, 5  ;;  %v6241_v7 = vcombine.low %v8157_v36, %v8162_v42  ;;  %v1212_v8 = vld [vmem:[%s7975_s29 + $0xc] sm:$0xe] }
  0x9b   : > { %v6508_v50 = vcombine.low %v2952_v53, %v2955_v45  ;;  %11127 = vst [vmem:[#allocation18_spill] sm:$0xff] %v8574_v34  ;;  %v2966_v36 = vsel %vm8260_vm6, %v6494_v3, %v2965_v49  ;;  %v1264_v22 = vrot.slane %v8467_v31, 5  ;;  %v1267_v53 = vrot.slane %v7829_v2, 5  ;;  %v1214_v31 = vld [vmem:[%s7975_s29 + $0x24] sm:$0xe]  ;;  %v7774_v3 = vld [vmem:[%s7975_s29 + $0x18] sm:$0xff]  }
  0x9c   : > { %v2969_v42 = vsel %vm8260_vm6, %v2967_v17, %v2968_v9  ;;  %v1274_v45 = vrot.slane %v7830_v39, 5  ;;  %v8595_v10 = vrot.slane %v2317_v19, 5  ;;  %v6242_v49 = vcombine.low %v8190_v51, %v8198_v61 }
  0x9d   : > { %7296 = vmatmul.mubr.msk.bf16.gmra.mrb[20].mxu0 %vm706_vm3, %v6506_v4  ;;  %v6269_v25 = vrot.slane %v1212_v8, 9  ;;  %v1266_v51 = vrot.slane %v1264_v22, 4  ;;  %v1292_v19 = vrot.slane %v8548_v59, 5  ;;  %v6270_v8 = vrot.slane %v1213_v18, 9  ;;  %v7832_v59 = vld [vmem:[%s7975_s29 + $0x2c] sm:$0x1] }
  0x9e   : > { %7299 = vmatprep.mubr.msk.bf16.mxu0 %vm706_vm3, %v6507_v1  ;;  %v6509_v1 = vcombine.low %v2959_v52, %v2962_v38  ;;  %v1211_v52 = vld [vmem:[%s7975_s29] sm:$0xe]  ;;  %11128 = vst [vmem:[#allocation19_spill] sm:$0xff] %v8595_v10  ;;  %v6271_v2 = vrot.slane %v1214_v31, 9  ;;  %v1216_v18 = vld [vmem:[%s7975_s29 + $0x3c] sm:$0xe] }
  0x9f   : > { %7144 = vmatmul.mubr.msk.bf16.gmra.mrb[4].mxu1 %vm706_vm3, %v6238_v57  ;;  %v8569_v57 = vld [vmem:[%s7975_s29 + $0x40] sm:$0xf]  ;;  %v6268_v9 = vrot.slane %v1211_v52, 9  ;;  %v1320_v33 = vrot.slane %v8235_v12, 5  ;;  %v7845_v10 = vld [vmem:[%s7975_s29 + $0x8c] sm:$0x1] }
  0xa0   : > { %7147 = vmatprep.mubr.msk.bf16.mxu1 %vm706_vm3, %v6239_v21  ;;  %v6240_v4 = vcombine.low %v7827_v26, %v8569_v57  ;;  %v8576_v21 = vrot.slane %v2311_v0, 4  ;;  %v6510_v0 = vcombine.low %v2966_v36, %v2969_v42  ;;  %v1273_v26 = vrot.slane %v1271_v63, 4  ;;  %v7831_v36 = vld [vmem:[%s7975_s29 + $0x20] sm:$0x1] }
  0xa1   : > { %v1281_v42 = vrot.slane %v7831_v36, 5  ;;  %v1299_v31 = vrot.slane %v8569_v57, 5  ;;  %v6593_v36 = vld [vmem:[%s7975_s29 + $0x18] sm:$0xf] }
  0xa2   : > { %v8624_v39 = vsel %vm8260_vm6, %v1273_v26, %v1274_v45  ;;  %v8637_v45 = vsel %vm8260_vm6, %v1266_v51, %v1267_v53  ;;  %v7777_v53 = vld [vmem:[%s7975_s29 + $0x24] sm:$0xff]  }
  0xa3   : > { %v1301_v61 = vrot.slane %v1299_v31, 4 }
  0xa5   : > { %7300 = vmatmul.mubr.msk.bf16.gmra.mrb[24].mxu0 %vm706_vm3, %v6508_v50  ;;  %v1285_v50 = vrot.slane %v8542_v13, 5  ;;  %v1215_v13 = vld [vmem:[%s7975_s29 + $0x30] sm:$0xe] }
  0xa6   : > { %7303 = vmatprep.mubr.msk.bf16.mxu0 %vm706_vm3, %v6509_v1  ;;  %v6243_v1 = vcombine.low %v8227_v6, %v8235_v12  ;;  %v8618_v6 = vsel %vm8260_vm6, %v6269_v25, %v1271_v63  ;;  %v8633_v25 = vsel %vm8260_vm6, %v6268_v9, %v1264_v22  ;;  %v6272_v26 = vrot.slane %v1215_v13, 9  ;;  %v7833_v22 = vld [vmem:[%s7975_s29 + $0x38] sm:$0x1]  ;;  %v7834_v13 = vld [vmem:[%s7975_s29 + $0x4c] sm:$0xf] }
  0xa7   : > { %7148 = vmatmul.mubr.msk.bf16.gmra.mrb[8].mxu1 %vm706_vm3, %v6240_v4  ;;  %v1278_v4 = vrot.slane %v8510_v37, 5  ;;  %v1287_v38 = vrot.slane %v1285_v50, 4  ;;  %v1288_v37 = vrot.slane %v7832_v59, 5  ;;  %v1295_v9 = vrot.slane %v7833_v22, 5  ;;  %v7835_v63 = vld [vmem:[%s7975_s29 + $0x44] sm:$0x1] }
  0xa8   : > { %7151 = vmatprep.mubr.msk.bf16.mxu1 %vm706_vm3, %v6241_v7  ;;  %v1306_v59 = vrot.slane %v7834_v13, 5  ;;  %v8666_v51 = vsel %vm8260_vm6, %v6271_v2, %v1285_v50  ;;  %v6594_v13 = vld [vmem:[%s7975_s29 + $0x1c] sm:$0xf]  ;;  %v6273_v7 = vrot.slane %v1216_v18, 9  ;;  %v1302_v17 = vrot.slane %v7835_v63, 5 }
  0xa9   : > { %v1280_v52 = vrot.slane %v1278_v4, 4  ;;  %v8670_v57 = vsel %vm8260_vm6, %v1287_v38, %v1288_v37  ;;  %v8683_v50 = vsel %vm8260_vm6, %v6272_v26, %v1292_v19  ;;  %v3678_v37 = vshrl.u32 %v6593_v36, 16  ;;  %v7836_v18 = vld [vmem:[%s7975_s29 + $0x50] sm:$0x1] }
  0xaa   : > { %v3681_v2 = vshll.u32 %v6593_v36, 16  ;;  %v1309_v63 = vrot.slane %v7836_v18, 5  ;;  %v11129_v36 = vcombine.low %v8252_v41, %v8267_v58  ;;  %v8704_v12 = vsel %vm8260_vm6, %v6273_v7, %v1299_v31  ;;  %v7781_v58 = vld [vmem:[%s7975_s29 + $0x3c] sm:$0xff]   ;;  %v8724_v31 = vld [vmem:[%s7975_s29 + $0x28] sm:$0xf] }
  0xab   : > { %v8662_v22 = vsel %vm8260_vm6, %v1280_v52, %v1281_v42  ;;  %v8679_v42 = vld [vmem:[%s11049_s1 + $0x40] sm:$0xff]   ;;  %v1308_v52 = vrot.slane %v1306_v59, 4  ;;  %v11130_v41 = vcombine.low %v8290_v5, %v8297_v14  ;;  %11131 = vst [vmem:[#allocation20_spill] sm:$0xff] %v8724_v31  ;;  %v6599_v5 = vld [vmem:[%s7975_s29 + $0x30] sm:$0xf]  ;;  %v7783_v14 = vld [vmem:[%s7975_s29 + $0x48] sm:$0xff]  }
  0xac   : > { %v3683_v7 = vrot.slane %v3681_v2, 5 }
  0xad   : > { %7304 = vmatmul.mubr.msk.bf16.gmra.mrb[28].mxu0 %vm706_vm3, %v6510_v0  ;;  %v1217_v0 = vld [vmem:[%s7975_s29 + $0x48] sm:$0xe] }
  0xae   : > { %7309 = vmatprep.mubr.msk.bf16.mxu0 %vm706_vm3, %v7774_v3  ;;  %v1294_v3 = vrot.slane %v1292_v19, 4  ;;  %v6274_v29 = vrot.slane %v1217_v0, 9  ;;  %v7837_v0 = vld [vmem:[%s7975_s29 + $0x58] sm:$0xf]  ;;  %v8731_v19 = vld [vmem:[%s7975_s29 + $0x20] sm:$0x1] }
  0xaf   : > { %7152 = vmatmul.mubr.msk.bf16.gmra.mrb[12].mxu1 %vm706_vm3, %v6242_v49  ;;  %v7779_v49 = vld [vmem:[%s7975_s29 + $0x30] sm:$0xff]   ;;  %v1313_v27 = vrot.slane %v7837_v0, 5  ;;  %v6596_v0 = vld [vmem:[%s7975_s29 + $0x24] sm:$0xf]  ;;  %11132 = vst [vmem:[#allocation21_spill] sm:$0xff] %v8731_v19 }
  0xb0   : > { %7155 = vmatprep.mubr.msk.bf16.mxu1 %vm706_vm3, %v6243_v1  ;;  %v8654_v1 = vsel %vm8260_vm6, %v6270_v8, %v1278_v4  ;;  %v1218_v4 = vld [vmem:[%s7975_s29 + $0x54] sm:$0xe]  ;;  %v1219_v8 = vld [vmem:[%s7975_s29 + $0x60] sm:$0xe]  ;;  %v8687_v38 = vsel %vm8260_vm6, %v1294_v3, %v1295_v9  ;;  %v3687_v3 = vshll.u32 %v6594_v13, 16  ;;  %v3691_v9 = vshrl.u32 %v6594_v13, 16 }
  0xb1   : > { %v6275_v18 = vrot.slane %v1218_v4, 9  ;;  %v6276_v13 = vrot.slane %v1219_v8, 9  ;;  %v1315_v4 = vrot.slane %v1313_v27, 4  ;;  %v7838_v8 = vld [vmem:[%s7975_s29 + $0x5c] sm:$0x1]  ;;  %v3702_v47 = vshrl.u32 %v6596_v0, 16 }
  0xb2   : > { %v8744_v2 = vrot.slane %v3687_v3, 5  ;;  %v3705_v30 = vshll.u32 %v6596_v0, 16  ;;  %v3726_v3 = vshrl.u32 %v6599_v5, 16  ;;  %v11134_v0 = vcombine.low %v8316_v56, %v8324_v11  ;;  %v8783_v11 = vld [vmem:[%s7975_s29 + $0x2c] sm:$0x1] }
  0xb3   : > { %v8752_v20 = vsel %vm8260_vm6, %v6276_v13, %v1320_v33  ;;  %11136 = vst [vmem:[#allocation23_spill] sm:$0xff] %v8783_v11 }
  0xb5   : > { %7310 = vmatmul.mubr.msk.bf16.vlgmr.msra.gmra.mrb[0].mxu0 %vm706_vm3, %v7777_v53  ;;  %v8708_v53 = vsel %vm8260_vm6, %v1301_v61, %v1302_v17  ;;  %v8721_v17 = vsel %vm8260_vm6, %v6274_v29, %v1306_v59  ;;  %v3680_v61 = vrot.slane %v3678_v37, 4  ;;  %v8736_v29 = vld [vmem:[%s7975_s29 + $0x34] sm:$0xf]  ;;  %v8742_v37 = vsel %vm8260_vm6, %v1308_v52, %v1309_v63 }
  0xb6   : > { %7342 = vmatpush3.bf16.msra.mxu0 %v8329_v46  ;;  %7313 = vmatprep.mubr.msk.bf16.mxu0 %vm706_vm3, %v7779_v49  ;;  %v1322_v49 = vrot.slane %v1320_v33, 4  ;;  %v1220_v46 = vld [vmem:[%s7975_s29 + $0x6c] sm:$0xe]  ;;  %11133 = vst [vmem:[#allocation22_spill] sm:$0xff] %v8736_v29  ;;  %v1327_v59 = vrot.slane %v7840_v43, 5  ;;  %v3711_v52 = vshll.u32 %v8724_v31, 16 }
  0xb7   : > { %7156 = vmatmul.mubr.msk.bf16.gmra.mrb[16].mxu1 %vm706_vm3, %v11129_v36  ;;  %v1316_v36 = vrot.slane %v7838_v8, 5  ;;  %7375 = vmatprep.subr.bf16.mxu0 %v8679_v42  ;;  %v3693_v8 = vrot.slane %v3691_v9, 4  ;;  %v3684_v48 = vor.u32 %v3683_v7, %v3680_v61  ;;  %v3715_v63 = vshrl.u32 %v8724_v31, 16  ;;  %v7841_v61 = vld [vmem:[%s7975_s29 + $0x74] sm:$0x1] }
  0xb8   : > { %7159 = vmatprep.mubr.msk.bf16.mxu1 %vm706_vm3, %v11130_v41  ;;  %v7839_v41 = vld [vmem:[%s7975_s29 + $0x68] sm:$0x1]  ;;  %v3729_v9 = vshll.u32 %v6599_v5, 16  ;;  %v3735_v60 = vshll.u32 %v8736_v29, 16  ;;  %v6277_v13 = vrot.slane %v1220_v46, 9  ;;  %v1330_v7 = vrot.slane %v7841_v61, 5 }
  0xb9   : > { %v1323_v26 = vrot.slane %v7839_v41, 5  ;;  %v8748_v41 = vsel %vm8260_vm6, %v6275_v18, %v1313_v27  ;;  %v3739_v27 = vshrl.u32 %v8736_v29, 16  ;;  %v8762_v33 = vsel %vm8260_vm6, %v1315_v4, %v1316_v36 }
  0xba   : > { %v3697_v18 = vshll.u32 %v8731_v19, 16  ;;  %v3704_v5 = vrot.slane %v3702_v47, 4  ;;  %v11135_v4 = vcombine.low %v8348_v54, %v8353_v62  ;;  %v8780_v46 = vrot.slane %v3684_v48, 4  ;;  %v7785_v62 = vld [vmem:[%s7975_s29 + $0x54] sm:$0xff]   ;;  %v7787_v48 = vld [vmem:[%s7975_s29 + $0x60] sm:$0xff]  }
  0xbb   : > { %v8766_v43 = vsel %vm8260_vm6, %v1322_v49, %v1323_v26  ;;  %v3707_v26 = vrot.slane %v3705_v30, 5  ;;  %v1329_v56 = vrot.slane %v1327_v59, 4  ;;  %v8785_v36 = vrot.slane %v3711_v52, 5  ;;  %v8788_v49 = vld [vmem:[%s7975_s29 + $0x38] sm:$0x1] }
  0xbc   : > { %11137 = vst [vmem:[#allocation24_spill] sm:$0xff] %v8788_v49  ;;  %v3731_v47 = vrot.slane %v3729_v9, 5  ;;  %v8790_v30 = vrot.slane %v3735_v60, 5  ;;  %v3741_v54 = vrot.slane %v3739_v27, 4  ;;  %v8800_v61 = vrot.slane %v3697_v18, 5 }
  0xbd   : > { %7314 = vmatmul.mubr.msk.bf16.gmra.mrb[4].mxu0 %vm706_vm3, %v7781_v58  ;;  %v3694_v58 = vor.u32 %v3693_v8, %v8744_v2  ;;  %v3728_v8 = vrot.slane %v3726_v3, 4  ;;  %v8806_v60 = vsel %vm8260_vm6, %v6277_v13, %v1327_v59  ;;  %v3708_v9 = vor.u32 %v3707_v26, %v3704_v5  ;;  %v1222_v26 = vld [vmem:[%s7975_s29 + $0x84] sm:$0xe] }
  0xbe   : > { %7317 = vmatprep.mubr.msk.bf16.mxu0 %vm706_vm3, %v7783_v14  ;;  %v3717_v14 = vrot.slane %v3715_v63, 4  ;;  %v3721_v27 = vshll.u32 %v8783_v11, 16  ;;  %v8815_v52 = vsel %vm8260_vm6, %v1329_v56, %v1330_v7  ;;  %v1221_v63 = vld [vmem:[%s7975_s29 + $0x78] sm:$0xe]  ;;  %v3745_v29 = vshll.u32 %v8788_v49, 16 }
  0xbf   : > { %7160 = vmatmul.mubr.msk.bf16.gmra.mrb[20].mxu1 %vm706_vm3, %v11134_v0  ;;  %v8802_v3 = vrot.slane %v3694_v58, 4  ;;  %v8811_v0 = vld [vmem:[%s7975_s29 + $0x40] sm:$0xf]  ;;  %v7842_v58 = vld [vmem:[%s7975_s29 + $0x7c] sm:$0xf]  ;;  %v3732_v13 = vor.u32 %v3731_v47, %v3728_v8  ;;  %v3742_v5 = vor.u32 %v3741_v54, %v8790_v30  ;;  %v11139_v59 = vcombine.low %v8368_v35, %v8379_v44 }
  0xc0   : > { %7163 = vmatprep.mubr.msk.bf16.mxu1 %vm706_vm3, %v11135_v4  ;;  %v6602_v4 = vld [vmem:[%s7975_s29 + $0x3c] sm:$0xf]  ;;  %11138 = vst [vmem:[#allocation25_spill] sm:$0xff] %v8811_v0  ;;  %v3718_v18 = vor.u32 %v3717_v14, %v8785_v36  ;;  %v1334_v55 = vrot.slane %v7842_v58, 5  ;;  %v7843_v11 = vld [vmem:[%s7975_s29 + $0x88] sm:$0xf] }
  0xc1   : > { %v1341_v7 = vrot.slane %v7843_v11, 5  ;;  %v3750_v56 = vshrl.u32 %v6602_v4, 16  ;;  %v3753_v14 = vshll.u32 %v6602_v4, 16  ;;  %v3759_v58 = vshll.u32 %v8811_v0, 16  ;;  %v7844_v54 = vld [vmem:[%s7975_s29 + $0x80] sm:$0x1] }
  0xc2   : > { %v3763_v49 = vshrl.u32 %v8811_v0, 16  ;;  %v3709_v8 = vrot.slane %v3708_v9, 4  ;;  %v3723_v11 = vrot.slane %v3721_v27, 5  ;;  %v6278_v47 = vrot.slane %v1221_v63, 9 }
  0xc3   : > { %v11140_v4 = vcombine.low %v8400_v24, %v8405_v16  ;;  %v3719_v0 = vrot.slane %v3718_v18, 4  ;;  %v1336_v31 = vrot.slane %v1334_v55, 4  ;;  %v3747_v35 = vrot.slane %v3745_v29, 5 }
  0xc4   : > { %v6279_v44 = vrot.slane %v1222_v26, 9  ;;  %v3733_v19 = vrot.slane %v3732_v13, 4  ;;  %v3743_v9 = vrot.slane %v3742_v5, 4  ;;  %v1343_v27 = vrot.slane %v1341_v7, 4  ;;  %v8859_v5 = vld [vmem:[%s7975_s29 + $0x4c] sm:$0xf] }
  0xc5   : > { %7318 = vmatmul.mubr.msk.bf16.gmra.mrb[8].mxu0 %vm706_vm3, %v7785_v62  ;;  %v1337_v62 = vrot.slane %v7844_v54, 5  ;;  %v1344_v63 = vrot.slane %v7845_v10, 5  ;;  %v8845_v54 = vld [vmem:[%s7975_s29 + $0x44] sm:$0x1]  ;;  %v3752_v34 = vrot.slane %v3750_v56, 4  ;;  %v3755_v24 = vrot.slane %v3753_v14, 5 }
  0xc6   : > { %7321 = vmatprep.mubr.msk.bf16.mxu0 %vm706_vm3, %v7787_v48  ;;  %v7789_v48 = vld [vmem:[%s7975_s29 + $0x6c] sm:$0xff]   ;;  %11141 = vst [vmem:[#allocation26_spill] sm:$0xff] %v8845_v54  ;;  %v8847_v16 = vrot.slane %v3759_v58, 5  ;;  %v3765_v18 = vrot.slane %v3763_v49, 4  ;;  %v3700_v29 = vsel %vm7994_vm2, %v8802_v3, %v8800_v61  ;;  %v8856_v13 = vsel %vm8260_vm6, %v6278_v47, %v1334_v55  ;;  %11142 = vst [vmem:[#allocation27_spill] sm:$0xff] %v8859_v5 }
  0xc7   : > { %7164 = vmatmul.mubr.msk.bf16.gmra.mrb[24].mxu1 %vm706_vm3, %v11139_v59  ;;  %v6605_v59 = vld [vmem:[%s7975_s29 + $0x48] sm:$0xf]  ;;  %v3714_v56 = vsel %vm7994_vm2, %v3709_v8, %v8785_v36  ;;  %v3724_v49 = vsel %vm7994_vm2, %v3719_v0, %v3723_v11  ;;  %v8868_v14 = vsel %vm8260_vm6, %v1336_v31, %v1337_v62  ;;  %v8872_v55 = vsel %vm8260_vm6, %v6279_v44, %v1341_v7  ;;  %v1223_v61 = vld [vmem:[%s7975_s29 + $0x90] sm:$0xe]  ;;  %v7846_v47 = vld [vmem:[%s7975_s29 + $0x94] sm:$0xf] }
  0xc8   : > { %7167 = vmatprep.mubr.msk.bf16.mxu1 %vm706_vm3, %v11140_v4  ;;  %v7790_v4 = vld [vmem:[%s7975_s29 + $0x78] sm:$0xff]   ;;  %v3774_v10 = vshrl.u32 %v6605_v59, 16  ;;  %v3777_v26 = vshll.u32 %v6605_v59, 16  ;;  %v3738_v3 = vsel %vm7994_vm2, %v3733_v19, %v8790_v30  ;;  %v3748_v36 = vsel %vm7994_vm2, %v3743_v9, %v3747_v35  ;;  %v7791_v59 = vld [vmem:[%s7975_s29 + $0x84] sm:$0xff]  }
  0xc9   : > { %v8882_v0 = vsel %vm8260_vm6, %v1343_v27, %v1344_v63  ;;  %v3769_v31 = vshll.u32 %v8845_v54, 16  ;;  %v3756_v58 = vor.u32 %v3755_v24, %v3752_v34  ;;  %v3766_v7 = vor.u32 %v3765_v18, %v8847_v16  ;;  %v6608_v27 = vld [vmem:[%s7975_s29 + $0x54] sm:$0xf]  ;;  %v7847_v24 = vld [vmem:[%s7975_s29 + $0x98] sm:$0x1] }
  0xca   : > { %11143 = vst [vmem:[#allocation28_spill] sm:$0xff] %v8882_v0  ;;  %v3783_v8 = vshll.u32 %v8859_v5, 16  ;;  %v3787_v19 = vshrl.u32 %v8859_v5, 16  ;;  %v11144_v30 = vcombine.low %v8415_v15, %v8427_v23  ;;  %v6280_v11 = vrot.slane %v1223_v61, 9  ;;  %v8935_v61 = vld [vmem:[%s7975_s29 + $0x64] sm:$0xf] }
  0xcb   : > { %v1348_v62 = vrot.slane %v7846_v47, 5  ;;  %v3776_v34 = vrot.slane %v3774_v10, 4  ;;  %v3779_v35 = vrot.slane %v3777_v26, 5  ;;  %v11145_v44 = vcombine.low %v8633_v25, %v8637_v45  ;;  %v8914_v45 = vld [vmem:[%s7975_s29 + $0x50] sm:$0x1]  ;;  %11149 = vst [vmem:[#allocation31_spill] sm:$0xff] %v8935_v61 }
  0xcc   : > { %v11146_v15 = vsel %vm7994_vm2, %v8780_v46, %v8744_v2  ;;  %v8909_v9 = vcombine.low %v3714_v56, %v3724_v49  ;;  %11147 = vst [vmem:[#allocation29_spill] sm:$0xff] %v8914_v45  ;;  %v8917_v63 = vcombine.low %v3738_v3, %v3748_v36  ;;  %v8921_v46 = vrot.slane %v3769_v31, 5  ;;  %v7792_v3 = vld [vmem:[%s7975_s29 + $0x90] sm:$0xff]   ;;  %v8960_v25 = vld [vmem:[%s7975_s29 + $0x5c] sm:$0x1] }
  0xcd   : > { %7322 = vmatmul.mubr.msk.bf16.gmra.mrb[12].mxu0 %vm706_vm3, %v7789_v48  ;;  %v8905_v23 = vcombine.low %v11146_v15, %v3700_v29  ;;  %v1351_v18 = vrot.slane %v7847_v24, 5  ;;  %v6611_v29 = vld [vmem:[%s7975_s29 + $0x60] sm:$0xf]  ;;  %v8928_v10 = vrot.slane %v3756_v58, 4  ;;  %v8930_v26 = vrot.slane %v3766_v7, 4  ;;  %11150 = vst [vmem:[#allocation32_spill] sm:$0xff] %v8960_v25 }
  0xce   : > { %7325 = vmatprep.mubr.msk.bf16.mxu0 %vm706_vm3, %v7790_v4  ;;  %v8925_v4 = vld [vmem:[%s7975_s29 + $0x58] sm:$0xf]  ;;  %v8932_v56 = vrot.slane %v3783_v8, 5  ;;  %v3789_v49 = vrot.slane %v3787_v19, 4  ;;  %v8940_v36 = vsel %vm8260_vm6, %v6280_v11, %v1348_v62  ;;  %v1350_v31 = vrot.slane %v1348_v62, 4 }
  0xcf   : > { %7168 = vmatmul.mubr.msk.bf16.gmra.mrb[28].mxu1 %vm706_vm3, %v11144_v30  ;;  %11148 = vst [vmem:[#allocation30_spill] sm:$0xff] %v8925_v4  ;;  %v3780_v30 = vor.u32 %v3779_v35, %v3776_v34  ;;  %v3793_v47 = vshll.u32 %v8914_v45, 16  ;;  %v1224_v58 = vld [vmem:[%s7975_s29 + $0x9c] sm:$0xe]  ;;  %v3801_v7 = vshll.u32 %v6608_v27, 16  ;;  %v3807_v8 = vshll.u32 %v8925_v4, 16 }
  0xd0   : > { %7173 = vmatprep.mubr.msk.bf16.mxu1 %vm706_vm3, %v11145_v44  ;;  %v3798_v44 = vshrl.u32 %v6608_v27, 16  ;;  %v3811_v19 = vshrl.u32 %v8925_v4, 16  ;;  %v3822_v15 = vshrl.u32 %v6611_v29, 16  ;;  %v3825_v24 = vshll.u32 %v6611_v29, 16  ;;  %v7848_v27 = vld [vmem:[%s7975_s29 + $0xa0] sm:$0xf] }
  0xd1   : > { %v3831_v2 = vshll.u32 %v8935_v61, 16  ;;  %v3835_v11 = vshrl.u32 %v8935_v61, 16  ;;  %v3790_v35 = vor.u32 %v3789_v49, %v8932_v56  ;;  %v1355_v29 = vrot.slane %v7848_v27, 5  ;;  %v7849_v54 = vld [vmem:[%s7975_s29 + $0xa4] sm:$0x1] }
  0xd2   : > { %v8967_v48 = vrot.slane %v3780_v30, 4  ;;  %v8969_v62 = vrot.slane %v3793_v47, 5  ;;  %v6281_v34 = vrot.slane %v1224_v58, 9  ;;  %v1358_v49 = vrot.slane %v7849_v54, 5  ;;  %v6614_v61 = vld [vmem:[%s7975_s29 + $0x6c] sm:$0xf] }
  0xd3   : > { %v11152_v27 = vcombine.low %v8654_v1, %v8662_v22  ;;  %v3813_v30 = vrot.slane %v3811_v19, 4  ;;  %v8981_v47 = vld [vmem:[%s7975_s29 + $0x70] sm:$0xf]  ;;  %v7793_v58 = vld [vmem:[%s7975_s29 + $0x9c] sm:$0xff]   ;;  %v3827_v54 = vrot.slane %v3825_v24, 5  ;;  %v8984_v4 = vrot.slane %v3831_v2, 5 }
  0xd4   : > { %11153 = vst [vmem:[#allocation33_spill] sm:$0xff] %v8981_v47  ;;  %v3837_v45 = vrot.slane %v3835_v11, 4  ;;  %v8989_v1 = vld [vmem:[%s11049_s1 + $0x20] sm:$0xff]   ;;  %v1357_v22 = vrot.slane %v1355_v29, 4  ;;  %v7795_v19 = vld [vmem:[%s7975_s29 + $0xa8] sm:$0xff]   ;;  %v9000_v2 = vsel %vm8260_vm6, %v1350_v31, %v1351_v18  ;;  %v3855_v24 = vshll.u32 %v8981_v47, 16 }
  0xd5   : > { %7326 = vmatmul.mubr.msk.bf16.gmra.mrb[16].mxu0 %vm706_vm3, %v7791_v59  ;;  %v11151_v59 = vcombine.low %v8618_v6, %v8624_v39  ;;  %v3800_v6 = vrot.slane %v3798_v44, 4  ;;  %v3803_v39 = vrot.slane %v3801_v7, 5  ;;  %11154 = vst [vmem:[#allocation34_spill] sm:$0xff] %v8989_v1  ;;  %v8995_v44 = vld [vmem:[%s7975_s29 + $0x68] sm:$0x1]  ;;  %v3846_v7 = vshrl.u32 %v6614_v61, 16 }
  0xd6   : > { %7329 = vmatprep.mubr.msk.bf16.mxu0 %vm706_vm3, %v7792_v3  ;;  %v8978_v3 = vrot.slane %v3807_v8, 5  ;;  %11155 = vst [vmem:[#allocation35_spill] sm:$0xff] %v8995_v44  ;;  %v3849_v8 = vshll.u32 %v6614_v61, 16  ;;  %v3859_v11 = vshrl.u32 %v8981_v47, 16  ;;  %v1225_v61 = vld [vmem:[%s7975_s29 + $0xa8] sm:$0xe] }
  0xd7   : > { %7174 = vmatmul.mubr.msk.bf16.vlgmr.msra.gmra.mrb[0].mxu1 %vm706_vm3, %v11151_v59  ;;  %v3824_v59 = vrot.slane %v3822_v15, 4  ;;  %v3817_v15 = vshll.u32 %v8960_v25, 16  ;;  %v7851_v5 = vld [vmem:[%s7975_s29 + $0xac] sm:$0xf]  ;;  %v3838_v25 = vor.u32 %v3837_v45, %v8984_v4  ;;  %v3841_v47 = vshll.u32 %v8995_v44, 16  ;;  %v7796_v18 = vld [vmem:[%s7975_s29 + $0xb4] sm:$0xff]  }
  0xd8   : > { %7177 = vmatprep.mubr.msk.bf16.mxu1 %vm706_vm3, %v11152_v27  ;;  %7206 = vmatpush3.bf16.msra.mxu1 %v8518_v32  ;;  %v8992_v32 = vrot.slane %v3790_v35, 4  ;;  %v9007_v35 = vsel %vm8260_vm6, %v6281_v34, %v1355_v29  ;;  %v3804_v27 = vor.u32 %v3803_v39, %v3800_v6  ;;  %v1362_v0 = vrot.slane %v7851_v5, 5  ;;  %v9028_v29 = vld [vmem:[%s7975_s29 + $0x74] sm:$0x1] }
  0xd9   : > { %7409 = vmatprep.subr.bf16.mxu1 %v8989_v1  ;;  %v3814_v1 = vor.u32 %v3813_v30, %v8978_v3  ;;  %v3828_v31 = vor.u32 %v3827_v54, %v3824_v59  ;;  %v9025_v5 = vsel %vm8260_vm6, %v1357_v22, %v1358_v49  ;;  %11156 = vst [vmem:[#allocation36_spill] sm:$0xff] %v9028_v29  ;;  %v3848_v6 = vrot.slane %v3846_v7, 4  ;;  %v6617_v59 = vld [vmem:[%s7975_s29 + $0x78] sm:$0xf]  ;;  %v7852_v22 = vld [vmem:[%s7975_s29 + $0xb0] sm:$0x1] }
  0xda   : > { %v3796_v34 = vsel %vm7994_vm2, %v8992_v32, %v8969_v62  ;;  %v3851_v39 = vrot.slane %v3849_v8, 5  ;;  %v11157_v45 = vcombine.low %v8666_v51, %v8670_v57  ;;  %v3819_v30 = vrot.slane %v3817_v15, 5  ;;  %v9044_v8 = vld [vmem:[%s7975_s29 + $0x7c] sm:$0xf] }
  0xdb   : > { %v6282_v62 = vrot.slane %v1225_v61, 9  ;;  %v3861_v49 = vrot.slane %v3859_v11, 4  ;;  %v11158_v54 = vcombine.low %v8683_v50, %v8687_v38  ;;  %v3805_v32 = vrot.slane %v3804_v27, 4  ;;  %11159 = vst [vmem:[#allocation37_spill] sm:$0xff] %v9044_v8  ;;  %v1226_v61 = vld [vmem:[%s7975_s29 + $0xb4] sm:$0xe] }
  0xdc   : > { %v3815_v51 = vrot.slane %v3814_v1, 4  ;;  %v1364_v57 = vrot.slane %v1362_v0, 4  ;;  %v1365_v7 = vrot.slane %v7852_v22, 5  ;;  %v3839_v15 = vrot.slane %v3838_v25, 4  ;;  %v7797_v27 = vld [vmem:[%s7975_s29 + $0xc0] sm:$0xff]  }
  0xdd   : > { %7330 = vmatmul.mubr.msk.bf16.gmra.mrb[20].mxu0 %vm706_vm3, %v7793_v58  ;;  %v9035_v58 = vrot.slane %v3855_v24, 5  ;;  %v3843_v24 = vrot.slane %v3841_v47, 5  ;;  %v3852_v44 = vor.u32 %v3851_v39, %v3848_v6  ;;  %v3865_v50 = vshll.u32 %v9028_v29, 16 }
  0xde   : > { %7333 = vmatprep.mubr.msk.bf16.mxu0 %vm706_vm3, %v7795_v19  ;;  %v3829_v19 = vrot.slane %v3828_v31, 4  ;;  %v3870_v38 = vshrl.u32 %v6617_v59, 16  ;;  %v3873_v1 = vshll.u32 %v6617_v59, 16  ;;  %v3879_v25 = vshll.u32 %v9044_v8, 16 }
  0xdf   : > { %7178 = vmatmul.mubr.msk.bf16.gmra.mrb[4].mxu1 %vm706_vm3, %v11157_v45  ;;  %v7853_v45 = vld [vmem:[%s7975_s29 + $0xb8] sm:$0xf]  ;;  %v3862_v31 = vor.u32 %v3861_v49, %v9035_v58  ;;  %v3883_v47 = vshrl.u32 %v9044_v8, 16  ;;  %v3810_v6 = vsel %vm7994_vm2, %v3805_v32, %v8978_v3  ;;  %v3820_v39 = vsel %vm7994_vm2, %v3815_v51, %v3819_v30  ;;  %v7854_v3 = vld [vmem:[%s7975_s29 + $0xbc] sm:$0x1] }
  0xe0   : > { %7181 = vmatprep.mubr.msk.bf16.mxu1 %vm706_vm3, %v11158_v54  ;;  %v1369_v11 = vrot.slane %v7853_v45, 5  ;;  %v9053_v54 = vsel %vm8260_vm6, %v6282_v62, %v1362_v0  ;;  %v9065_v59 = vsel %vm8260_vm6, %v1364_v57, %v1365_v7  ;;  %v6283_v22 = vrot.slane %v1226_v61, 9  ;;  %v9068_v0 = vld [vmem:[%s7975_s29 + $0x80] sm:$0x1] }
  0xe1   : > { %11160 = vst [vmem:[#allocation38_spill] sm:$0xff] %v9068_v0  ;;  %v3834_v62 = vsel %vm7994_vm2, %v3829_v19, %v8984_v4  ;;  %v3844_v49 = vsel %vm7994_vm2, %v3839_v15, %v3843_v24  ;;  %v1372_v32 = vrot.slane %v7854_v3, 5  ;;  %v9077_v30 = vrot.slane %v3852_v44, 4  ;;  %v6620_v24 = vld [vmem:[%s7975_s29 + $0x84] sm:$0xf] }
  0xe2   : > { %v1371_v45 = vrot.slane %v1369_v11, 4  ;;  %v9079_v51 = vrot.slane %v3865_v50, 5  ;;  %v9081_v57 = vrot.slane %v3870_v38, 4  ;;  %v9083_v7 = vrot.slane %v3873_v1, 5  ;;  %v6629_v3 = vld [vmem:[%s7975_s29 + $0xa8] sm:$0xf] }
  0xe3   : > { %v11161_v4 = vcombine.low %v8704_v12, %v8708_v53  ;;  %v9090_v19 = vrot.slane %v3862_v31, 4  ;;  %v9092_v44 = vrot.slane %v3879_v25, 5  ;;  %v3889_v15 = vshll.u32 %v9068_v0, 16  ;;  %v9183_v31 = vld [vmem:[%s7975_s29 + $0x8c] sm:$0x1] }
  0xe4   : > { %v11162_v61 = vcombine.low %v8721_v17, %v8742_v37  ;;  %v11163_v12 = vsel %vm7994_vm2, %v8930_v26, %v8921_v46  ;;  %v11164_v53 = vsel %vm7994_vm2, %v8928_v10, %v8847_v16  ;;  %v11165_v17 = vsel %vm7994_vm2, %v8967_v48, %v8932_v56  ;;  %v6623_v48 = vld [vmem:[%s7975_s29 + $0x90] sm:$0xf] }
  0xe5   : > { %7334 = vmatmul.mubr.msk.bf16.gmra.mrb[24].mxu0 %vm706_vm3, %v7796_v18  ;;  %v9094_v18 = vrot.slane %v3883_v47, 4  ;;  %v9112_v50 = vcombine.low %v11164_v53, %v11163_v12  ;;  %v9121_v37 = vcombine.low %v11165_v17, %v3796_v34  ;;  %v9125_v26 = vcombine.low %v3810_v6, %v3820_v39  ;;  %v7798_v56 = vld [vmem:[%s7975_s29 + $0xcc] sm:$0xff]   ;;  %v6626_v6 = vld [vmem:[%s7975_s29 + $0x9c] sm:$0xf] }
  0xe6   : > { %7337 = vmatprep.mubr.msk.bf16.mxu0 %vm706_vm3, %v7797_v27  ;;  %v9129_v10 = vcombine.low %v3834_v62, %v3844_v49  ;;  %v9133_v1 = vsel %vm8260_vm6, %v6283_v22, %v1369_v11  ;;  %v9136_v27 = vld [vmem:[%s7975_s29 + $0x88] sm:$0xf]  ;;  %v9142_v34 = vsel %vm8260_vm6, %v1371_v45, %v1372_v32  ;;  %v3876_v25 = vor.u32 %v9083_v7, %v9081_v57  ;;  %v9151_v11 = vld [vmem:[%s7975_s29 + $0x94] sm:$0xf]  ;;  %v9163_v45 = vld [vmem:[%s7975_s29 + $0xa0] sm:$0xf] }
  0xe7   : > { %7182 = vmatmul.mubr.msk.bf16.gmra.mrb[8].mxu1 %vm706_vm3, %v11161_v4  ;;  %11166 = vst [vmem:[#allocation39_spill] sm:$0xff] %v9136_v27  ;;  %v3894_v47 = vshrl.u32 %v6620_v24, 16  ;;  %11167 = vst [vmem:[#allocation40_spill] sm:$0xff] %v9151_v11  ;;  %v3886_v22 = vor.u32 %v9094_v18, %v9092_v44  ;;  %v9160_v62 = vrot.slane %v3889_v15, 5  ;;  %v3897_v49 = vshll.u32 %v6620_v24, 16 }
  0xe8   : > { %7185 = vmatprep.mubr.msk.bf16.mxu1 %vm706_vm3, %v11162_v61  ;;  %11168 = vst [vmem:[#allocation41_spill] sm:$0xff] %v9163_v45  ;;  %v3903_v32 = vshll.u32 %v9136_v27, 16  ;;  %v3907_v57 = vshrl.u32 %v9136_v27, 16  ;;  %v3918_v7 = vshrl.u32 %v6623_v48, 16  ;;  %v3921_v4 = vshll.u32 %v6623_v48, 16 }
  0xe9   : > { %v9169_v61 = vld [vmem:[%s7975_s29 + $0xac] sm:$0xf]  ;;  %v3927_v12 = vshll.u32 %v9151_v11, 16  ;;  %v3931_v53 = vshrl.u32 %v9151_v11, 16  ;;  %v3942_v18 = vshrl.u32 %v6626_v6, 16  ;;  %v3945_v15 = vshll.u32 %v6626_v6, 16 }
  0xea   : > { %11169 = vst [vmem:[#allocation42_spill] sm:$0xff] %v9169_v61  ;;  %v3951_v24 = vshll.u32 %v9163_v45, 16  ;;  %v3955_v17 = vshrl.u32 %v9163_v45, 16  ;;  %v3966_v16 = vshrl.u32 %v6629_v3, 16  ;;  %v3969_v46 = vshll.u32 %v6629_v3, 16 }
  0xeb   : > { %v11170_v48 = vcombine.low %v8748_v41, %v8762_v33  ;;  %v3896_v6 = vrot.slane %v3894_v47, 4  ;;  %v3899_v39 = vrot.slane %v3897_v49, 5  ;;  %v3979_v38 = vshrl.u32 %v9169_v61, 16  ;;  %v9199_v11 = vld [vmem:[%s7975_s29 + $0xa4] sm:$0x1] }
  0xec   : > { %v11171_v3 = vcombine.low %v8752_v20, %v8766_v43  ;;  %v9191_v41 = vrot.slane %v3903_v32, 5  ;;  %v3909_v33 = vrot.slane %v3907_v57, 4  ;;  %v3923_v45 = vrot.slane %v3921_v4, 5  ;;  %11172 = vst [vmem:[#allocation43_spill] sm:$0xff] %v9199_v11  ;;  %v9204_v43 = vld [vmem:[%s7975_s29 + $0xb0] sm:$0x1] }
  0xed   : > { %7338 = vmatmul.mubr.msk.bf16.gmra.mrb[28].mxu0 %vm706_vm3, %v7798_v56  ;;  %v3975_v56 = vshll.u32 %v9169_v61, 16  ;;  %v9196_v47 = vrot.slane %v3927_v12, 5  ;;  %v3933_v49 = vrot.slane %v3931_v53, 4  ;;  %v3944_v27 = vrot.slane %v3942_v18, 4  ;;  %11173 = vst [vmem:[#allocation44_spill] sm:$0xff] %v9204_v43 }
  0xee   : > { %7343 = vmatprep.mubr.msk.bf16.mxu0 %vm706_vm3, %v8905_v23  ;;  %v3920_v23 = vrot.slane %v3918_v7, 4  ;;  %v3947_v61 = vrot.slane %v3945_v15, 5  ;;  %v9201_v0 = vrot.slane %v3951_v24, 5  ;;  %v3957_v20 = vrot.slane %v3955_v17, 4  ;;  %v6632_v53 = vld [vmem:[%s7975_s29 + $0xb4] sm:$0xf] }
  0xef   : > { %7186 = vmatmul.mubr.msk.bf16.gmra.mrb[12].mxu1 %vm706_vm3, %v11170_v48  ;;  %v9194_v48 = vld [vmem:[%s7975_s29 + $0x98] sm:$0x1]  ;;  %v3968_v32 = vrot.slane %v3966_v16, 4  ;;  %v3971_v57 = vrot.slane %v3969_v46, 5  ;;  %v9208_v7 = vrot.slane %v3886_v22, 4  ;;  %v9210_v4 = vrot.slane %v3975_v56, 5 }
  0xf0   : > { %7189 = vmatprep.mubr.msk.bf16.mxu1 %vm706_vm3, %v11171_v3  ;;  %v9206_v3 = vrot.slane %v3876_v25, 4  ;;  %v3981_v12 = vrot.slane %v3979_v38, 4  ;;  %v3900_v8 = vor.u32 %v3899_v39, %v3896_v6  ;;  %v3910_v18 = vor.u32 %v3909_v33, %v9191_v41  ;;  %v9217_v17 = vld [vmem:[%s7975_s29 + $0xb8] sm:$0xf] }
  0xf1   : > { %v3913_v15 = vshll.u32 %v9183_v31, 16  ;;  %v3937_v24 = vshll.u32 %v9194_v48, 16  ;;  %11174 = vst [vmem:[#allocation45_spill] sm:$0xff] %v9217_v17  ;;  %v3924_v29 = vor.u32 %v3923_v45, %v3920_v23  ;;  %v3934_v46 = vor.u32 %v3933_v49, %v9196_v47 }
  0xf2   : > { %v3948_v16 = vor.u32 %v3947_v61, %v3944_v27  ;;  %v3961_v25 = vshll.u32 %v9199_v11, 16  ;;  %v3958_v38 = vor.u32 %v3957_v20, %v9201_v0  ;;  %v3972_v39 = vor.u32 %v3971_v57, %v3968_v32 }
  0xf3   : > { %v3985_v22 = vshll.u32 %v9204_v43, 16  ;;  %v3990_v6 = vshrl.u32 %v6632_v53, 16  ;;  %v11175_v56 = vcombine.low %v8806_v60, %v8815_v52  ;;  %v3982_v27 = vor.u32 %v3981_v12, %v9210_v4 }
  0xf4   : > { %v3993_v45 = vshll.u32 %v6632_v53, 16  ;;  %v3999_v61 = vshll.u32 %v9217_v17, 16  ;;  %v11176_v33 = vcombine.low %v8856_v13, %v8868_v14  ;;  %v3901_v52 = vrot.slane %v3900_v8, 4  ;;  %v6635_v13 = vld [vmem:[%s7975_s29 + $0xc0] sm:$0xf] }
  0xf5   : > { %7344 = vmatmul.mubr.msk.bf16.vlgmr.msra.gmra.mrb[0].mxu0 %vm706_vm3, %v8909_v9  ;;  %v4003_v9 = vshrl.u32 %v9217_v17, 16  ;;  %v3911_v60 = vrot.slane %v3910_v18, 4  ;;  %v3939_v23 = vrot.slane %v3937_v24, 5  ;;  %v3925_v49 = vrot.slane %v3924_v29, 4 }
  0xf6   : > { %7376 = vmatpush3.bf16.msra.mxu0 %v8679_v42  ;;  %7347 = vmatprep.mubr.msk.bf16.mxu0 %vm706_vm3, %v8917_v63  ;;  %v3915_v42 = vrot.slane %v3913_v15, 5  ;;  %v3935_v20 = vrot.slane %v3934_v46, 4  ;;  %v3949_v32 = vrot.slane %v3948_v16, 4  ;;  %v3963_v57 = vrot.slane %v3961_v25, 5  ;;  %v6678_v25 = vld [vmem:[%s7975_s29 + $0x48] sm:$0xe] }
  0xf7   : > { %7190 = vmatmul.mubr.msk.bf16.gmra.mrb[16].mxu1 %vm706_vm3, %v11175_v56  ;;  %v3959_v12 = vrot.slane %v3958_v38, 4  ;;  %v3973_v53 = vrot.slane %v3972_v39, 4  ;;  %v3987_v56 = vrot.slane %v3985_v22, 5  ;;  %v3992_v17 = vrot.slane %v3990_v6, 4  ;;  %v11177_v38 = vld [vmem:[#allocation18_spill] sm:$0xff] }
  0xf8   : > { %7193 = vmatprep.mubr.msk.bf16.mxu1 %vm706_vm3, %v11176_v33  ;;  %v3983_v14 = vrot.slane %v3982_v27, 4  ;;  %v9241_v33 = vld [vmem:[%s7975_s29 + $0xbc] sm:$0x1]  ;;  %v3995_v43 = vrot.slane %v3993_v45, 5  ;;  %v9243_v11 = vrot.slane %v3999_v61, 5  ;;  %v4005_v63 = vrot.slane %v4003_v9, 4 }
  0xf9   : > { %v3882_v29 = vsel %vm7994_vm2, %v9206_v3, %v9092_v44  ;;  %v3892_v8 = vsel %vm7994_vm2, %v9208_v7, %v9160_v62  ;;  %v3906_v18 = vsel %vm7994_vm2, %v3901_v52, %v9191_v41  ;;  %v3916_v15 = vsel %vm7994_vm2, %v3911_v60, %v3915_v42  ;;  %v9264_v44 = vld [vmem:[%s7975_s29 + $0xc4] sm:$0xf]  ;;  %v6679_v60 = vld [vmem:[%s7975_s29 + $0x54] sm:$0xe] }
  0xfa   : > { %v3930_v24 = vsel %vm7994_vm2, %v3925_v49, %v9196_v47  ;;  %v3940_v46 = vsel %vm7994_vm2, %v3935_v20, %v3939_v23  ;;  %v4014_v3 = vshrl.u32 %v6635_v13, 16  ;;  %v4017_v16 = vshll.u32 %v6635_v13, 16  ;;  %v11184_v20 = vld [vmem:[#allocation27_spill] sm:$0xff] }
  0xfb   : > { %v3954_v62 = vsel %vm7994_vm2, %v3949_v32, %v9201_v0  ;;  %v3964_v41 = vsel %vm7994_vm2, %v3959_v12, %v3963_v57  ;;  %v3978_v47 = vsel %vm7994_vm2, %v3973_v53, %v9210_v4  ;;  %v4009_v7 = vshll.u32 %v9241_v33, 16  ;;  %v11185_v57 = vld [vmem:[#allocation29_spill] sm:$0xff]  ;;  %v6680_v53 = vld [vmem:[%s7975_s29 + $0x60] sm:$0xe] }
  0xfc   : > { %v11178_v39 = vor.u32 %v8576_v21, %v11177_v38  ;;  %v3988_v0 = vsel %vm7994_vm2, %v3983_v14, %v3987_v56  ;;  %v3996_v4 = vor.u32 %v3995_v43, %v3992_v17  ;;  %v4006_v27 = vor.u32 %v4005_v63, %v9243_v11  ;;  %v11186_v14 = vld [vmem:[#allocation30_spill] sm:$0xff] }
  0xfd   : > { %7348 = vmatmul.mubr.msk.bf16.gmra.mrb[4].mxu0 %vm706_vm3, %v9112_v50  ;;  %v11179_v50 = vld [vmem:[#allocation28_spill] sm:$0xff]  ;;  %v11181_v21 = vcombine.low %v8940_v36, %v9000_v2  ;;  %v11183_v43 = vsel %vm7994_vm2, %v9077_v30, %v9035_v58  ;;  %v9310_v45 = vcombine.low %v3882_v29, %v3892_v8  ;;  %v4023_v36 = vshll.u32 %v9264_v44, 16  ;;  %v6638_v30 = vld [vmem:[%s7975_s29 + $0xcc] sm:$0xf] }
  0xfe   : > { %v9281_v22 = vrot.slane %v11178_v39, 4  ;;  %v11180_v6 = vcombine.low %v8872_v55, %v11179_v50  ;;  %7351 = vmatprep.mubr.msk.bf16.mxu0 %vm706_vm3, %v9121_v37  ;;  %v6299_v55 = vcombine.low %v9133_v1, %v9142_v34  ;;  %v11182_v37 = vsel %vm7994_vm2, %v9090_v19, %v9079_v51  ;;  %v11187_v29 = vld [vmem:[#allocation32_spill] sm:$0xff]  ;;  %v11189_v39 = vld [vmem:[#allocation31_spill] sm:$0xff]  ;;  %v6674_v1 = vld [vmem:[%s7975_s29 + $0x18] sm:$0xe] }
  0xff   : > { %v9308_v17 = vcombine.low %v11183_v43, %v11182_v37  ;;  %v9313_v2 = vcombine.low %v3906_v18, %v3916_v15  ;;  %v4016_v61 = vrot.slane %v4014_v3, 4  ;;  %v4019_v9 = vrot.slane %v4017_v16, 5  ;;  %v6681_v18 = vld [vmem:[%s7975_s29 + $0x6c] sm:$0xe]  ;;  %v11193_v43 = vld [vmem:[#allocation36_spill] sm:$0xff] }
 0x100   : > { %7194 = vmatmul.mubr.msk.bf16.gmra.mrb[20].mxu1 %vm706_vm3, %v11180_v6  ;;  %v6694_v52 = vrot.slane %v6678_v25, 9  ;;  %v9316_v51 = vcombine.low %v3930_v24, %v3940_v46  ;;  %v9318_v19 = vcombine.low %v3954_v62, %v3964_v41  ;;  %v9320_v42 = vcombine.low %v3978_v47, %v3988_v0  ;;  %v9355_v25 = vld [vmem:[%s7975_s29 + $0xc8] sm:$0x1] }
 0x101   : > { %7197 = vmatprep.mubr.msk.bf16.mxu1 %vm706_vm3, %v11181_v21  ;;  %v9322_v58 = vrot.slane %v4009_v7, 5  ;;  %v9325_v23 = vrot.slane %v3996_v4, 4  ;;  %v9327_v49 = vrot.slane %v4006_v27, 4  ;;  %v4452_v32 = vrot.slane %v11184_v20, 5  ;;  %v11190_v6 = vld [vmem:[#allocation35_spill] sm:$0xff]  ;;  %v11192_v21 = vld [vmem:[#allocation33_spill] sm:$0xff] }
 0x102   : > { %v4455_v12 = vrot.slane %v11185_v57, 5  ;;  %v9332_v56 = vrot.slane %v4023_v36, 5  ;;  %v6695_v13 = vrot.slane %v6679_v60, 9  ;;  %v4459_v63 = vrot.slane %v11186_v14, 5  ;;  %v6682_v57 = vld [vmem:[%s7975_s29 + $0x78] sm:$0xe] }
 0x103   : > { %v4462_v8 = vrot.slane %v11187_v29, 5  ;;  %v4020_v15 = vor.u32 %v4019_v9, %v4016_v61  ;;  %v4027_v24 = vshrl.u32 %v9264_v44, 16  ;;  %v9340_v46 = vsel %vm8260_vm6, %v6694_v52, %v4452_v32  ;;  %v6409_v14 = vld [vmem:[%s7975_s29 + $0x78] sm:$0xf] }
 0x104   : > { %v4454_v3 = vrot.slane %v4452_v32, 4  ;;  %v4038_v16 = vshrl.u32 %v6638_v30, 16  ;;  %v9346_v62 = vsel %vm8260_vm6, %v6695_v13, %v4459_v63  ;;  %v4461_v41 = vrot.slane %v4459_v63, 4  ;;  %v7800_v63 = vld [vmem:[%s7975_s29 + $0xc] sm:$0xff]  }
 0x105   : > { %7352 = vmatmul.mubr.msk.bf16.gmra.mrb[8].mxu0 %vm706_vm3, %v9125_v26  ;;  %v6696_v47 = vrot.slane %v6680_v53, 9  ;;  %v11188_v7 = vcombine.low %v9007_v35, %v9025_v5  ;;  %v4466_v50 = vrot.slane %v11189_v39, 5  ;;  %v4469_v0 = vrot.slane %v11190_v6, 5  ;;  %v9368_v5 = vld [vmem:[%s7975_s29 + $0xd0] sm:$0xf]  ;;  %v11194_v6 = vld [vmem:[#allocation37_spill] sm:$0xff] }
 0x106   : > { %7355 = vmatprep.mubr.msk.bf16.mxu0 %vm706_vm3, %v9129_v10  ;;  %v9359_v26 = vsel %vm8260_vm6, %v4454_v3, %v4455_v12  ;;  %v6697_v4 = vrot.slane %v6681_v18, 9  ;;  %v11191_v35 = vcombine.low %v9053_v54, %v9065_v59  ;;  %v9374_v27 = vsel %vm8260_vm6, %v4461_v41, %v4462_v8  ;;  %v6683_v39 = vld [vmem:[%s7975_s29 + $0x84] sm:$0xe]  ;;  %v11207_v18 = vld [vmem:[#allocation41_spill] sm:$0xff] }
 0x107   : > { %v4473_v37 = vrot.slane %v11192_v21, 5  ;;  %v4476_v36 = vrot.slane %v11193_v43, 5  ;;  %v4041_v61 = vshll.u32 %v6638_v30, 16  ;;  %v9382_v59 = vsel %vm8260_vm6, %v6696_v47, %v4466_v50  ;;  %v11196_v43 = vld [vmem:[#allocation19_spill] sm:$0xff] }
 0x108   : > { %7198 = vmatmul.mubr.msk.bf16.gmra.mrb[24].mxu1 %vm706_vm3, %v11188_v7  ;;  %v4468_v9 = vrot.slane %v4466_v50, 4  ;;  %v4029_v52 = vrot.slane %v4027_v24, 4  ;;  %v4033_v60 = vshll.u32 %v9355_v25, 16  ;;  %v4002_v30 = vsel %vm7994_vm2, %v9325_v23, %v9243_v11  ;;  %v9421_v50 = vld [vmem:[%s7975_s29 + $0xd4] sm:$0x1] }
 0x109   : > { %7201 = vmatprep.mubr.msk.bf16.mxu1 %vm706_vm3, %v11191_v35  ;;  %v9387_v20 = vsel %vm8260_vm6, %v6697_v4, %v4473_v37  ;;  %v4475_v32 = vrot.slane %v4473_v37, 4  ;;  %v4047_v12 = vshll.u32 %v9368_v5, 16  ;;  %v4051_v53 = vshrl.u32 %v9368_v5, 16  ;;  %v11195_v4 = vld [vmem:[#allocation38_spill] sm:$0xff] }
 0x10a   : > { %v9398_v13 = vsel %vm8260_vm6, %v4468_v9, %v4469_v0  ;;  %v4012_v29 = vsel %vm7994_vm2, %v9327_v49, %v9322_v58  ;;  %v9406_v8 = vrot.slane %v4020_v15, 4  ;;  %v4040_v3 = vrot.slane %v4038_v16, 4  ;;  %v6412_v58 = vld [vmem:[%s7975_s29 + $0x84] sm:$0xf] }
 0x10b   : > { %v9412_v24 = vsel %vm8260_vm6, %v4475_v32, %v4476_v36  ;;  %v4043_v41 = vrot.slane %v4041_v61, 5  ;;  %v6698_v7 = vrot.slane %v6682_v57, 9  ;;  %v4030_v15 = vor.u32 %v4029_v52, %v9332_v56  ;;  %v11197_v57 = vld [vmem:[#allocation39_spill] sm:$0xff] }
 0x10c   : > { %v4480_v0 = vrot.slane %v11194_v6, 5  ;;  %v4483_v35 = vrot.slane %v11195_v4, 5  ;;  %v2298_v21 = vshrl.u32 %v6409_v14, 16  ;;  %v9431_v16 = vrot.slane %v4047_v12, 5  ;;  %v7801_v6 = vld [vmem:[%s7975_s29 + $0x18] sm:$0xff]   ;;  %v7802_v4 = vld [vmem:[%s7975_s29 + $0x24] sm:$0xff]  }
 0x10d   : > { %7356 = vmatmul.mubr.msk.bf16.gmra.mrb[12].mxu0 %vm706_vm3, %v9308_v17  ;;  %v4053_v17 = vrot.slane %v4051_v53, 4  ;;  %v2301_v37 = vshll.u32 %v6409_v14, 16  ;;  %v9437_v36 = vsel %vm7994_vm2, %v9281_v22, %v11196_v43  ;;  %v6699_v61 = vrot.slane %v6683_v39, 9  ;;  %v7855_v53 = vld [vmem:[%s7975_s29 + $0x1c] sm:$0xf] }
 0x10e   : > { %7359 = vmatprep.mubr.msk.bf16.mxu0 %vm706_vm3, %v9310_v45  ;;  %v9443_v34 = vsel %vm8260_vm6, %v6698_v7, %v4480_v0  ;;  %v2300_v45 = vrot.slane %v2298_v21, 4  ;;  %v4044_v9 = vor.u32 %v4043_v41, %v4040_v3  ;;  %v4057_v52 = vshll.u32 %v9421_v50, 16 }
 0x10f   : > { %v2303_v32 = vrot.slane %v2301_v37, 5  ;;  %v4487_v22 = vrot.slane %v11197_v57, 5  ;;  %v9447_v12 = vrot.slane %v4033_v60, 5  ;;  %v4424_v14 = vrot.slane %v7855_v53, 5  ;;  %v11198_v57 = vld [vmem:[#allocation21_spill] sm:$0xff]  ;;  %v11206_v60 = vld [vmem:[#allocation26_spill] sm:$0xff] }
 0x110   : > { %7202 = vmatmul.mubr.msk.bf16.gmra.mrb[28].mxu1 %vm706_vm3, %v6299_v55  ;;  %v4482_v55 = vrot.slane %v4480_v0, 4  ;;  %v4490_v7 = vrot.slane %v9183_v31, 5  ;;  %v4026_v3 = vsel %vm7994_vm2, %v9406_v8, %v9332_v56  ;;  %v6690_v41 = vrot.slane %v6674_v1, 9  ;;  %v6684_v0 = vld [vmem:[%s7975_s29 + $0x90] sm:$0xe] }
 0x111   : > { %7207 = vmatprep.mubr.msk.bf16.mxu1 %vm706_vm3, %v7800_v63  ;;  %v2304_v39 = vor.u32 %v2303_v32, %v2300_v45  ;;  %v4031_v21 = vrot.slane %v4030_v15, 4  ;;  %v9467_v37 = vsel %vm8260_vm6, %v6699_v61, %v4487_v22  ;;  %v4489_v31 = vrot.slane %v4487_v22, 4  ;;  %v6675_v56 = vld [vmem:[%s7975_s29 + $0x24] sm:$0xe]  ;;  %v11199_v45 = vld [vmem:[#allocation40_spill] sm:$0xff] }
 0x112   : > { %v9452_v63 = vsel %vm8260_vm6, %v4482_v55, %v4483_v35  ;;  %v4054_v35 = vor.u32 %v4053_v17, %v9431_v16  ;;  %v4045_v43 = vrot.slane %v4044_v9, 4  ;;  %v4059_v55 = vrot.slane %v4057_v52, 5  ;;  %v11200_v52 = vld [vmem:[#allocation20_spill] sm:$0xff] }
 0x113   : > { %v4427_v53 = vrot.slane %v11198_v57, 5  ;;  %v2305_v8 = vrot.slane %v2304_v39, 4  ;;  %v4426_v1 = vrot.slane %v4424_v14, 4  ;;  %v9475_v15 = vsel %vm8260_vm6, %v4489_v31, %v4490_v7  ;;  %v11201_v7 = vld [vmem:[#allocation34_spill] sm:$0xff]  ;;  %v11203_v31 = vld [vmem:[#allocation25_spill] sm:$0xff]  ;;  %v11205_v22 = vld [vmem:[#allocation24_spill] sm:$0xff] }
 0x114   : > { %v6700_v17 = vrot.slane %v6684_v0, 9  ;;  %v4494_v61 = vrot.slane %v11199_v45, 5  ;;  %v9483_v9 = vsel %vm8260_vm6, %v6690_v41, %v4424_v14  ;;  %v6676_v14 = vld [vmem:[%s7975_s29 + $0x30] sm:$0xe]  ;;  %v11202_v41 = vld [vmem:[#allocation22_spill] sm:$0xff]  ;;  %v4445_v57 = vrot.slane %v11203_v31, 5 }
 0x115   : > { %7360 = vmatmul.mubr.msk.bf16.gmra.mrb[16].mxu0 %vm706_vm3, %v9313_v2  ;;  %v4431_v2 = vrot.slane %v11200_v52, 5  ;;  %v9489_v32 = vsel %vm7994_vm2, %v2305_v8, %v11177_v38  ;;  %v4438_v39 = vrot.slane %v11202_v41, 5  ;;  %v6677_v38 = vld [vmem:[%s7975_s29 + $0x3c] sm:$0xe]  ;;  %v4497_v45 = vrot.slane %v9194_v48, 5 }
 0x116   : > { %7363 = vmatprep.mubr.msk.bf16.mxu0 %vm706_vm3, %v9316_v51  ;;  %v4055_v51 = vrot.slane %v4054_v35, 4  ;;  %v9503_v8 = vsel %vm8260_vm6, %v6700_v17, %v4494_v61  ;;  %v4036_v35 = vsel %vm7994_vm2, %v4031_v21, %v9447_v12  ;;  %v9514_v52 = vsel %vm8260_vm6, %v4426_v1, %v4427_v53  ;;  %v6685_v31 = vld [vmem:[%s7975_s29 + $0x9c] sm:$0xe]  ;;  %v7803_v17 = vld [vmem:[%s7975_s29 + $0x30] sm:$0xff]  }
 0x117   : > { %v4433_v0 = vrot.slane %v4431_v2, 4  ;;  %v4441_v48 = vrot.slane %v11205_v22, 5  ;;  %v7804_v21 = vld [vmem:[%s7975_s29 + $0x3c] sm:$0xff]   ;;  %v6693_v53 = vrot.slane %v6677_v38, 9  ;;  %v6701_v47 = vrot.slane %v6685_v31, 9  ;;  %v11208_v38 = vld [vmem:[#allocation43_spill] sm:$0xff] }
 0x118   : > { %7208 = vmatmul.mubr.msk.bf16.vlgmr.msra.gmra.mrb[0].mxu1 %vm706_vm3, %v7801_v6  ;;  %v6691_v6 = vrot.slane %v6675_v56, 9  ;;  %v4050_v56 = vsel %vm7994_vm2, %v4045_v43, %v9431_v16  ;;  %v4060_v16 = vsel %vm7994_vm2, %v4055_v51, %v4059_v55  ;;  %v4440_v43 = vrot.slane %v4438_v39, 4  ;;  %v7858_v1 = vld [vmem:[%s7975_s29 + $0x94] sm:$0xf] }
 0x119   : > { %7211 = vmatprep.mubr.msk.bf16.mxu1 %vm706_vm3, %v7802_v4  ;;  %7410 = vmatpush3.bf16.msra.mxu1 %v11201_v7  ;;  %v4496_v4 = vrot.slane %v4494_v61, 4  ;;  %v11204_v7 = vld [vmem:[#allocation23_spill] sm:$0xff]  ;;  %v6692_v61 = vrot.slane %v6676_v14, 9  ;;  %v4448_v14 = vrot.slane %v11206_v60, 5  ;;  %v4501_v22 = vrot.slane %v11207_v18, 5 }
 0x11a   : > { %v4434_v41 = vrot.slane %v11204_v7, 5  ;;  %v4447_v7 = vrot.slane %v4445_v57, 4  ;;  %v6654_v55 = vcombine.low %v4002_v30, %v4012_v29  ;;  %v6655_v51 = vcombine.low %v4026_v3, %v4036_v35  ;;  %v6406_v18 = vld [vmem:[%s7975_s29 + $0x6c] sm:$0xf]  ;;  %v7856_v35 = vld [vmem:[%s7975_s29 + $0x70] sm:$0xf] }
 0x11b   : > { %v9522_v12 = vsel %vm8260_vm6, %v4496_v4, %v4497_v45  ;;  %v4504_v4 = vrot.slane %v11208_v38, 5  ;;  %v9561_v23 = vsel %vm8260_vm6, %v6701_v47, %v4501_v22  ;;  %v4503_v49 = vrot.slane %v4501_v22, 4  ;;  %v6415_v47 = vld [vmem:[%s7975_s29 + $0x90] sm:$0xf]  ;;  %v6686_v45 = vld [vmem:[%s7975_s29 + $0xa8] sm:$0xe] }
 0x11c   : > { %v9556_v11 = vsel %vm8260_vm6, %v4433_v0, %v4434_v41  ;;  %v9568_v30 = vsel %vm8260_vm6, %v6692_v61, %v4438_v39  ;;  %v9572_v29 = vsel %vm8260_vm6, %v4440_v43, %v4441_v48  ;;  %v9576_v3 = vsel %vm8260_vm6, %v6693_v53, %v4445_v57  ;;  %v7857_v48 = vld [vmem:[%s7975_s29 + $0x88] sm:$0xf]  ;;  %v7806_v53 = vld [vmem:[%s7975_s29 + $0x54] sm:$0xff]   ;;  %v11209_v22 = vld [vmem:[#allocation42_spill] sm:$0xff] }
 0x11d   : > { %7364 = vmatmul.mubr.msk.bf16.gmra.mrb[20].mxu0 %vm706_vm3, %v9318_v19  ;;  %v9552_v19 = vsel %vm8260_vm6, %v6691_v6, %v4431_v2  ;;  %v9581_v2 = vsel %vm8260_vm6, %v4447_v7, %v4448_v14  ;;  %v2274_v6 = vshrl.u32 %v6406_v18, 16  ;;  %v2277_v0 = vshll.u32 %v6406_v18, 16  ;;  %v11210_v38 = vld [vmem:[#allocation44_spill] sm:$0xff] }
 0x11e   : > { %7367 = vmatprep.mubr.msk.bf16.mxu0 %vm706_vm3, %v9320_v42  ;;  %v9564_v42 = vcombine.low %v4050_v56, %v4060_v16  ;;  %v9585_v39 = vsel %vm8260_vm6, %v4503_v49, %v4504_v4  ;;  %v2283_v56 = vshll.u32 %v7856_v35, 16  ;;  %v2287_v41 = vshrl.u32 %v7856_v35, 16  ;;  %v6687_v57 = vld [vmem:[%s7975_s29 + $0xb4] sm:$0xe] }
 0x11f   : > { %v2322_v31 = vshrl.u32 %v6412_v58, 16  ;;  %v2325_v61 = vshll.u32 %v6412_v58, 16  ;;  %v2335_v16 = vshrl.u32 %v7857_v48, 16  ;;  %v2346_v43 = vshrl.u32 %v6415_v47, 16 }
 0x120   : > { %7212 = vmatmul.mubr.msk.bf16.gmra.mrb[4].mxu1 %vm706_vm3, %v7803_v17  ;;  %v7805_v17 = vld [vmem:[%s7975_s29 + $0x48] sm:$0xff]   ;;  %v2349_v7 = vshll.u32 %v6415_v47, 16  ;;  %v6702_v14 = vrot.slane %v6686_v45, 9  ;;  %v4508_v18 = vrot.slane %v11209_v22, 5  ;;  %v4511_v4 = vrot.slane %v11210_v38, 5 }
 0x121   : > { %7215 = vmatprep.mubr.msk.bf16.mxu1 %vm706_vm3, %v7804_v21  ;;  %v2331_v21 = vshll.u32 %v7857_v48, 16  ;;  %v2276_v49 = vrot.slane %v2274_v6, 4  ;;  %v2279_v35 = vrot.slane %v2277_v0, 5  ;;  %v2355_v54 = vshll.u32 %v7858_v1, 16 }
 0x122   : > { %v2359_v10 = vshrl.u32 %v7858_v1, 16  ;;  %v9599_v58 = vrot.slane %v2283_v56, 5  ;;  %v2289_v60 = vrot.slane %v2287_v41, 4  ;;  %v9603_v48 = vsel %vm8260_vm6, %v6702_v14, %v4508_v18 }
 0x123   : > { %v4510_v47 = vrot.slane %v4508_v18, 4  ;;  %v2324_v6 = vrot.slane %v2322_v31, 4  ;;  %v2327_v0 = vrot.slane %v2325_v61, 5  ;;  %v9607_v45 = vrot.slane %v2331_v21, 5  ;;  %v11212_v61 = vld [vmem:[#allocation45_spill] sm:$0xff] }
 0x124   : > { %v2337_v1 = vrot.slane %v2335_v16, 4  ;;  %v2351_v56 = vrot.slane %v2349_v7, 5  ;;  %v6703_v14 = vrot.slane %v6687_v57, 9  ;;  %v4515_v21 = vrot.slane %v11212_v61, 5  ;;  %v7807_v57 = vld [vmem:[%s7975_s29 + $0x60] sm:$0xff]  }
 0x125   : > { %7368 = vmatmul.mubr.msk.bf16.gmra.mrb[24].mxu0 %vm706_vm3, %v6654_v55  ;;  %v2348_v55 = vrot.slane %v2346_v43, 4  ;;  %v9612_v41 = vsel %vm8260_vm6, %v4510_v47, %v4511_v4  ;;  %v2280_v16 = vor.u32 %v2279_v35, %v2276_v49  ;;  %v2290_v43 = vor.u32 %v2289_v60, %v9599_v58  ;;  %v7808_v4 = vld [vmem:[%s7975_s29 + $0x6c] sm:$0xff]   ;;  %v6418_v61 = vld [vmem:[%s7975_s29 + $0x9c] sm:$0xf]  ;;  %v6424_v31 = vld [vmem:[%s7975_s29 + $0xb4] sm:$0xf] }
 0x126   : > { %7371 = vmatprep.mubr.msk.bf16.mxu0 %vm706_vm3, %v6655_v51  ;;  %11211 = vst [vmem:[#allocation18_spill] sm:$0xff] %v9612_v41  ;;  %v2361_v51 = vrot.slane %v2359_v10, 4  ;;  %v4518_v22 = vrot.slane %v9241_v33, 5  ;;  %v6707_v10 = vcombine.low %v9552_v19, %v9556_v11  ;;  %v9627_v18 = vsel %vm8260_vm6, %v6703_v14, %v4515_v21  ;;  %v7860_v35 = vld [vmem:[%s7975_s29 + $0x8c] sm:$0x1]  ;;  %v7814_v41 = vld [vmem:[%s7975_s29 + $0xb4] sm:$0xff]  }
 0x127   : > { %11213 = vst [vmem:[#allocation28_spill] sm:$0xff] %v9627_v18  ;;  %v4517_v38 = vrot.slane %v4515_v21, 4  ;;  %v6708_v60 = vcombine.low %v9568_v30, %v9572_v29  ;;  %v2338_v33 = vor.u32 %v2337_v1, %v9607_v45  ;;  %v2341_v47 = vshll.u32 %v7860_v35, 16  ;;  %v7862_v35 = vld [vmem:[%s7975_s29 + $0xa0] sm:$0xf] }
 0x128   : > { %7216 = vmatmul.mubr.msk.bf16.gmra.mrb[8].mxu1 %vm706_vm3, %v7805_v17  ;;  %v9614_v17 = vrot.slane %v2355_v54, 5  ;;  %v2328_v54 = vor.u32 %v2327_v0, %v2324_v6  ;;  %v2352_v19 = vor.u32 %v2351_v56, %v2348_v55  ;;  %v7861_v6 = vld [vmem:[%s7975_s29 + $0x98] sm:$0x1]  ;;  %v2281_v30 = vrot.slane %v2280_v16, 4 }
 0x129   : > { %7219 = vmatprep.mubr.msk.bf16.mxu1 %vm706_vm3, %v7806_v53  ;;  %v7859_v53 = vld [vmem:[%s7975_s29 + $0x74] sm:$0x1]  ;;  %v2365_v0 = vshll.u32 %v7861_v6, 16  ;;  %v9642_v14 = vsel %vm8260_vm6, %v4517_v38, %v4518_v22  ;;  %v2291_v29 = vrot.slane %v2290_v43, 4  ;;  %v11215_v55 = vcombine.low %v9483_v9, %v9514_v52  ;;  %v6689_v6 = vld [vmem:[%s7975_s29 + $0xcc] sm:$0xe] }
 0x12a   : > { %v2293_v7 = vshll.u32 %v7859_v53, 16  ;;  %v6688_v53 = vld [vmem:[%s7975_s29 + $0xc0] sm:$0xe]  ;;  %v2362_v11 = vor.u32 %v2361_v51, %v9614_v17  ;;  %11214 = vst [vmem:[#allocation27_spill] sm:$0xff] %v9642_v14  ;;  %v2329_v56 = vrot.slane %v2328_v54, 4  ;;  %v2370_v51 = vshrl.u32 %v6418_v61, 16 }
 0x12b   : > { %v2373_v22 = vshll.u32 %v6418_v61, 16  ;;  %v6704_v38 = vrot.slane %v6688_v53, 9  ;;  %v2343_v16 = vrot.slane %v2341_v47, 5  ;;  %v4522_v43 = vrot.slane %v9264_v44, 5 }
 0x12c   : > { %v2295_v21 = vrot.slane %v2293_v7, 5  ;;  %v4525_v7 = vrot.slane %v9355_v25, 5  ;;  %v2363_v9 = vrot.slane %v2362_v11, 4  ;;  %v2367_v52 = vrot.slane %v2365_v0, 5  ;;  %v6421_v11 = vld [vmem:[%s7975_s29 + $0xa8] sm:$0xf] }
 0x12d   : > { %7372 = vmatmul.mubr.msk.bf16.gmra.mrb[28].mxu0 %vm706_vm3, %v9564_v42  ;;  %v2339_v42 = vrot.slane %v2338_v33, 4  ;;  %v2379_v54 = vshll.u32 %v7862_v35, 16  ;;  %v9661_v61 = vsel %vm7994_vm2, %v2281_v30, %v9599_v58  ;;  %v9665_v44 = vsel %vm8260_vm6, %v6704_v38, %v4522_v43  ;;  %v7809_v33 = vld [vmem:[%s7975_s29 + $0x78] sm:$0xff]   ;;  %v7810_v0 = vld [vmem:[%s7975_s29 + $0x84] sm:$0xff]  }
 0x12e   : > { %7377 = vmatprep.mubr.msk.bf16.mxu0 %vm706_vm3, %v11215_v55  ;;  %11216 = vst [vmem:[#allocation29_spill] sm:$0xff] %v9665_v44  ;;  %v4524_v25 = vrot.slane %v4522_v43, 4  ;;  %v9670_v47 = vsel %vm7994_vm2, %v2291_v29, %v2295_v21  ;;  %v9675_v53 = vsel %vm7994_vm2, %v2329_v56, %v9607_v45  ;;  %v9679_v58 = vrot.slane %v2373_v22, 5  ;;  %v9688_v55 = vld [vmem:[%s7975_s29 + $0xa4] sm:$0x1]  ;;  %v11236_v44 = vld [vmem:[#allocation16_spill] sm:$0xff] }
 0x12f   : > { %v9685_v30 = vsel %vm7994_vm2, %v2339_v42, %v2343_v16  ;;  %v6705_v45 = vrot.slane %v6689_v6, 9  ;;  %v9704_v22 = vrot.slane %v2379_v54, 5  ;;  %v2394_v16 = vshrl.u32 %v6421_v11, 16  ;;  %v11221_v54 = vld [vmem:[#allocation4_spill] sm:$0xff] }
 0x130   : > { %7220 = vmatmul.mubr.msk.bf16.gmra.mrb[12].mxu1 %vm706_vm3, %v7807_v57  ;;  %v2353_v57 = vrot.slane %v2352_v19, 4  ;;  %v9677_v19 = vrot.slane %v2370_v51, 4  ;;  %v9693_v21 = vsel %vm8260_vm6, %v4524_v25, %v4525_v7  ;;  %v9702_v51 = vsel %vm7994_vm2, %v2363_v9, %v2367_v52  ;;  %v11218_v9 = vld [vmem:[#allocation2_spill] sm:$0xff]  ;;  %v7864_v25 = vld [vmem:[%s7975_s29 + $0xac] sm:$0xf] }
 0x131   : > { %7223 = vmatprep.mubr.msk.bf16.mxu1 %vm706_vm3, %v7808_v4  ;;  %v2383_v4 = vshrl.u32 %v7862_v35, 16  ;;  %11217 = vst [vmem:[#allocation30_spill] sm:$0xff] %v9693_v21  ;;  %v4529_v43 = vrot.slane %v9368_v5, 5  ;;  %v4966_v52 = vunpack.c.l.bf16 %v11218_v9  ;;  %v4968_v6 = vunpack.c.l.bf16 %v11221_v54  ;;  %v11223_v9 = vld [vmem:[#allocation6_spill] sm:$0xff] }
 0x132   : > { %v9698_v56 = vsel %vm7994_vm2, %v2353_v57, %v9614_v17  ;;  %v4532_v17 = vrot.slane %v9421_v50, 5  ;;  %v2397_v57 = vshll.u32 %v6421_v11, 16  ;;  %v2407_v11 = vshrl.u32 %v7864_v25, 16 }
 0x133   : > { %v9709_v42 = vrot.slane %v2383_v4, 4  ;;  %v9722_v5 = vsel %vm8260_vm6, %v6705_v45, %v4529_v43  ;;  %v4531_v50 = vrot.slane %v4529_v43, 4  ;;  %v4970_v1 = vunpack.c.l.bf16 %v11223_v9  ;;  %v11225_v43 = vld [vmem:[#allocation7_spill] sm:$0xff] }
 0x134   : > { %11220 = vst [vmem:[#allocation32_spill] sm:$0xff] %v9722_v5  ;;  %v4971_v54 = vunpack.c.l.bf16 %v11225_v43  ;;  %v9739_v29 = vrot.slane %v2397_v57, 5  ;;  %v11229_v43 = vld [vmem:[#allocation11_spill] sm:$0xff]  ;;  %v9751_v21 = vrot.slane %v2407_v11, 4  ;;  %v2418_v5 = vshrl.u32 %v6424_v31, 16 }
 0x135   : > { %7378 = vmatmul.mubr.msk.bf16.vlgmr.msra.gmra.mrb[0].mxu0 %vm706_vm3, %v6707_v10  ;;  %v11219_v10 = vld [vmem:[#allocation3_spill] sm:$0xff]  ;;  %v9735_v45 = vsel %vm8260_vm6, %v4531_v50, %v4532_v17  ;;  %v4975_v49 = vunpack.c.l.bf16 %v11229_v43  ;;  %v11233_v11 = vcombine.low %v9340_v46, %v9359_v26  ;;  %v11234_v43 = vld [vmem:[#allocation14_spill] sm:$0xff] }
 0x136   : > { %7381 = vmatprep.mubr.msk.bf16.mxu0 %vm706_vm3, %v6708_v60  ;;  %v4967_v35 = vunpack.c.l.bf16 %v11219_v10  ;;  %v11222_v60 = vld [vmem:[#allocation5_spill] sm:$0xff]  ;;  %11224 = vst [vmem:[#allocation31_spill] sm:$0xff] %v9735_v45  ;;  %v7689_v50 = vpack.i.bf16 %v4971_v54, %v4970_v1  ;;  %v11228_v10 = vld [vmem:[#allocation10_spill] sm:$0xff]  ;;  %v2420_v14 = vrot.slane %v2418_v5, 4 }
 0x137   : > { %v4969_v4 = vunpack.c.l.bf16 %v11222_v60  ;;  %v7811_v60 = vld [vmem:[%s7975_s29 + $0x90] sm:$0xff]   ;;  %v4974_v7 = vunpack.c.l.bf16 %v11228_v10  ;;  %v11232_v10 = vld [vmem:[#allocation13_spill] sm:$0xff]  ;;  %v7867_v26 = vld [vmem:[%s7975_s29 + $0xc4] sm:$0xf] }
 0x138   : > { %7224 = vmatmul.mubr.msk.bf16.gmra.mrb[16].mxu1 %vm706_vm3, %v7809_v33  ;;  %v2403_v33 = vshll.u32 %v7864_v25, 16  ;;  %v7679_v38 = vpack.i.bf16 %v4967_v35, %v4966_v52  ;;  %v11227_v25 = vld [vmem:[#allocation9_spill] sm:$0xff]  ;;  %v7865_v52 = vld [vmem:[%s7975_s29 + $0xb0] sm:$0x1]  ;;  %7690 = vrot.lane.b32.xlu1 %v7689_v50, %s7910_s20  ;;  %v4977_v54 = vunpack.c.l.bf16 %v11232_v10  ;;  %v2455_v10 = vshrl.u32 %v7867_v26, 16 }
 0x139   : > { %7227 = vmatprep.mubr.msk.bf16.mxu1 %vm706_vm3, %v7810_v0  ;;  %v9730_v0 = vrot.slane %v2394_v16, 4  ;;  %v11226_v16 = vld [vmem:[#allocation8_spill] sm:$0xff]  ;;  %v4973_v9 = vunpack.c.l.bf16 %v11227_v25  ;;  %v7684_v17 = vpack.i.bf16 %v4969_v4, %v4968_v6  ;;  %v2413_v45 = vshll.u32 %v7865_v52, 16 }
 0x13a   : > { %7680 = vrot.lane.b32.xlu0 %v7679_v38, %s7910_s20  ;;  %v4972_v35 = vunpack.c.l.bf16 %v11226_v16  ;;  %v9749_v57 = vrot.slane %v2403_v33, 5  ;;  %v6427_v38 = vld [vmem:[%s7975_s29 + $0xc0] sm:$0xf]  ;;  %v11230_v16 = vcombine.low %v9576_v3, %v9581_v2  ;;  %v11231_v6 = vld [vmem:[#allocation12_spill] sm:$0xff]  ;;  %v4984_v33 = vunpack.c.l.bf16 %v9489_v32  ;;  %v7866_v2 = vld [vmem:[%s7975_s29 + $0xb8] sm:$0xf] }
 0x13b   : > { %v4976_v4 = vunpack.c.l.bf16 %v11231_v6  ;;  %v2421_v3 = vshll.u32 %v6424_v31, 16  ;;  %v2427_v52 = vshll.u32 %v7866_v2, 16  ;;  %v2431_v25 = vshrl.u32 %v7866_v2, 16 }
 0x13c   : > { %v7694_v1 = vpack.i.bf16 %v4973_v9, %v4972_v35  ;;  %v4985_v35 = vunpack.c.l.bf16 %v9437_v36  ;;  %v2442_v9 = vshrl.u32 %v6427_v38, 16  ;;  %v7699_v50 = vpack.i.bf16 %v4975_v49, %v4974_v7  ;;  %v11237_v49 = vld [vmem:[#allocation17_spill] sm:$0xff] }
 0x13d   : > { %7382 = vmatmul.mubr.msk.bf16.gmra.mrb[4].mxu0 %vm706_vm3, %v11230_v16  ;;  %v11235_v16 = vld [vmem:[#allocation15_spill] sm:$0xff]  ;;  %v2445_v46 = vshll.u32 %v6427_v38, 16  ;;  %v2451_v31 = vshll.u32 %v7867_v26, 16  ;;  %v2400_v2 = vor.u32 %v9739_v29, %v9730_v0  ;;  %v4981_v7 = vunpack.c.l.bf16 %v11237_v49  ;;  %v7815_v49 = vld [vmem:[%s7975_s29 + $0xc0] sm:$0xff]  }
 0x13e   : > { %7385 = vmatprep.mubr.msk.bf16.mxu0 %vm706_vm3, %v11233_v11  ;;  %7685 = vrot.lane.b32.xlu0 %v7684_v17, %s7910_s20  ;;  %v4979_v6 = vunpack.c.l.bf16 %v11235_v16  ;;  %v9775_v11 = vpack.i.bf16 %v4985_v35, %v4984_v33  ;;  %v4980_v17 = vunpack.c.l.bf16 %v11236_v44  ;;  %v2423_v16 = vrot.slane %v2421_v3, 5 }
 0x13f   : > { %7695 = vrot.lane.b32.xlu1 %v7694_v1, %s7910_s20  ;;  %v9783_v18 = vrot.slane %v2427_v52, 5  ;;  %v2433_v38 = vrot.slane %v2431_v25, 4  ;;  %v2410_v33 = vor.u32 %v9751_v21, %v9749_v57  ;;  %v4982_v0 = vunpack.c.l.bf16 %v9661_v61 }
 0x140   : > { %7228 = vmatmul.mubr.msk.bf16.gmra.mrb[20].mxu1 %vm706_vm3, %v7811_v60  ;;  %v4978_v60 = vunpack.c.l.bf16 %v11234_v43  ;;  %v7813_v43 = vld [vmem:[%s7975_s29 + $0xa8] sm:$0xff]   ;;  %v4983_v1 = vunpack.c.l.bf16 %v9670_v47  ;;  %v2444_v44 = vrot.slane %v2442_v9, 4  ;;  %v2457_v5 = vrot.slane %v2455_v10, 4 }
 0x141   : > { %7231 = vmatprep.mubr.msk.bf16.mxu1 %vm706_vm3, %v7812_v40  ;;  %v7704_v40 = vpack.i.bf16 %v4977_v54, %v4976_v4  ;;  %v2447_v4 = vrot.slane %v2445_v46, 5  ;;  %v2453_v54 = vrot.slane %v2451_v31, 5  ;;  %v11238_v3 = vcombine.low %v9346_v62, %v9374_v27 }
 0x142   : > { %7700 = vrot.lane.b32.xlu0 %v7699_v50, %s7910_s20  ;;  %v7709_v29 = vpack.i.bf16 %v4979_v6, %v4978_v60  ;;  %v11239_v21 = vor.u32 %v9679_v58, %v9677_v19  ;;  %v11240_v25 = vor.u32 %v9709_v42, %v9704_v22  ;;  %v11241_v50 = vshll.u32 %v9688_v55, 16  ;;  %v7868_v42 = vld [vmem:[%s7975_s29 + $0xbc] sm:$0x1] }
 0x143   : > { %7705 = vrot.lane.b32.xlu1 %v7704_v40, %s7910_s20  ;;  %v7714_v9 = vpack.i.bf16 %v4981_v7, %v4980_v17  ;;  %v11242_v62 = vcombine.low %v9382_v59, %v9398_v13  ;;  %v2415_v27 = vrot.slane %v2413_v45, 5  ;;  %v2424_v19 = vor.u32 %v2423_v16, %v2420_v14  ;;  %v7869_v45 = vld [vmem:[%s7975_s29 + $0xc8] sm:$0x1]  ;;  %s7911_s29 = smov 120  }
 0x144   : > { %v2377_v52 = vrot.slane %v11239_v21, 4  ;;  %v2387_v35 = vrot.slane %v11240_v25, 4  ;;  %v2391_v60 = vrot.slane %v11241_v50, 5  ;;  %v2434_v58 = vor.u32 %v2433_v38, %v9783_v18 }
 0x145   : > { %7386 = vmatmul.mubr.msk.bf16.gmra.mrb[8].mxu0 %vm706_vm3, %v11238_v3  ;;  %v2437_v6 = vshll.u32 %v7868_v42, 16  ;;  %v2401_v55 = vrot.slane %v2400_v2, 4  ;;  %v7719_v46 = vpack.i.bf16 %v4983_v1, %v4982_v0  ;;  %v4986_v26 = vunpack.c.l.bf16 %v9675_v53  ;;  %v11258_v42 = vld [vmem:[#allocation31_spill] sm:$0xff] }
 0x146   : > { %7389 = vmatprep.mubr.msk.bf16.mxu0 %vm706_vm3, %v11242_v62  ;;  %7710 = vrot.lane.b32.xlu0 %v7709_v29, %s7910_s20  ;;  %v4987_v59 = vunpack.c.l.bf16 %v9685_v30  ;;  %v2411_v13 = vrot.slane %v2410_v33, 4  ;;  %v2448_v31 = vor.u32 %v2447_v4, %v2444_v44  ;;  %v2458_v10 = vor.u32 %v2457_v5, %v2453_v54 }
 0x147   : > { %v2461_v14 = vshll.u32 %v7869_v45, 16  ;;  %v6438_v40 = vcombine.low %v9661_v61, %v9670_v47  ;;  %7715 = vrot.lane.b32.xlu1 %v7714_v9, %s7910_s20  ;;  %v4988_v2 = vunpack.c.l.bf16 %v9698_v56  ;;  %v4989_v17 = vunpack.c.l.bf16 %v9702_v51 }
 0x148   : > { %7232 = vmatmul.mubr.msk.bf16.gmra.mrb[24].mxu1 %vm706_vm3, %v7813_v43  ;;  %v2392_v7 = vsel %vm7994_vm2, %v2387_v35, %v2391_v60  ;;  %v2425_v43 = vrot.slane %v2424_v19, 4  ;;  %v2435_v16 = vrot.slane %v2434_v58, 4  ;;  %v2439_v38 = vrot.slane %v2437_v6, 5  ;;  %v11252_v19 = vld [vmem:[#allocation27_spill] sm:$0xff]  ;;  %v11257_v58 = vld [vmem:[#allocation32_spill] sm:$0xff] }
 0x149   : > { %7235 = vmatprep.mubr.msk.bf16.mxu1 %vm706_vm3, %v7814_v41  ;;  %v2382_v41 = vsel %vm7994_vm2, %v2377_v52, %v9704_v22  ;;  %v2406_v61 = vsel %vm7994_vm2, %v2401_v55, %v9749_v57  ;;  %v7729_v47 = vpack.i.bf16 %v4987_v59, %v4986_v26  ;;  %v4991_v33 = vunpack.c.l.bf16 %v2392_v7 }
 0x14a   : > { %7720 = vrot.lane.b32.xlu0 %v7719_v46, %s7910_s20  ;;  %v4990_v22 = vunpack.c.l.bf16 %v2382_v41  ;;  %v2416_v29 = vsel %vm7994_vm2, %v2411_v13, %v2415_v27  ;;  %v2449_v0 = vrot.slane %v2448_v31, 4  ;;  %v2459_v1 = vrot.slane %v2458_v10, 4 }
 0x14b   : > { %v2463_v44 = vrot.slane %v2461_v14, 5  ;;  %v11243_v4 = vcombine.low %v9387_v20, %v9412_v24  ;;  %7725 = vrot.lane.b32.xlu1 %v9775_v11, %s7910_s20  ;;  %v7734_v57 = vpack.i.bf16 %v4989_v17, %v4988_v2  ;;  %v4992_v5 = vunpack.c.l.bf16 %v2406_v61 }
 0x14c   : > { %v4993_v3 = vunpack.c.l.bf16 %v2416_v29  ;;  %v11244_v21 = vcombine.low %v9443_v34, %v9452_v63  ;;  %v2430_v52 = vsel %vm7994_vm2, %v2425_v43, %v9783_v18  ;;  %v2440_v20 = vsel %vm7994_vm2, %v2435_v16, %v2439_v38 }
 0x14d   : > { %7390 = vmatmul.mubr.msk.bf16.gmra.mrb[12].mxu0 %vm706_vm3, %v11243_v4  ;;  %v7739_v24 = vpack.i.bf16 %v4991_v33, %v4990_v22  ;;  %v4994_v11 = vunpack.c.l.bf16 %v2430_v52  ;;  %v4995_v25 = vunpack.c.l.bf16 %v2440_v20  ;;  %v2454_v35 = vsel %vm7994_vm2, %v2449_v0, %v2453_v54 }
 0x14e   : > { %7393 = vmatprep.mubr.msk.bf16.mxu0 %vm706_vm3, %v11244_v21  ;;  %7730 = vrot.lane.b32.xlu0 %v7729_v47, %s7910_s20  ;;  %v2464_v34 = vsel %vm7994_vm2, %v2459_v1, %v2463_v44  ;;  %v7744_v63 = vpack.i.bf16 %v4993_v3, %v4992_v5  ;;  %v4996_v18 = vunpack.c.l.bf16 %v2454_v35  ;;  %v6440_v60 = vcombine.low %v9675_v53, %v9685_v30  ;;  %v11251_v30 = vld [vmem:[#allocation28_spill] sm:$0xff]  ;;  %v9942_v44 = vld [vmem:[%s11050_s2] ss:$0 sm:$0xff] }
 0x14f   : > { %7735 = vrot.lane.b32.xlu1 %v7734_v57, %s7910_s20  ;;  %v4997_v50 = vunpack.c.l.bf16 %v2464_v34  ;;  %v7749_v9 = vpack.i.bf16 %v4995_v25, %v4994_v11  ;;  %v11245_v62 = vcombine.low %v9467_v37, %v9475_v15  ;;  %v11246_v54 = vcombine.low %v9489_v32, %v9437_v36  ;;  %v11249_v32 = vld [vmem:[#allocation18_spill] sm:$0xff] }
 0x150   : > { %7236 = vmatmul.mubr.msk.bf16.gmra.mrb[28].mxu1 %vm706_vm3, %v7815_v49  ;;  %v11247_v27 = vcombine.low %v9503_v8, %v9522_v12  ;;  %v6441_v37 = vcombine.low %v9698_v56, %v9702_v51  ;;  %v6442_v15 = vcombine.low %v2382_v41, %v2392_v7  ;;  %v11248_v36 = vcombine.low %v9561_v23, %v9585_v39  ;;  %v11254_v23 = vld [vmem:[#allocation29_spill] sm:$0xff]  ;;  %v11255_v39 = vld [vmem:[#allocation30_spill] sm:$0xff] }
 0x151   : > { %7257 = vmatprep.mubr.msk.bf16.mxu1 %vm706_vm3, %v6438_v40  ;;  %v7754_v28 = vpack.i.bf16 %v4997_v50, %v4996_v18  ;;  %v11250_v8 = vcombine.low %v9603_v48, %v11249_v32  ;;  %v6443_v12 = vcombine.low %v2406_v61, %v2416_v29  ;;  %v6444_v53 = vcombine.low %v2430_v52, %v2440_v20 }
 0x152   : > { %7740 = vrot.lane.b32.xlu0 %v7739_v24, %s7910_s20  ;;  %v11253_v56 = vcombine.low %v11251_v30, %v11252_v19  ;;  %v11256_v51 = vcombine.low %v11254_v23, %v11255_v39  ;;  %v6445_v48 = vcombine.low %v2454_v35, %v2464_v34  ;;  %v11259_v6 = vcombine.low %v11257_v58, %v11258_v42 }
 0x153   : > { %7745 = vrot.lane.b32.xlu1 %v7744_v63, %s7910_s20 }
 0x155   : > { %7394 = vmatmul.mubr.msk.bf16.gmra.mrb[16].mxu0 %vm706_vm3, %v11245_v62 }
 0x156   : > { %7397 = vmatprep.mubr.msk.bf16.mxu0 %vm706_vm3, %v11247_v27  ;;  %7750 = vrot.lane.b32.xlu0 %v7749_v9, %s7910_s20 }
 0x157   : > { %7755 = vrot.lane.b32.xlu1 %v7754_v28, %s7910_s20 }
 0x158   : > { %7258 = vmatmul.mubr.msk.bf16.vlgmr.msra.gmra.mrb[16].mxu1 %vm706_vm3, %v11246_v54 }
 0x159   : > { %7261 = vmatprep.mubr.msk.bf16.mxu1 %vm706_vm3, %v6440_v60 }
 0x15d   : > { %7398 = vmatmul.mubr.msk.bf16.gmra.mrb[20].mxu0 %vm706_vm3, %v11248_v36 }
 0x15e   : > { %7401 = vmatprep.mubr.msk.bf16.mxu0 %vm706_vm3, %v11250_v8 }
 0x160   : > { %7262 = vmatmul.mubr.msk.bf16.gmra.mrb[20].mxu1 %vm706_vm3, %v6441_v37 }
 0x161   : > { %7265 = vmatprep.mubr.msk.bf16.mxu1 %vm706_vm3, %v6442_v15 }
 0x165   : > { %7402 = vmatmul.mubr.msk.bf16.gmra.mrb[24].mxu0 %vm706_vm3, %v11253_v56 }
 0x166   : > { %7405 = vmatprep.mubr.msk.bf16.mxu0 %vm706_vm3, %v11256_v51 }
 0x168   : > { %7266 = vmatmul.mubr.msk.bf16.gmra.mrb[24].mxu1 %vm706_vm3, %v6443_v12 }
 0x169   : > { %7269 = vmatprep.mubr.msk.bf16.mxu1 %vm706_vm3, %v6444_v53 }
 0x16d   : > { %7406 = vmatmul.mubr.msk.bf16.gmra.mrb[28].mxu0 %vm706_vm3, %v11259_v6 }
 0x170   : > { %7270 = vmatmul.mubr.msk.bf16.gmra.mrb[28].mxu1 %vm706_vm3, %v6445_v48 }
 0x1aa   : > { %v9906_v14 = vpop.permute.xlu1 %7690 }
 0x1ac   : > { %v9910_v41 = vpop.permute.xlu0 %7680 }
 0x1b0   : > { %v9920_v43 = vpop.permute.xlu0 %7685 }
 0x1b1   : > { %v9918_v7 = vpop.permute.xlu1 %7695 }
 0x1b4   : > { %v9931_v22 = vpop.permute.xlu0 %7700 }
 0x1b5   : > { %v9925_v38 = vpop.permute.xlu1 %7705 }
 0x1b8   : > { %v9937_v0 = vpop.permute.xlu0 %7710 }
 0x1b9   : > { %v9935_v29 = vpop.permute.xlu1 %7715 }
 0x1bc   : > { %v9952_v18 = vpop.permute.xlu0 %7720 }
 0x1bd   : > { %v9944_v5 = vpop.permute.xlu1 %7725 }
 0x1c0   : > { %v9972_v23 = vpop.permute.xlu0 %7730 }
 0x1c1   : > { %v9964_v15 = vpop.permute.xlu1 %7735 }
 0x1eb   : > { %v7209_v55 = vpop.f32.mrb[0].mxu1 }
 0x1ec   : > { %v1874_v46 = vpop.f32.mrb[1].mxu1 }
 0x1ed   : > { %v7210_v26 = vpop.f32.mrb[2].mxu1 }
 0x1ee   : > { %v1877_v59 = vpop.f32.mrb[3].mxu1 }
 0x1f3   : > { %v7213_v13 = vpop.f32.mrb[4].mxu1 }
 0x1f4   : > { %v1890_v31 = vpop.f32.mrb[5].mxu1 }
 0x1f5   : > { %v9902_v10 = vpop.f32.mrb[6].mxu1 }
 0x1f6   : > { %v9904_v45 = vpop.f32.mrb[7].mxu1 }
 0x1fb   : > { %v9908_v40 = vpop.f32.mrb[8].mxu1 }
 0x1fc   : > { %v9912_v2 = vpop.f32.mrb[9].mxu1 }
 0x1fd   : > { %v9914_v17 = vpop.f32.mrb[10].mxu1 }
 0x1fe   : > { %v9916_v49 = vpop.f32.mrb[11].mxu1 }
 0x203   : > { %v9922_v16 = vpop.f32.mrb[12].mxu1 }
 0x204   : > { %v9927_v61 = vpop.f32.mrb[13].mxu1 }
 0x205   : > { %v9929_v47 = vpop.f32.mrb[14].mxu1 }
 0x206   : > { %v9933_v33 = vpop.f32.mrb[15].mxu1 }
 0x208   : > { %v7379_v1 = vpop.f32.mrb[0].mxu0 }
 0x209   : > { %v7411_v4 = vadd.f32 %v7379_v1, %v7209_v55  ;;  %v4672_v57 = vpop.f32.mrb[1].mxu0 }
 0x20a   : > { %v7412_v3 = vadd.f32 %v4672_v57, %v1874_v46  ;;  %v7380_v21 = vpop.f32.mrb[2].mxu0 }
 0x20b   : > { %v4840_v52 = vadd.f32 %v7411_v4, %v9942_v44  ;;  %v7413_v20 = vadd.f32 %v7380_v21, %v7210_v26  ;;  %v4675_v24 = vpop.f32.mrb[3].mxu0 }
 0x20c   : > { %v4838_v11 = vadd.f32 %v7412_v3, %v9942_v44  ;;  %v7414_v25 = vadd.f32 %v4675_v24, %v1877_v59 }
 0x20d   : > { %vm4872_vm8 = vcmp.ge.f32.partialorder %v4840_v52, 0.0  ;;  %v4904_v35 = vmul.f32 0.05, %v4840_v52  ;;  %v7870_v34 = vadd.low.f32.bf16 %v4840_v52, %v9920_v43  ;;  %v9950_v63 = vadd.f32 %v7413_v20, %v9942_v44  ;;  %v10006_v20 = vpop.permute.xlu0 %7740 }
 0x20e   : > { %vm4870_vm9 = vcmp.ge.f32.partialorder %v4838_v11, 0.0  ;;  %v4902_v50 = vmul.f32 0.05, %v4838_v11  ;;  %v9955_v60 = vadd.f32 %v7414_v25, %v9942_v44  ;;  %v7871_v1 = vadd.low.f32.bf16 %v4838_v11, %v9910_v41 }
 0x20f   : > { %v4936_v9 = vsel %vm4872_vm8, %v4840_v52, %v4904_v35  ;;  %vm5160_vm10 = vcmp.ge.f32.partialorder %v7870_v34, 0.0  ;;  %v5192_v62 = vmul.f32 0.05, %v7870_v34  ;;  %vm4873_vm11 = vcmp.ge.f32.partialorder %v9950_v63, 0.0 }
 0x210   : > { %v6888_v28 = vpack.c.bf16 %v4936_v9, %v4936_v9  ;;  %v4934_v54 = vsel %vm4870_vm9, %v4838_v11, %v4902_v50  ;;  %v4905_v27 = vmul.f32 0.05, %v9950_v63  ;;  %v7383_v37 = vpop.f32.mrb[4].mxu0  ;;  %vm4871_vm12 = vcmp.ge.f32.partialorder %v9955_v60, 0.0 }
 0x211   : > { %v6886_v36 = vpack.c.bf16 %v4934_v54, %v4934_v54  ;;  %v4903_v32 = vmul.f32 0.05, %v9955_v60  ;;  %v4688_v8 = vpop.f32.mrb[5].mxu0  ;;  %v7415_v53 = vadd.f32 %v7383_v37, %v7213_v13  ;;  %v5224_v56 = vsel %vm5160_vm10, %v7870_v34, %v5192_v62 }
 0x212   : > { %5385 = vst.msk [vmem:[%s9960_s28 + $0x8] sm:$0xf] %vm5382_vm7, %v6888_v28  ;;  %v4937_v12 = vsel %vm4873_vm11, %v9950_v63, %v4905_v27  ;;  %v7416_v30 = vadd.f32 %v4688_v8, %v1890_v31  ;;  %v7384_v19 = vpop.f32.mrb[6].mxu0  ;;  %v6920_v42 = vpack.c.bf16 %v5224_v56, %v5224_v56  ;;  %vm5158_vm1 = vcmp.ge.f32.partialorder %v7871_v1, 0.0 }
 0x213   : > { %5383 = vst.msk [vmem:[%s9960_s28] sm:$0xf] %vm5382_vm7, %v6886_v36  ;;  %v6889_v39 = vpack.c.bf16 %v4937_v12, %v4937_v12  ;;  %v4935_v51 = vsel %vm4871_vm12, %v9955_v60, %v4903_v32  ;;  %v7417_v48 = vadd.f32 %v7384_v19, %v9902_v10  ;;  %v4691_v58 = vpop.f32.mrb[7].mxu0  ;;  %v9979_v55 = vadd.f32 %v7415_v53, %v9942_v44  ;;  %v9996_v10 = vpop.permute.xlu1 %7745 }
 0x214   : > { %v6887_v6 = vpack.c.bf16 %v4935_v51, %v4935_v51  ;;  %v9982_v46 = vadd.f32 %v7416_v30, %v9942_v44  ;;  %v7418_v26 = vadd.f32 %v4691_v58, %v9904_v45  ;;  %v5588_v52 = vshrl.u32 %v6920_v42, 16 }
 0x215   : > { %5386 = vst.msk [vmem:[%s9960_s28 + $0xc] sm:$0xf] %vm5382_vm7, %v6889_v39  ;;  %v9988_v59 = vadd.f32 %v7417_v48, %v9942_v44  ;;  %vm4876_vm13 = vcmp.ge.f32.partialorder %v9979_v55, 0.0  ;;  %v4908_v13 = vmul.f32 0.05, %v9979_v55  ;;  %v5591_v9 = vshll.u32 %v6920_v42, 16 }
 0x216   : > { %5384 = vst.msk [vmem:[%s9960_s28 + $0x4] sm:$0xf] %vm5382_vm7, %v6887_v6  ;;  %vm4874_vm14 = vcmp.ge.f32.partialorder %v9982_v46, 0.0  ;;  %v4906_v31 = vmul.f32 0.05, %v9982_v46  ;;  %v10004_v3 = vadd.f32 %v7418_v26, %v9942_v44  ;;  %v10019_v32 = vrot.slane %v5588_v52, 7 }
 0x217   : > { %vm4877_vm15 = vcmp.ge.f32.partialorder %v9988_v59, 0.0  ;;  %v4909_v45 = vmul.f32 0.05, %v9988_v59  ;;  %v4940_v4 = vsel %vm4876_vm13, %v9979_v55, %v4908_v13  ;;  %v5190_v12 = vmul.f32 0.05, %v7871_v1  ;;  %v10045_v51 = vpop.permute.xlu1 %7755 }
 0x218   : > { %v4938_v57 = vsel %vm4874_vm14, %v9982_v46, %v4906_v31  ;;  %v7387_v21 = vpop.f32.mrb[8].mxu0  ;;  %v6892_v24 = vpack.c.bf16 %v4940_v4, %v4940_v4  ;;  %vm4875_vm0 = vcmp.ge.f32.partialorder %v10004_v3, 0.0  ;;  %v4907_v34 = vmul.f32 0.05, %v10004_v3  ;;  %v10055_v4 = vpop.permute.xlu0 %7750 }
 0x219   : > { %v6890_v25 = vpack.c.bf16 %v4938_v57, %v4938_v57  ;;  %v4704_v11 = vpop.f32.mrb[9].mxu0  ;;  %v4941_v35 = vsel %vm4877_vm15, %v9988_v59, %v4909_v45  ;;  %v7419_v28 = vadd.f32 %v7387_v21, %v9908_v40  ;;  %v5593_v19 = vor.u32 %v5591_v9, %v10019_v32 }
 0x21a   : > { %v7388_v50 = vpop.f32.mrb[10].mxu0  ;;  %5389 = vst.msk [vmem:[%s9960_s28 + $0x18] sm:$0xf] %vm5382_vm7, %v6892_v24  ;;  %v6893_v62 = vpack.c.bf16 %v4941_v35, %v4941_v35  ;;  %v7420_v54 = vadd.f32 %v4704_v11, %v9912_v2  ;;  %v4939_v36 = vsel %vm4875_vm0, %v10004_v3, %v4907_v34  ;;  %v7873_v48 = vadd.high.f32.bf16 %v9955_v60, %v9910_v41 }
 0x21b   : > { %5387 = vst.msk [vmem:[%s9960_s28 + $0x10] sm:$0xf] %vm5382_vm7, %v6890_v25  ;;  %v7421_v27 = vadd.f32 %v7388_v50, %v9914_v17  ;;  %v4707_v37 = vpop.f32.mrb[11].mxu0  ;;  %v6891_v53 = vpack.c.bf16 %v4939_v36, %v4939_v36  ;;  %v10025_v30 = vadd.f32 %v7419_v28, %v9942_v44  ;;  %v7872_v17 = vadd.high.f32.bf16 %v9950_v63, %v9920_v43 }
 0x21c   : > { %v7422_v8 = vadd.f32 %v4707_v37, %v9916_v49  ;;  %5390 = vst.msk [vmem:[%s9960_s28 + $0x1c] sm:$0xf] %vm5382_vm7, %v6893_v62  ;;  %v10028_v40 = vadd.f32 %v7420_v54, %v9942_v44  ;;  %5848 = vrot.lane.b32.xlu1 %v5593_v19, %s7911_s29  ;;  %v5222_v6 = vsel %vm5158_vm1, %v7871_v1, %v5190_v12  ;;  %vm5159_vm8 = vcmp.ge.f32.partialorder %v7873_v48, 0.0 }
 0x21d   : > { %v10031_v2 = vadd.f32 %v7421_v27, %v9942_v44  ;;  %5388 = vst.msk [vmem:[%s9960_s28 + $0x14] sm:$0xf] %vm5382_vm7, %v6891_v53  ;;  %vm4880_vm2 = vcmp.ge.f32.partialorder %v10025_v30, 0.0  ;;  %v4912_v56 = vmul.f32 0.05, %v10025_v30  ;;  %vm5161_vm6 = vcmp.ge.f32.partialorder %v7872_v17, 0.0 }
 0x21e   : > { %v10037_v49 = vadd.f32 %v7422_v8, %v9942_v44  ;;  %vm4878_vm3 = vcmp.ge.f32.partialorder %v10028_v40, 0.0  ;;  %v4910_v39 = vmul.f32 0.05, %v10028_v40  ;;  %v10061_v60 = vadd.low.f32.bf16 %v9979_v55, %v9918_v7 }
 0x21f   : > { %vm4881_vm4 = vcmp.ge.f32.partialorder %v10031_v2, 0.0  ;;  %v4913_v43 = vmul.f32 0.05, %v10031_v2  ;;  %v4944_v58 = vsel %vm4880_vm2, %v10025_v30, %v4912_v56  ;;  %v6918_v52 = vpack.c.bf16 %v5222_v6, %v5222_v6 }
 0x220   : > { %v7391_v63 = vpop.f32.mrb[12].mxu0  ;;  %v4942_v42 = vsel %vm4878_vm3, %v10028_v40, %v4910_v39  ;;  %v6896_v13 = vpack.c.bf16 %v4944_v58, %v4944_v58  ;;  %vm4879_vm5 = vcmp.ge.f32.partialorder %v10037_v49, 0.0  ;;  %v4911_v21 = vmul.f32 0.05, %v10037_v49 }
 0x221   : > { %v4720_v26 = vpop.f32.mrb[13].mxu0  ;;  %v6894_v31 = vpack.c.bf16 %v4942_v42, %v4942_v42  ;;  %v4945_v57 = vsel %vm4881_vm4, %v10031_v2, %v4913_v43  ;;  %v5193_v24 = vmul.f32 0.05, %v7872_v17  ;;  %v5191_v11 = vmul.f32 0.05, %v7873_v48 }
 0x222   : > { %v7392_v45 = vpop.f32.mrb[14].mxu0  ;;  %5393 = vst.msk [vmem:[%s9960_s28 + $0x28] sm:$0xf] %vm5382_vm7, %v6896_v13  ;;  %v6897_v1 = vpack.c.bf16 %v4945_v57, %v4945_v57  ;;  %v4943_v25 = vsel %vm4879_vm5, %v10037_v49, %v4911_v21  ;;  %v7423_v35 = vadd.f32 %v7391_v63, %v9922_v16  ;;  %vm5567_vm9 = vsmask.f32 256 }
 0x223   : > { %v4723_v41 = vpop.f32.mrb[15].mxu0  ;;  %5391 = vst.msk [vmem:[%s9960_s28 + $0x20] sm:$0xf] %vm5382_vm7, %v6894_v31  ;;  %vm5568_vm10 = vsmask.f32 4368  ;;  %v6895_v55 = vpack.c.bf16 %v4943_v25, %v4943_v25  ;;  %v5571_v34 = vshrl.u32 %v6918_v52, 16  ;;  %v5225_v9 = vsel %vm5161_vm6, %v7872_v17, %v5193_v24 }
 0x224   : > { %5394 = vst.msk [vmem:[%s9960_s28 + $0x2c] sm:$0xf] %vm5382_vm7, %v6897_v1  ;;  %v5574_v50 = vshll.u32 %v6918_v52, 16  ;;  %v10072_v62 = vpack.c.bf16 %v5225_v9, %v5225_v9  ;;  %v5223_v28 = vsel %vm5159_vm8, %v7873_v48, %v5191_v11  ;;  %v10075_v54 = vadd.f32 %v7423_v35, %v9942_v44  ;;  %vm10139_vm15 = vmor %vm5567_vm9, %vm5568_vm10 }
 0x225   : > { %v7424_v27 = vadd.f32 %v4720_v26, %v9927_v61  ;;  %5392 = vst.msk [vmem:[%s9960_s28 + $0x24] sm:$0xf] %vm5382_vm7, %v6895_v55  ;;  %v10080_v16 = vrot.slane %v5571_v34, 7  ;;  %v6919_v37 = vpack.c.bf16 %v5223_v28, %v5223_v28  ;;  %v7425_v36 = vadd.f32 %v7392_v45, %v9929_v47 }
 0x226   : > { %v7426_v8 = vadd.f32 %v4723_v41, %v9933_v33  ;;  %v5596_v53 = vshrl.u32 %v10072_v62, 16  ;;  %vm4884_vm11 = vcmp.ge.f32.partialorder %v10075_v54, 0.0  ;;  %v4916_v17 = vmul.f32 0.05, %v10075_v54 }
 0x227   : > { %v10088_v19 = vadd.f32 %v7424_v27, %v9942_v44  ;;  %v5576_v39 = vor.u32 %v5574_v50, %v10080_v16  ;;  %v5579_v43 = vshrl.u32 %v6919_v37, 16  ;;  %v10094_v47 = vadd.f32 %v7425_v36, %v9942_v44 }
 0x228   : > { %v7395_v12 = vpop.f32.mrb[16].mxu0  ;;  %v5598_v48 = vrot.slane %v5596_v53, 7  ;;  %v4948_v58 = vsel %vm4884_vm11, %v10075_v54, %v4916_v17  ;;  %vm5164_vm13 = vcmp.ge.f32.partialorder %v10061_v60, 0.0  ;;  %v5196_v13 = vmul.f32 0.05, %v10061_v60 }
 0x229   : > { %v10090_v56 = vpop.f32.mrb[17].mxu0  ;;  %vm4882_vm12 = vcmp.ge.f32.partialorder %v10088_v19, 0.0  ;;  %v4914_v42 = vmul.f32 0.05, %v10088_v19  ;;  %5842 = vrot.lane.b32.xlu0 %v5576_v39, %s7911_s29  ;;  %v5581_v31 = vrot.slane %v5579_v43, 7  ;;  %v6900_v45 = vpack.c.bf16 %v4948_v58, %v4948_v58 }
 0x22a   : > { %v10098_v63 = vpop.f32.mrb[18].mxu0  ;;  %v5603_v21 = vrot.slane %v5598_v48, 4  ;;  %vm4885_vm14 = vcmp.ge.f32.partialorder %v10094_v47, 0.0  ;;  %v4917_v1 = vmul.f32 0.05, %v10094_v47  ;;  %v7875_v52 = vadd.low.f32.bf16 %v9982_v46, %v9906_v14 }
 0x22b   : > { %v7259_v61 = vpop.f32.mrb[16].mxu1  ;;  %v10105_v26 = vpop.f32.mrb[19].mxu0  ;;  %v4946_v41 = vsel %vm4882_vm12, %v10088_v19, %v4914_v42  ;;  %v7876_v24 = vadd.high.f32.bf16 %v9988_v59, %v9918_v7  ;;  %v5586_v25 = vrot.slane %v5581_v31, 4  ;;  %5397 = vst.msk [vmem:[%s9960_s28 + $0x38] sm:$0xf] %vm5382_vm7, %v6900_v45  ;;  %v10123_v35 = vadd.high.f32.bf16 %v10004_v3, %v9906_v14 }
 0x22c   : > { %v10096_v33 = vpop.f32.mrb[17].mxu1  ;;  %v6898_v11 = vpack.c.bf16 %v4946_v41, %v4946_v41  ;;  %5852 = vrot.lane.b32.xlu1 %v5603_v21, %s7911_s29  ;;  %v4949_v55 = vsel %vm4885_vm14, %v10094_v47, %v4917_v1  ;;  %v5582_v34 = vshll.u32 %v6919_v37, 16  ;;  %v10128_v50 = vadd.f32 %v7426_v8, %v9942_v44 }
 0x22d   : > { %v10103_v6 = vpop.f32.mrb[18].mxu1  ;;  %v10132_v7 = vadd.low.f32.bf16 %v10025_v30, %v9925_v38  ;;  %5846 = vrot.lane.b32.xlu0 %v5586_v25, %s7911_s29  ;;  %v6901_v46 = vpack.c.bf16 %v4949_v55, %v4949_v55  ;;  %v5599_v59 = vshll.u32 %v10072_v62, 16  ;;  %v5228_v3 = vsel %vm5164_vm13, %v10061_v60, %v5196_v13 }
 0x22e   : > { %v10110_v57 = vpop.f32.mrb[19].mxu1  ;;  %5395 = vst.msk [vmem:[%s9960_s28 + $0x30] sm:$0xf] %vm5382_vm7, %v6898_v11  ;;  %v10151_v30 = vadd.high.f32.bf16 %v10031_v2, %v9925_v38  ;;  %v5577_v28 = vrot.slane %v10080_v16, 4  ;;  %v5584_v27 = vor.u32 %v5582_v34, %v5581_v31  ;;  %vm4883_vm0 = vcmp.ge.f32.partialorder %v10128_v50, 0.0 }
 0x22f   : > { %5398 = vst.msk [vmem:[%s9960_s28 + $0x3c] sm:$0xf] %vm5382_vm7, %v6901_v46  ;;  %v4915_v62 = vmul.f32 0.05, %v10128_v50  ;;  %v5594_v60 = vrot.slane %v10019_v32, 4  ;;  %v5601_v8 = vor.u32 %v5599_v59, %v5598_v48  ;;  %v6924_v53 = vpack.c.bf16 %v5228_v3, %v5228_v3 }
 0x230   : > { %v10147_v9 = vpop.f32.mrb[20].mxu0  ;;  %v5585_v2 = vsel %vm10139_vm15, %v5577_v28, %v5584_v27  ;;  %vm5162_vm1 = vcmp.ge.f32.partialorder %v7875_v52, 0.0  ;;  %v5194_v16 = vmul.f32 0.05, %v7875_v52  ;;  %v7427_v39 = vadd.f32 %v7395_v12, %v7259_v61 }
 0x231   : > { %v10157_v36 = vpop.f32.mrb[21].mxu0  ;;  %5844 = vrot.lane.b32.xlu1 %v5585_v2, %s7911_s29  ;;  %v4947_v32 = vsel %vm4883_vm0, %v10128_v50, %v4915_v62  ;;  %v5602_v48 = vsel %vm10139_vm15, %v5594_v60, %v5601_v8  ;;  %v5622_v42 = vshrl.u32 %v6924_v53, 16  ;;  %v5625_v13 = vshll.u32 %v6924_v53, 16 }
 0x232   : > { %v10165_v38 = vpop.f32.mrb[22].mxu0  ;;  %v6899_v45 = vpack.c.bf16 %v4947_v32, %v4947_v32  ;;  %5850 = vrot.lane.b32.xlu0 %v5602_v48, %s7911_s29  ;;  %v5226_v12 = vsel %vm5162_vm1, %v7875_v52, %v5194_v16  ;;  %v10183_v61 = vadd.f32 %v7427_v39, %v9942_v44  ;;  %v7428_v21 = vadd.f32 %v10090_v56, %v10096_v33 }
 0x233   : > { %v10155_v37 = vpop.f32.mrb[20].mxu1  ;;  %v10171_v58 = vpop.f32.mrb[23].mxu0  ;;  %v10187_v41 = vrot.slane %v5622_v42, 7  ;;  %v6922_v1 = vpack.c.bf16 %v5226_v12, %v5226_v12  ;;  %vm5165_vm2 = vcmp.ge.f32.partialorder %v7876_v24, 0.0  ;;  %v5197_v25 = vmul.f32 0.05, %v7876_v24 }
 0x234   : > { %v10163_v17 = vpop.f32.mrb[21].mxu1  ;;  %v10191_v11 = vadd.low.f32.bf16 %v10028_v40, %v9931_v22  ;;  %5396 = vst.msk [vmem:[%s9960_s28 + $0x34] sm:$0xf] %vm5382_vm7, %v6899_v45  ;;  %vm4888_vm3 = vcmp.ge.f32.partialorder %v10183_v61, 0.0  ;;  %v4920_v52 = vmul.f32 0.05, %v10183_v61  ;;  %v10198_v55 = vadd.f32 %v7428_v21, %v9942_v44 }
 0x235   : > { %v10169_v43 = vpop.f32.mrb[22].mxu1  ;;  %v10201_v56 = vmul.f32 0.05, %v10132_v7  ;;  %v5627_v33 = vor.u32 %v5625_v13, %v10187_v41  ;;  %v5605_v34 = vshrl.u32 %v6922_v1, 16  ;;  %v5229_v46 = vsel %vm5165_vm2, %v7876_v24, %v5197_v25 }
 0x236   : > { %v10179_v31 = vpop.f32.mrb[23].mxu1  ;;  %vm5168_vm4 = vcmp.ge.f32.partialorder %v10132_v7, 0.0  ;;  %v4952_v40 = vsel %vm4888_vm3, %v10183_v61, %v4920_v52  ;;  %vm4886_vm5 = vcmp.ge.f32.partialorder %v10198_v55, 0.0  ;;  %v4918_v3 = vmul.f32 0.05, %v10198_v55 }
 0x237   : > { %5860 = vrot.lane.b32.xlu1 %v5627_v33, %s7911_s29  ;;  %v10215_v62 = vrot.slane %v5605_v34, 7  ;;  %v5608_v24 = vshll.u32 %v6922_v1, 16  ;;  %v6904_v60 = vpack.c.bf16 %v4952_v40, %v4952_v40  ;;  %v6925_v8 = vpack.c.bf16 %v5229_v46, %v5229_v46 }
 0x238   : > { %v10204_v59 = vpop.f32.mrb[24].mxu0  ;;  %vm5166_vm6 = vcmp.ge.f32.partialorder %v10191_v11, 0.0  ;;  %v4950_v16 = vsel %vm4886_vm5, %v10198_v55, %v4918_v3  ;;  %v7429_v39 = vadd.f32 %v10098_v63, %v10103_v6  ;;  %vm5163_vm8 = vcmp.ge.f32.partialorder %v10123_v35, 0.0 }
 0x239   : > { %v10212_v27 = vpop.f32.mrb[25].mxu0  ;;  %v5610_v42 = vor.u32 %v5608_v24, %v10215_v62  ;;  %5401 = vst.msk [vmem:[%s9960_s28 + $0x48] sm:$0xf] %vm5382_vm7, %v6904_v60  ;;  %v6902_v13 = vpack.c.bf16 %v4950_v16, %v4950_v16  ;;  %v5630_v45 = vshrl.u32 %v6925_v8, 16  ;;  %v5195_v12 = vmul.f32 0.05, %v10123_v35 }
 0x23a   : > { %v10219_v2 = vpop.f32.mrb[26].mxu0  ;;  %v5198_v1 = vmul.f32 0.05, %v10191_v11  ;;  %v10239_v63 = vadd.high.f32.bf16 %v10037_v49, %v9931_v22  ;;  %v10242_v6 = vadd.f32 %v7429_v39, %v9942_v44  ;;  %v7430_v25 = vadd.f32 %v10105_v26, %v10110_v57 }
 0x23b   : > { %v10210_v28 = vpop.f32.mrb[24].mxu1  ;;  %v10228_v48 = vpop.f32.mrb[27].mxu0  ;;  %v10248_v52 = vadd.low.f32.bf16 %v10075_v54, %v9935_v29  ;;  %v10252_v33 = vadd.low.f32.bf16 %v10088_v19, %v9937_v0  ;;  %5854 = vrot.lane.b32.xlu0 %v5610_v42, %s7911_s29  ;;  %5399 = vst.msk [vmem:[%s9960_s28 + $0x40] sm:$0xf] %vm5382_vm7, %v6902_v13  ;;  %v5632_v22 = vrot.slane %v5630_v45, 7  ;;  %v5227_v49 = vsel %vm5163_vm8, %v10123_v35, %v5195_v12 }
 0x23c   : > { %v10217_v53 = vpop.f32.mrb[25].mxu1  ;;  %vm4889_vm10 = vcmp.ge.f32.partialorder %v10242_v6, 0.0  ;;  %v4921_v26 = vmul.f32 0.05, %v10242_v6  ;;  %v6923_v57 = vpack.c.bf16 %v5227_v49, %v5227_v49  ;;  %v5611_v54 = vrot.slane %v10215_v62, 4 }
 0x23d   : > { %v10226_v32 = vpop.f32.mrb[26].mxu1  ;;  %v5637_v34 = vrot.slane %v5632_v22, 4  ;;  %v10264_v19 = vadd.f32 %v7430_v25, %v9942_v44  ;;  %v5628_v46 = vrot.slane %v10187_v41, 4  ;;  %v7431_v40 = vadd.f32 %v10147_v9, %v10155_v37 }
 0x23e   : > { %v10234_v21 = vpop.f32.mrb[27].mxu1  ;;  %v4953_v35 = vsel %vm4889_vm10, %v10242_v6, %v4921_v26  ;;  %v5613_v24 = vshrl.u32 %v6923_v57, 16  ;;  %v5633_v60 = vshll.u32 %v6925_v8, 16  ;;  %v7432_v16 = vadd.f32 %v10157_v36, %v10163_v17 }
 0x23f   : > { %5864 = vrot.lane.b32.xlu1 %v5637_v34, %s7911_s29  ;;  %v6905_v41 = vpack.c.bf16 %v4953_v35, %v4953_v35  ;;  %vm4887_vm11 = vcmp.ge.f32.partialorder %v10264_v19, 0.0  ;;  %v4919_v9 = vmul.f32 0.05, %v10264_v19  ;;  %v5616_v37 = vshll.u32 %v6923_v57, 16 }
 0x240   : > { %v10269_v3 = vpop.f32.mrb[28].mxu0  ;;  %v5615_v8 = vrot.slane %v5613_v24, 7  ;;  %v5635_v45 = vor.u32 %v5633_v60, %v5632_v22  ;;  %v10286_v36 = vadd.f32 %v7431_v40, %v9942_v44  ;;  %v10289_v17 = vadd.f32 %v7432_v16, %v9942_v44 }
 0x241   : > { %v10276_v39 = vpop.f32.mrb[29].mxu0  ;;  %5402 = vst.msk [vmem:[%s9960_s28 + $0x4c] sm:$0xf] %vm5382_vm7, %v6905_v41  ;;  %v4951_v49 = vsel %vm4887_vm11, %v10264_v19, %v4919_v9  ;;  %v5232_v22 = vsel %vm5168_vm4, %v10132_v7, %v10201_v56  ;;  %v7433_v26 = vadd.f32 %v10165_v38, %v10169_v43  ;;  %v5230_v57 = vsel %vm5166_vm6, %v10191_v11, %v5198_v1 }
 0x242   : > { %v10283_v13 = vpop.f32.mrb[30].mxu0  ;;  %v5620_v40 = vrot.slane %v5615_v8, 4  ;;  %v6903_v35 = vpack.c.bf16 %v4951_v49, %v4951_v49  ;;  %v5618_v24 = vor.u32 %v5616_v37, %v5615_v8  ;;  %v5636_v60 = vsel %vm10139_vm15, %v5628_v46, %v5635_v45 }
 0x243   : > { %v10274_v62 = vpop.f32.mrb[28].mxu1  ;;  %v10293_v25 = vpop.f32.mrb[31].mxu0  ;;  %vm4892_vm12 = vcmp.ge.f32.partialorder %v10286_v36, 0.0  ;;  %v4924_v16 = vmul.f32 0.05, %v10286_v36  ;;  %vm4890_vm13 = vcmp.ge.f32.partialorder %v10289_v17, 0.0  ;;  %v10317_v38 = vadd.low.f32.bf16 %v10183_v61, %v9944_v5 }
 0x244   : > { %v10281_v42 = vpop.f32.mrb[29].mxu1  ;;  %v4922_v7 = vmul.f32 0.05, %v10289_v17  ;;  %5858 = vrot.lane.b32.xlu0 %v5620_v40, %s7911_s29  ;;  %5400 = vst.msk [vmem:[%s9960_s28 + $0x44] sm:$0xf] %vm5382_vm7, %v6903_v35  ;;  %v5619_v43 = vsel %vm10139_vm15, %v5611_v54, %v5618_v24  ;;  %v6928_v11 = vpack.c.bf16 %v5232_v22, %v5232_v22  ;;  %v10325_v56 = vadd.f32 %v7433_v26, %v9942_v44 }
 0x245   : > { %v10291_v12 = vpop.f32.mrb[30].mxu1  ;;  %v10328_v1 = vmul.f32 0.05, %v10248_v52  ;;  %5856 = vrot.lane.b32.xlu1 %v5619_v43, %s7911_s29  ;;  %v4956_v61 = vsel %vm4892_vm12, %v10286_v36, %v4924_v16  ;;  %v6926_v41 = vpack.c.bf16 %v5230_v57, %v5230_v57  ;;  %v10335_v9 = vadd.high.f32.bf16 %v10094_v47, %v9935_v29 }
 0x246   : > { %v10307_v34 = vpop.f32.mrb[31].mxu1  ;;  %v4954_v46 = vsel %vm4890_vm13, %v10289_v17, %v4922_v7  ;;  %v10338_v54 = vmul.f32 0.05, %v10252_v33  ;;  %v6908_v37 = vpack.c.bf16 %v4956_v61, %v4956_v61  ;;  %v10342_v45 = vadd.high.f32.bf16 %v10128_v50, %v9937_v0 }
 0x247   : > { %v6906_v8 = vpack.c.bf16 %v4954_v46, %v4954_v46  ;;  %v5656_v49 = vshrl.u32 %v6928_v11, 16  ;;  %vm4893_vm14 = vcmp.ge.f32.partialorder %v10325_v56, 0.0  ;;  %v4925_v22 = vmul.f32 0.05, %v10325_v56 }
 0x248   : > { %v10347_v26 = vmul.f32 0.05, %v10317_v38  ;;  %v10351_v29 = vadd.low.f32.bf16 %v10198_v55, %v9952_v18  ;;  %5862 = vrot.lane.b32.xlu0 %v5636_v60, %s7911_s29  ;;  %5405 = vst.msk [vmem:[%s9960_s28 + $0x58] sm:$0xf] %vm5382_vm7, %v6908_v37  ;;  %v5659_v0 = vshll.u32 %v6928_v11, 16  ;;  %v5639_v47 = vshrl.u32 %v6926_v41, 16 }
 0x249   : > { %5403 = vst.msk [vmem:[%s9960_s28 + $0x50] sm:$0xf] %vm5382_vm7, %v6906_v8  ;;  %v10358_v50 = vrot.slane %v5656_v49, 7  ;;  %v4957_v57 = vsel %vm4893_vm14, %v10325_v56, %v4925_v22  ;;  %v5642_v40 = vshll.u32 %v6926_v41, 16  ;;  %v7434_v35 = vadd.f32 %v10171_v58, %v10179_v31 }
 0x24a   : > { %v6909_v24 = vpack.c.bf16 %v4957_v57, %v4957_v57  ;;  %v5641_v55 = vrot.slane %v5639_v47, 7  ;;  %vm5169_vm0 = vcmp.ge.f32.partialorder %v10151_v30, 0.0  ;;  %v5201_v60 = vmul.f32 0.05, %v10151_v30 }
 0x24b   : > { %v5661_v16 = vor.u32 %v5659_v0, %v10358_v50  ;;  %v10367_v7 = vadd.f32 %v7434_v35, %v9942_v44  ;;  %vm5167_vm1 = vcmp.ge.f32.partialorder %v10239_v63, 0.0  ;;  %v5199_v43 = vmul.f32 0.05, %v10239_v63 }
 0x24c   : > { %5406 = vst.msk [vmem:[%s9960_s28 + $0x5c] sm:$0xf] %vm5382_vm7, %v6909_v24  ;;  %v5644_v11 = vor.u32 %v5642_v40, %v5641_v55  ;;  %v5233_v58 = vsel %vm5169_vm0, %v10151_v30, %v5201_v60  ;;  %v7435_v31 = vadd.f32 %v10204_v59, %v10210_v28  ;;  %v7436_v61 = vadd.f32 %v10212_v27, %v10217_v53 }
 0x24d   : > { %vm5172_vm2 = vcmp.ge.f32.partialorder %v10248_v52, 0.0  ;;  %v10380_v46 = vmul.f32 0.05, %v10351_v29  ;;  %5872 = vrot.lane.b32.xlu1 %v5661_v16, %s7911_s29  ;;  %vm4891_vm3 = vcmp.ge.f32.partialorder %v10367_v7, 0.0  ;;  %v4923_v41 = vmul.f32 0.05, %v10367_v7 }
 0x24e   : > { %v6929_v37 = vpack.c.bf16 %v5233_v58, %v5233_v58  ;;  %v10387_v30 = vadd.low.f32.bf16 %v10286_v36, %v9964_v15  ;;  %5866 = vrot.lane.b32.xlu0 %v5644_v11, %s7911_s29  ;;  %v5231_v59 = vsel %vm5167_vm1, %v10239_v63, %v5199_v43  ;;  %v4864_v28 = vadd.f32 %v7435_v31, %v9942_v44 }
 0x24f   : > { %v10393_v27 = vadd.f32 %v7436_v61, %v9942_v44  ;;  %v4955_v53 = vsel %vm4891_vm3, %v10367_v7, %v4923_v41  ;;  %v6927_v49 = vpack.c.bf16 %v5231_v59, %v5231_v59  ;;  %v7437_v22 = vadd.f32 %v10219_v2, %v10226_v32 }
 0x250   : > { %v5664_v8 = vshrl.u32 %v6929_v37, 16  ;;  %v6907_v0 = vpack.c.bf16 %v4955_v53, %v4955_v53  ;;  %vm4896_vm4 = vcmp.ge.f32.partialorder %v4864_v28, 0.0  ;;  %v4928_v36 = vmul.f32 0.05, %v4864_v28 }
 0x251   : > { %vm4894_vm5 = vcmp.ge.f32.partialorder %v10393_v27, 0.0  ;;  %v10401_v63 = vadd.high.f32.bf16 %v10242_v6, %v9944_v5  ;;  %v5647_v57 = vshrl.u32 %v6927_v49, 16  ;;  %v4926_v40 = vmul.f32 0.05, %v10393_v27 }
 0x252   : > { %v5666_v47 = vrot.slane %v5664_v8, 7  ;;  %v10406_v35 = vadd.low.f32.bf16 %v10289_v17, %v9972_v23  ;;  %5404 = vst.msk [vmem:[%s9960_s28 + $0x54] sm:$0xf] %vm5382_vm7, %v6907_v0  ;;  %v4960_v2 = vsel %vm4896_vm4, %v4864_v28, %v4928_v36  ;;  %v5650_v32 = vshll.u32 %v6927_v49, 16 }
 0x253   : > { %v10411_v24 = vadd.f32 %v7437_v22, %v9942_v44  ;;  %v5649_v5 = vrot.slane %v5647_v57, 7  ;;  %v6912_v6 = vpack.c.bf16 %v4960_v2, %v4960_v2  ;;  %v4958_v16 = vsel %vm4894_vm5, %v10393_v27, %v4926_v40 }
 0x254   : > { %v5671_v60 = vrot.slane %v5666_v47, 4  ;;  %v10416_v43 = vadd.high.f32.bf16 %v10264_v19, %v9952_v18  ;;  %v10419_v17 = vmul.f32 0.05, %v10387_v30  ;;  %v6910_v11 = vpack.c.bf16 %v4958_v16, %v4958_v16 }
 0x255   : > { %vm4897_vm6 = vcmp.ge.f32.partialorder %v10411_v24, 0.0  ;;  %v5654_v58 = vrot.slane %v5649_v5, 4  ;;  %5409 = vst.msk [vmem:[%s9960_s28 + $0x68] sm:$0xf] %vm5382_vm7, %v6912_v6  ;;  %v5645_v31 = vrot.slane %v5641_v55, 4  ;;  %v5652_v61 = vor.u32 %v5650_v32, %v5649_v5 }
 0x256   : > { %5876 = vrot.lane.b32.xlu1 %v5671_v60, %s7911_s29  ;;  %v4929_v41 = vmul.f32 0.05, %v10411_v24  ;;  %v10428_v59 = vadd.high.f32.bf16 %v10325_v56, %v9964_v15  ;;  %v10431_v18 = vmul.f32 0.05, %v10406_v35  ;;  %5407 = vst.msk [vmem:[%s9960_s28 + $0x60] sm:$0xf] %vm5382_vm7, %v6910_v11  ;;  %v7438_v15 = vadd.f32 %v10228_v48, %v10234_v21 }
 0x257   : > { %v5662_v19 = vrot.slane %v10358_v50, 4  ;;  %v5667_v53 = vshll.u32 %v6929_v37, 16  ;;  %5870 = vrot.lane.b32.xlu0 %v5654_v58, %s7911_s29  ;;  %v5653_v55 = vsel %vm10139_vm15, %v5645_v31, %v5652_v61  ;;  %vm5173_vm8 = vcmp.ge.f32.partialorder %v10335_v9, 0.0 }
 0x258   : > { %v4961_v8 = vsel %vm4897_vm6, %v10411_v24, %v4929_v41  ;;  %vm5170_vm10 = vcmp.ge.f32.partialorder %v10252_v33, 0.0  ;;  %v5205_v50 = vmul.f32 0.05, %v10335_v9  ;;  %v5236_v37 = vsel %vm5172_vm2, %v10248_v52, %v10328_v1 }
 0x259   : > { %v6913_v56 = vpack.c.bf16 %v4961_v8, %v4961_v8  ;;  %v5669_v49 = vor.u32 %v5667_v53, %v5666_v47  ;;  %v4863_v22 = vadd.f32 %v7438_v15, %v9942_v44  ;;  %v6932_v0 = vpack.c.bf16 %v5236_v37, %v5236_v37 }
 0x25a   : > { %5868 = vrot.lane.b32.xlu1 %v5653_v55, %s7911_s29  ;;  %v7439_v48 = vadd.f32 %v10269_v3, %v10274_v62  ;;  %v7440_v21 = vadd.f32 %v10276_v39, %v10281_v42  ;;  %v5237_v47 = vsel %vm5173_vm8, %v10335_v9, %v5205_v50  ;;  %vm5171_vm11 = vcmp.ge.f32.partialorder %v10342_v45, 0.0 }
 0x25b   : > { %5410 = vst.msk [vmem:[%s9960_s28 + $0x6c] sm:$0xf] %vm5382_vm7, %v6913_v56  ;;  %v5670_v36 = vsel %vm10139_vm15, %v5662_v19, %v5669_v49  ;;  %v5203_v52 = vmul.f32 0.05, %v10342_v45  ;;  %v10463_v1 = vadd.low.f32.bf16 %v4864_v28, %v9996_v10  ;;  %vm4895_vm12 = vcmp.ge.f32.partialorder %v4863_v22, 0.0 }
 0x25c   : > { %5874 = vrot.lane.b32.xlu0 %v5670_v36, %s7911_s29  ;;  %v4927_v3 = vmul.f32 0.05, %v4863_v22  ;;  %v6933_v62 = vpack.c.bf16 %v5237_v47, %v5237_v47  ;;  %v5690_v39 = vshrl.u32 %v6932_v0, 16  ;;  %v5693_v42 = vshll.u32 %v6932_v0, 16 }
 0x25d   : > { %v4868_v57 = vadd.f32 %v7439_v48, %v9942_v44  ;;  %v10468_v40 = vadd.f32 %v7440_v21, %v9942_v44  ;;  %vm5176_vm13 = vcmp.ge.f32.partialorder %v10317_v38, 0.0  ;;  %v5235_v28 = vsel %vm5171_vm11, %v10342_v45, %v5203_v52 }
 0x25e   : > { %v4959_v9 = vsel %vm4895_vm12, %v4863_v22, %v4927_v3  ;;  %v5698_v2 = vshrl.u32 %v6933_v62, 16  ;;  %v7441_v32 = vadd.f32 %v10283_v13, %v10291_v12  ;;  %v5692_v5 = vrot.slane %v5690_v39, 7 }
 0x25f   : > { %v6911_v60 = vpack.c.bf16 %v4959_v9, %v4959_v9  ;;  %vm4900_vm14 = vcmp.ge.f32.partialorder %v4868_v57, 0.0  ;;  %v4932_v6 = vmul.f32 0.05, %v4868_v57  ;;  %v10476_v16 = vadd.low.f32.bf16 %v10393_v27, %v10006_v20 }
 0x260   : > { %v5700_v11 = vrot.slane %v5698_v2, 7  ;;  %vm4898_vm0 = vcmp.ge.f32.partialorder %v10468_v40, 0.0  ;;  %v4930_v58 = vmul.f32 0.05, %v10468_v40  ;;  %v5695_v31 = vor.u32 %v5693_v42, %v5692_v5 }
 0x261   : > { %5408 = vst.msk [vmem:[%s9960_s28 + $0x64] sm:$0xf] %vm5382_vm7, %v6911_v60  ;;  %v4964_v45 = vsel %vm4900_vm14, %v4868_v57, %v4932_v6  ;;  %v6931_v61 = vpack.c.bf16 %v5235_v28, %v5235_v28  ;;  %v10483_v13 = vadd.f32 %v7441_v32, %v9942_v44  ;;  %vm5174_vm1 = vcmp.ge.f32.partialorder %v10351_v29, 0.0 }
 0x262   : > { %v5705_v12 = vrot.slane %v5700_v11, 4  ;;  %v6916_v41 = vpack.c.bf16 %v4964_v45, %v4964_v45  ;;  %v4962_v27 = vsel %vm4898_vm0, %v10468_v40, %v4930_v58  ;;  %v10488_v19 = vadd.low.f32.bf16 %v4868_v57, %v10045_v51  ;;  %5884 = vrot.lane.b32.xlu0 %v5695_v31, %s7911_s29 }
 0x263   : > { %v10492_v53 = vadd.high.f32.bf16 %v10367_v7, %v9972_v23  ;;  %v6914_v55 = vpack.c.bf16 %v4962_v27, %v4962_v27  ;;  %v5681_v8 = vshrl.u32 %v6931_v61, 16  ;;  %vm4901_vm2 = vcmp.ge.f32.partialorder %v10483_v13, 0.0 }
 0x264   : > { %v10497_v15 = vmul.f32 0.05, %v10463_v1  ;;  %v10501_v56 = vadd.high.f32.bf16 %v10411_v24, %v9996_v10  ;;  %5888 = vrot.lane.b32.xlu1 %v5705_v12, %s7911_s29  ;;  %5413 = vst.msk [vmem:[%s9960_s28 + $0x78] sm:$0xf] %vm5382_vm7, %v6916_v41  ;;  %v4933_v23 = vmul.f32 0.05, %v10483_v13  ;;  %v5234_v7 = vsel %vm5170_vm10, %v10252_v33, %v10338_v54 }
 0x265   : > { %vm5180_vm3 = vcmp.ge.f32.partialorder %v10387_v30, 0.0  ;;  %v10513_v49 = vmul.f32 0.05, %v10476_v16  ;;  %5411 = vst.msk [vmem:[%s9960_s28 + $0x70] sm:$0xf] %vm5382_vm7, %v6914_v55  ;;  %v5683_v10 = vrot.slane %v5681_v8, 7  ;;  %v6930_v24 = vpack.c.bf16 %v5234_v7, %v5234_v7 }
 0x266   : > { %v7442_v50 = vadd.f32 %v10293_v25, %v10307_v34  ;;  %v10520_v37 = vadd.high.f32.bf16 %v4863_v22, %v10006_v20  ;;  %v10523_v0 = vmul.f32 0.05, %v10488_v19  ;;  %v4965_v33 = vsel %vm4901_vm2, %v10483_v13, %v4933_v23 }
 0x267   : > { %v5701_v54 = vshll.u32 %v6933_v62, 16  ;;  %v5688_v48 = vrot.slane %v5683_v10, 4  ;;  %v6917_v21 = vpack.c.bf16 %v4965_v33, %v4965_v33  ;;  %v5673_v36 = vshrl.u32 %v6930_v24, 16 }
 0x268   : > { %v5696_v47 = vrot.slane %v5692_v5, 4  ;;  %v5676_v52 = vshll.u32 %v6930_v24, 16  ;;  %v10527_v3 = vadd.f32 %v7442_v50, %v9942_v44  ;;  %vm5177_vm4 = vcmp.ge.f32.partialorder %v10401_v63, 0.0 }
 0x269   : > { %v5703_v39 = vor.u32 %v5701_v54, %v5700_v11  ;;  %vm5178_vm5 = vcmp.ge.f32.partialorder %v10406_v35, 0.0  ;;  %5882 = vrot.lane.b32.xlu1 %v5688_v48, %s7911_s29  ;;  %5414 = vst.msk [vmem:[%s9960_s28 + $0x7c] sm:$0xf] %vm5382_vm7, %v6917_v21  ;;  %v5675_v20 = vrot.slane %v5673_v36, 7  ;;  %v5684_v25 = vshll.u32 %v6931_v61, 16 }
 0x26a   : > { %v5209_v34 = vmul.f32 0.05, %v10401_v63  ;;  %v5240_v22 = vsel %vm5176_vm13, %v10317_v38, %v10347_v26  ;;  %vm4899_vm6 = vcmp.ge.f32.partialorder %v10527_v3, 0.0  ;;  %v4931_v44 = vmul.f32 0.05, %v10527_v3 }
 0x26b   : > { %v5704_v62 = vsel %vm10139_vm15, %v5696_v47, %v5703_v39  ;;  %vm5175_vm8 = vcmp.ge.f32.partialorder %v10416_v43, 0.0  ;;  %v5678_v42 = vor.u32 %v5676_v52, %v5675_v20  ;;  %v5679_v57 = vrot.slane %v5675_v20, 4 }
 0x26c   : > { %v5686_v9 = vor.u32 %v5684_v25, %v5683_v10  ;;  %v5241_v2 = vsel %vm5177_vm4, %v10401_v63, %v5209_v34  ;;  %v4963_v28 = vsel %vm4899_vm6, %v10527_v3, %v4931_v44  ;;  %v6936_v60 = vpack.c.bf16 %v5240_v22, %v5240_v22 }
 0x26d   : > { %v6937_v32 = vpack.c.bf16 %v5241_v2, %v5241_v2  ;;  %v5207_v38 = vmul.f32 0.05, %v10416_v43  ;;  %5878 = vrot.lane.b32.xlu0 %v5678_v42, %s7911_s29  ;;  %v6915_v26 = vpack.c.bf16 %v4963_v28, %v4963_v28  ;;  %5886 = vrot.lane.b32.xlu1 %v5704_v62, %s7911_s29  ;;  %v5238_v6 = vsel %vm5174_vm1, %v10351_v29, %v10380_v46 }
 0x26e   : > { %v5687_v5 = vsel %vm10139_vm15, %v5679_v57, %v5686_v9  ;;  %vm5181_vm10 = vcmp.ge.f32.partialorder %v10428_v59, 0.0  ;;  %v5724_v11 = vshrl.u32 %v6936_v60, 16  ;;  %v5727_v58 = vshll.u32 %v6936_v60, 16 }
 0x26f   : > { %v5732_v63 = vshrl.u32 %v6937_v32, 16  ;;  %v5239_v31 = vsel %vm5175_vm8, %v10416_v43, %v5207_v38  ;;  %5412 = vst.msk [vmem:[%s9960_s28 + $0x74] sm:$0xf] %vm5382_vm7, %v6915_v26  ;;  %v6934_v61 = vpack.c.bf16 %v5238_v6, %v5238_v6  ;;  %v5735_v12 = vshll.u32 %v6937_v32, 16 }
 0x270   : > { %v6935_v45 = vpack.c.bf16 %v5239_v31, %v5239_v31  ;;  %v5213_v41 = vmul.f32 0.05, %v10428_v59  ;;  %vm5184_vm11 = vcmp.ge.f32.partialorder %v10463_v1, 0.0  ;;  %v5726_v29 = vrot.slane %v5724_v11, 7 }
 0x271   : > { %v5734_v27 = vrot.slane %v5732_v63, 7  ;;  %v5244_v46 = vsel %vm5180_vm3, %v10387_v30, %v10419_v17  ;;  %vm5179_vm12 = vcmp.ge.f32.partialorder %v10492_v53, 0.0  ;;  %5880 = vrot.lane.b32.xlu0 %v5687_v5, %s7911_s29  ;;  %v5707_v55 = vshrl.u32 %v6934_v61, 16 }
 0x272   : > { %v5715_v43 = vshrl.u32 %v6935_v45, 16  ;;  %v5710_v8 = vshll.u32 %v6934_v61, 16  ;;  %v5718_v23 = vshll.u32 %v6935_v45, 16  ;;  %v5729_v10 = vor.u32 %v5727_v58, %v5726_v29 }
 0x273   : > { %v5739_v7 = vrot.slane %v5734_v27, 4  ;;  %v5730_v24 = vrot.slane %v5726_v29, 4  ;;  %v5737_v50 = vor.u32 %v5735_v12, %v5734_v27  ;;  %v5709_v54 = vrot.slane %v5707_v55, 7 }
 0x274   : > { %v5717_v33 = vrot.slane %v5715_v43, 7  ;;  %v5245_v48 = vsel %vm5181_vm10, %v10428_v59, %v5213_v41  ;;  %v6940_v21 = vpack.c.bf16 %v5244_v46, %v5244_v46  ;;  %vm5182_vm7 = vcmp.ge.f32.partialorder %v10476_v16, 0.0 }
 0x275   : > { %5900 = vrot.lane.b32.xlu1 %v5739_v7, %s7911_s29  ;;  %v5738_v30 = vsel %vm10139_vm15, %v5730_v24, %v5737_v50  ;;  %v6941_v17 = vpack.c.bf16 %v5245_v48, %v5245_v48  ;;  %v5211_v36 = vmul.f32 0.05, %v10492_v53  ;;  %v5242_v47 = vsel %vm5178_vm5, %v10406_v35, %v10431_v18  ;;  %5896 = vrot.lane.b32.xlu0 %v5729_v10, %s7911_s29 }
 0x276   : > { %v10583_v52 = vadd.low.f32.bf16 %v10468_v40, %v10055_v4  ;;  %v5722_v59 = vrot.slane %v5717_v33, 4  ;;  %v5713_v39 = vrot.slane %v5709_v54, 4  ;;  %v5720_v20 = vor.u32 %v5718_v23, %v5717_v33 }
 0x277   : > { %vm5188_vm13 = vcmp.ge.f32.partialorder %v10488_v19, 0.0  ;;  %v5712_v25 = vor.u32 %v5710_v8, %v5709_v54  ;;  %v5766_v34 = vshrl.u32 %v6941_v17, 16  ;;  %v5758_v22 = vshrl.u32 %v6940_v21, 16 }
 0x278   : > { %v5243_v44 = vsel %vm5179_vm12, %v10492_v53, %v5211_v36  ;;  %v5721_v35 = vsel %vm10139_vm15, %v5713_v39, %v5720_v20  ;;  %v6938_v40 = vpack.c.bf16 %v5242_v47, %v5242_v47  ;;  %v5769_v62 = vshll.u32 %v6941_v17, 16 }
 0x279   : > { %v6939_v18 = vpack.c.bf16 %v5243_v44, %v5243_v44  ;;  %5894 = vrot.lane.b32.xlu1 %v5722_v59, %s7911_s29  ;;  %v5768_v42 = vrot.slane %v5766_v34, 7  ;;  %v5760_v57 = vrot.slane %v5758_v22, 7  ;;  %vm5185_vm14 = vcmp.ge.f32.partialorder %v10501_v56, 0.0  ;;  %5890 = vrot.lane.b32.xlu0 %v5712_v25, %s7911_s29 }
 0x27a   : > { %v5217_v9 = vmul.f32 0.05, %v10501_v56  ;;  %v7900_v2 = vadd.high.f32.bf16 %v10483_v13, %v10045_v51  ;;  %v5218_v28 = vmul.f32 0.05, %v10583_v52  ;;  %v5741_v32 = vshrl.u32 %v6938_v40, 16 }
 0x27b   : > { %v5749_v53 = vshrl.u32 %v6939_v18, 16  ;;  %vm5186_vm0 = vcmp.ge.f32.partialorder %v10583_v52, 0.0  ;;  %v7901_v60 = vadd.high.f32.bf16 %v10527_v3, %v10055_v4  ;;  %v5764_v38 = vrot.slane %v5760_v57, 4 }
 0x27c   : > { %v5771_v26 = vor.u32 %v5769_v62, %v5768_v42  ;;  %v5752_v5 = vshll.u32 %v6939_v18, 16  ;;  %v5743_v63 = vrot.slane %v5741_v32, 7  ;;  %v5249_v11 = vsel %vm5185_vm14, %v10501_v56, %v5217_v9 }
 0x27d   : > { %v5751_v6 = vrot.slane %v5749_v53, 7  ;;  %v5248_v51 = vsel %vm5184_vm11, %v10463_v1, %v10497_v15  ;;  %5898 = vrot.lane.b32.xlu1 %v5738_v30, %s7911_s29  ;;  %v5761_v13 = vshll.u32 %v6940_v21, 16  ;;  %v6945_v31 = vpack.c.bf16 %v5249_v11, %v5249_v11  ;;  %5892 = vrot.lane.b32.xlu0 %v5721_v35, %s7911_s29 }
 0x27e   : > { %v5772_v58 = vsel %vm10139_vm15, %v5764_v38, %v5771_v26  ;;  %v10610_v4 = vpack.c.bf16 %v5248_v51, %v5248_v51  ;;  %v5744_v3 = vshll.u32 %v6938_v40, 16  ;;  %v5747_v45 = vrot.slane %v5743_v63, 4 }
 0x27f   : > { %v5754_v61 = vor.u32 %v5752_v5, %v5751_v6  ;;  %vm5183_vm1 = vcmp.ge.f32.partialorder %v10520_v37, 0.0  ;;  %v5773_v56 = vrot.slane %v5768_v42, 4  ;;  %v5800_v12 = vshrl.u32 %v6945_v31, 16 }
 0x280   : > { %v5792_v1 = vshrl.u32 %v10610_v4, 16  ;;  %v5215_v15 = vmul.f32 0.05, %v10520_v37  ;;  %v5763_v41 = vor.u32 %v5761_v13, %v5760_v57  ;;  %v5246_v29 = vsel %vm5182_vm7, %v10476_v16, %v10513_v49 }
 0x281   : > { %v5755_v27 = vsel %vm10139_vm15, %v5747_v45, %v5754_v61  ;;  %v5803_v46 = vshll.u32 %v6945_v31, 16  ;;  %5912 = vrot.lane.b32.xlu1 %v5773_v56, %s7911_s29  ;;  %v10623_v43 = vrot.slane %v5800_v12, 7  ;;  %v10628_v23 = vpack.c.bf16 %v5246_v29, %v5246_v29 }
 0x282   : > { %v10625_v55 = vrot.slane %v5792_v1, 7  ;;  %v5247_v8 = vsel %vm5183_vm1, %v10520_v37, %v5215_v15  ;;  %5908 = vrot.lane.b32.xlu0 %v5763_v41, %s7911_s29  ;;  %vm5189_vm2 = vcmp.ge.f32.partialorder %v7900_v2, 0.0  ;;  %v5221_v10 = vmul.f32 0.05, %v7900_v2 }
 0x283   : > { %v6943_v7 = vpack.c.bf16 %v5247_v8, %v5247_v8  ;;  %v5252_v16 = vsel %vm5188_vm13, %v10488_v19, %v10523_v0  ;;  %v5756_v49 = vrot.slane %v5751_v6, 4  ;;  %v5746_v24 = vor.u32 %v5744_v3, %v5743_v63 }
 0x284   : > { %v5775_v50 = vshrl.u32 %v10628_v23, 16  ;;  %vm5187_vm3 = vcmp.ge.f32.partialorder %v7901_v60, 0.0  ;;  %v5798_v37 = vrot.slane %v10625_v55, 4  ;;  %v5805_v54 = vor.u32 %v5803_v46, %v10623_v43 }
 0x285   : > { %v5783_v33 = vshrl.u32 %v6943_v7, 16  ;;  %v5786_v48 = vshll.u32 %v6943_v7, 16  ;;  %5906 = vrot.lane.b32.xlu1 %v5756_v49, %s7911_s29  ;;  %v5253_v30 = vsel %vm5189_vm2, %v7900_v2, %v5221_v10  ;;  %v10641_v17 = vpack.c.bf16 %v5252_v16, %v5252_v16 }
 0x286   : > { %v10639_v21 = vrot.slane %v5775_v50, 7  ;;  %v5219_v19 = vmul.f32 0.05, %v7901_v60  ;;  %5902 = vrot.lane.b32.xlu0 %v5746_v24, %s7911_s29  ;;  %v10648_v36 = vsel %vm10139_vm15, %v5798_v37, %v5805_v54  ;;  %v6949_v47 = vpack.c.bf16 %v5253_v30, %v5253_v30 }
 0x287   : > { %v10644_v0 = vrot.slane %v5783_v33, 7  ;;  %v5250_v59 = vsel %vm5186_vm0, %v10583_v52, %v5218_v28  ;;  %v5795_v39 = vshll.u32 %v10610_v4, 16  ;;  %v5826_v20 = vshrl.u32 %v10641_v17, 16 }
 0x288   : > { %v5781_v25 = vrot.slane %v10639_v21, 4  ;;  %v5834_v22 = vshrl.u32 %v6949_v47, 16  ;;  %v5251_v44 = vsel %vm5187_vm3, %v7901_v60, %v5219_v19  ;;  %v10670_v18 = vpack.c.bf16 %v5250_v59, %v5250_v59 }
 0x289   : > { %v5788_v34 = vor.u32 %v5786_v48, %v10644_v0  ;;  %5910 = vrot.lane.b32.xlu1 %v5772_v58, %s7911_s29  ;;  %v10666_v52 = vrot.slane %v5826_v20, 7  ;;  %v10668_v35 = vpack.c.bf16 %v5251_v44, %v5251_v44  ;;  %v5837_v40 = vshll.u32 %v6949_v47, 16 }
 0x28a   : > { %5904 = vrot.lane.b32.xlu0 %v5755_v27, %s7911_s29  ;;  %v10677_v42 = vrot.slane %v5834_v22, 7  ;;  %vm5415_vm4 = vcmask 125952   ;;  %v5807_v57 = vrot.slane %v10623_v43, 4  ;;  %v5809_v2 = vshrl.u32 %v10670_v18, 16 }
 0x28b   : > { %v10675_v62 = vsel %vm10139_vm15, %v5781_v25, %v5788_v34  ;;  %v5817_v9 = vshrl.u32 %v10668_v35, 16  ;;  %v7912_v28 = vmov 0   ;;  %v5797_v53 = vor.u32 %v5795_v39, %v10625_v55 }
 0x28c   : > { %5423 = vst.msk [vmem:[%s10663_s6 + $0x18] sm:$0xf] %vm5415_vm4, %v7912_v28  ;;  %5416 = vst.msk [vmem:[%s10663_s6] sm:$0xf] %vm5415_vm4, %v7912_v28  ;;  %v5832_v32 = vrot.slane %v10666_v52, 4  ;;  %v5839_v60 = vor.u32 %v5837_v40, %v10677_v42  ;;  %v5820_v38 = vshll.u32 %v10668_v35, 16 }
 0x28d   : > { %5417 = vst.msk [vmem:[%s10663_s6 + $0x4] sm:$0xf] %vm5415_vm4, %v7912_v28  ;;  %5420 = vst.msk [vmem:[%s10663_s6 + $0xc] sm:$0xf] %vm5415_vm4, %v7912_v28  ;;  %5924 = vrot.lane.b32.xlu1 %v5807_v57, %s7911_s29  ;;  %v5819_v26 = vrot.slane %v5817_v9, 7  ;;  %v5811_v5 = vrot.slane %v5809_v2, 7 }
 0x28e   : > { %5421 = vst.msk [vmem:[%s10663_s6 + $0x10] sm:$0xf] %vm5415_vm4, %v7912_v28  ;;  %5424 = vst.msk [vmem:[%s10663_s6 + $0x1c] sm:$0xf] %vm5415_vm4, %v7912_v28  ;;  %vm5988_vm5 = vsmask.f32 7938  ;;  %5920 = vrot.lane.b32.xlu0 %v5797_v53, %s7911_s29  ;;  %v5840_v63 = vsel %vm10139_vm15, %v5832_v32, %v5839_v60  ;;  %v5849_v3 = vpop.permute.xlu1 %5848 }
 0x28f   : > { %5426 = vst.msk [vmem:[%s10663_s6 + $0x24] sm:$0xf] %vm5415_vm4, %v7912_v28  ;;  %5427 = vst.msk [vmem:[%s10663_s6 + $0x28] sm:$0xf] %vm5415_vm4, %v7912_v28  ;;  %vm5418_vm6 = vcmask 122880   ;;  %v5778_v6 = vshll.u32 %v10628_v23, 16  ;;  %v5822_v13 = vor.u32 %v5820_v38, %v5819_v26 }
 0x290   : > { %5429 = vst.msk [vmem:[%s10663_s6 + $0x30] sm:$0xf] %vm5415_vm4, %v7912_v28  ;;  %5430 = vst.msk [vmem:[%s10663_s6 + $0x34] sm:$0xf] %vm5415_vm4, %v7912_v28  ;;  %v5790_v11 = vrot.slane %v10644_v0, 4  ;;  %v5815_v51 = vrot.slane %v5811_v5, 4 }
 0x291   : > { %5432 = vst.msk [vmem:[%s10663_s6 + $0x3c] sm:$0xf] %vm5415_vm4, %v7912_v28  ;;  %5433 = vst.msk [vmem:[%s10663_s6 + $0x40] sm:$0xf] %vm5415_vm4, %v7912_v28  ;;  %v5780_v58 = vor.u32 %v5778_v6, %v10639_v21  ;;  %v5829_v14 = vshll.u32 %v10641_v17, 16  ;;  %v5841_v56 = vrot.slane %v10677_v42, 4 }
 0x292   : > { %5435 = vst.msk [vmem:[%s10663_s6 + $0x48] sm:$0xf] %vm5415_vm4, %v7912_v28  ;;  %5436 = vst.msk [vmem:[%s10663_s6 + $0x4c] sm:$0xf] %vm5415_vm4, %v7912_v28  ;;  %5918 = vrot.lane.b32.xlu1 %v5790_v11, %s7911_s29  ;;  %v5823_v4 = vsel %vm10139_vm15, %v5815_v51, %v5822_v13  ;;  %v5812_v1 = vshll.u32 %v10670_v18, 16  ;;  %v5824_v15 = vrot.slane %v5819_v26, 4 }
 0x293   : > { %5438 = vst.msk [vmem:[%s10663_s6 + $0x54] sm:$0xf] %vm5415_vm4, %v7912_v28  ;;  %5439 = vst.msk [vmem:[%s10663_s6 + $0x58] sm:$0xf] %vm5415_vm4, %v7912_v28  ;;  %5914 = vrot.lane.b32.xlu0 %v5780_v58, %s7911_s29  ;;  %v6809_v45 = vld [vmem:[%s10663_s6 + $0x18] sm:$0xf]  ;;  %v5831_v12 = vor.u32 %v5829_v14, %v10666_v52 }
 0x294   : > { %5441 = vst.msk [vmem:[%s10663_s6 + $0x60] sm:$0xf] %vm5415_vm4, %v7912_v28  ;;  %5442 = vst.msk [vmem:[%s10663_s6 + $0x64] sm:$0xf] %vm5415_vm4, %v7912_v28  ;;  %v6804_v41 = vld [vmem:[%s10663_s6 + $0xc] sm:$0xf]  ;;  %v5814_v27 = vor.u32 %v5812_v1, %v5811_v5 }
 0x295   : > { %5444 = vst.msk [vmem:[%s10663_s6 + $0x6c] sm:$0xf] %vm5415_vm4, %v7912_v28  ;;  %5445 = vst.msk [vmem:[%s10663_s6 + $0x70] sm:$0xf] %vm5415_vm4, %v7912_v28 }
 0x296   : > { %5447 = vst.msk [vmem:[%s10663_s6 + $0x78] sm:$0xf] %vm5415_vm4, %v7912_v28  ;;  %5448 = vst.msk [vmem:[%s10663_s6 + $0x7c] sm:$0xf] %vm5415_vm4, %v7912_v28  ;;  %5922 = vrot.lane.b32.xlu1 %v10648_v36, %s7911_s29  ;;  %v6814_v54 = vld [vmem:[%s10663_s6 + $0x24] sm:$0xf] }
 0x297   : > { %5450 = vst.msk [vmem:[%s10663_s6 + $0x84] sm:$0xf] %vm5415_vm4, %v7912_v28  ;;  %5451 = vst.msk [vmem:[%s10663_s6 + $0x88] sm:$0xf] %vm5415_vm4, %v7912_v28  ;;  %5916 = vrot.lane.b32.xlu0 %v10675_v62, %s7911_s29  ;;  %v6819_v50 = vld [vmem:[%s10663_s6 + $0x30] sm:$0xf] }
 0x298   : > { %5453 = vst.msk [vmem:[%s10663_s6 + $0x90] sm:$0xf] %vm5415_vm4, %v7912_v28  ;;  %5454 = vst.msk [vmem:[%s10663_s6 + $0x94] sm:$0xf] %vm5415_vm4, %v7912_v28  ;;  %v6824_v25 = vld [vmem:[%s10663_s6 + $0x3c] sm:$0xf] }
 0x299   : > { %5456 = vst.msk [vmem:[%s10663_s6 + $0x9c] sm:$0xf] %vm5415_vm4, %v7912_v28  ;;  %5457 = vst.msk [vmem:[%s10663_s6 + $0xa0] sm:$0xf] %vm5415_vm4, %v7912_v28  ;;  %v6829_v20 = vld [vmem:[%s10663_s6 + $0x48] sm:$0xf] }
 0x29a   : > { %5459 = vst.msk [vmem:[%s10663_s6 + $0xa8] sm:$0xf] %vm5415_vm4, %v7912_v28  ;;  %5460 = vst.msk [vmem:[%s10663_s6 + $0xac] sm:$0xf] %vm5415_vm4, %v7912_v28  ;;  %5936 = vrot.lane.b32.xlu1 %v5841_v56, %s7911_s29  ;;  %v6834_v11 = vld [vmem:[%s10663_s6 + $0x54] sm:$0xf] }
 0x29b   : > { %5462 = vst.msk [vmem:[%s10663_s6 + $0xb4] sm:$0xf] %vm5415_vm4, %v7912_v28  ;;  %5463 = vst.msk [vmem:[%s10663_s6 + $0xb8] sm:$0xf] %vm5415_vm4, %v7912_v28  ;;  %5932 = vrot.lane.b32.xlu0 %v5831_v12, %s7911_s29  ;;  %v5843_v29 = vpop.permute.xlu0 %5842 }
 0x29c   : > { %5465 = vst.msk [vmem:[%s10663_s6 + $0xc0] sm:$0xf] %vm5415_vm4, %v7912_v28  ;;  %5466 = vst.msk [vmem:[%s10663_s6 + $0xc4] sm:$0xf] %vm5415_vm4, %v7912_v28 }
 0x29d   : > { %5468 = vst.msk [vmem:[%s10663_s6 + $0xcc] sm:$0xf] %vm5415_vm4, %v7912_v28  ;;  %5469 = vst.msk [vmem:[%s10663_s6 + $0xd0] sm:$0xf] %vm5415_vm4, %v7912_v28 }
 0x29e   : > { %5425 = vst.msk [vmem:[%s10663_s6 + $0x20] sm:$0x1] %vm5418_vm6, %v7912_v28  ;;  %5419 = vst.msk [vmem:[%s10663_s6 + $0x8] sm:$0x1] %vm5418_vm6, %v7912_v28  ;;  %5930 = vrot.lane.b32.xlu1 %v5824_v15, %s7911_s29  ;;  %v5853_v23 = vpop.permute.xlu1 %5852  ;;  %v6844_v15 = vld [vmem:[%s10663_s6 + $0x6c] sm:$0xf] }
 0x29f   : > { %5422 = vst.msk [vmem:[%s10663_s6 + $0x14] sm:$0x1] %vm5418_vm6, %v7912_v28  ;;  %5428 = vst.msk [vmem:[%s10663_s6 + $0x2c] sm:$0x1] %vm5418_vm6, %v7912_v28  ;;  %5926 = vrot.lane.b32.xlu0 %v5814_v27, %s7911_s29  ;;  %v5847_v10 = vpop.permute.xlu0 %5846 }
 0x2a0   : > { %5431 = vst.msk [vmem:[%s10663_s6 + $0x38] sm:$0x1] %vm5418_vm6, %v7912_v28  ;;  %5434 = vst.msk [vmem:[%s10663_s6 + $0x44] sm:$0x1] %vm5418_vm6, %v7912_v28 }
 0x2a1   : > { %5437 = vst.msk [vmem:[%s10663_s6 + $0x50] sm:$0x1] %vm5418_vm6, %v7912_v28  ;;  %5440 = vst.msk [vmem:[%s10663_s6 + $0x5c] sm:$0x1] %vm5418_vm6, %v7912_v28 }
 0x2a2   : > { %5443 = vst.msk [vmem:[%s10663_s6 + $0x68] sm:$0x1] %vm5418_vm6, %v7912_v28  ;;  %5446 = vst.msk [vmem:[%s10663_s6 + $0x74] sm:$0x1] %vm5418_vm6, %v7912_v28  ;;  %5934 = vrot.lane.b32.xlu1 %v5840_v63, %s7911_s29 }
 0x2a3   : > { %5449 = vst.msk [vmem:[%s10663_s6 + $0x80] sm:$0x1] %vm5418_vm6, %v7912_v28  ;;  %5452 = vst.msk [vmem:[%s10663_s6 + $0x8c] sm:$0x1] %vm5418_vm6, %v7912_v28  ;;  %5928 = vrot.lane.b32.xlu0 %v5823_v4, %s7911_s29  ;;  %v5845_v49 = vpop.permute.xlu1 %5844 }
 0x2a4   : > { %5455 = vst.msk [vmem:[%s10663_s6 + $0x98] sm:$0x1] %vm5418_vm6, %v7912_v28  ;;  %5458 = vst.msk [vmem:[%s10663_s6 + $0xa4] sm:$0x1] %vm5418_vm6, %v7912_v28  ;;  %v5851_v24 = vpop.permute.xlu0 %5850 }
 0x2a5   : > { %5461 = vst.msk [vmem:[%s10663_s6 + $0xb0] sm:$0x1] %vm5418_vm6, %v7912_v28  ;;  %5464 = vst.msk [vmem:[%s10663_s6 + $0xbc] sm:$0x1] %vm5418_vm6, %v7912_v28  ;;  %v6812_v55 = vld [vmem:[%s10663_s6 + $0x20] sm:$0x1] }
 0x2a6   : > { %5467 = vst.msk [vmem:[%s10663_s6 + $0xc8] sm:$0x1] %vm5418_vm6, %v7912_v28  ;;  %5470 = vst.msk [vmem:[%s10663_s6 + $0xd4] sm:$0x1] %vm5418_vm6, %v7912_v28  ;;  %v6807_v8 = vld [vmem:[%s10663_s6 + $0x14] sm:$0x1] }
 0x2a7   : > { %vm10857_vm8 = vmand %vm5415_vm4, %vm5988_vm5  ;;  %6806 = vst.msk [vmem:[%s10663_s6 + $0x10] sm:$0xf] %vm5415_vm4, %v5845_v49  ;;  %v6822_v30 = vld [vmem:[%s10663_s6 + $0x38] sm:$0x1]  ;;  %v6817_v0 = vld [vmem:[%s10663_s6 + $0x2c] sm:$0x1] }
 0x2a8   : > { %v6000_v61 = vsel %vm10857_vm8, %v5849_v3, %v6809_v45  ;;  %v5991_v46 = vsel %vm10857_vm8, %v5843_v29, %v6804_v41  ;;  %vm10886_vm15 = vmand %vm5418_vm6, %vm5567_vm9  ;;  %6811 = vst.msk [vmem:[%s10663_s6 + $0x1c] sm:$0xf] %vm5415_vm4, %v5851_v24  ;;  %v6832_v35 = vld [vmem:[%s10663_s6 + $0x50] sm:$0x1]  ;;  %v6827_v40 = vld [vmem:[%s10663_s6 + $0x44] sm:$0x1] }
 0x2a9   : > { %6810 = vst [vmem:[%s10663_s6 + $0x18] sm:$0xf] %v6000_v61  ;;  %6805 = vst [vmem:[%s10663_s6 + $0xc] sm:$0xf] %v5991_v46  ;;  %v6004_v7 = vsel %vm10886_vm15, %v5853_v23, %v6812_v55  ;;  %v5997_v16 = vsel %vm10886_vm15, %v5847_v10, %v6807_v8  ;;  %v5861_v33 = vpop.permute.xlu1 %5860  ;;  %v6839_v28 = vld [vmem:[%s10663_s6 + $0x60] sm:$0xf] }
 0x2aa   : > { %6813 = vst [vmem:[%s10663_s6 + $0x20] sm:$0x1] %v6004_v7  ;;  %6808 = vst [vmem:[%s10663_s6 + $0x14] sm:$0x1] %v5997_v16  ;;  %v6014_v37 = vsel %vm10857_vm8, %v5861_v33, %v6819_v50  ;;  %v6842_v53 = vld [vmem:[%s10663_s6 + $0x68] sm:$0x1] }
 0x2ab   : > { %6820 = vst [vmem:[%s10663_s6 + $0x30] sm:$0xf] %v6014_v37  ;;  %v6837_v5 = vld [vmem:[%s10663_s6 + $0x5c] sm:$0x1]  ;;  %v6852_v3 = vld [vmem:[%s10663_s6 + $0x80] sm:$0x1] }
 0x2ac   : > { %v6849_v45 = vld [vmem:[%s10663_s6 + $0x78] sm:$0xf]  ;;  %v6847_v1 = vld [vmem:[%s10663_s6 + $0x74] sm:$0x1]  ;;  %v6859_v7 = vld [vmem:[%s10663_s6 + $0x90] sm:$0xf] }
 0x2ad   : > { %v5855_v48 = vpop.permute.xlu0 %5854  ;;  %v6862_v23 = vld [vmem:[%s10663_s6 + $0x98] sm:$0x1]  ;;  %v6857_v50 = vld [vmem:[%s10663_s6 + $0x8c] sm:$0x1]  ;;  %v6854_v33 = vld [vmem:[%s10663_s6 + $0x84] sm:$0xf] }
 0x2ae   : > { %v6007_v21 = vsel %vm10857_vm8, %v5855_v48, %v6814_v54 }
 0x2af   : > { %6815 = vst [vmem:[%s10663_s6 + $0x24] sm:$0xf] %v6007_v21 }
 0x2b1   : > { %v5865_v17 = vpop.permute.xlu1 %5864 }
 0x2b2   : > { %v6018_v19 = vsel %vm10886_vm15, %v5865_v17, %v6822_v30 }
 0x2b3   : > { %6823 = vst [vmem:[%s10663_s6 + $0x38] sm:$0x1] %v6018_v19  ;;  %v6872_v19 = vld [vmem:[%s10663_s6 + $0xb0] sm:$0x1] }
 0x2b6   : > { %v5859_v36 = vpop.permute.xlu0 %5858 }
 0x2b7   : > { %v6011_v47 = vsel %vm10886_vm15, %v5859_v36, %v6817_v0  ;;  %v5857_v59 = vpop.permute.xlu1 %5856  ;;  %v6869_v0 = vld [vmem:[%s10663_s6 + $0xa8] sm:$0xf] }
 0x2b8   : > { %6818 = vst [vmem:[%s10663_s6 + $0x2c] sm:$0x1] %v6011_v47  ;;  %6816 = vst.msk [vmem:[%s10663_s6 + $0x28] sm:$0xf] %vm5415_vm4, %v5857_v59 }
 0x2ba   : > { %v5863_v39 = vpop.permute.xlu0 %5862 }
 0x2bb   : > { %6821 = vst.msk [vmem:[%s10663_s6 + $0x34] sm:$0xf] %vm5415_vm4, %v5863_v39 }
 0x2bf   : > { %v5873_v34 = vpop.permute.xlu1 %5872 }
 0x2c0   : > { %v6028_v22 = vsel %vm10857_vm8, %v5873_v34, %v6829_v20  ;;  %v5867_v44 = vpop.permute.xlu0 %5866  ;;  %v6867_v20 = vld [vmem:[%s10663_s6 + $0xa4] sm:$0x1] }
 0x2c1   : > { %6830 = vst [vmem:[%s10663_s6 + $0x48] sm:$0xf] %v6028_v22  ;;  %v6021_v52 = vsel %vm10857_vm8, %v5867_v44, %v6824_v25  ;;  %v6864_v25 = vld [vmem:[%s10663_s6 + $0x9c] sm:$0xf] }
 0x2c2   : > { %6825 = vst [vmem:[%s10663_s6 + $0x3c] sm:$0xf] %v6021_v52 }
 0x2c8   : > { %v5877_v18 = vpop.permute.xlu1 %5876 }
 0x2c9   : > { %v6032_v62 = vsel %vm10886_vm15, %v5877_v18, %v6832_v35  ;;  %v5871_v42 = vpop.permute.xlu0 %5870 }
 0x2ca   : > { %6833 = vst [vmem:[%s10663_s6 + $0x50] sm:$0x1] %v6032_v62  ;;  %v6025_v57 = vsel %vm10886_vm15, %v5871_v42, %v6827_v40  ;;  %v6882_v40 = vld [vmem:[%s10663_s6 + $0xc8] sm:$0x1]  ;;  %v6879_v62 = vld [vmem:[%s10663_s6 + $0xc0] sm:$0xf] }
 0x2cb   : > { %6828 = vst [vmem:[%s10663_s6 + $0x44] sm:$0x1] %v6025_v57 }
 0x2cc   : > { %v5869_v9 = vpop.permute.xlu1 %5868 }
 0x2cd   : > { %6826 = vst.msk [vmem:[%s10663_s6 + $0x40] sm:$0xf] %vm5415_vm4, %v5869_v9 }
 0x2ce   : > { %v5875_v2 = vpop.permute.xlu0 %5874 }
 0x2cf   : > { %6831 = vst.msk [vmem:[%s10663_s6 + $0x4c] sm:$0xf] %vm5415_vm4, %v5875_v2 }
 0x2d4   : > { %v5885_v32 = vpop.permute.xlu0 %5884 }
 0x2d5   : > { %v6042_v38 = vsel %vm10857_vm8, %v5885_v32, %v6839_v28  ;;  %v6877_v28 = vld [vmem:[%s10663_s6 + $0xbc] sm:$0x1] }
 0x2d6   : > { %v5889_v60 = vpop.permute.xlu1 %5888  ;;  %6840 = vst [vmem:[%s10663_s6 + $0x60] sm:$0xf] %v6042_v38 }
 0x2d7   : > { %v6046_v26 = vsel %vm10886_vm15, %v5889_v60, %v6842_v53  ;;  %v6874_v53 = vld [vmem:[%s10663_s6 + $0xb4] sm:$0xf] }
 0x2d8   : > { %6843 = vst [vmem:[%s10663_s6 + $0x68] sm:$0x1] %v6046_v26 }
 0x2db   : > { %v5883_v6 = vpop.permute.xlu1 %5882 }
 0x2dc   : > { %v6039_v63 = vsel %vm10886_vm15, %v5883_v6, %v6837_v5 }
 0x2dd   : > { %6838 = vst [vmem:[%s10663_s6 + $0x5c] sm:$0x1] %v6039_v63 }
 0x2df   : > { %v5879_v51 = vpop.permute.xlu0 %5878  ;;  %v5887_v13 = vpop.permute.xlu1 %5886 }
 0x2e0   : > { %v6035_v58 = vsel %vm10857_vm8, %v5879_v51, %v6834_v11  ;;  %6841 = vst.msk [vmem:[%s10663_s6 + $0x64] sm:$0xf] %vm5415_vm4, %v5887_v13 }
 0x2e1   : > { %6835 = vst [vmem:[%s10663_s6 + $0x54] sm:$0xf] %v6035_v58 }
 0x2e3   : > { %v5881_v4 = vpop.permute.xlu0 %5880 }
 0x2e4   : > { %6836 = vst.msk [vmem:[%s10663_s6 + $0x58] sm:$0xf] %vm5415_vm4, %v5881_v4 }
 0x2e7   : > { %v5901_v61 = vpop.permute.xlu1 %5900  ;;  %v5897_v56 = vpop.permute.xlu0 %5896 }
 0x2e8   : > { %v6060_v14 = vsel %vm10886_vm15, %v5901_v61, %v6852_v3  ;;  %v6056_v12 = vsel %vm10857_vm8, %v5897_v56, %v6849_v45 }
 0x2e9   : > { %6853 = vst [vmem:[%s10663_s6 + $0x80] sm:$0x1] %v6060_v14  ;;  %6850 = vst [vmem:[%s10663_s6 + $0x78] sm:$0xf] %v6056_v12 }
 0x2eb   : > { %v5895_v41 = vpop.permute.xlu1 %5894  ;;  %v5891_v29 = vpop.permute.xlu0 %5890 }
 0x2ec   : > { %v6053_v27 = vsel %vm10886_vm15, %v5895_v41, %v6847_v1  ;;  %v6049_v46 = vsel %vm10857_vm8, %v5891_v29, %v6844_v15 }
 0x2ed   : > { %6848 = vst [vmem:[%s10663_s6 + $0x74] sm:$0x1] %v6053_v27  ;;  %6845 = vst [vmem:[%s10663_s6 + $0x6c] sm:$0xf] %v6049_v46 }
 0x2ef   : > { %v5899_v55 = vpop.permute.xlu1 %5898  ;;  %v5893_v8 = vpop.permute.xlu0 %5892 }
 0x2f0   : > { %6851 = vst.msk [vmem:[%s10663_s6 + $0x7c] sm:$0xf] %vm5415_vm4, %v5899_v55  ;;  %6846 = vst.msk [vmem:[%s10663_s6 + $0x70] sm:$0xf] %vm5415_vm4, %v5893_v8 }
 0x2f3   : > { %v5913_v10 = vpop.permute.xlu1 %5912 }
 0x2f4   : > { %v6074_v16 = vsel %vm10886_vm15, %v5913_v10, %v6862_v23  ;;  %v5909_v49 = vpop.permute.xlu0 %5908 }
 0x2f5   : > { %6863 = vst [vmem:[%s10663_s6 + $0x98] sm:$0x1] %v6074_v16  ;;  %v6070_v24 = vsel %vm10857_vm8, %v5909_v49, %v6859_v7 }
 0x2f6   : > { %6860 = vst [vmem:[%s10663_s6 + $0x90] sm:$0xf] %v6070_v24 }
 0x2f7   : > { %v5907_v37 = vpop.permute.xlu1 %5906 }
 0x2f8   : > { %v6067_v54 = vsel %vm10886_vm15, %v5907_v37, %v6857_v50  ;;  %v5903_v48 = vpop.permute.xlu0 %5902 }
 0x2f9   : > { %6858 = vst [vmem:[%s10663_s6 + $0x8c] sm:$0x1] %v6067_v54  ;;  %v6063_v21 = vsel %vm10857_vm8, %v5903_v48, %v6854_v33 }
 0x2fa   : > { %6855 = vst [vmem:[%s10663_s6 + $0x84] sm:$0xf] %v6063_v21 }
 0x2fb   : > { %v5911_v30 = vpop.permute.xlu1 %5910 }
 0x2fc   : > { %6861 = vst.msk [vmem:[%s10663_s6 + $0x94] sm:$0xf] %vm5415_vm4, %v5911_v30  ;;  %v5905_v17 = vpop.permute.xlu0 %5904 }
 0x2fd   : > { %6856 = vst.msk [vmem:[%s10663_s6 + $0x88] sm:$0xf] %vm5415_vm4, %v5905_v17 }
 0x2ff   : > { %v5925_v36 = vpop.permute.xlu1 %5924 }
 0x300   : > { %v6088_v47 = vsel %vm10886_vm15, %v5925_v36, %v6872_v19  ;;  %v5921_v59 = vpop.permute.xlu0 %5920 }
 0x301   : > { %6873 = vst [vmem:[%s10663_s6 + $0xb0] sm:$0x1] %v6088_v47  ;;  %v6084_v39 = vsel %vm10857_vm8, %v5921_v59, %v6869_v0 }
 0x302   : > { %6870 = vst [vmem:[%s10663_s6 + $0xa8] sm:$0xf] %v6084_v39 }
 0x304   : > { %v5919_v34 = vpop.permute.xlu1 %5918 }
 0x305   : > { %v6081_v22 = vsel %vm10886_vm15, %v5919_v34, %v6867_v20  ;;  %v5915_v44 = vpop.permute.xlu0 %5914 }
 0x306   : > { %6868 = vst [vmem:[%s10663_s6 + $0xa4] sm:$0x1] %v6081_v22  ;;  %v6077_v52 = vsel %vm10857_vm8, %v5915_v44, %v6864_v25 }
 0x307   : > { %6865 = vst [vmem:[%s10663_s6 + $0x9c] sm:$0xf] %v6077_v52 }
 0x308   : > { %v5923_v35 = vpop.permute.xlu1 %5922 }
 0x309   : > { %6871 = vst.msk [vmem:[%s10663_s6 + $0xac] sm:$0xf] %vm5415_vm4, %v5923_v35  ;;  %v5917_v18 = vpop.permute.xlu0 %5916 }
 0x30a   : > { %6866 = vst.msk [vmem:[%s10663_s6 + $0xa0] sm:$0xf] %vm5415_vm4, %v5917_v18 }
 0x30c   : > { %v5937_v42 = vpop.permute.xlu1 %5936 }
 0x30d   : > { %v6102_v57 = vsel %vm10886_vm15, %v5937_v42, %v6882_v40  ;;  %v5933_v9 = vpop.permute.xlu0 %5932 }
 0x30e   : > { %6883 = vst [vmem:[%s10663_s6 + $0xc8] sm:$0x1] %v6102_v57  ;;  %v6098_v2 = vsel %vm10857_vm8, %v5933_v9, %v6879_v62 }
 0x30f   : > { %6880 = vst [vmem:[%s10663_s6 + $0xc0] sm:$0xf] %v6098_v2 }
 0x310   : > { %v5931_v32 = vpop.permute.xlu1 %5930 }
 0x311   : > { %v6095_v60 = vsel %vm10886_vm15, %v5931_v32, %v6877_v28  ;;  %v5927_v38 = vpop.permute.xlu0 %5926 }
 0x312   : > { %6878 = vst [vmem:[%s10663_s6 + $0xbc] sm:$0x1] %v6095_v60  ;;  %v6091_v26 = vsel %vm10857_vm8, %v5927_v38, %v6874_v53 }
 0x313   : > { %6875 = vst [vmem:[%s10663_s6 + $0xb4] sm:$0xf] %v6091_v26 }
 0x314   : > { %v5935_v5 = vpop.permute.xlu1 %5934 }
 0x315   : > { %6881 = vst.msk [vmem:[%s10663_s6 + $0xc4] sm:$0xf] %vm5415_vm4, %v5935_v5  ;;  %v5929_v6 = vpop.permute.xlu0 %5928 }
 0x316   : > { %6876 = vst.msk [vmem:[%s10663_s6 + $0xb8] sm:$0xf] %vm5415_vm4, %v5929_v6 }
 0x317 PF: > { %s15_s15 = sadd.s32 1, %s7908_s15  }
 0x318   : > { %p12_p5 = scmp.ge.s32.totalorder %s15_s15, 4  }
 0x31a   :  { %14 = sbr.rel (!%p12_p5) target bundleno = 1 (0x1), region = 77 }

// kernel: erfdb_forward.14
= control target key start
LH: loop header
LB: loop body
LE: loop exit
PB: predicated region body
PF: predicated region fallthrough
CT: control target
= control target key end

     0   :  { %v122_v0 = vmov 0.0   ;;  %vm123_vm0 = vmmov 0   ;;  %vm47_vm1 = vcmask 1041408   ;;  %vm43_vm2 = vcmask 293888   ;;  %s162_s1 = inlined_call_operand.vmem [shape: bf16[36,4], index: 1, kind: input, shape index: {}]   ;;  %s163_s0 = inlined_call_operand.vmem [shape: bf16[8,36], index: 0, kind: input, shape index: {}]   ;;  %s164_s2 = inlined_call_operand.vmem [shape: f32[1,4], index: 2, kind: input, shape index: {}]   ;;  %s165_s3 = inlined_call_operand.vmem [shape: f32[8,4], index: 3, kind: output, shape index: {}]  }
   0x1   :  { %107 = vmatprep.subr.bf16.mxu0 %v122_v0  ;;  %v119_v1 = vld [vmem:[%s162_s1] sm:$0xff]   ;;  %113 = vmatprep.mubr.msk.bf16.mxu0 %vm123_vm0, %v122_v0  ;;  %v120_v2 = vld [vmem:[%s162_s1 + $0x8] sm:$0xff]   ;;  %v121_v3 = vld [vmem:[%s162_s1 + $0x10] ss:$0 sps:$4 sm:$0x33]   ;;  %vm92_vm3 = vcmask 31744  }
   0x2   :  { %108 = vmatpush3.bf16.msra.mxu0 %v119_v1  ;;  %v49_v4 = vsel %vm47_vm1, %v121_v3, 0  ;;  %v15_v5 = vld [vmem:[%s163_s0] sm:$0xf] }
   0x3   :  { %109 = vmatprep.subr.bf16.mxu0 %v122_v0  ;;  %v98_v6 = vld [vmem:[%s164_s2] ss:$0 sm:$0xff] }
   0x6   :  { %110 = vmatpush3.bf16.msra.mxu0 %v120_v2 }
   0x7   :  { %111 = vmatprep.subr.bf16.mxu0 %v122_v0 }
   0xa   :  { %112 = vmatpush3.bf16.msra.mxu0 %v49_v4 }
   0xd   :  { %114 = vmatmul.mubr.msk.bf16.vlgmr.msra.gmra.mrb[0].mxu0 %vm43_vm2, %v15_v5 }
  0xe0   :  { %v85_v7 = vpop.f32.mrb[0].mxu0 }
  0xe1   :  { %v86_v8 = vadd.f32 %v98_v6, %v85_v7  ;;  %v115_v9 = vpop.f32.mrb[1].mxu0 }
  0xe2   :  { %v88_v10 = vpop.f32.mrb[2].mxu0 }
  0xe3   :  { %v91_v11 = vmax.f32 %v86_v8, 0.0  ;;  %v116_v12 = vpop.f32.mrb[3].mxu0 }
  0xe5   :  { %93 = vst.msk [vmem:[%s165_s3] sm:$0xff] %vm92_vm3, %v91_v11 }

// kernel: erfdb_forward.16
= control target key start
LH: loop header
LB: loop body
LE: loop exit
PB: predicated region body
PF: predicated region fallthrough
CT: control target
= control target key end

     0   :  { %v121_v0 = vmov 0.0   ;;  %vm122_vm0 = vmmov 0   ;;  %vm47_vm1 = vcmask 1041408   ;;  %vm43_vm2 = vcmask 293888   ;;  %s161_s1 = inlined_call_operand.vmem [shape: bf16[36,4], index: 1, kind: input, shape index: {}]   ;;  %s162_s0 = inlined_call_operand.vmem [shape: bf16[8,36], index: 0, kind: input, shape index: {}]   ;;  %s163_s2 = inlined_call_operand.vmem [shape: f32[1,4], index: 2, kind: input, shape index: {}]   ;;  %s164_s3 = inlined_call_operand.vmem [shape: f32[8,4], index: 3, kind: output, shape index: {}]  }
   0x1   :  { %106 = vmatprep.subr.bf16.mxu0 %v121_v0  ;;  %v118_v1 = vld [vmem:[%s161_s1] sm:$0xff]   ;;  %112 = vmatprep.mubr.msk.bf16.mxu0 %vm122_vm0, %v121_v0  ;;  %v119_v2 = vld [vmem:[%s161_s1 + $0x8] sm:$0xff]   ;;  %v120_v3 = vld [vmem:[%s161_s1 + $0x10] ss:$0 sps:$4 sm:$0x33]   ;;  %vm91_vm3 = vcmask 31744  }
   0x2   :  { %107 = vmatpush3.bf16.msra.mxu0 %v118_v1  ;;  %v49_v4 = vsel %vm47_vm1, %v120_v3, 0  ;;  %v15_v5 = vld [vmem:[%s162_s0] sm:$0xf] }
   0x3   :  { %108 = vmatprep.subr.bf16.mxu0 %v121_v0  ;;  %v97_v6 = vld [vmem:[%s163_s2] ss:$0 sm:$0xff] }
   0x6   :  { %109 = vmatpush3.bf16.msra.mxu0 %v119_v2 }
   0x7   :  { %110 = vmatprep.subr.bf16.mxu0 %v121_v0 }
   0xa   :  { %111 = vmatpush3.bf16.msra.mxu0 %v49_v4 }
   0xd   :  { %113 = vmatmul.mubr.msk.bf16.vlgmr.msra.gmra.mrb[0].mxu0 %vm43_vm2, %v15_v5 }
  0xe0   :  { %v85_v7 = vpop.f32.mrb[0].mxu0 }
  0xe1   :  { %v86_v8 = vadd.f32 %v97_v6, %v85_v7  ;;  %v114_v9 = vpop.f32.mrb[1].mxu0 }
  0xe2   :  { %v88_v10 = vpop.f32.mrb[2].mxu0 }
  0xe3   :  { %92 = vst.msk [vmem:[%s164_s3] sm:$0xff] %vm91_vm3, %v86_v8  ;;  %v115_v11 = vpop.f32.mrb[3].mxu0 }

// kernel: erfdb_forward.17
= control target key start
LH: loop header
LB: loop body
LE: loop exit
PB: predicated region body
PF: predicated region fallthrough
CT: control target
= control target key end

     0   :  { %s1767_s27 = smov 0   ;;  %s2118_s0 = inlined_call_operand.vmem [shape: f32[512,16], index: 0, kind: input, shape index: {}]   ;;  %s2119_s1 = inlined_call_operand.vmem [shape: f32[512,16], index: 1, kind: input, shape index: {}]   ;;  %s2120_s2 = inlined_call_operand.vmem [shape: f32[512,4], index: 2, kind: input, shape index: {}]   ;;  %s2121_s3 = inlined_call_operand.vmem [shape: f32[512,4], index: 3, kind: input, shape index: {}]   ;;  %s2122_s4 = inlined_call_operand.vmem [shape: bf16[4,4], index: 4, kind: input, shape index: {}]   ;;  %s2123_s5 = inlined_call_operand.vmem [shape: f32[1,4], index: 5, kind: input, shape index: {}]   ;;  %s2124_s6 = inlined_call_operand.vmem [shape: bf16[4,16], index: 6, kind: input, shape index: {}]   ;;  %s2125_s7 = inlined_call_operand.vmem [shape: f32[1,16], index: 7, kind: input, shape index: {}]   ;;  %s2126_s8 = inlined_call_operand.vmem [shape: f32[512,16], index: 8, kind: output, shape index: {}]  }
   0x1 LB: > { %s1391_s28 = sadd.s32 4294967295, %s1720_s27   ;;  %p1395_p0 = scmp.ge.s32.totalorder %s1720_s27, 1  ;;  %s1720_s27 = sphi %s1767_s27, %s18_s27  }
   0x2   : > { %p296_p1 = scmp.lt.s32.totalorder %s1720_s27, 3 }
   0x4   : > { %p297_p2 = pnand %p1395_p0, %p296_p1 }
   0x5   : > { %v424_v0 = vld [vmem:[%s2122_s4] sm:$0x3] (!%p297_p2)  ;;  %vm481_vm0 = vcmask (!%p297_p2), 1041408   ;;  %s1396_s9 = sshll.u32 (!%p297_p2), %s1391_s28, 5  ;;  %vm432_vm1 = vcmask (!%p297_p2), 31744   ;;  %vm1266_vm2 = vcmask (!%p297_p2), 130048  }
   0x6   : > { %300 = sbr.rel (%p297_p2) target bundleno = 549 (0x225), region = 52  ;;  %1576 = vmatprep.subr.msk.bf16.mxu0 (!%p297_p2), %vm481_vm0, %v424_v0  ;;  %v483_v1 = vsel (!%p297_p2), %vm481_vm0, %v424_v0, 0  ;;  %p346_p3 = scmp.lt.s32.totalorder (!%p297_p2), %s1396_s9, 63  ;;  %v726_v50 = vld [vmem:[%s2124_s6] sm:$0x3] (!%p297_p2) }
   0x7   : > { %1509 = vmatpush3.bf16.msra.mxu0 (!%p297_p2), %v483_v1  ;;  %1577 = vmatprep.subr.msk.bf16.mxu1 (!%p297_p2), %vm481_vm0, %v726_v50  ;;  %v783_v51 = vsel (!%p297_p2), %vm481_vm0, %v726_v50, 0  ;;  %v1844_v52 = vld [vmem:[%s2123_s5] ss:$0 sm:$0xff] (!%p297_p2) }
   0x8   : > { %1543 = vmatpush3.bf16.msra.mxu1 (!%p297_p2), %v783_v51 }
   0xd   : > { %s2128_s9 = smov (!%p346_p3, %s1396_s9), 63 }
   0xe   : > { %s1780_s10 = sshll.u32 %s2128_s9, 3 }
   0xf   : > { %s1786_s13 = scalar_lea.vmem %s2120_s2, %s1780_s10  ;;  %s1850_s20 = scalar_lea.vmem %s2121_s3, %s1780_s10 }
  0x10   : > { %v376_v2 = vld [vmem:[%s1786_s13] sm:$0xff]  ;;  %v377_v3 = vld [vmem:[%s1786_s13 + $0x8] sm:$0xff]  ;;  %v378_v4 = vld [vmem:[%s1786_s13 + $0x10] sm:$0xff]  ;;  %s1953_s25 = scalar_lea.vmem %s2119_s1, %s1780_s10  ;;  %s1959_s29 = scalar_lea.vmem %s2118_s0, %s1780_s10 }
  0x11   : > { %v408_v5 = vpack.c.bf16 %v377_v3, %v376_v2  ;;  %v379_v6 = vld [vmem:[%s1786_s13 + $0x18] sm:$0xff]  ;;  %v380_v7 = vld [vmem:[%s1786_s13 + $0x20] sm:$0xff]  ;;  %v381_v8 = vld [vmem:[%s1786_s13 + $0x28] sm:$0xff]  ;;  %s1975_s11 = scalar_lea.vmem %s2126_s8, %s1780_s10 }
  0x12   : > { %v409_v9 = vpack.c.bf16 %v379_v6, %v378_v4  ;;  %v410_v10 = vpack.c.bf16 %v381_v8, %v380_v7  ;;  %v382_v11 = vld [vmem:[%s1786_s13 + $0x30] sm:$0xff]  ;;  %v383_v12 = vld [vmem:[%s1786_s13 + $0x38] sm:$0xff]  ;;  %v384_v13 = vld [vmem:[%s1786_s13 + $0x40] sm:$0xff] }
  0x13   : > { %1510 = vmatprep.mubr.msk.bf16.mxu0 %vm432_vm1, %v408_v5  ;;  %v385_v14 = vld [vmem:[%s1786_s13 + $0x48] sm:$0xff]  ;;  %v411_v15 = vpack.c.bf16 %v383_v12, %v382_v11  ;;  %v386_v17 = vld [vmem:[%s1786_s13 + $0x50] sm:$0xff]  ;;  %v387_v18 = vld [vmem:[%s1786_s13 + $0x58] sm:$0xff] }
  0x14   : > { %1511 = vmatmul.mubr.msk.bf16.vlgmr.msra.gmra.mrb[0].mxu0 %vm432_vm1, %v409_v9  ;;  %v412_v16 = vpack.c.bf16 %v385_v14, %v384_v13  ;;  %v388_v19 = vld [vmem:[%s1786_s13 + $0x60] sm:$0xff]  ;;  %v389_v20 = vld [vmem:[%s1786_s13 + $0x68] sm:$0xff]  ;;  %v413_v21 = vpack.c.bf16 %v387_v18, %v386_v17  ;;  %v390_v23 = vld [vmem:[%s1786_s13 + $0x70] sm:$0xff] }
  0x15   : > { %1514 = vmatprep.mubr.msk.bf16.mxu0 %vm432_vm1, %v410_v10  ;;  %v414_v22 = vpack.c.bf16 %v389_v20, %v388_v19  ;;  %v391_v24 = vld [vmem:[%s1786_s13 + $0x78] sm:$0xff]  ;;  %v392_v25 = vld [vmem:[%s1786_s13 + $0x80] sm:$0xff]  ;;  %v393_v26 = vld [vmem:[%s1786_s13 + $0x88] sm:$0xff] }
  0x16   : > { %v415_v27 = vpack.c.bf16 %v391_v24, %v390_v23  ;;  %v416_v28 = vpack.c.bf16 %v393_v26, %v392_v25  ;;  %v394_v29 = vld [vmem:[%s1786_s13 + $0x90] sm:$0xff]  ;;  %v395_v30 = vld [vmem:[%s1786_s13 + $0x98] sm:$0xff]  ;;  %v396_v31 = vld [vmem:[%s1786_s13 + $0xa0] sm:$0xff] }
  0x17   : > { %v397_v32 = vld [vmem:[%s1786_s13 + $0xa8] sm:$0xff]  ;;  %v417_v33 = vpack.c.bf16 %v395_v30, %v394_v29  ;;  %v398_v35 = vld [vmem:[%s1786_s13 + $0xb0] sm:$0xff]  ;;  %v399_v36 = vld [vmem:[%s1786_s13 + $0xb8] sm:$0xff] }
  0x18   : > { %v418_v34 = vpack.c.bf16 %v397_v32, %v396_v31  ;;  %v400_v37 = vld [vmem:[%s1786_s13 + $0xc0] sm:$0xff]  ;;  %v401_v38 = vld [vmem:[%s1786_s13 + $0xc8] sm:$0xff]  ;;  %v419_v39 = vpack.c.bf16 %v399_v36, %v398_v35  ;;  %v402_v41 = vld [vmem:[%s1786_s13 + $0xd0] sm:$0xff] }
  0x19   : > { %v420_v40 = vpack.c.bf16 %v401_v38, %v400_v37  ;;  %v403_v42 = vld [vmem:[%s1786_s13 + $0xd8] sm:$0xff]  ;;  %v404_v43 = vld [vmem:[%s1786_s13 + $0xe0] sm:$0xff]  ;;  %v405_v44 = vld [vmem:[%s1786_s13 + $0xe8] sm:$0xff] }
  0x1a   : > { %v421_v45 = vpack.c.bf16 %v403_v42, %v402_v41  ;;  %v422_v46 = vpack.c.bf16 %v405_v44, %v404_v43  ;;  %v406_v47 = vld [vmem:[%s1786_s13 + $0xf0] sm:$0xff]  ;;  %v407_v48 = vld [vmem:[%s1786_s13 + $0xf8] sm:$0xff]  ;;  %v646_v60 = vld [vmem:[%s1850_s20] sm:$0xff] }
  0x1b   : > { %v423_v49 = vpack.c.bf16 %v407_v48, %v406_v47  ;;  %v648_v56 = vld [vmem:[%s1850_s20 + $0x10] sm:$0xff]  ;;  %v649_v59 = vld [vmem:[%s1850_s20 + $0x18] sm:$0xff]  ;;  %v647_v63 = vld [vmem:[%s1850_s20 + $0x8] sm:$0xff] }
  0x1c   : > { %1515 = vmatmul.mubr.msk.bf16.gmra.mrb[4].mxu0 %vm432_vm1, %v411_v15  ;;  %v652_v10 = vld [vmem:[%s1850_s20 + $0x30] sm:$0xff]  ;;  %v653_v13 = vld [vmem:[%s1850_s20 + $0x38] sm:$0xff]  ;;  %v650_v14 = vld [vmem:[%s1850_s20 + $0x20] sm:$0xff] }
  0x1d   : > { %1518 = vmatprep.mubr.msk.bf16.mxu0 %vm432_vm1, %v412_v16  ;;  %v651_v17 = vld [vmem:[%s1850_s20 + $0x28] sm:$0xff]  ;;  %v657_v31 = vld [vmem:[%s1850_s20 + $0x58] sm:$0xff]  ;;  %v654_v32 = vld [vmem:[%s1850_s20 + $0x40] sm:$0xff] }
  0x1e   : > { %v655_v35 = vld [vmem:[%s1850_s20 + $0x48] sm:$0xff]  ;;  %v658_v50 = vld [vmem:[%s1850_s20 + $0x60] sm:$0xff] }
  0x24   : > { %1519 = vmatmul.mubr.msk.bf16.gmra.mrb[8].mxu0 %vm432_vm1, %v413_v21 }
  0x25   : > { %1522 = vmatprep.mubr.msk.bf16.mxu0 %vm432_vm1, %v414_v22 }
  0x2c   : > { %1523 = vmatmul.mubr.msk.bf16.gmra.mrb[12].mxu0 %vm432_vm1, %v415_v27 }
  0x2d   : > { %1526 = vmatprep.mubr.msk.bf16.mxu0 %vm432_vm1, %v416_v28  ;;  %v656_v28 = vld [vmem:[%s1850_s20 + $0x50] sm:$0xff] }
  0x34   : > { %1527 = vmatmul.mubr.msk.bf16.gmra.mrb[16].mxu0 %vm432_vm1, %v417_v33 }
  0x35   : > { %1530 = vmatprep.mubr.msk.bf16.mxu0 %vm432_vm1, %v418_v34 }
  0x3c   : > { %1531 = vmatmul.mubr.msk.bf16.gmra.mrb[20].mxu0 %vm432_vm1, %v419_v39 }
  0x3d   : > { %1534 = vmatprep.mubr.msk.bf16.mxu0 %vm432_vm1, %v420_v40 }
  0x44   : > { %1535 = vmatmul.mubr.msk.bf16.gmra.mrb[24].mxu0 %vm432_vm1, %v421_v45 }
  0x45   : > { %1538 = vmatprep.mubr.msk.bf16.mxu0 %vm432_vm1, %v422_v46  ;;  %v660_v46 = vld [vmem:[%s1850_s20 + $0x70] sm:$0xff] }
  0x4c   : > { %1539 = vmatmul.mubr.msk.bf16.gmra.mrb[28].mxu0 %vm432_vm1, %v423_v49  ;;  %v661_v49 = vld [vmem:[%s1850_s20 + $0x78] sm:$0xff] }
  0xe7   : > { %v1512_v53 = vpop.f32.mrb[0].mxu0 }
  0xe8   : > { %v528_v54 = vadd.f32 %v1512_v53, %v1844_v52  ;;  %v519_v55 = vpop.f32.mrb[1].mxu0 }
  0xe9   : > { %v520_v57 = vadd.f32 %v1844_v52, %v519_v55  ;;  %v1513_v58 = vpop.f32.mrb[2].mxu0 }
  0xea   : > { %v531_v61 = vadd.f32 %v1513_v58, %v1844_v52  ;;  %v522_v62 = vpop.f32.mrb[3].mxu0  ;;  %v680_v1 = vadd.f32 %v648_v56, %v528_v54  ;;  %v659_v54 = vld [vmem:[%s1850_s20 + $0x68] sm:$0xff] }
  0xeb   : > { %v523_v0 = vadd.f32 %v1844_v52, %v522_v62  ;;  %v678_v3 = vadd.f32 %v646_v60, %v520_v57 }
  0xec   : > { %v681_v2 = vadd.f32 %v649_v59, %v531_v61 }
  0xed   : > { %v679_v4 = vadd.f32 %v647_v63, %v523_v0 }
  0xee   : > { %v711_v5 = vpack.c.bf16 %v681_v2, %v680_v1  ;;  %v664_v1 = vld [vmem:[%s1850_s20 + $0x90] sm:$0xff] }
  0xef   : > { %v1516_v6 = vpop.f32.mrb[4].mxu0  ;;  %v710_v7 = vpack.c.bf16 %v679_v4, %v678_v3  ;;  %v665_v4 = vld [vmem:[%s1850_s20 + $0x98] sm:$0xff] }
  0xf0   : > { %v544_v8 = vadd.f32 %v1516_v6, %v1844_v52  ;;  %v535_v9 = vpop.f32.mrb[5].mxu0 }
  0xf1   : > { %v536_v11 = vadd.f32 %v1844_v52, %v535_v9  ;;  %v1517_v12 = vpop.f32.mrb[6].mxu0  ;;  %1544 = vmatprep.mubr.msk.bf16.mxu1 %vm432_vm1, %v710_v7 }
  0xf2   : > { %v547_v15 = vadd.f32 %v1517_v12, %v1844_v52  ;;  %v538_v16 = vpop.f32.mrb[7].mxu0  ;;  %1545 = vmatmul.mubr.msk.bf16.vlgmr.msra.gmra.mrb[0].mxu1 %vm432_vm1, %v711_v5  ;;  %v684_v19 = vadd.f32 %v652_v10, %v544_v8  ;;  %v662_v5 = vld [vmem:[%s1850_s20 + $0x80] sm:$0xff]  ;;  %v663_v8 = vld [vmem:[%s1850_s20 + $0x88] sm:$0xff] }
  0xf3   : > { %v539_v18 = vadd.f32 %v1844_v52, %v538_v16  ;;  %v682_v21 = vadd.f32 %v650_v14, %v536_v11 }
  0xf4   : > { %v685_v20 = vadd.f32 %v653_v13, %v547_v15 }
  0xf5   : > { %v683_v22 = vadd.f32 %v651_v17, %v539_v18 }
  0xf6   : > { %v713_v23 = vpack.c.bf16 %v685_v20, %v684_v19  ;;  %v668_v19 = vld [vmem:[%s1850_s20 + $0xb0] sm:$0xff] }
  0xf7   : > { %v712_v24 = vpack.c.bf16 %v683_v22, %v682_v21  ;;  %v1520_v25 = vpop.f32.mrb[8].mxu0  ;;  %v669_v22 = vld [vmem:[%s1850_s20 + $0xb8] sm:$0xff] }
  0xf8   : > { %v560_v26 = vadd.f32 %v1520_v25, %v1844_v52  ;;  %v551_v27 = vpop.f32.mrb[9].mxu0 }
  0xf9   : > { %v552_v29 = vadd.f32 %v1844_v52, %v551_v27  ;;  %v1521_v30 = vpop.f32.mrb[10].mxu0  ;;  %1548 = vmatprep.mubr.msk.bf16.mxu1 %vm432_vm1, %v712_v24 }
  0xfa   : > { %v563_v33 = vadd.f32 %v1521_v30, %v1844_v52  ;;  %v554_v34 = vpop.f32.mrb[11].mxu0  ;;  %1549 = vmatmul.mubr.msk.bf16.gmra.mrb[4].mxu1 %vm432_vm1, %v713_v23  ;;  %v688_v37 = vadd.f32 %v656_v28, %v560_v26  ;;  %v666_v23 = vld [vmem:[%s1850_s20 + $0xa0] sm:$0xff]  ;;  %v667_v26 = vld [vmem:[%s1850_s20 + $0xa8] sm:$0xff] }
  0xfb   : > { %v555_v36 = vadd.f32 %v1844_v52, %v554_v34  ;;  %v686_v39 = vadd.f32 %v654_v32, %v552_v29 }
  0xfc   : > { %v689_v38 = vadd.f32 %v657_v31, %v563_v33 }
  0xfd   : > { %v687_v40 = vadd.f32 %v655_v35, %v555_v36 }
  0xfe   : > { %v715_v41 = vpack.c.bf16 %v689_v38, %v688_v37  ;;  %v672_v37 = vld [vmem:[%s1850_s20 + $0xd0] sm:$0xff] }
  0xff   : > { %v714_v42 = vpack.c.bf16 %v687_v40, %v686_v39  ;;  %v1524_v43 = vpop.f32.mrb[12].mxu0  ;;  %v673_v40 = vld [vmem:[%s1850_s20 + $0xd8] sm:$0xff] }
 0x100   : > { %v576_v44 = vadd.f32 %v1524_v43, %v1844_v52  ;;  %v567_v45 = vpop.f32.mrb[13].mxu0 }
 0x101   : > { %v568_v47 = vadd.f32 %v1844_v52, %v567_v45  ;;  %v1525_v48 = vpop.f32.mrb[14].mxu0  ;;  %1552 = vmatprep.mubr.msk.bf16.mxu1 %vm432_vm1, %v714_v42 }
 0x102   : > { %v579_v51 = vadd.f32 %v1525_v48, %v1844_v52  ;;  %v570_v53 = vpop.f32.mrb[15].mxu0  ;;  %1553 = vmatmul.mubr.msk.bf16.gmra.mrb[8].mxu1 %vm432_vm1, %v715_v41  ;;  %v692_v56 = vadd.f32 %v660_v46, %v576_v44  ;;  %v670_v41 = vld [vmem:[%s1850_s20 + $0xc0] sm:$0xff]  ;;  %v671_v44 = vld [vmem:[%s1850_s20 + $0xc8] sm:$0xff] }
 0x103   : > { %v571_v55 = vadd.f32 %v1844_v52, %v570_v53  ;;  %v690_v58 = vadd.f32 %v658_v50, %v568_v47 }
 0x104   : > { %v693_v57 = vadd.f32 %v661_v49, %v579_v51 }
 0x105   : > { %v691_v59 = vadd.f32 %v659_v54, %v571_v55 }
 0x106   : > { %v717_v60 = vpack.c.bf16 %v693_v57, %v692_v56  ;;  %v676_v56 = vld [vmem:[%s1850_s20 + $0xf0] sm:$0xff] }
 0x107   : > { %v716_v61 = vpack.c.bf16 %v691_v59, %v690_v58  ;;  %v1528_v62 = vpop.f32.mrb[16].mxu0  ;;  %v677_v59 = vld [vmem:[%s1850_s20 + $0xf8] sm:$0xff] }
 0x108   : > { %v592_v63 = vadd.f32 %v1528_v62, %v1844_v52  ;;  %v583_v0 = vpop.f32.mrb[17].mxu0 }
 0x109   : > { %v584_v2 = vadd.f32 %v1844_v52, %v583_v0  ;;  %v1529_v3 = vpop.f32.mrb[18].mxu0  ;;  %1556 = vmatprep.mubr.msk.bf16.mxu1 %vm432_vm1, %v716_v61 }
 0x10a   : > { %v595_v6 = vadd.f32 %v1529_v3, %v1844_v52  ;;  %v586_v7 = vpop.f32.mrb[19].mxu0  ;;  %1557 = vmatmul.mubr.msk.bf16.gmra.mrb[12].mxu1 %vm432_vm1, %v717_v60  ;;  %v696_v10 = vadd.f32 %v664_v1, %v592_v63  ;;  %v674_v60 = vld [vmem:[%s1850_s20 + $0xe0] sm:$0xff]  ;;  %v675_v63 = vld [vmem:[%s1850_s20 + $0xe8] sm:$0xff] }
 0x10b   : > { %v587_v9 = vadd.f32 %v1844_v52, %v586_v7  ;;  %v694_v12 = vadd.f32 %v662_v5, %v584_v2  ;;  %v1935_v7 = vld [vmem:[%s2125_s7] ss:$0 sm:$0xff] }
 0x10c   : > { %v697_v11 = vadd.f32 %v665_v4, %v595_v6 }
 0x10d   : > { %v695_v13 = vadd.f32 %v663_v8, %v587_v9 }
 0x10e   : > { %v719_v14 = vpack.c.bf16 %v697_v11, %v696_v10 }
 0x10f   : > { %v718_v15 = vpack.c.bf16 %v695_v13, %v694_v12  ;;  %v1532_v16 = vpop.f32.mrb[20].mxu0 }
 0x110   : > { %v608_v17 = vadd.f32 %v1532_v16, %v1844_v52  ;;  %v599_v18 = vpop.f32.mrb[21].mxu0 }
 0x111   : > { %v600_v20 = vadd.f32 %v1844_v52, %v599_v18  ;;  %v1533_v21 = vpop.f32.mrb[22].mxu0  ;;  %1560 = vmatprep.mubr.msk.bf16.mxu1 %vm432_vm1, %v718_v15 }
 0x112   : > { %v611_v24 = vadd.f32 %v1533_v21, %v1844_v52  ;;  %v602_v25 = vpop.f32.mrb[23].mxu0  ;;  %1561 = vmatmul.mubr.msk.bf16.gmra.mrb[16].mxu1 %vm432_vm1, %v719_v14  ;;  %v700_v28 = vadd.f32 %v668_v19, %v608_v17 }
 0x113   : > { %v603_v27 = vadd.f32 %v1844_v52, %v602_v25  ;;  %v698_v30 = vadd.f32 %v666_v23, %v600_v20 }
 0x114   : > { %v701_v29 = vadd.f32 %v669_v22, %v611_v24 }
 0x115   : > { %v699_v31 = vadd.f32 %v667_v26, %v603_v27 }
 0x116   : > { %v721_v32 = vpack.c.bf16 %v701_v29, %v700_v28 }
 0x117   : > { %v720_v33 = vpack.c.bf16 %v699_v31, %v698_v30  ;;  %v1536_v34 = vpop.f32.mrb[24].mxu0 }
 0x118   : > { %v624_v35 = vadd.f32 %v1536_v34, %v1844_v52  ;;  %v615_v36 = vpop.f32.mrb[25].mxu0 }
 0x119   : > { %v616_v38 = vadd.f32 %v1844_v52, %v615_v36  ;;  %v1537_v39 = vpop.f32.mrb[26].mxu0  ;;  %1564 = vmatprep.mubr.msk.bf16.mxu1 %vm432_vm1, %v720_v33 }
 0x11a   : > { %v627_v42 = vadd.f32 %v1537_v39, %v1844_v52  ;;  %v618_v43 = vpop.f32.mrb[27].mxu0  ;;  %1565 = vmatmul.mubr.msk.bf16.gmra.mrb[20].mxu1 %vm432_vm1, %v721_v32  ;;  %v704_v46 = vadd.f32 %v672_v37, %v624_v35 }
 0x11b   : > { %v619_v45 = vadd.f32 %v1844_v52, %v618_v43  ;;  %v702_v48 = vadd.f32 %v670_v41, %v616_v38 }
 0x11c   : > { %v705_v47 = vadd.f32 %v673_v40, %v627_v42 }
 0x11d   : > { %v703_v49 = vadd.f32 %v671_v44, %v619_v45 }
 0x11e   : > { %v723_v50 = vpack.c.bf16 %v705_v47, %v704_v46 }
 0x11f   : > { %v722_v51 = vpack.c.bf16 %v703_v49, %v702_v48  ;;  %v1540_v53 = vpop.f32.mrb[28].mxu0 }
 0x120   : > { %v640_v54 = vadd.f32 %v1540_v53, %v1844_v52  ;;  %v631_v55 = vpop.f32.mrb[29].mxu0 }
 0x121   : > { %v632_v57 = vadd.f32 %v1844_v52, %v631_v55  ;;  %v1541_v58 = vpop.f32.mrb[30].mxu0  ;;  %1568 = vmatprep.mubr.msk.bf16.mxu1 %vm432_vm1, %v722_v51 }
 0x122   : > { %v643_v61 = vadd.f32 %v1541_v58, %v1844_v52  ;;  %v634_v62 = vpop.f32.mrb[31].mxu0  ;;  %1569 = vmatmul.mubr.msk.bf16.gmra.mrb[24].mxu1 %vm432_vm1, %v723_v50  ;;  %v708_v1 = vadd.f32 %v676_v56, %v640_v54 }
 0x123   : > { %v635_v0 = vadd.f32 %v1844_v52, %v634_v62  ;;  %v706_v3 = vadd.f32 %v674_v60, %v632_v57 }
 0x124   : > { %v709_v2 = vadd.f32 %v677_v59, %v643_v61  ;;  %v980_v61 = vld [vmem:[%s1953_s25 + $0x10] sm:$0xff] }
 0x125   : > { %v707_v4 = vadd.f32 %v675_v63, %v635_v0 }
 0x126   : > { %v725_v5 = vpack.c.bf16 %v709_v2, %v708_v1  ;;  %v978_v1 = vld [vmem:[%s1953_s25] sm:$0xff] }
 0x127   : > { %v724_v6 = vpack.c.bf16 %v707_v4, %v706_v3 }
 0x129   : > { %1572 = vmatprep.mubr.msk.bf16.mxu1 %vm432_vm1, %v724_v6 }
 0x12a   : > { %1573 = vmatmul.mubr.msk.bf16.gmra.mrb[28].mxu1 %vm432_vm1, %v725_v5 }
 0x1c5   : > { %v1546_v8 = vpop.f32.mrb[0].mxu1 }
 0x1c6   : > { %v828_v9 = vadd.f32 %v1546_v8, %v1935_v7  ;;  %v819_v10 = vpop.f32.mrb[1].mxu1  ;;  %v948_v8 = vld [vmem:[%s1959_s29 + $0x10] sm:$0xff] }
 0x1c7   : > { %v820_v52 = vadd.f32 %v1935_v7, %v819_v10  ;;  %v1547_v11 = vpop.f32.mrb[2].mxu1 }
 0x1c8   : > { %v1442_v12 = vmul.f32 -1.442695, %v828_v9  ;;  %v831_v13 = vadd.f32 %v1547_v11, %v1935_v7  ;;  %v822_v14 = vpop.f32.mrb[3].mxu1  ;;  %v981_v9 = vld [vmem:[%s1953_s25 + $0x18] sm:$0xff] }
 0x1c9   : > { %v1440_v15 = vmul.f32 -1.442695, %v820_v52  ;;  %v823_v16 = vadd.f32 %v1935_v7, %v822_v14  ;;  %v979_v14 = vld [vmem:[%s1953_s25 + $0x8] sm:$0xff] }
 0x1ca   : > { %1586 = vpow2.f32 %v1442_v12  ;;  %v1443_v17 = vmul.f32 -1.442695, %v831_v13  ;;  %v946_v13 = vld [vmem:[%s1959_s29] sm:$0xff] }
 0x1cb   : > { %1588 = vpow2.f32 %v1440_v15  ;;  %v1441_v18 = vmul.f32 -1.442695, %v823_v16 }
 0x1cc   : > { %1590 = vpow2.f32 %v1443_v17 }
 0x1cd   : > { %1592 = vpow2.f32 %v1441_v18  ;;  %v1550_v19 = vpop.f32.mrb[4].mxu1  ;;  %v949_v18 = vld [vmem:[%s1959_s29 + $0x18] sm:$0xff] }
 0x1ce   : > { %v844_v20 = vadd.f32 %v1550_v19, %v1935_v7  ;;  %v835_v21 = vpop.f32.mrb[5].mxu1 }
 0x1cf   : > { %v836_v22 = vadd.f32 %v1935_v7, %v835_v21  ;;  %v1551_v23 = vpop.f32.mrb[6].mxu1 }
 0x1d0   : > { %v1446_v24 = vmul.f32 -1.442695, %v844_v20  ;;  %v847_v25 = vadd.f32 %v1551_v23, %v1935_v7  ;;  %v838_v26 = vpop.f32.mrb[7].mxu1  ;;  %v947_v23 = vld [vmem:[%s1959_s29 + $0x8] sm:$0xff] }
 0x1d1   : > { %v1444_v27 = vmul.f32 -1.442695, %v836_v22  ;;  %v839_v28 = vadd.f32 %v1935_v7, %v838_v26 }
 0x1d2   : > { %1594 = vpow2.f32 %v1446_v24  ;;  %v1447_v29 = vmul.f32 -1.442695, %v847_v25 }
 0x1d3   : > { %1596 = vpow2.f32 %v1444_v27  ;;  %v1445_v30 = vmul.f32 -1.442695, %v839_v28 }
 0x1d4   : > { %v1587_v31 = vpop.eup %1586  ;;  %1598 = vpow2.f32 %v1447_v29 }
 0x1d5   : > { %v1589_v32 = vpop.eup %1588  ;;  %v1108_v33 = vadd.f32 1.0, %v1587_v31  ;;  %1600 = vpow2.f32 %v1445_v30  ;;  %v1554_v34 = vpop.f32.mrb[8].mxu1 }
 0x1d6   : > { %v1591_v35 = vpop.eup %1590  ;;  %v1106_v36 = vadd.f32 1.0, %v1589_v32  ;;  %v860_v37 = vadd.f32 %v1554_v34, %v1935_v7  ;;  %v851_v38 = vpop.f32.mrb[9].mxu1 }
 0x1d7   : > { %v1593_v39 = vpop.eup %1592  ;;  %1602 = vrcp.f32 %v1108_v33  ;;  %v1109_v40 = vadd.f32 1.0, %v1591_v35  ;;  %v852_v41 = vadd.f32 %v1935_v7, %v851_v38  ;;  %v1555_v42 = vpop.f32.mrb[10].mxu1  ;;  %v984_v35 = vld [vmem:[%s1953_s25 + $0x30] sm:$0xff] }
 0x1d8   : > { %1604 = vrcp.f32 %v1106_v36  ;;  %v1107_v43 = vadd.f32 1.0, %v1593_v39  ;;  %v1450_v44 = vmul.f32 -1.442695, %v860_v37  ;;  %v863_v45 = vadd.f32 %v1555_v42, %v1935_v7  ;;  %v854_v46 = vpop.f32.mrb[11].mxu1 }
 0x1d9   : > { %1606 = vrcp.f32 %v1109_v40  ;;  %v1448_v47 = vmul.f32 -1.442695, %v852_v41  ;;  %v855_v48 = vadd.f32 %v1935_v7, %v854_v46  ;;  %v982_v40 = vld [vmem:[%s1953_s25 + $0x20] sm:$0xff]  ;;  %v952_v46 = vld [vmem:[%s1959_s29 + $0x30] sm:$0xff] }
 0x1da   : > { %1608 = vrcp.f32 %v1107_v43  ;;  %v1451_v49 = vmul.f32 -1.442695, %v863_v45 }
 0x1db   : > { %1610 = vpow2.f32 %v1450_v44  ;;  %v1449_v50 = vmul.f32 -1.442695, %v855_v48 }
 0x1dc   : > { %v1595_v51 = vpop.eup %1594  ;;  %1612 = vpow2.f32 %v1448_v47  ;;  %v985_v47 = vld [vmem:[%s1953_s25 + $0x38] sm:$0xff] }
 0x1dd   : > { %v1597_v53 = vpop.eup %1596  ;;  %v1112_v54 = vadd.f32 1.0, %v1595_v51  ;;  %1614 = vpow2.f32 %v1451_v49  ;;  %v1558_v55 = vpop.f32.mrb[12].mxu1 }
 0x1de   : > { %v1599_v56 = vpop.eup %1598  ;;  %v1110_v57 = vadd.f32 1.0, %v1597_v53  ;;  %1616 = vpow2.f32 %v1449_v50  ;;  %v876_v58 = vadd.f32 %v1558_v55, %v1935_v7  ;;  %v867_v59 = vpop.f32.mrb[13].mxu1  ;;  %v983_v55 = vld [vmem:[%s1953_s25 + $0x28] sm:$0xff] }
 0x1df   : > { %v1601_v60 = vpop.eup %1600  ;;  %1618 = vrcp.f32 %v1112_v54  ;;  %v1113_v62 = vadd.f32 1.0, %v1599_v56  ;;  %v868_v63 = vadd.f32 %v1935_v7, %v867_v59  ;;  %v1559_v0 = vpop.f32.mrb[14].mxu1  ;;  %v950_v54 = vld [vmem:[%s1959_s29 + $0x20] sm:$0xff]  ;;  %v953_v59 = vld [vmem:[%s1959_s29 + $0x38] sm:$0xff] }
 0x1e0   : > { %1620 = vrcp.f32 %v1110_v57  ;;  %v1111_v2 = vadd.f32 1.0, %v1601_v60  ;;  %v1454_v3 = vmul.f32 -1.442695, %v876_v58  ;;  %v879_v4 = vadd.f32 %v1559_v0, %v1935_v7  ;;  %v870_v5 = vpop.f32.mrb[15].mxu1  ;;  %v951_v0 = vld [vmem:[%s1959_s29 + $0x28] sm:$0xff] }
 0x1e1   : > { %v1603_v6 = vpop.eup %1602  ;;  %1622 = vrcp.f32 %v1113_v62  ;;  %v1452_v10 = vmul.f32 -1.442695, %v868_v63  ;;  %v871_v52 = vadd.f32 %v1935_v7, %v870_v5 }
 0x1e2   : > { %v1605_v11 = vpop.eup %1604  ;;  %v1204_v12 = vmul.f32 %v1603_v6, %v980_v61  ;;  %1624 = vrcp.f32 %v1111_v2  ;;  %v1455_v15 = vmul.f32 -1.442695, %v879_v4 }
 0x1e3   : > { %v1607_v16 = vpop.eup %1606  ;;  %v1202_v17 = vmul.f32 %v1605_v11, %v978_v1  ;;  %1626 = vpow2.f32 %v1454_v3  ;;  %v1453_v19 = vmul.f32 -1.442695, %v871_v52 }
 0x1e4   : > { %v1609_v20 = vpop.eup %1608  ;;  %v1236_v21 = vadd.f32 %v1204_v12, %v948_v8  ;;  %v1205_v22 = vmul.f32 %v1607_v16, %v981_v9  ;;  %1628 = vpow2.f32 %v1452_v10  ;;  %v988_v16 = vld [vmem:[%s1953_s25 + $0x50] sm:$0xff] }
 0x1e5   : > { %v1611_v24 = vpop.eup %1610  ;;  %v1234_v25 = vadd.f32 %v1202_v17, %v946_v13  ;;  %v1203_v26 = vmul.f32 %v1609_v20, %v979_v14  ;;  %1630 = vpow2.f32 %v1455_v15  ;;  %v1562_v27 = vpop.f32.mrb[16].mxu1 }
 0x1e6   : > { %v1613_v28 = vpop.eup %1612  ;;  %1269 = vst.msk [vmem:[%s1975_s11 + $0x10] sm:$0xff] %vm1266_vm2, %v1236_v21  ;;  %v1237_v29 = vadd.f32 %v1205_v22, %v949_v18  ;;  %v1116_v30 = vadd.f32 1.0, %v1611_v24  ;;  %1632 = vpow2.f32 %v1453_v19  ;;  %v892_v31 = vadd.f32 %v1562_v27, %v1935_v7  ;;  %v883_v32 = vpop.f32.mrb[17].mxu1  ;;  %v986_v21 = vld [vmem:[%s1953_s25 + $0x40] sm:$0xff]  ;;  %v989_v27 = vld [vmem:[%s1953_s25 + $0x58] sm:$0xff] }
 0x1e7   : > { %v1615_v33 = vpop.eup %1614  ;;  %1267 = vst.msk [vmem:[%s1975_s11] sm:$0xff] %vm1266_vm2, %v1234_v25  ;;  %v1235_v34 = vadd.f32 %v1203_v26, %v947_v23  ;;  %v1114_v36 = vadd.f32 1.0, %v1613_v28  ;;  %v884_v37 = vadd.f32 %v1935_v7, %v883_v32  ;;  %v1563_v38 = vpop.f32.mrb[18].mxu1  ;;  %v956_v26 = vld [vmem:[%s1959_s29 + $0x50] sm:$0xff]  ;;  %v987_v32 = vld [vmem:[%s1953_s25 + $0x48] sm:$0xff] }
 0x1e8   : > { %v1617_v39 = vpop.eup %1616  ;;  %1270 = vst.msk [vmem:[%s1975_s11 + $0x18] sm:$0xff] %vm1266_vm2, %v1237_v29  ;;  %1634 = vrcp.f32 %v1116_v30  ;;  %v1117_v41 = vadd.f32 1.0, %v1615_v33  ;;  %v1458_v42 = vmul.f32 -1.442695, %v892_v31  ;;  %v895_v43 = vadd.f32 %v1563_v38, %v1935_v7  ;;  %v886_v44 = vpop.f32.mrb[19].mxu1  ;;  %v954_v31 = vld [vmem:[%s1959_s29 + $0x40] sm:$0xff] }
 0x1e9   : > { %v1619_v45 = vpop.eup %1618  ;;  %1268 = vst.msk [vmem:[%s1975_s11 + $0x8] sm:$0xff] %vm1266_vm2, %v1235_v34  ;;  %1636 = vrcp.f32 %v1114_v36  ;;  %v1115_v48 = vadd.f32 1.0, %v1617_v39  ;;  %v1456_v49 = vmul.f32 -1.442695, %v884_v37  ;;  %v887_v50 = vadd.f32 %v1935_v7, %v886_v44  ;;  %v957_v36 = vld [vmem:[%s1959_s29 + $0x58] sm:$0xff] }
 0x1ea   : > { %v1621_v51 = vpop.eup %1620  ;;  %v1208_v53 = vmul.f32 %v1619_v45, %v984_v35  ;;  %1638 = vrcp.f32 %v1117_v41  ;;  %v1459_v56 = vmul.f32 -1.442695, %v895_v43 }
 0x1eb   : > { %v1623_v57 = vpop.eup %1622  ;;  %v1206_v58 = vmul.f32 %v1621_v51, %v982_v40  ;;  %1640 = vrcp.f32 %v1115_v48  ;;  %v1457_v60 = vmul.f32 -1.442695, %v887_v50  ;;  %v955_v40 = vld [vmem:[%s1959_s29 + $0x48] sm:$0xff] }
 0x1ec   : > { %v1625_v61 = vpop.eup %1624  ;;  %v1240_v62 = vadd.f32 %v1208_v53, %v952_v46  ;;  %v1209_v63 = vmul.f32 %v1623_v57, %v985_v47  ;;  %1642 = vpow2.f32 %v1458_v42 }
 0x1ed   : > { %v1627_v1 = vpop.eup %1626  ;;  %v1238_v2 = vadd.f32 %v1206_v58, %v950_v54  ;;  %v1207_v3 = vmul.f32 %v1625_v61, %v983_v55  ;;  %1644 = vpow2.f32 %v1456_v49  ;;  %v1566_v4 = vpop.f32.mrb[20].mxu1  ;;  %v992_v55 = vld [vmem:[%s1953_s25 + $0x70] sm:$0xff] }
 0x1ee   : > { %v1629_v5 = vpop.eup %1628  ;;  %1273 = vst.msk [vmem:[%s1975_s11 + $0x30] sm:$0xff] %vm1266_vm2, %v1240_v62  ;;  %v1241_v6 = vadd.f32 %v1209_v63, %v953_v59  ;;  %v1120_v8 = vadd.f32 1.0, %v1627_v1  ;;  %1646 = vpow2.f32 %v1459_v56  ;;  %v908_v9 = vadd.f32 %v1566_v4, %v1935_v7  ;;  %v899_v10 = vpop.f32.mrb[21].mxu1  ;;  %v960_v1 = vld [vmem:[%s1959_s29 + $0x70] sm:$0xff] }
 0x1ef   : > { %v1631_v52 = vpop.eup %1630  ;;  %1271 = vst.msk [vmem:[%s1975_s11 + $0x20] sm:$0xff] %vm1266_vm2, %v1238_v2  ;;  %v1239_v11 = vadd.f32 %v1207_v3, %v951_v0  ;;  %v1118_v12 = vadd.f32 1.0, %v1629_v5  ;;  %1648 = vpow2.f32 %v1457_v60  ;;  %v900_v13 = vadd.f32 %v1935_v7, %v899_v10  ;;  %v1567_v14 = vpop.f32.mrb[22].mxu1  ;;  %v990_v60 = vld [vmem:[%s1953_s25 + $0x60] sm:$0xff]  ;;  %v993_v2 = vld [vmem:[%s1953_s25 + $0x78] sm:$0xff] }
 0x1f0   : > { %v1633_v15 = vpop.eup %1632  ;;  %1274 = vst.msk [vmem:[%s1975_s11 + $0x38] sm:$0xff] %vm1266_vm2, %v1241_v6  ;;  %1650 = vrcp.f32 %v1120_v8  ;;  %v1121_v17 = vadd.f32 1.0, %v1631_v52  ;;  %v1462_v18 = vmul.f32 -1.442695, %v908_v9  ;;  %v911_v19 = vadd.f32 %v1567_v14, %v1935_v7  ;;  %v902_v20 = vpop.f32.mrb[23].mxu1  ;;  %v958_v8 = vld [vmem:[%s1959_s29 + $0x60] sm:$0xff] }
 0x1f1   : > { %1272 = vst.msk [vmem:[%s1975_s11 + $0x28] sm:$0xff] %vm1266_vm2, %v1239_v11  ;;  %1652 = vrcp.f32 %v1118_v12  ;;  %v1119_v22 = vadd.f32 1.0, %v1633_v15  ;;  %v1460_v23 = vmul.f32 -1.442695, %v900_v13  ;;  %v903_v24 = vadd.f32 %v1935_v7, %v902_v20  ;;  %v991_v9 = vld [vmem:[%s1953_s25 + $0x68] sm:$0xff]  ;;  %v961_v12 = vld [vmem:[%s1959_s29 + $0x78] sm:$0xff] }
 0x1f2   : > { %v1635_v25 = vpop.eup %1634  ;;  %1654 = vrcp.f32 %v1121_v17  ;;  %v1463_v28 = vmul.f32 -1.442695, %v911_v19  ;;  %v959_v17 = vld [vmem:[%s1959_s29 + $0x68] sm:$0xff] }
 0x1f3   : > { %v1637_v29 = vpop.eup %1636  ;;  %v1212_v30 = vmul.f32 %v1635_v25, %v988_v16  ;;  %1656 = vrcp.f32 %v1119_v22  ;;  %v1461_v33 = vmul.f32 -1.442695, %v903_v24 }
 0x1f4   : > { %v1639_v34 = vpop.eup %1638  ;;  %v1210_v35 = vmul.f32 %v1637_v29, %v986_v21  ;;  %1658 = vpow2.f32 %v1462_v18 }
 0x1f5   : > { %v1641_v37 = vpop.eup %1640  ;;  %v1244_v38 = vadd.f32 %v1212_v30, %v956_v26  ;;  %v1213_v39 = vmul.f32 %v1639_v34, %v989_v27  ;;  %1660 = vpow2.f32 %v1460_v23  ;;  %v1570_v41 = vpop.f32.mrb[24].mxu1  ;;  %v996_v34 = vld [vmem:[%s1953_s25 + $0x90] sm:$0xff] }
 0x1f6   : > { %v1643_v42 = vpop.eup %1642  ;;  %v1242_v43 = vadd.f32 %v1210_v35, %v954_v31  ;;  %v1211_v44 = vmul.f32 %v1641_v37, %v987_v32  ;;  %1662 = vpow2.f32 %v1463_v28  ;;  %v924_v45 = vadd.f32 %v1570_v41, %v1935_v7  ;;  %v915_v46 = vpop.f32.mrb[25].mxu1 }
 0x1f7   : > { %v1645_v47 = vpop.eup %1644  ;;  %1277 = vst.msk [vmem:[%s1975_s11 + $0x50] sm:$0xff] %vm1266_vm2, %v1244_v38  ;;  %v1245_v48 = vadd.f32 %v1213_v39, %v957_v36  ;;  %v1124_v49 = vadd.f32 1.0, %v1643_v42  ;;  %1664 = vpow2.f32 %v1461_v33  ;;  %v916_v50 = vadd.f32 %v1935_v7, %v915_v46  ;;  %v1571_v51 = vpop.f32.mrb[26].mxu1  ;;  %v994_v38 = vld [vmem:[%s1953_s25 + $0x80] sm:$0xff] }
 0x1f8   : > { %v1647_v53 = vpop.eup %1646  ;;  %1275 = vst.msk [vmem:[%s1975_s11 + $0x40] sm:$0xff] %vm1266_vm2, %v1242_v43  ;;  %v1243_v54 = vadd.f32 %v1211_v44, %v955_v40  ;;  %v1122_v56 = vadd.f32 1.0, %v1645_v47  ;;  %v927_v57 = vadd.f32 %v1571_v51, %v1935_v7  ;;  %v918_v58 = vpop.f32.mrb[27].mxu1  ;;  %v1466_v62 = vmul.f32 -1.442695, %v924_v45  ;;  %v964_v43 = vld [vmem:[%s1959_s29 + $0x90] sm:$0xff] }
 0x1f9   : > { %v1649_v59 = vpop.eup %1648  ;;  %1278 = vst.msk [vmem:[%s1975_s11 + $0x58] sm:$0xff] %vm1266_vm2, %v1245_v48  ;;  %1666 = vrcp.f32 %v1124_v49  ;;  %v1125_v61 = vadd.f32 1.0, %v1647_v53  ;;  %v919_v63 = vadd.f32 %v1935_v7, %v918_v58  ;;  %v1464_v4 = vmul.f32 -1.442695, %v916_v50  ;;  %v997_v44 = vld [vmem:[%s1953_s25 + $0x98] sm:$0xff]  ;;  %v962_v48 = vld [vmem:[%s1959_s29 + $0x80] sm:$0xff] }
 0x1fa   : > { %v1651_v0 = vpop.eup %1650  ;;  %1276 = vst.msk [vmem:[%s1975_s11 + $0x48] sm:$0xff] %vm1266_vm2, %v1243_v54  ;;  %1668 = vrcp.f32 %v1122_v56  ;;  %v1123_v3 = vadd.f32 1.0, %v1649_v59  ;;  %v1467_v10 = vmul.f32 -1.442695, %v927_v57  ;;  %v995_v49 = vld [vmem:[%s1953_s25 + $0x88] sm:$0xff]  ;;  %v965_v54 = vld [vmem:[%s1959_s29 + $0x98] sm:$0xff] }
 0x1fb   : > { %v1653_v5 = vpop.eup %1652  ;;  %v1216_v6 = vmul.f32 %v1651_v0, %v992_v55  ;;  %1670 = vrcp.f32 %v1125_v61  ;;  %v1465_v13 = vmul.f32 -1.442695, %v919_v63  ;;  %v963_v57 = vld [vmem:[%s1959_s29 + $0x88] sm:$0xff] }
 0x1fc   : > { %v1655_v52 = vpop.eup %1654  ;;  %v1214_v11 = vmul.f32 %v1653_v5, %v990_v60  ;;  %1672 = vrcp.f32 %v1123_v3  ;;  %v998_v5 = vld [vmem:[%s1953_s25 + $0xa0] sm:$0xff] }
 0x1fd   : > { %v1657_v14 = vpop.eup %1656  ;;  %v1248_v15 = vadd.f32 %v1216_v6, %v960_v1  ;;  %v1217_v16 = vmul.f32 %v1655_v52, %v993_v2  ;;  %1674 = vpow2.f32 %v1466_v62  ;;  %v1574_v18 = vpop.f32.mrb[28].mxu1  ;;  %v1000_v2 = vld [vmem:[%s1953_s25 + $0xb0] sm:$0xff] }
 0x1fe   : > { %v1659_v19 = vpop.eup %1658  ;;  %v1246_v20 = vadd.f32 %v1214_v11, %v958_v8  ;;  %v1215_v21 = vmul.f32 %v1657_v14, %v991_v9  ;;  %1676 = vpow2.f32 %v1464_v4  ;;  %v940_v22 = vadd.f32 %v1574_v18, %v1935_v7  ;;  %v931_v23 = vpop.f32.mrb[29].mxu1  ;;  %v968_v9 = vld [vmem:[%s1959_s29 + $0xb0] sm:$0xff]  ;;  %v999_v14 = vld [vmem:[%s1953_s25 + $0xa8] sm:$0xff] }
 0x1ff   : > { %v1661_v24 = vpop.eup %1660  ;;  %1281 = vst.msk [vmem:[%s1975_s11 + $0x70] sm:$0xff] %vm1266_vm2, %v1248_v15  ;;  %v1249_v25 = vadd.f32 %v1217_v16, %v961_v12  ;;  %v1128_v26 = vadd.f32 1.0, %v1659_v19  ;;  %1678 = vpow2.f32 %v1467_v10  ;;  %v932_v27 = vadd.f32 %v1935_v7, %v931_v23  ;;  %v1575_v28 = vpop.f32.mrb[30].mxu1  ;;  %v1001_v10 = vld [vmem:[%s1953_s25 + $0xb8] sm:$0xff] }
 0x200   : > { %v1663_v29 = vpop.eup %1662  ;;  %1279 = vst.msk [vmem:[%s1975_s11 + $0x60] sm:$0xff] %vm1266_vm2, %v1246_v20  ;;  %v1247_v30 = vadd.f32 %v1215_v21, %v959_v17  ;;  %v1126_v31 = vadd.f32 1.0, %v1661_v24  ;;  %1680 = vpow2.f32 %v1465_v13  ;;  %v934_v32 = vpop.f32.mrb[31].mxu1  ;;  %v1470_v36 = vmul.f32 -1.442695, %v940_v22  ;;  %v966_v13 = vld [vmem:[%s1959_s29 + $0xa0] sm:$0xff] }
 0x201   : > { %v1665_v33 = vpop.eup %1664  ;;  %1282 = vst.msk [vmem:[%s1975_s11 + $0x78] sm:$0xff] %vm1266_vm2, %v1249_v25  ;;  %1682 = vrcp.f32 %v1128_v26  ;;  %v1129_v35 = vadd.f32 1.0, %v1663_v29  ;;  %v943_v37 = vadd.f32 %v1575_v28, %v1935_v7  ;;  %v1468_v40 = vmul.f32 -1.442695, %v932_v27  ;;  %v969_v17 = vld [vmem:[%s1959_s29 + $0xb8] sm:$0xff]  ;;  %v967_v21 = vld [vmem:[%s1959_s29 + $0xa8] sm:$0xff] }
 0x202   : > { %1280 = vst.msk [vmem:[%s1975_s11 + $0x68] sm:$0xff] %vm1266_vm2, %v1247_v30  ;;  %1684 = vrcp.f32 %v1126_v31  ;;  %v1127_v39 = vadd.f32 1.0, %v1665_v33  ;;  %v935_v41 = vadd.f32 %v1935_v7, %v934_v32  ;;  %v1004_v32 = vld [vmem:[%s1953_s25 + $0xd0] sm:$0xff] }
 0x203   : > { %v1667_v42 = vpop.eup %1666  ;;  %1686 = vrcp.f32 %v1129_v35  ;;  %v1471_v45 = vmul.f32 -1.442695, %v943_v37  ;;  %v972_v37 = vld [vmem:[%s1959_s29 + $0xd0] sm:$0xff] }
 0x204   : > { %v1669_v46 = vpop.eup %1668  ;;  %v1220_v47 = vmul.f32 %v1667_v42, %v996_v34  ;;  %1688 = vrcp.f32 %v1127_v39  ;;  %v1469_v50 = vmul.f32 -1.442695, %v935_v41  ;;  %v1002_v34 = vld [vmem:[%s1953_s25 + $0xc0] sm:$0xff]  ;;  %v1003_v42 = vld [vmem:[%s1953_s25 + $0xc8] sm:$0xff] }
 0x205   : > { %v1671_v51 = vpop.eup %1670  ;;  %v1218_v53 = vmul.f32 %v1669_v46, %v994_v38  ;;  %1690 = vpow2.f32 %v1470_v36  ;;  %v1005_v38 = vld [vmem:[%s1953_s25 + $0xd8] sm:$0xff]  ;;  %v970_v41 = vld [vmem:[%s1959_s29 + $0xc0] sm:$0xff] }
 0x206   : > { %v1673_v55 = vpop.eup %1672  ;;  %v1252_v7 = vadd.f32 %v1220_v47, %v964_v43  ;;  %v1221_v56 = vmul.f32 %v1671_v51, %v997_v44  ;;  %1692 = vpow2.f32 %v1468_v40 }
 0x207   : > { %v1675_v58 = vpop.eup %1674  ;;  %v1250_v59 = vadd.f32 %v1218_v53, %v962_v48  ;;  %v1219_v60 = vmul.f32 %v1673_v55, %v995_v49  ;;  %1694 = vpow2.f32 %v1471_v45  ;;  %v973_v45 = vld [vmem:[%s1959_s29 + $0xd8] sm:$0xff]  ;;  %v971_v49 = vld [vmem:[%s1959_s29 + $0xc8] sm:$0xff]  ;;  %v1008_v55 = vld [vmem:[%s1953_s25 + $0xf0] sm:$0xff] }
 0x208   : > { %v1677_v61 = vpop.eup %1676  ;;  %1285 = vst.msk [vmem:[%s1975_s11 + $0x90] sm:$0xff] %vm1266_vm2, %v1252_v7  ;;  %v1253_v62 = vadd.f32 %v1221_v56, %v965_v54  ;;  %v1132_v63 = vadd.f32 1.0, %v1675_v58  ;;  %1696 = vpow2.f32 %v1469_v50  ;;  %v1006_v7 = vld [vmem:[%s1953_s25 + $0xe0] sm:$0xff]  ;;  %v1009_v58 = vld [vmem:[%s1953_s25 + $0xf8] sm:$0xff] }
 0x209   : > { %v1679_v0 = vpop.eup %1678  ;;  %1283 = vst.msk [vmem:[%s1975_s11 + $0x80] sm:$0xff] %vm1266_vm2, %v1250_v59  ;;  %v1251_v1 = vadd.f32 %v1219_v60, %v963_v57  ;;  %v1130_v3 = vadd.f32 1.0, %v1677_v61  ;;  %v976_v57 = vld [vmem:[%s1959_s29 + $0xf0] sm:$0xff]  ;;  %v974_v61 = vld [vmem:[%s1959_s29 + $0xe0] sm:$0xff] }
 0x20a   : > { %v1681_v4 = vpop.eup %1680  ;;  %1286 = vst.msk [vmem:[%s1975_s11 + $0x98] sm:$0xff] %vm1266_vm2, %v1253_v62  ;;  %1698 = vrcp.f32 %v1132_v63  ;;  %v1133_v6 = vadd.f32 1.0, %v1679_v0  ;;  %v1007_v62 = vld [vmem:[%s1953_s25 + $0xe8] sm:$0xff] }
 0x20b   : > { %v1683_v8 = vpop.eup %1682  ;;  %1284 = vst.msk [vmem:[%s1975_s11 + $0x88] sm:$0xff] %vm1266_vm2, %v1251_v1  ;;  %1700 = vrcp.f32 %v1130_v3  ;;  %v1131_v52 = vadd.f32 1.0, %v1681_v4  ;;  %v977_v1 = vld [vmem:[%s1959_s29 + $0xf8] sm:$0xff] }
 0x20c   : > { %v1685_v11 = vpop.eup %1684  ;;  %v1224_v12 = vmul.f32 %v1683_v8, %v1000_v2  ;;  %1702 = vrcp.f32 %v1133_v6 }
 0x20d   : > { %v1687_v15 = vpop.eup %1686  ;;  %v1222_v16 = vmul.f32 %v1685_v11, %v998_v5  ;;  %1704 = vrcp.f32 %v1131_v52  ;;  %v975_v5 = vld [vmem:[%s1959_s29 + $0xe8] sm:$0xff] }
 0x20e   : > { %v1689_v18 = vpop.eup %1688  ;;  %v1256_v19 = vadd.f32 %v1224_v12, %v968_v9  ;;  %v1225_v20 = vmul.f32 %v1687_v15, %v1001_v10 }
 0x20f   : > { %v1691_v22 = vpop.eup %1690  ;;  %v1254_v23 = vadd.f32 %v1222_v16, %v966_v13  ;;  %v1223_v24 = vmul.f32 %v1689_v18, %v999_v14 }
 0x210   : > { %v1693_v25 = vpop.eup %1692  ;;  %1289 = vst.msk [vmem:[%s1975_s11 + $0xb0] sm:$0xff] %vm1266_vm2, %v1256_v19  ;;  %v1257_v26 = vadd.f32 %v1225_v20, %v969_v17  ;;  %v1136_v27 = vadd.f32 1.0, %v1691_v22 }
 0x211   : > { %v1695_v28 = vpop.eup %1694  ;;  %1287 = vst.msk [vmem:[%s1975_s11 + $0xa0] sm:$0xff] %vm1266_vm2, %v1254_v23  ;;  %v1255_v29 = vadd.f32 %v1223_v24, %v967_v21  ;;  %v1134_v30 = vadd.f32 1.0, %v1693_v25 }
 0x212   : > { %v1697_v31 = vpop.eup %1696  ;;  %1290 = vst.msk [vmem:[%s1975_s11 + $0xb8] sm:$0xff] %vm1266_vm2, %v1257_v26  ;;  %1706 = vrcp.f32 %v1136_v27  ;;  %v1137_v33 = vadd.f32 1.0, %v1695_v28 }
 0x213   : > { %1288 = vst.msk [vmem:[%s1975_s11 + $0xa8] sm:$0xff] %vm1266_vm2, %v1255_v29  ;;  %1708 = vrcp.f32 %v1134_v30  ;;  %v1135_v35 = vadd.f32 1.0, %v1697_v31 }
 0x214   : > { %v1699_v36 = vpop.eup %1698  ;;  %1710 = vrcp.f32 %v1137_v33 }
 0x215   : > { %v1701_v39 = vpop.eup %1700  ;;  %v1228_v40 = vmul.f32 %v1699_v36, %v1004_v32  ;;  %1712 = vrcp.f32 %v1135_v35 }
 0x216   : > { %v1703_v43 = vpop.eup %1702  ;;  %v1226_v44 = vmul.f32 %v1701_v39, %v1002_v34 }
 0x217   : > { %v1705_v46 = vpop.eup %1704  ;;  %v1260_v47 = vadd.f32 %v1228_v40, %v972_v37  ;;  %v1229_v48 = vmul.f32 %v1703_v43, %v1005_v38 }
 0x218   : > { %v1258_v50 = vadd.f32 %v1226_v44, %v970_v41  ;;  %v1227_v51 = vmul.f32 %v1705_v46, %v1003_v42 }
 0x219   : > { %1293 = vst.msk [vmem:[%s1975_s11 + $0xd0] sm:$0xff] %vm1266_vm2, %v1260_v47  ;;  %v1261_v53 = vadd.f32 %v1229_v48, %v973_v45 }
 0x21a   : > { %1291 = vst.msk [vmem:[%s1975_s11 + $0xc0] sm:$0xff] %vm1266_vm2, %v1258_v50  ;;  %v1259_v54 = vadd.f32 %v1227_v51, %v971_v49 }
 0x21b   : > { %1294 = vst.msk [vmem:[%s1975_s11 + $0xd8] sm:$0xff] %vm1266_vm2, %v1261_v53 }
 0x21c   : > { %v1707_v56 = vpop.eup %1706  ;;  %1292 = vst.msk [vmem:[%s1975_s11 + $0xc8] sm:$0xff] %vm1266_vm2, %v1259_v54 }
 0x21d   : > { %v1709_v59 = vpop.eup %1708  ;;  %v1232_v60 = vmul.f32 %v1707_v56, %v1008_v55 }
 0x21e   : > { %v1711_v63 = vpop.eup %1710  ;;  %v1230_v0 = vmul.f32 %v1709_v59, %v1006_v7 }
 0x21f   : > { %v1713_v2 = vpop.eup %1712  ;;  %v1264_v3 = vadd.f32 %v1232_v60, %v976_v57  ;;  %v1233_v4 = vmul.f32 %v1711_v63, %v1009_v58 }
 0x220   : > { %v1262_v6 = vadd.f32 %v1230_v0, %v974_v61  ;;  %v1231_v8 = vmul.f32 %v1713_v2, %v1007_v62 }
 0x221   : > { %1297 = vst.msk [vmem:[%s1975_s11 + $0xf0] sm:$0xff] %vm1266_vm2, %v1264_v3  ;;  %v1265_v9 = vadd.f32 %v1233_v4, %v977_v1 }
 0x222   : > { %1295 = vst.msk [vmem:[%s1975_s11 + $0xe0] sm:$0xff] %vm1266_vm2, %v1262_v6  ;;  %v1263_v10 = vadd.f32 %v1231_v8, %v975_v5 }
 0x223   : > { %1298 = vst.msk [vmem:[%s1975_s11 + $0xf8] sm:$0xff] %vm1266_vm2, %v1265_v9 }
 0x224   : > { %1296 = vst.msk [vmem:[%s1975_s11 + $0xe8] sm:$0xff] %vm1266_vm2, %v1263_v10 }
 0x225 PF: > { %s18_s27 = sadd.s32 1, %s1720_s27  }
 0x226   : > { %p15_p4 = scmp.ge.s32.totalorder %s18_s27, 4  }
 0x228   :  { %17 = sbr.rel (!%p15_p4) target bundleno = 1 (0x1), region = 91 }

</bundles_post_ra>
